<compile_context>
chip_gen: v5e
topology: v5e:2x2
jax: 0.10.0
libtpu: 0.0.40
codegen_flags: <defaults>
</compile_context>

<pallas_src>
import jax
import jax.numpy as jnp
from jax.experimental import pallas as pl
from jax.experimental.pallas import tpu as pltpu

LANE = 128          # lane padding target (per-gate / per-direction hidden width)
BATCH_ALIGN = 16    # batch-row alignment (full bf16 sublane tile)
BATCH_BLOCK = 256   # batch rows per grid block (GRU batch grid + attention grid)
TIME_CHUNK = 8      # GRU timesteps streamed per grid step


def _round_up(x, m):
    return (x + m - 1) // m * m


def _pad_to_block(n, block=BATCH_BLOCK, align=BATCH_ALIGN):
    """Return (padded_n, block_size) with block_size | padded_n."""
    n_al = _round_up(max(int(n), 1), align)
    if n_al <= block:
        return n_al, n_al
    return _round_up(n_al, block), block


def _time_chunk(t):
    """Return (padded_T, chunk) with chunk | padded_T."""
    t = int(t)
    if t <= TIME_CHUNK:
        return t, t
    return _round_up(t, TIME_CHUNK), TIME_CHUNK


def _vmem_limit(est_bytes):
    # Scoped-VMEM request sized from the actual block + scratch footprint
    # (defaults: 16 MiB v5e / 32 MiB v6e,v7x); kept below physical VMEM.
    return int(min(max(est_bytes + (4 << 20), 32 << 20), 64 << 20))


# --------------------------------------------------------------------------
# Pallas kernels
# --------------------------------------------------------------------------
def _bigru_kernel(xf_ref, xb_ref, mkb_ref, wih_ref, bih_ref, whh_ref, bhn_ref,
                  hf_out, hb_out, gif_scr, gib_scr, hf_scr, hb_scr):
    """Fused bidirectional GRU, one streamed time chunk per grid step.

    Grid = (batch_blocks, time_chunks).  Forward consumes time chunk `ic`,
    backward consumes chunk `nc-1-ic` walking time in reverse; per-step masking
    keeps the backward hidden state at zero until each row's last valid token,
    reproducing pack_padded_sequence semantics without XLA reverse gathers.

    xf_ref : (Tc, Bb, F)  bf16   forward-direction input chunk
    xb_ref : (Tc, Bb, F)  bf16   backward-direction input chunk
    mkb_ref: (Tc, Bb, 1)  f32    validity mask for the backward chunk
    wih_ref: (2, F, 3Hp)  bf16   input weights, gates [r|z|n], lane padded
    bih_ref: (2, 1, 3Hp)  f32    b_ih with b_hh[r,z] folded in
    whh_ref: (2, Hp, 3Hp) bf16   hidden weights, 3 gates fused
    bhn_ref: (2, 1, Hp)   f32    hidden bias of the n gate
    hf_out : (Tc, Bb, Hp) bf16   forward hidden states
    hb_out : (Tc, Bb, Hp) bf16   backward hidden states
    """
    ic = pl.program_id(1)
    tc, bb, f = xf_ref.shape
    hp = hf_scr.shape[-1]

    @pl.when(ic == 0)
    def _():
        hf_scr[...] = jnp.zeros_like(hf_scr)
        hb_scr[...] = jnp.zeros_like(hb_scr)

    # Chunk input projections: one MXU matmul per direction, bias pre-folded,
    # stored bf16 (halves the chunk scratch vs f32).
    xf = xf_ref[...].reshape(tc * bb, f)
    xb = xb_ref[...].reshape(tc * bb, f)
    gif_scr[...] = (jnp.dot(xf, wih_ref[0], preferred_element_type=jnp.float32)
                    + bih_ref[0]).reshape(tc, bb, 3 * hp).astype(gif_scr.dtype)
    gib_scr[...] = (jnp.dot(xb, wih_ref[1], preferred_element_type=jnp.float32)
                    + bih_ref[1]).reshape(tc, bb, 3 * hp).astype(gib_scr.dtype)

    whh_f, whh_b = whh_ref[0], whh_ref[1]
    bhn_f, bhn_b = bhn_ref[0], bhn_ref[1]

    def gate_update(gi, gh, h, bhn):
        r = jax.nn.sigmoid(gi[:, :hp] + gh[:, :hp])
        z = jax.nn.sigmoid(gi[:, hp:2 * hp] + gh[:, hp:2 * hp])
        n = jnp.tanh(gi[:, 2 * hp:] + r * (gh[:, 2 * hp:] + bhn))
        return (1.0 - z) * n + z * h

    def step(s, carry):
        hf, hb = carry                                  # (Bb, Hp) f32, in vregs
        sb = tc - 1 - s
        # Two independent per-step hidden matmuls, issued back to back so the
        # fwd/bwd latency chains hide each other on single-core chips.
        ghf = jnp.dot(hf.astype(jnp.bfloat16), whh_f,
                      preferred_element_type=jnp.float32)
        ghb = jnp.dot(hb.astype(jnp.bfloat16), whh_b,
                      preferred_element_type=jnp.float32)
        hf_new = gate_update(gif_scr[s].astype(jnp.float32), ghf, hf, bhn_f)
        hb_new = gate_update(gib_scr[sb].astype(jnp.float32), ghb, hb, bhn_b)
        hb_new = hb_new * mkb_ref[sb]                   # packed-seq semantics
        hf_out[s] = hf_new.astype(hf_out.dtype)
        hb_out[sb] = hb_new.astype(hb_out.dtype)
        return hf_new, hb_new

    hf_last, hb_last = jax.lax.fori_loop(
        0, tc, step, (hf_scr[...], hb_scr[...]), unroll=True)
    hf_scr[...] = hf_last
    hb_scr[...] = hb_last


def _attend(hf_ref, hb_ref, mask_ref, wlin_ref, blin_ref, watt_ref):
    """Shared attention body on one (T, Bb) batch block:
    tanh-linear (K-split over fwd/bwd, no concat) -> score lane-reduce ->
    masked softmax (exactly exp(att)*mask / (sum + 1e-4)) -> pooled context."""
    t, b, hp = hf_ref.shape
    ap = wlin_ref.shape[-1]
    hf = hf_ref[...]
    hb = hb_ref[...]
    emb = jnp.tanh(
        jnp.dot(hf.reshape(t * b, hp), wlin_ref[0],
                preferred_element_type=jnp.float32)
        + jnp.dot(hb.reshape(t * b, hp), wlin_ref[1],
                  preferred_element_type=jnp.float32)
        + blin_ref[...]).reshape(t, b, ap)
    # Score as a lane reduce (avoids a lane-width-1 matmul output).
    att = jnp.sum(emb * watt_ref[...][None, :, :], axis=-1, keepdims=True)

    mask = mask_ref[...]                                       # (T, Bb, 1)
    att_max = jnp.max(jnp.where(mask > 0.0, att, -1e30), axis=0, keepdims=True)
    att_max = jnp.maximum(att_max, 0.0)        # keeps reference +1e-4 exact
    ex = jnp.exp(jnp.minimum(att - att_max, 0.0)) * mask
    denom = jnp.sum(ex, axis=0, keepdims=True) + 1e-4 * jnp.exp(-att_max)
    soft = ex / denom
    ctx_f = jnp.sum(soft * hf.astype(jnp.float32), axis=0)     # (Bb, Hp)
    ctx_b = jnp.sum(soft * hb.astype(jnp.float32), axis=0)
    return ctx_f, ctx_b


def _attention_pool_kernel(hf_ref, hb_ref, mask_ref, wlin_ref, blin_ref,
                           watt_ref, out_ref):
    hp = hf_ref.shape[-1]
    ctx_f, ctx_b = _attend(hf_ref, hb_ref, mask_ref, wlin_ref, blin_ref, watt_ref)
    out_ref[:, :hp] = ctx_f.astype(out_ref.dtype)
    out_ref[:, hp:] = ctx_b.astype(out_ref.dtype)


def _attention_classify_kernel(hf_ref, hb_ref, mask_ref, wlin_ref, blin_ref,
                               watt_ref, wout_ref, bout_ref, out_ref):
    ctx_f, ctx_b = _attend(hf_ref, hb_ref, mask_ref, wlin_ref, blin_ref, watt_ref)
    out_ref[...] = (
        jnp.dot(ctx_f.astype(jnp.bfloat16), wout_ref[0],
                preferred_element_type=jnp.float32)
        + jnp.dot(ctx_b.astype(jnp.bfloat16), wout_ref[1],
                  preferred_element_type=jnp.float32)
        + bout_ref[...])


# --------------------------------------------------------------------------
# pallas_call wrappers
# --------------------------------------------------------------------------
def bigru(x_tm, mask, gp, hp, tc, bb):
    """x_tm: (T_pad, B_pad, F) bf16 time-major; mask: (T_pad, B_pad, 1) f32.
    Returns (h_fwd, h_bwd): (T_pad, B_pad, Hp) bf16 each."""
    t_pad, b_pad, f = x_tm.shape
    nc = t_pad // tc
    nb = b_pad // bb
    wih, bih, whh, bhn = gp["wih"], gp["bih"], gp["whh"], gp["bhn"]

    def fwd_map(ib, ic):
        return (ic, ib, 0)

    def bwd_map(ib, ic):
        return (nc - 1 - ic, ib, 0)

    est = (2 * (2 * tc * bb * f * 2 + tc * bb * 4 + 2 * tc * bb * hp * 2)
           + 2 * (int(wih.size + whh.size) * 2 + int(bih.size + bhn.size) * 4)
           + 2 * tc * bb * 3 * hp * 2 + 2 * bb * hp * 4)

    return pl.pallas_call(
        _bigru_kernel,
        out_shape=(jax.ShapeDtypeStruct((t_pad, b_pad, hp), jnp.bfloat16),
                   jax.ShapeDtypeStruct((t_pad, b_pad, hp), jnp.bfloat16)),
        grid=(nb, nc),
        in_specs=[
            pl.BlockSpec((tc, bb, f), fwd_map),
            pl.BlockSpec((tc, bb, f), bwd_map),
            pl.BlockSpec((tc, bb, 1), bwd_map),
            pl.BlockSpec(tuple(wih.shape), lambda ib, ic: (0, 0, 0)),
            pl.BlockSpec(tuple(bih.shape), lambda ib, ic: (0, 0, 0)),
            pl.BlockSpec(tuple(whh.shape), lambda ib, ic: (0, 0, 0)),
            pl.BlockSpec(tuple(bhn.shape), lambda ib, ic: (0, 0, 0)),
        ],
        out_specs=(pl.BlockSpec((tc, bb, hp), fwd_map),
                   pl.BlockSpec((tc, bb, hp), bwd_map)),
        scratch_shapes=[pltpu.VMEM((tc, bb, 3 * hp), jnp.bfloat16),
                        pltpu.VMEM((tc, bb, 3 * hp), jnp.bfloat16),
                        pltpu.VMEM((bb, hp), jnp.float32),
                        pltpu.VMEM((bb, hp), jnp.float32)],
        compiler_params=pltpu.CompilerParams(
            dimension_semantics=("parallel", "arbitrary"),
            vmem_limit_bytes=_vmem_limit(est)),
    )(x_tm, x_tm, mask, wih, bih, whh, bhn)


def attention_pool(hf, hb, mask, ap_par, bb):
    """Attended [fwd|bwd] context per batch row: (B_pad, 2Hp) bf16."""
    t_pad, b_pad, hp = hf.shape
    wlin, blin, watt = ap_par["wlin"], ap_par["blin"], ap_par["watt"]
    apad = wlin.shape[-1]
    est = (2 * (2 * t_pad * bb * hp * 2 + t_pad * bb * 4 + bb * 2 * hp * 2)
           + 2 * (int(wlin.size) * 2 + int(blin.size + watt.size) * 4)
           + 3 * t_pad * bb * apad * 4)
    return pl.pallas_call(
        _attention_pool_kernel,
        out_shape=jax.ShapeDtypeStruct((b_pad, 2 * hp), jnp.bfloat16),
        grid=(b_pad // bb,),
        in_specs=[
            pl.BlockSpec((t_pad, bb, hp), lambda i: (0, i, 0)),
            pl.BlockSpec((t_pad, bb, hp), lambda i: (0, i, 0)),
            pl.BlockSpec((t_pad, bb, 1), lambda i: (0, i, 0)),
            pl.BlockSpec(tuple(wlin.shape), lambda i: (0, 0, 0)),
            pl.BlockSpec(tuple(blin.shape), lambda i: (0, 0)),
            pl.BlockSpec(tuple(watt.shape), lambda i: (0, 0)),
        ],
        out_specs=pl.BlockSpec((bb, 2 * hp), lambda i: (i, 0)),
        compiler_params=pltpu.CompilerParams(
            dimension_semantics=("parallel",),
            vmem_limit_bytes=_vmem_limit(est)),
    )(hf, hb, mask, wlin, blin, watt)


def attention_classify(hf, hb, mask, ap_par, wout, bout, bb):
    """Attention pooling fused with the final classifier: (B_pad, Cp) f32."""
    t_pad, b_pad, hp = hf.shape
    wlin, blin, watt = ap_par["wlin"], ap_par["blin"], ap_par["watt"]
    apad = wlin.shape[-1]
    cp = wout.shape[-1]
    est = (2 * (2 * t_pad * bb * hp * 2 + t_pad * bb * 4 + bb * cp * 4)
           + 2 * (int(wlin.size + wout.size) * 2
                  + int(blin.size + watt.size + bout.size) * 4)
           + 3 * t_pad * bb * apad * 4)
    return pl.pallas_call(
        _attention_classify_kernel,
        out_shape=jax.ShapeDtypeStruct((b_pad, cp), jnp.float32),
        grid=(b_pad // bb,),
        in_specs=[
            pl.BlockSpec((t_pad, bb, hp), lambda i: (0, i, 0)),
            pl.BlockSpec((t_pad, bb, hp), lambda i: (0, i, 0)),
            pl.BlockSpec((t_pad, bb, 1), lambda i: (0, i, 0)),
            pl.BlockSpec(tuple(wlin.shape), lambda i: (0, 0, 0)),
            pl.BlockSpec(tuple(blin.shape), lambda i: (0, 0)),
            pl.BlockSpec(tuple(watt.shape), lambda i: (0, 0)),
            pl.BlockSpec(tuple(wout.shape), lambda i: (0, 0, 0)),
            pl.BlockSpec(tuple(bout.shape), lambda i: (0, 0)),
        ],
        out_specs=pl.BlockSpec((bb, cp), lambda i: (i, 0)),
        compiler_params=pltpu.CompilerParams(
            dimension_semantics=("parallel",),
            vmem_limit_bytes=_vmem_limit(est)),
    )(hf, hb, mask, wlin, blin, watt, wout, bout)


def encode_level(x, lengths, gp, hp):
    """x: (B, T, F) batch-first; lengths: (B,) int32.
    Returns h_fwd, h_bwd (T_pad, B_pad, Hp) bf16, mask (T_pad, B_pad, 1) f32, bb."""
    b, t, f = x.shape
    b_pad, bb = _pad_to_block(b)
    t_pad, tc = _time_chunk(t)
    x = jnp.pad(x.astype(jnp.bfloat16),
                ((0, b_pad - b), (0, t_pad - t), (0, 0)))
    lengths = jnp.pad(lengths.astype(jnp.int32), (0, b_pad - b))
    x_tm = jnp.transpose(x, (1, 0, 2))                       # (T_pad, B_pad, F)
    mask = (jnp.arange(t_pad, dtype=jnp.int32)[:, None]
            < lengths[None, :]).astype(jnp.float32)[:, :, None]
    hf, hb = bigru(x_tm, mask, gp, hp, tc, bb)
    return hf, hb, mask, bb


def reorder_sent(sents, sent_order):
    """sents: (S, H2); sent_order: (D, Ts), 1-based, 0 = padding row."""
    padded = jnp.concatenate(
        [jnp.zeros((1, sents.shape[1]), sents.dtype), sents], axis=0)
    revs = padded[sent_order.reshape(-1)]
    return revs.reshape(sent_order.shape[0], sent_order.shape[1], sents.shape[1])


def han_forward(kp, batch_reviews, sent_order, ls, lr, num_class):
    hp = kp["word_rnn"]["bhn"].shape[-1]
    num_sents = batch_reviews.shape[0]
    num_docs = sent_order.shape[0]

    # Embedding lookup (padding_idx=0 row is zero); dropout = eval-mode identity.
    # TODO(synk): the embedding lookup and the sent_order reorder below remain
    # XLA gathers; scalar-prefetched DMA row gathers would be the Pallas path.
    emb_w = kp["embed"][batch_reviews]                               # (S, Tw, E)

    # ---- word level: fused BiGRU + attention pooling over words ----
    hf_w, hb_w, mask_w, bb_w = encode_level(emb_w, ls, kp["word_rnn"], hp)
    sent_embs = attention_pool(hf_w, hb_w, mask_w, kp["word_att"], bb_w)
    sent_embs = sent_embs[:num_sents]                                # (S, 2Hp)

    # ---- sentence level: reorder into docs, BiGRU + attention + classifier ----
    rev_embs = reorder_sent(sent_embs, sent_order)                   # (D, Ts, 2Hp)
    hf_s, hb_s, mask_s, bb_s = encode_level(rev_embs, lr, kp["sent_rnn"], hp)
    logits = attention_classify(hf_s, hb_s, mask_s, kp["sent_att"],
                                kp["wout"], kp["bout"], bb_s)        # (D_pad, Cp)
    return logits[:num_docs, :num_class]


# --------------------------------------------------------------------------
# Parameter preparation (PyTorch layout -> fused / lane-padded / bf16 layout)
# --------------------------------------------------------------------------
def _pad_gate_cols(w, h, hp):
    """(..., 3h) with gate blocks [r|z|n] -> (..., 3hp); each gate padded to hp."""
    pad = [(0, 0)] * (w.ndim - 1) + [(0, hp - h)]
    blocks = [jnp.pad(w[..., g * h:(g + 1) * h], pad) for g in range(3)]
    return jnp.concatenate(blocks, axis=-1)


def _pad_dir_rows(w, h, hp):
    """(2h, N) rows ordered [fwd-block | bwd-block] -> (2hp, N)."""
    pad = [(0, hp - h)] + [(0, 0)] * (w.ndim - 1)
    return jnp.concatenate([jnp.pad(w[:h], pad), jnp.pad(w[h:], pad)], axis=0)


def _prep_gru(p, h, hp, dir_layout_inputs):
    def one(wi, bi, wh, bh):
        wih_t = wi.T                                        # (in, 3H)
        if dir_layout_inputs:                               # input = [fwd|bwd] enc
            wih_t = _pad_dir_rows(wih_t, h, hp)             # (2Hp, 3H)
        wih_t = _pad_gate_cols(wih_t, h, hp)                # (in_p, 3Hp)
        # Fold b_hh of the r and z gates into the input bias; keep b_hn apart.
        bias = bi + jnp.concatenate([bh[:2 * h], jnp.zeros((h,), bh.dtype)])
        bias = _pad_gate_cols(bias.reshape(1, 3 * h), h, hp)          # (1, 3Hp)
        whh_t = jnp.pad(_pad_gate_cols(wh.T, h, hp), ((0, hp - h), (0, 0)))
        bhn = jnp.pad(bh[2 * h:].reshape(1, h), ((0, 0), (0, hp - h)))
        return wih_t, bias, whh_t, bhn

    f = one(p["w_ih"], p["b_ih"], p["w_hh"], p["b_hh"])
    r = one(p["w_ih_r"], p["b_ih_r"], p["w_hh_r"], p["b_hh_r"])
    return dict(
        wih=jnp.stack([f[0], r[0]]).astype(jnp.bfloat16),
        bih=jnp.stack([f[1], r[1]]).astype(jnp.float32),
        whh=jnp.stack([f[2], r[2]]).astype(jnp.bfloat16),
        bhn=jnp.stack([f[3], r[3]]).astype(jnp.float32),
    )


def _prep_attn(p, h, hp, ap):
    wlin_t = p["w_lin"].T                                   # (2h_in, 2h_att)
    wf = jnp.pad(wlin_t[:h], ((0, hp - h), (0, ap - 2 * h)))
    wb = jnp.pad(wlin_t[h:], ((0, hp - h), (0, ap - 2 * h)))
    blin = jnp.pad(p["b_lin"].reshape(1, 2 * h), ((0, 0), (0, ap - 2 * h)))
    watt = jnp.pad(p["w_att"].reshape(1, 2 * h), ((0, 0), (0, ap - 2 * h)))
    return dict(wlin=jnp.stack([wf, wb]).astype(jnp.bfloat16),
                blin=blin.astype(jnp.float32),
                watt=watt.astype(jnp.float32))


def prepare_params(raw, hid_size, num_class, lane=LANE):
    h = hid_size
    hp = _round_up(h, lane)
    ap = _round_up(2 * h, lane)
    cp = _round_up(num_class, lane)

    wout_t = raw["lin_out_w"].T                             # (2H, C)
    wof = jnp.pad(wout_t[:h], ((0, hp - h), (0, cp - num_class)))
    wob = jnp.pad(wout_t[h:], ((0, hp - h), (0, cp - num_class)))
    bout = jnp.pad(raw["lin_out_b"].reshape(1, -1),
                   ((0, 0), (0, cp - num_class)))

    return dict(
        embed=raw["embed"],
        word_rnn=_prep_gru(raw["word_rnn"], h, hp, dir_layout_inputs=False),
        sent_rnn=_prep_gru(raw["sent_rnn"], h, hp, dir_layout_inputs=True),
        word_att=_prep_attn(raw["word_att"], h, hp, ap),
        sent_att=_prep_attn(raw["sent_att"], h, hp, ap),
        wout=jnp.stack([wof, wob]).astype(jnp.bfloat16),
        bout=bout.astype(jnp.float32),
    )


# --------------------------------------------------------------------------
# Deterministic parameter init (PyTorch-style raw layouts)
# --------------------------------------------------------------------------
def init_params(key, ntoken, num_class, emb_size, hid_size):
    h2 = 2 * hid_size
    keys = iter(jax.random.split(key, 64))

    def u(shape, scale):
        return jax.random.uniform(next(keys), shape, jnp.float32, -scale, scale)

    embed = jax.random.normal(next(keys), (ntoken, emb_size), jnp.float32) * 0.1
    embed = embed.at[0].set(0.0)   # padding_idx = 0

    def gru(inp, hid):
        s = 1.0 / float(hid) ** 0.5
        return dict(w_ih=u((3 * hid, inp), s), w_hh=u((3 * hid, hid), s),
                    b_ih=u((3 * hid,), s), b_hh=u((3 * hid,), s),
                    w_ih_r=u((3 * hid, inp), s), w_hh_r=u((3 * hid, hid), s),
                    b_ih_r=u((3 * hid,), s), b_hh_r=u((3 * hid,), s))

    def att(hid2):
        s = 1.0 / float(hid2) ** 0.5
        return dict(w_lin=u((hid2, hid2), s), b_lin=u((hid2,), s),
                    w_att=u((1, hid2), s))

    s_out = 1.0 / float(h2) ** 0.5
    return dict(embed=embed,
                word_rnn=gru(emb_size, hid_size),
                sent_rnn=gru(h2, hid_size),
                word_att=att(h2), sent_att=att(h2),
                lin_out_w=u((num_class, h2), s_out),
                lin_out_b=u((num_class,), s_out))


# --------------------------------------------------------------------------
if __name__ == "__main__":
    key = jax.random.PRNGKey(0)
    k_param, k_tok = jax.random.split(key)

    ntoken, num_class, emb_size, hid_size = 50, 5, 16, 8
    num_sents, max_words = 6, 7
    num_docs, max_sents = 2, 3

    raw = init_params(k_param, ntoken, num_class, emb_size, hid_size)
    params = prepare_params(raw, hid_size, num_class)

    # Sequence lengths (sorted descending, as required by pack_padded_sequence).
    ls = jnp.array([7, 6, 5, 4, 3, 2], dtype=jnp.int32)
    lr = jnp.array([3, 2], dtype=jnp.int32)

    batch_reviews = jax.random.randint(k_tok, (num_sents, max_words), 1, ntoken)
    word_mask = jnp.arange(max_words)[None, :] < ls[:, None]
    batch_reviews = jnp.where(word_mask, batch_reviews, 0).astype(jnp.int32)

    # 1-based sentence indices per document, 0 = padding row.
    sent_order = jnp.array([[1, 2, 3], [4, 5, 0]], dtype=jnp.int32)

    fwd = jax.jit(han_forward, static_argnums=(5,))
    out = fwd(params, batch_reviews, sent_order, ls, lr, num_class)
    out = jax.block_until_ready(out)
    assert out.shape == (num_docs, num_class)
    assert bool(jnp.all(jnp.isfinite(out)))
    print("KERNEL_OK")
</pallas_src>

<mosaic_0001>
module attributes {stable_mosaic.version = 11 : i64} {
  func.func @_attention_pool_kernel(%arg0: i32, %arg1: memref<7x16x128xbf16, #tpu.memory_space<vmem>>, %arg2: memref<7x16x128xbf16, #tpu.memory_space<vmem>>, %arg3: memref<7x16x1xf32, #tpu.memory_space<vmem>>, %arg4: memref<2x128x128xbf16, #tpu.memory_space<vmem>>, %arg5: memref<1x128xf32, #tpu.memory_space<vmem>>, %arg6: memref<1x128xf32, #tpu.memory_space<vmem>>, %arg7: memref<16x256xbf16, #tpu.memory_space<vmem>>) attributes {dimension_semantics = [#tpu.dimension_semantics<parallel>], iteration_bounds = array<i64: 1>, scalar_prefetch = 0 : i64, scratch_operands = 0 : i64, tpu.core_type = #tpu.core_type<tc>, window_params = [{transform_indices = @transform_0, window_bounds = array<i64: 7, 16, 128>}, {transform_indices = @transform_1, window_bounds = array<i64: 7, 16, 128>}, {transform_indices = @transform_2, window_bounds = array<i64: 7, 16, 1>}, {pipeline_mode = #tpu.pipeline_mode<synchronous>, transform_indices = @transform_3, window_bounds = array<i64: 2, 128, 128>}, {pipeline_mode = #tpu.pipeline_mode<synchronous>, transform_indices = @transform_4, window_bounds = array<i64: 1, 128>}, {pipeline_mode = #tpu.pipeline_mode<synchronous>, transform_indices = @transform_5, window_bounds = array<i64: 1, 128>}, {transform_indices = @transform_6, window_bounds = array<i64: 16, 256>}]} {
    %c0 = arith.constant 0 : index
    %c0_0 = arith.constant 0 : index
    %c0_1 = arith.constant 0 : index
    %0 = vector.load %arg1[%c0, %c0_0, %c0_1] : memref<7x16x128xbf16, #tpu.memory_space<vmem>>, vector<7x16x128xbf16>
    %c0_2 = arith.constant 0 : index
    %c0_3 = arith.constant 0 : index
    %c0_4 = arith.constant 0 : index
    %1 = vector.load %arg2[%c0_2, %c0_3, %c0_4] : memref<7x16x128xbf16, #tpu.memory_space<vmem>>, vector<7x16x128xbf16>
    %2 = vector.shape_cast %0 : vector<7x16x128xbf16> to vector<112x128xbf16>
    %c0_5 = arith.constant 0 : index
    %c0_6 = arith.constant 0 : index
    %c0_7 = arith.constant 0 : index
    %3 = vector.load %arg4[%c0_5, %c0_6, %c0_7] : memref<2x128x128xbf16, #tpu.memory_space<vmem>>, vector<1x128x128xbf16>
    %4 = vector.shape_cast %3 : vector<1x128x128xbf16> to vector<128x128xbf16>
    %cst = arith.constant dense<0.000000e+00> : vector<112x128xf32>
    %5 = tpu.matmul %2, %4, %cst {dimension_numbers = #tpu.dot_dimension_numbers<[1], [0], [0], [1], [0, 0, 1, 1], [], []>} : vector<112x128xbf16>, vector<128x128xbf16>, vector<112x128xf32> -> vector<112x128xf32>
    %6 = vector.shape_cast %1 : vector<7x16x128xbf16> to vector<112x128xbf16>
    %c1 = arith.constant 1 : index
    %c0_8 = arith.constant 0 : index
    %c0_9 = arith.constant 0 : index
    %7 = vector.load %arg4[%c1, %c0_8, %c0_9] : memref<2x128x128xbf16, #tpu.memory_space<vmem>>, vector<1x128x128xbf16>
    %8 = vector.shape_cast %7 : vector<1x128x128xbf16> to vector<128x128xbf16>
    %cst_10 = arith.constant dense<0.000000e+00> : vector<112x128xf32>
    %9 = tpu.matmul %6, %8, %cst_10 {dimension_numbers = #tpu.dot_dimension_numbers<[1], [0], [0], [1], [0, 0, 1, 1], [], []>} : vector<112x128xbf16>, vector<128x128xbf16>, vector<112x128xf32> -> vector<112x128xf32>
    %10 = arith.addf %5, %9 : vector<112x128xf32>
    %c0_11 = arith.constant 0 : index
    %c0_12 = arith.constant 0 : index
    %11 = vector.load %arg5[%c0_11, %c0_12] : memref<1x128xf32, #tpu.memory_space<vmem>>, vector<1x128xf32>
    %12 = vector.broadcast %11 : vector<1x128xf32> to vector<112x128xf32>
    %13 = arith.addf %10, %12 : vector<112x128xf32>
    %14 = math.tanh %13 : vector<112x128xf32>
    %15 = vector.shape_cast %14 : vector<112x128xf32> to vector<7x16x128xf32>
    %c0_13 = arith.constant 0 : index
    %c0_14 = arith.constant 0 : index
    %16 = vector.load %arg6[%c0_13, %c0_14] : memref<1x128xf32, #tpu.memory_space<vmem>>, vector<1x128xf32>
    %17 = vector.shape_cast %16 : vector<1x128xf32> to vector<1x1x128xf32>
    %18 = vector.broadcast %17 : vector<1x1x128xf32> to vector<7x16x128xf32>
    %19 = arith.mulf %15, %18 : vector<7x16x128xf32>
    %cst_15 = arith.constant dense<0.000000e+00> : vector<7x16xf32>
    %20 = vector.multi_reduction <add>, %19, %cst_15 [2] : vector<7x16x128xf32> to vector<7x16xf32>
    %21 = vector.shape_cast %20 : vector<7x16xf32> to vector<7x16x1xf32>
    %c0_16 = arith.constant 0 : index
    %c0_17 = arith.constant 0 : index
    %c0_18 = arith.constant 0 : index
    %22 = vector.load %arg3[%c0_16, %c0_17, %c0_18] : memref<7x16x1xf32, #tpu.memory_space<vmem>>, vector<7x16x1xf32>
    %cst_19 = arith.constant 0.000000e+00 : f32
    %23 = vector.broadcast %cst_19 : f32 to vector<7x16x1xf32>
    %24 = arith.cmpf ogt, %22, %23 : vector<7x16x1xf32>
    %cst_20 = arith.constant -1.000000e+30 : f32
    %25 = vector.broadcast %cst_20 : f32 to vector<7x16x1xf32>
    %26 = arith.select %24, %21, %25 : vector<7x16x1xi1>, vector<7x16x1xf32>
    %cst_21 = arith.constant dense<0xFF800000> : vector<16x1xf32>
    %27 = vector.multi_reduction <maximumf>, %26, %cst_21 [0] : vector<7x16x1xf32> to vector<16x1xf32>
    %28 = vector.shape_cast %27 : vector<16x1xf32> to vector<1x16x1xf32>
    %cst_22 = arith.constant 0.000000e+00 : f32
    %29 = vector.broadcast %cst_22 : f32 to vector<1x16x1xf32>
    %30 = arith.maximumf %28, %29 : vector<1x16x1xf32>
    %31 = vector.broadcast %30 : vector<1x16x1xf32> to vector<7x16x1xf32>
    %32 = arith.subf %21, %31 : vector<7x16x1xf32>
    %cst_23 = arith.constant 0.000000e+00 : f32
    %33 = vector.broadcast %cst_23 : f32 to vector<7x16x1xf32>
    %34 = arith.minimumf %32, %33 : vector<7x16x1xf32>
    %35 = math.exp %34 : vector<7x16x1xf32>
    %36 = arith.mulf %35, %22 : vector<7x16x1xf32>
    %cst_24 = arith.constant dense<0.000000e+00> : vector<16x1xf32>
    %37 = vector.multi_reduction <add>, %36, %cst_24 [0] : vector<7x16x1xf32> to vector<16x1xf32>
    %38 = vector.shape_cast %37 : vector<16x1xf32> to vector<1x16x1xf32>
    %cst_25 = arith.constant 0.000000e+00 : f32
    %39 = vector.broadcast %cst_25 : f32 to vector<1x16x1xf32>
    %40 = arith.subf %39, %30 : vector<1x16x1xf32>
    %41 = math.exp %40 : vector<1x16x1xf32>
    %cst_26 = arith.constant 9.99999974E-5 : f32
    %42 = vector.broadcast %cst_26 : f32 to vector<1x16x1xf32>
    %43 = arith.mulf %42, %41 : vector<1x16x1xf32>
    %44 = arith.addf %38, %43 : vector<1x16x1xf32>
    %45 = vector.broadcast %44 : vector<1x16x1xf32> to vector<7x16x1xf32>
    %46 = arith.divf %36, %45 : vector<7x16x1xf32>
    %47 = arith.extf %0 : vector<7x16x128xbf16> to vector<7x16x128xf32>
    %48 = vector.broadcast %46 : vector<7x16x1xf32> to vector<7x16x128xf32>
    %49 = arith.mulf %48, %47 : vector<7x16x128xf32>
    %cst_27 = arith.constant dense<0.000000e+00> : vector<16x128xf32>
    %50 = vector.multi_reduction <add>, %49, %cst_27 [0] : vector<7x16x128xf32> to vector<16x128xf32>
    %51 = arith.extf %1 : vector<7x16x128xbf16> to vector<7x16x128xf32>
    %52 = vector.broadcast %46 : vector<7x16x1xf32> to vector<7x16x128xf32>
    %53 = arith.mulf %52, %51 : vector<7x16x128xf32>
    %cst_28 = arith.constant dense<0.000000e+00> : vector<16x128xf32>
    %54 = vector.multi_reduction <add>, %53, %cst_28 [0] : vector<7x16x128xf32> to vector<16x128xf32>
    %55 = arith.truncf %50 : vector<16x128xf32> to vector<16x128xbf16>
    %c0_29 = arith.constant 0 : index
    %c0_30 = arith.constant 0 : index
    %56 = vector.load %arg7[%c0_29, %c0_30] : memref<16x256xbf16, #tpu.memory_space<vmem>>, vector<16x128xbf16>
    tpu.vector_store %arg7[%c0_29, %c0_30], %55 {strides = array<i32>} : memref<16x256xbf16, #tpu.memory_space<vmem>>, vector<16x128xbf16>,
    %57 = arith.truncf %54 : vector<16x128xf32> to vector<16x128xbf16>
    %c0_31 = arith.constant 0 : index
    %c128 = arith.constant 128 : index
    %58 = vector.load %arg7[%c0_31, %c128] : memref<16x256xbf16, #tpu.memory_space<vmem>>, vector<16x128xbf16>
    tpu.vector_store %arg7[%c0_31, %c128], %57 {strides = array<i32>} : memref<16x256xbf16, #tpu.memory_space<vmem>>, vector<16x128xbf16>,
    return
  }
  func.func @transform_0(%arg0: i32) -> (i32, i32, i32) {
    %c0_i32 = arith.constant 0 : i32
    %c0_i32_0 = arith.constant 0 : i32
    %c0_i32_1 = arith.constant 0 : i32
    return %c0_i32, %arg0, %c0_i32_0 : i32, i32, i32
  }
  func.func @transform_1(%arg0: i32) -> (i32, i32, i32) {
    %c0_i32 = arith.constant 0 : i32
    %c0_i32_0 = arith.constant 0 : i32
    %c0_i32_1 = arith.constant 0 : i32
    return %c0_i32, %arg0, %c0_i32_0 : i32, i32, i32
  }
  func.func @transform_2(%arg0: i32) -> (i32, i32, i32) {
    %c0_i32 = arith.constant 0 : i32
    %c0_i32_0 = arith.constant 0 : i32
    %c0_i32_1 = arith.constant 0 : i32
    return %c0_i32, %arg0, %c0_i32_0 : i32, i32, i32
  }
  func.func @transform_3(%arg0: i32) -> (i32, i32, i32) {
    %c0_i32 = arith.constant 0 : i32
    %c0_i32_0 = arith.constant 0 : i32
    %c0_i32_1 = arith.constant 0 : i32
    %c0_i32_2 = arith.constant 0 : i32
    return %c0_i32, %c0_i32_0, %c0_i32_1 : i32, i32, i32
  }
  func.func @transform_4(%arg0: i32) -> (i32, i32) {
    %c0_i32 = arith.constant 0 : i32
    %c0_i32_0 = arith.constant 0 : i32
    %c0_i32_1 = arith.constant 0 : i32
    return %c0_i32, %c0_i32_0 : i32, i32
  }
  func.func @transform_5(%arg0: i32) -> (i32, i32) {
    %c0_i32 = arith.constant 0 : i32
    %c0_i32_0 = arith.constant 0 : i32
    %c0_i32_1 = arith.constant 0 : i32
    return %c0_i32, %c0_i32_0 : i32, i32
  }
  func.func @transform_6(%arg0: i32) -> (i32, i32) {
    %c0_i32 = arith.constant 0 : i32
    %c0_i32_0 = arith.constant 0 : i32
    return %arg0, %c0_i32 : i32, i32
  }
}

module attributes {stable_mosaic.version = 11 : i64} {
  func.func @_bigru_kernel(%arg0: i32, %arg1: i32, %arg2: memref<7x16x16xbf16, #tpu.memory_space<vmem>>, %arg3: memref<7x16x16xbf16, #tpu.memory_space<vmem>>, %arg4: memref<7x16x1xf32, #tpu.memory_space<vmem>>, %arg5: memref<2x16x384xbf16, #tpu.memory_space<vmem>>, %arg6: memref<2x1x384xf32, #tpu.memory_space<vmem>>, %arg7: memref<2x128x384xbf16, #tpu.memory_space<vmem>>, %arg8: memref<2x1x128xf32, #tpu.memory_space<vmem>>, %arg9: memref<7x16x128xbf16, #tpu.memory_space<vmem>>, %arg10: memref<7x16x128xbf16, #tpu.memory_space<vmem>>, %arg11: memref<7x16x384xbf16, #tpu.memory_space<vmem>>, %arg12: memref<7x16x384xbf16, #tpu.memory_space<vmem>>, %arg13: memref<16x128xf32, #tpu.memory_space<vmem>>, %arg14: memref<16x128xf32, #tpu.memory_space<vmem>>) attributes {dimension_semantics = [#tpu.dimension_semantics<parallel>, #tpu.dimension_semantics<arbitrary>], iteration_bounds = array<i64: 1, 1>, scalar_prefetch = 0 : i64, scratch_operands = 4 : i64, tpu.core_type = #tpu.core_type<tc>, window_params = [{transform_indices = @transform_0, window_bounds = array<i64: 7, 16, 16>}, {transform_indices = @transform_1, window_bounds = array<i64: 7, 16, 16>}, {transform_indices = @transform_2, window_bounds = array<i64: 7, 16, 1>}, {pipeline_mode = #tpu.pipeline_mode<synchronous>, transform_indices = @transform_3, window_bounds = array<i64: 2, 16, 384>}, {pipeline_mode = #tpu.pipeline_mode<synchronous>, transform_indices = @transform_4, window_bounds = array<i64: 2, 1, 384>}, {pipeline_mode = #tpu.pipeline_mode<synchronous>, transform_indices = @transform_5, window_bounds = array<i64: 2, 128, 384>}, {pipeline_mode = #tpu.pipeline_mode<synchronous>, transform_indices = @transform_6, window_bounds = array<i64: 2, 1, 128>}, {transform_indices = @transform_7, window_bounds = array<i64: 7, 16, 128>}, {transform_indices = @transform_8, window_bounds = array<i64: 7, 16, 128>}]} {
    %c0_i32 = arith.constant 0 : i32
    %0 = arith.cmpi eq, %arg1, %c0_i32 : i32
    %1 = arith.extui %0 : i1 to i32
    %c0_i32_0 = arith.constant 0 : i32
    %2 = arith.cmpi ne, %1, %c0_i32_0 : i32
    scf.if %2 {
      %cst_178 = arith.constant 0.000000e+00 : f32
      %627 = vector.broadcast %cst_178 : f32 to vector<16x128xf32>
      %c0_179 = arith.constant 0 : index
      %c0_180 = arith.constant 0 : index
      %628 = vector.load %arg13[%c0_179, %c0_180] : memref<16x128xf32, #tpu.memory_space<vmem>>, vector<16x128xf32>
      tpu.vector_store %arg13[%c0_179, %c0_180], %627 {strides = array<i32>} : memref<16x128xf32, #tpu.memory_space<vmem>>, vector<16x128xf32>,
      %cst_181 = arith.constant 0.000000e+00 : f32
      %629 = vector.broadcast %cst_181 : f32 to vector<16x128xf32>
      %c0_182 = arith.constant 0 : index
      %c0_183 = arith.constant 0 : index
      %630 = vector.load %arg14[%c0_182, %c0_183] : memref<16x128xf32, #tpu.memory_space<vmem>>, vector<16x128xf32>
      tpu.vector_store %arg14[%c0_182, %c0_183], %629 {strides = array<i32>} : memref<16x128xf32, #tpu.memory_space<vmem>>, vector<16x128xf32>,
    } else {
    }
    %c0 = arith.constant 0 : index
    %c0_1 = arith.constant 0 : index
    %c0_2 = arith.constant 0 : index
    %3 = vector.load %arg2[%c0, %c0_1, %c0_2] : memref<7x16x16xbf16, #tpu.memory_space<vmem>>, vector<7x16x16xbf16>
    %4 = vector.shape_cast %3 : vector<7x16x16xbf16> to vector<112x16xbf16>
    %c0_3 = arith.constant 0 : index
    %c0_4 = arith.constant 0 : index
    %c0_5 = arith.constant 0 : index
    %5 = vector.load %arg3[%c0_3, %c0_4, %c0_5] : memref<7x16x16xbf16, #tpu.memory_space<vmem>>, vector<7x16x16xbf16>
    %6 = vector.shape_cast %5 : vector<7x16x16xbf16> to vector<112x16xbf16>
    %c0_6 = arith.constant 0 : index
    %c0_7 = arith.constant 0 : index
    %c0_8 = arith.constant 0 : index
    %7 = vector.load %arg5[%c0_6, %c0_7, %c0_8] : memref<2x16x384xbf16, #tpu.memory_space<vmem>>, vector<1x16x384xbf16>
    %8 = vector.shape_cast %7 : vector<1x16x384xbf16> to vector<16x384xbf16>
    %cst = arith.constant dense<0.000000e+00> : vector<112x384xf32>
    %9 = tpu.matmul %4, %8, %cst {dimension_numbers = #tpu.dot_dimension_numbers<[1], [0], [0], [1], [0, 0, 1, 1], [], []>} : vector<112x16xbf16>, vector<16x384xbf16>, vector<112x384xf32> -> vector<112x384xf32>
    %c0_9 = arith.constant 0 : index
    %c0_10 = arith.constant 0 : index
    %c0_11 = arith.constant 0 : index
    %10 = vector.load %arg6[%c0_9, %c0_10, %c0_11] : memref<2x1x384xf32, #tpu.memory_space<vmem>>, vector<1x1x384xf32>
    %11 = vector.shape_cast %10 : vector<1x1x384xf32> to vector<1x384xf32>
    %12 = vector.broadcast %11 : vector<1x384xf32> to vector<112x384xf32>
    %13 = arith.addf %9, %12 : vector<112x384xf32>
    %14 = vector.shape_cast %13 : vector<112x384xf32> to vector<7x16x384xf32>
    %15 = arith.truncf %14 : vector<7x16x384xf32> to vector<7x16x384xbf16>
    %c0_12 = arith.constant 0 : index
    %c0_13 = arith.constant 0 : index
    %c0_14 = arith.constant 0 : index
    %16 = vector.load %arg11[%c0_12, %c0_13, %c0_14] : memref<7x16x384xbf16, #tpu.memory_space<vmem>>, vector<7x16x384xbf16>
    tpu.vector_store %arg11[%c0_12, %c0_13, %c0_14], %15 {strides = array<i32>} : memref<7x16x384xbf16, #tpu.memory_space<vmem>>, vector<7x16x384xbf16>,
    %c1 = arith.constant 1 : index
    %c0_15 = arith.constant 0 : index
    %c0_16 = arith.constant 0 : index
    %17 = vector.load %arg5[%c1, %c0_15, %c0_16] : memref<2x16x384xbf16, #tpu.memory_space<vmem>>, vector<1x16x384xbf16>
    %18 = vector.shape_cast %17 : vector<1x16x384xbf16> to vector<16x384xbf16>
    %cst_17 = arith.constant dense<0.000000e+00> : vector<112x384xf32>
    %19 = tpu.matmul %6, %18, %cst_17 {dimension_numbers = #tpu.dot_dimension_numbers<[1], [0], [0], [1], [0, 0, 1, 1], [], []>} : vector<112x16xbf16>, vector<16x384xbf16>, vector<112x384xf32> -> vector<112x384xf32>
    %c1_18 = arith.constant 1 : index
    %c0_19 = arith.constant 0 : index
    %c0_20 = arith.constant 0 : index
    %20 = vector.load %arg6[%c1_18, %c0_19, %c0_20] : memref<2x1x384xf32, #tpu.memory_space<vmem>>, vector<1x1x384xf32>
    %21 = vector.shape_cast %20 : vector<1x1x384xf32> to vector<1x384xf32>
    %22 = vector.broadcast %21 : vector<1x384xf32> to vector<112x384xf32>
    %23 = arith.addf %19, %22 : vector<112x384xf32>
    %24 = vector.shape_cast %23 : vector<112x384xf32> to vector<7x16x384xf32>
    %25 = arith.truncf %24 : vector<7x16x384xf32> to vector<7x16x384xbf16>
    %c0_21 = arith.constant 0 : index
    %c0_22 = arith.constant 0 : index
    %c0_23 = arith.constant 0 : index
    %26 = vector.load %arg12[%c0_21, %c0_22, %c0_23] : memref<7x16x384xbf16, #tpu.memory_space<vmem>>, vector<7x16x384xbf16>
    tpu.vector_store %arg12[%c0_21, %c0_22, %c0_23], %25 {strides = array<i32>} : memref<7x16x384xbf16, #tpu.memory_space<vmem>>, vector<7x16x384xbf16>,
    %c0_24 = arith.constant 0 : index
    %c0_25 = arith.constant 0 : index
    %c0_26 = arith.constant 0 : index
    %27 = vector.load %arg7[%c0_24, %c0_25, %c0_26] : memref<2x128x384xbf16, #tpu.memory_space<vmem>>, vector<1x128x384xbf16>
    %28 = vector.shape_cast %27 : vector<1x128x384xbf16> to vector<128x384xbf16>
    %c1_27 = arith.constant 1 : index
    %c0_28 = arith.constant 0 : index
    %c0_29 = arith.constant 0 : index
    %29 = vector.load %arg7[%c1_27, %c0_28, %c0_29] : memref<2x128x384xbf16, #tpu.memory_space<vmem>>, vector<1x128x384xbf16>
    %30 = vector.shape_cast %29 : vector<1x128x384xbf16> to vector<128x384xbf16>
    %c0_30 = arith.constant 0 : index
    %c0_31 = arith.constant 0 : index
    %c0_32 = arith.constant 0 : index
    %31 = vector.load %arg8[%c0_30, %c0_31, %c0_32] : memref<2x1x128xf32, #tpu.memory_space<vmem>>, vector<1x1x128xf32>
    %32 = vector.shape_cast %31 : vector<1x1x128xf32> to vector<1x128xf32>
    %c1_33 = arith.constant 1 : index
    %c0_34 = arith.constant 0 : index
    %c0_35 = arith.constant 0 : index
    %33 = vector.load %arg8[%c1_33, %c0_34, %c0_35] : memref<2x1x128xf32, #tpu.memory_space<vmem>>, vector<1x1x128xf32>
    %34 = vector.shape_cast %33 : vector<1x1x128xf32> to vector<1x128xf32>
    %c0_36 = arith.constant 0 : index
    %c0_37 = arith.constant 0 : index
    %35 = vector.load %arg13[%c0_36, %c0_37] : memref<16x128xf32, #tpu.memory_space<vmem>>, vector<16x128xf32>
    %c0_38 = arith.constant 0 : index
    %c0_39 = arith.constant 0 : index
    %36 = vector.load %arg14[%c0_38, %c0_39] : memref<16x128xf32, #tpu.memory_space<vmem>>, vector<16x128xf32>
    %c0_i32_40 = arith.constant 0 : i32
    %c6_i32 = arith.constant 6 : i32
    %37 = arith.subi %c6_i32, %c0_i32_40 : i32
    %38 = arith.truncf %35 : vector<16x128xf32> to vector<16x128xbf16>
    %cst_41 = arith.constant dense<0.000000e+00> : vector<16x384xf32>
    %39 = tpu.matmul %38, %28, %cst_41 {dimension_numbers = #tpu.dot_dimension_numbers<[1], [0], [0], [1], [0, 0, 1, 1], [], []>} : vector<16x128xbf16>, vector<128x384xbf16>, vector<16x384xf32> -> vector<16x384xf32>
    %40 = arith.truncf %36 : vector<16x128xf32> to vector<16x128xbf16>
    %cst_42 = arith.constant dense<0.000000e+00> : vector<16x384xf32>
    %41 = tpu.matmul %40, %30, %cst_42 {dimension_numbers = #tpu.dot_dimension_numbers<[1], [0], [0], [1], [0, 0, 1, 1], [], []>} : vector<16x128xbf16>, vector<128x384xbf16>, vector<16x384xf32> -> vector<16x384xf32>
    %42 = arith.index_cast %c0_i32_40 : i32 to index
    %c0_43 = arith.constant 0 : index
    %c0_44 = arith.constant 0 : index
    %43 = vector.load %arg11[%42, %c0_43, %c0_44] : memref<7x16x384xbf16, #tpu.memory_space<vmem>>, vector<1x16x384xbf16>
    %44 = vector.shape_cast %43 : vector<1x16x384xbf16> to vector<16x384xbf16>
    %45 = arith.extf %44 : vector<16x384xbf16> to vector<16x384xf32>
    %46 = vector.extract_strided_slice %45 {offsets = [0, 0], sizes = [16, 128], strides = [1, 1]} : vector<16x384xf32> to vector<16x128xf32>
    %47 = vector.extract_strided_slice %39 {offsets = [0, 0], sizes = [16, 128], strides = [1, 1]} : vector<16x384xf32> to vector<16x128xf32>
    %48 = arith.addf %46, %47 : vector<16x128xf32>
    %49 = arith.negf %48 : vector<16x128xf32>
    %50 = math.exp %49 : vector<16x128xf32>
    %cst_45 = arith.constant 1.000000e+00 : f32
    %51 = vector.broadcast %cst_45 : f32 to vector<16x128xf32>
    %52 = arith.addf %51, %50 : vector<16x128xf32>
    %53 = arith.divf %51, %52 : vector<16x128xf32>
    %54 = vector.extract_strided_slice %45 {offsets = [0, 128], sizes = [16, 128], strides = [1, 1]} : vector<16x384xf32> to vector<16x128xf32>
    %55 = vector.extract_strided_slice %39 {offsets = [0, 128], sizes = [16, 128], strides = [1, 1]} : vector<16x384xf32> to vector<16x128xf32>
    %56 = arith.addf %54, %55 : vector<16x128xf32>
    %57 = arith.negf %56 : vector<16x128xf32>
    %58 = math.exp %57 : vector<16x128xf32>
    %cst_46 = arith.constant 1.000000e+00 : f32
    %59 = vector.broadcast %cst_46 : f32 to vector<16x128xf32>
    %60 = arith.addf %59, %58 : vector<16x128xf32>
    %61 = arith.divf %59, %60 : vector<16x128xf32>
    %62 = vector.extract_strided_slice %45 {offsets = [0, 256], sizes = [16, 128], strides = [1, 1]} : vector<16x384xf32> to vector<16x128xf32>
    %63 = vector.extract_strided_slice %39 {offsets = [0, 256], sizes = [16, 128], strides = [1, 1]} : vector<16x384xf32> to vector<16x128xf32>
    %64 = vector.broadcast %32 : vector<1x128xf32> to vector<16x128xf32>
    %65 = arith.addf %63, %64 : vector<16x128xf32>
    %66 = arith.mulf %53, %65 : vector<16x128xf32>
    %67 = arith.addf %62, %66 : vector<16x128xf32>
    %68 = math.tanh %67 : vector<16x128xf32>
    %cst_47 = arith.constant 1.000000e+00 : f32
    %69 = vector.broadcast %cst_47 : f32 to vector<16x128xf32>
    %70 = arith.subf %69, %61 : vector<16x128xf32>
    %71 = arith.mulf %70, %68 : vector<16x128xf32>
    %72 = arith.mulf %61, %35 : vector<16x128xf32>
    %73 = arith.addf %71, %72 : vector<16x128xf32>
    %74 = arith.index_cast %37 : i32 to index
    %c0_48 = arith.constant 0 : index
    %c0_49 = arith.constant 0 : index
    %75 = vector.load %arg12[%74, %c0_48, %c0_49] : memref<7x16x384xbf16, #tpu.memory_space<vmem>>, vector<1x16x384xbf16>
    %76 = vector.shape_cast %75 : vector<1x16x384xbf16> to vector<16x384xbf16>
    %77 = arith.extf %76 : vector<16x384xbf16> to vector<16x384xf32>
    %78 = vector.extract_strided_slice %77 {offsets = [0, 0], sizes = [16, 128], strides = [1, 1]} : vector<16x384xf32> to vector<16x128xf32>
    %79 = vector.extract_strided_slice %41 {offsets = [0, 0], sizes = [16, 128], strides = [1, 1]} : vector<16x384xf32> to vector<16x128xf32>
    %80 = arith.addf %78, %79 : vector<16x128xf32>
    %81 = arith.negf %80 : vector<16x128xf32>
    %82 = math.exp %81 : vector<16x128xf32>
    %cst_50 = arith.constant 1.000000e+00 : f32
    %83 = vector.broadcast %cst_50 : f32 to vector<16x128xf32>
    %84 = arith.addf %83, %82 : vector<16x128xf32>
    %85 = arith.divf %83, %84 : vector<16x128xf32>
    %86 = vector.extract_strided_slice %77 {offsets = [0, 128], sizes = [16, 128], strides = [1, 1]} : vector<16x384xf32> to vector<16x128xf32>
    %87 = vector.extract_strided_slice %41 {offsets = [0, 128], sizes = [16, 128], strides = [1, 1]} : vector<16x384xf32> to vector<16x128xf32>
    %88 = arith.addf %86, %87 : vector<16x128xf32>
    %89 = arith.negf %88 : vector<16x128xf32>
    %90 = math.exp %89 : vector<16x128xf32>
    %cst_51 = arith.constant 1.000000e+00 : f32
    %91 = vector.broadcast %cst_51 : f32 to vector<16x128xf32>
    %92 = arith.addf %91, %90 : vector<16x128xf32>
    %93 = arith.divf %91, %92 : vector<16x128xf32>
    %94 = vector.extract_strided_slice %77 {offsets = [0, 256], sizes = [16, 128], strides = [1, 1]} : vector<16x384xf32> to vector<16x128xf32>
    %95 = vector.extract_strided_slice %41 {offsets = [0, 256], sizes = [16, 128], strides = [1, 1]} : vector<16x384xf32> to vector<16x128xf32>
    %96 = vector.broadcast %34 : vector<1x128xf32> to vector<16x128xf32>
    %97 = arith.addf %95, %96 : vector<16x128xf32>
    %98 = arith.mulf %85, %97 : vector<16x128xf32>
    %99 = arith.addf %94, %98 : vector<16x128xf32>
    %100 = math.tanh %99 : vector<16x128xf32>
    %cst_52 = arith.constant 1.000000e+00 : f32
    %101 = vector.broadcast %cst_52 : f32 to vector<16x128xf32>
    %102 = arith.subf %101, %93 : vector<16x128xf32>
    %103 = arith.mulf %102, %100 : vector<16x128xf32>
    %104 = arith.mulf %93, %36 : vector<16x128xf32>
    %105 = arith.addf %103, %104 : vector<16x128xf32>
    %106 = arith.index_cast %37 : i32 to index
    %c0_53 = arith.constant 0 : index
    %c0_54 = arith.constant 0 : index
    %107 = vector.load %arg4[%106, %c0_53, %c0_54] : memref<7x16x1xf32, #tpu.memory_space<vmem>>, vector<1x16x1xf32>
    %108 = vector.shape_cast %107 : vector<1x16x1xf32> to vector<16x1xf32>
    %109 = vector.broadcast %108 : vector<16x1xf32> to vector<16x128xf32>
    %110 = arith.mulf %105, %109 : vector<16x128xf32>
    %111 = arith.truncf %73 : vector<16x128xf32> to vector<16x128xbf16>
    %112 = arith.index_cast %c0_i32_40 : i32 to index
    %c0_55 = arith.constant 0 : index
    %c0_56 = arith.constant 0 : index
    %113 = vector.load %arg9[%112, %c0_55, %c0_56] : memref<7x16x128xbf16, #tpu.memory_space<vmem>>, vector<1x16x128xbf16>
    %114 = vector.shape_cast %113 : vector<1x16x128xbf16> to vector<16x128xbf16>
    %115 = vector.shape_cast %111 : vector<16x128xbf16> to vector<1x16x128xbf16>
    tpu.vector_store %arg9[%112, %c0_55, %c0_56], %115 {strides = array<i32>} : memref<7x16x128xbf16, #tpu.memory_space<vmem>>, vector<1x16x128xbf16>,
    %116 = arith.truncf %110 : vector<16x128xf32> to vector<16x128xbf16>
    %117 = arith.index_cast %37 : i32 to index
    %c0_57 = arith.constant 0 : index
    %c0_58 = arith.constant 0 : index
    %118 = vector.load %arg10[%117, %c0_57, %c0_58] : memref<7x16x128xbf16, #tpu.memory_space<vmem>>, vector<1x16x128xbf16>
    %119 = vector.shape_cast %118 : vector<1x16x128xbf16> to vector<16x128xbf16>
    %120 = vector.shape_cast %116 : vector<16x128xbf16> to vector<1x16x128xbf16>
    tpu.vector_store %arg10[%117, %c0_57, %c0_58], %120 {strides = array<i32>} : memref<7x16x128xbf16, #tpu.memory_space<vmem>>, vector<1x16x128xbf16>,
    %c1_i32 = arith.constant 1 : i32
    %c6_i32_59 = arith.constant 6 : i32
    %121 = arith.subi %c6_i32_59, %c1_i32 : i32
    %122 = arith.truncf %73 : vector<16x128xf32> to vector<16x128xbf16>
    %cst_60 = arith.constant dense<0.000000e+00> : vector<16x384xf32>
    %123 = tpu.matmul %122, %28, %cst_60 {dimension_numbers = #tpu.dot_dimension_numbers<[1], [0], [0], [1], [0, 0, 1, 1], [], []>} : vector<16x128xbf16>, vector<128x384xbf16>, vector<16x384xf32> -> vector<16x384xf32>
    %124 = arith.truncf %110 : vector<16x128xf32> to vector<16x128xbf16>
    %cst_61 = arith.constant dense<0.000000e+00> : vector<16x384xf32>
    %125 = tpu.matmul %124, %30, %cst_61 {dimension_numbers = #tpu.dot_dimension_numbers<[1], [0], [0], [1], [0, 0, 1, 1], [], []>} : vector<16x128xbf16>, vector<128x384xbf16>, vector<16x384xf32> -> vector<16x384xf32>
    %126 = arith.index_cast %c1_i32 : i32 to index
    %c0_62 = arith.constant 0 : index
    %c0_63 = arith.constant 0 : index
    %127 = vector.load %arg11[%126, %c0_62, %c0_63] : memref<7x16x384xbf16, #tpu.memory_space<vmem>>, vector<1x16x384xbf16>
    %128 = vector.shape_cast %127 : vector<1x16x384xbf16> to vector<16x384xbf16>
    %129 = arith.extf %128 : vector<16x384xbf16> to vector<16x384xf32>
    %130 = vector.extract_strided_slice %129 {offsets = [0, 0], sizes = [16, 128], strides = [1, 1]} : vector<16x384xf32> to vector<16x128xf32>
    %131 = vector.extract_strided_slice %123 {offsets = [0, 0], sizes = [16, 128], strides = [1, 1]} : vector<16x384xf32> to vector<16x128xf32>
    %132 = arith.addf %130, %131 : vector<16x128xf32>
    %133 = arith.negf %132 : vector<16x128xf32>
    %134 = math.exp %133 : vector<16x128xf32>
    %cst_64 = arith.constant 1.000000e+00 : f32
    %135 = vector.broadcast %cst_64 : f32 to vector<16x128xf32>
    %136 = arith.addf %135, %134 : vector<16x128xf32>
    %137 = arith.divf %135, %136 : vector<16x128xf32>
    %138 = vector.extract_strided_slice %129 {offsets = [0, 128], sizes = [16, 128], strides = [1, 1]} : vector<16x384xf32> to vector<16x128xf32>
    %139 = vector.extract_strided_slice %123 {offsets = [0, 128], sizes = [16, 128], strides = [1, 1]} : vector<16x384xf32> to vector<16x128xf32>
    %140 = arith.addf %138, %139 : vector<16x128xf32>
    %141 = arith.negf %140 : vector<16x128xf32>
    %142 = math.exp %141 : vector<16x128xf32>
    %cst_65 = arith.constant 1.000000e+00 : f32
    %143 = vector.broadcast %cst_65 : f32 to vector<16x128xf32>
    %144 = arith.addf %143, %142 : vector<16x128xf32>
    %145 = arith.divf %143, %144 : vector<16x128xf32>
    %146 = vector.extract_strided_slice %129 {offsets = [0, 256], sizes = [16, 128], strides = [1, 1]} : vector<16x384xf32> to vector<16x128xf32>
    %147 = vector.extract_strided_slice %123 {offsets = [0, 256], sizes = [16, 128], strides = [1, 1]} : vector<16x384xf32> to vector<16x128xf32>
    %148 = vector.broadcast %32 : vector<1x128xf32> to vector<16x128xf32>
    %149 = arith.addf %147, %148 : vector<16x128xf32>
    %150 = arith.mulf %137, %149 : vector<16x128xf32>
    %151 = arith.addf %146, %150 : vector<16x128xf32>
    %152 = math.tanh %151 : vector<16x128xf32>
    %cst_66 = arith.constant 1.000000e+00 : f32
    %153 = vector.broadcast %cst_66 : f32 to vector<16x128xf32>
    %154 = arith.subf %153, %145 : vector<16x128xf32>
    %155 = arith.mulf %154, %152 : vector<16x128xf32>
    %156 = arith.mulf %145, %73 : vector<16x128xf32>
    %157 = arith.addf %155, %156 : vector<16x128xf32>
    %158 = arith.index_cast %121 : i32 to index
    %c0_67 = arith.constant 0 : index
    %c0_68 = arith.constant 0 : index
    %159 = vector.load %arg12[%158, %c0_67, %c0_68] : memref<7x16x384xbf16, #tpu.memory_space<vmem>>, vector<1x16x384xbf16>
    %160 = vector.shape_cast %159 : vector<1x16x384xbf16> to vector<16x384xbf16>
    %161 = arith.extf %160 : vector<16x384xbf16> to vector<16x384xf32>
    %162 = vector.extract_strided_slice %161 {offsets = [0, 0], sizes = [16, 128], strides = [1, 1]} : vector<16x384xf32> to vector<16x128xf32>
    %163 = vector.extract_strided_slice %125 {offsets = [0, 0], sizes = [16, 128], strides = [1, 1]} : vector<16x384xf32> to vector<16x128xf32>
    %164 = arith.addf %162, %163 : vector<16x128xf32>
    %165 = arith.negf %164 : vector<16x128xf32>
    %166 = math.exp %165 : vector<16x128xf32>
    %cst_69 = arith.constant 1.000000e+00 : f32
    %167 = vector.broadcast %cst_69 : f32 to vector<16x128xf32>
    %168 = arith.addf %167, %166 : vector<16x128xf32>
    %169 = arith.divf %167, %168 : vector<16x128xf32>
    %170 = vector.extract_strided_slice %161 {offsets = [0, 128], sizes = [16, 128], strides = [1, 1]} : vector<16x384xf32> to vector<16x128xf32>
    %171 = vector.extract_strided_slice %125 {offsets = [0, 128], sizes = [16, 128], strides = [1, 1]} : vector<16x384xf32> to vector<16x128xf32>
    %172 = arith.addf %170, %171 : vector<16x128xf32>
    %173 = arith.negf %172 : vector<16x128xf32>
    %174 = math.exp %173 : vector<16x128xf32>
    %cst_70 = arith.constant 1.000000e+00 : f32
    %175 = vector.broadcast %cst_70 : f32 to vector<16x128xf32>
    %176 = arith.addf %175, %174 : vector<16x128xf32>
    %177 = arith.divf %175, %176 : vector<16x128xf32>
    %178 = vector.extract_strided_slice %161 {offsets = [0, 256], sizes = [16, 128], strides = [1, 1]} : vector<16x384xf32> to vector<16x128xf32>
    %179 = vector.extract_strided_slice %125 {offsets = [0, 256], sizes = [16, 128], strides = [1, 1]} : vector<16x384xf32> to vector<16x128xf32>
    %180 = vector.broadcast %34 : vector<1x128xf32> to vector<16x128xf32>
    %181 = arith.addf %179, %180 : vector<16x128xf32>
    %182 = arith.mulf %169, %181 : vector<16x128xf32>
    %183 = arith.addf %178, %182 : vector<16x128xf32>
    %184 = math.tanh %183 : vector<16x128xf32>
    %cst_71 = arith.constant 1.000000e+00 : f32
    %185 = vector.broadcast %cst_71 : f32 to vector<16x128xf32>
    %186 = arith.subf %185, %177 : vector<16x128xf32>
    %187 = arith.mulf %186, %184 : vector<16x128xf32>
    %188 = arith.mulf %177, %110 : vector<16x128xf32>
    %189 = arith.addf %187, %188 : vector<16x128xf32>
    %190 = arith.index_cast %121 : i32 to index
    %c0_72 = arith.constant 0 : index
    %c0_73 = arith.constant 0 : index
    %191 = vector.load %arg4[%190, %c0_72, %c0_73] : memref<7x16x1xf32, #tpu.memory_space<vmem>>, vector<1x16x1xf32>
    %192 = vector.shape_cast %191 : vector<1x16x1xf32> to vector<16x1xf32>
    %193 = vector.broadcast %192 : vector<16x1xf32> to vector<16x128xf32>
    %194 = arith.mulf %189, %193 : vector<16x128xf32>
    %195 = arith.truncf %157 : vector<16x128xf32> to vector<16x128xbf16>
    %196 = arith.index_cast %c1_i32 : i32 to index
    %c0_74 = arith.constant 0 : index
    %c0_75 = arith.constant 0 : index
    %197 = vector.load %arg9[%196, %c0_74, %c0_75] : memref<7x16x128xbf16, #tpu.memory_space<vmem>>, vector<1x16x128xbf16>
    %198 = vector.shape_cast %197 : vector<1x16x128xbf16> to vector<16x128xbf16>
    %199 = vector.shape_cast %195 : vector<16x128xbf16> to vector<1x16x128xbf16>
    tpu.vector_store %arg9[%196, %c0_74, %c0_75], %199 {strides = array<i32>} : memref<7x16x128xbf16, #tpu.memory_space<vmem>>, vector<1x16x128xbf16>,
    %200 = arith.truncf %194 : vector<16x128xf32> to vector<16x128xbf16>
    %201 = arith.index_cast %121 : i32 to index
    %c0_76 = arith.constant 0 : index
    %c0_77 = arith.constant 0 : index
    %202 = vector.load %arg10[%201, %c0_76, %c0_77] : memref<7x16x128xbf16, #tpu.memory_space<vmem>>, vector<1x16x128xbf16>
    %203 = vector.shape_cast %202 : vector<1x16x128xbf16> to vector<16x128xbf16>
    %204 = vector.shape_cast %200 : vector<16x128xbf16> to vector<1x16x128xbf16>
    tpu.vector_store %arg10[%201, %c0_76, %c0_77], %204 {strides = array<i32>} : memref<7x16x128xbf16, #tpu.memory_space<vmem>>, vector<1x16x128xbf16>,
    %c2_i32 = arith.constant 2 : i32
    %c6_i32_78 = arith.constant 6 : i32
    %205 = arith.subi %c6_i32_78, %c2_i32 : i32
    %206 = arith.truncf %157 : vector<16x128xf32> to vector<16x128xbf16>
    %cst_79 = arith.constant dense<0.000000e+00> : vector<16x384xf32>
    %207 = tpu.matmul %206, %28, %cst_79 {dimension_numbers = #tpu.dot_dimension_numbers<[1], [0], [0], [1], [0, 0, 1, 1], [], []>} : vector<16x128xbf16>, vector<128x384xbf16>, vector<16x384xf32> -> vector<16x384xf32>
    %208 = arith.truncf %194 : vector<16x128xf32> to vector<16x128xbf16>
    %cst_80 = arith.constant dense<0.000000e+00> : vector<16x384xf32>
    %209 = tpu.matmul %208, %30, %cst_80 {dimension_numbers = #tpu.dot_dimension_numbers<[1], [0], [0], [1], [0, 0, 1, 1], [], []>} : vector<16x128xbf16>, vector<128x384xbf16>, vector<16x384xf32> -> vector<16x384xf32>
    %210 = arith.index_cast %c2_i32 : i32 to index
    %c0_81 = arith.constant 0 : index
    %c0_82 = arith.constant 0 : index
    %211 = vector.load %arg11[%210, %c0_81, %c0_82] : memref<7x16x384xbf16, #tpu.memory_space<vmem>>, vector<1x16x384xbf16>
    %212 = vector.shape_cast %211 : vector<1x16x384xbf16> to vector<16x384xbf16>
    %213 = arith.extf %212 : vector<16x384xbf16> to vector<16x384xf32>
    %214 = vector.extract_strided_slice %213 {offsets = [0, 0], sizes = [16, 128], strides = [1, 1]} : vector<16x384xf32> to vector<16x128xf32>
    %215 = vector.extract_strided_slice %207 {offsets = [0, 0], sizes = [16, 128], strides = [1, 1]} : vector<16x384xf32> to vector<16x128xf32>
    %216 = arith.addf %214, %215 : vector<16x128xf32>
    %217 = arith.negf %216 : vector<16x128xf32>
    %218 = math.exp %217 : vector<16x128xf32>
    %cst_83 = arith.constant 1.000000e+00 : f32
    %219 = vector.broadcast %cst_83 : f32 to vector<16x128xf32>
    %220 = arith.addf %219, %218 : vector<16x128xf32>
    %221 = arith.divf %219, %220 : vector<16x128xf32>
    %222 = vector.extract_strided_slice %213 {offsets = [0, 128], sizes = [16, 128], strides = [1, 1]} : vector<16x384xf32> to vector<16x128xf32>
    %223 = vector.extract_strided_slice %207 {offsets = [0, 128], sizes = [16, 128], strides = [1, 1]} : vector<16x384xf32> to vector<16x128xf32>
    %224 = arith.addf %222, %223 : vector<16x128xf32>
    %225 = arith.negf %224 : vector<16x128xf32>
    %226 = math.exp %225 : vector<16x128xf32>
    %cst_84 = arith.constant 1.000000e+00 : f32
    %227 = vector.broadcast %cst_84 : f32 to vector<16x128xf32>
    %228 = arith.addf %227, %226 : vector<16x128xf32>
    %229 = arith.divf %227, %228 : vector<16x128xf32>
    %230 = vector.extract_strided_slice %213 {offsets = [0, 256], sizes = [16, 128], strides = [1, 1]} : vector<16x384xf32> to vector<16x128xf32>
    %231 = vector.extract_strided_slice %207 {offsets = [0, 256], sizes = [16, 128], strides = [1, 1]} : vector<16x384xf32> to vector<16x128xf32>
    %232 = vector.broadcast %32 : vector<1x128xf32> to vector<16x128xf32>
    %233 = arith.addf %231, %232 : vector<16x128xf32>
    %234 = arith.mulf %221, %233 : vector<16x128xf32>
    %235 = arith.addf %230, %234 : vector<16x128xf32>
    %236 = math.tanh %235 : vector<16x128xf32>
    %cst_85 = arith.constant 1.000000e+00 : f32
    %237 = vector.broadcast %cst_85 : f32 to vector<16x128xf32>
    %238 = arith.subf %237, %229 : vector<16x128xf32>
    %239 = arith.mulf %238, %236 : vector<16x128xf32>
    %240 = arith.mulf %229, %157 : vector<16x128xf32>
    %241 = arith.addf %239, %240 : vector<16x128xf32>
    %242 = arith.index_cast %205 : i32 to index
    %c0_86 = arith.constant 0 : index
    %c0_87 = arith.constant 0 : index
    %243 = vector.load %arg12[%242, %c0_86, %c0_87] : memref<7x16x384xbf16, #tpu.memory_space<vmem>>, vector<1x16x384xbf16>
    %244 = vector.shape_cast %243 : vector<1x16x384xbf16> to vector<16x384xbf16>
    %245 = arith.extf %244 : vector<16x384xbf16> to vector<16x384xf32>
    %246 = vector.extract_strided_slice %245 {offsets = [0, 0], sizes = [16, 128], strides = [1, 1]} : vector<16x384xf32> to vector<16x128xf32>
    %247 = vector.extract_strided_slice %209 {offsets = [0, 0], sizes = [16, 128], strides = [1, 1]} : vector<16x384xf32> to vector<16x128xf32>
    %248 = arith.addf %246, %247 : vector<16x128xf32>
    %249 = arith.negf %248 : vector<16x128xf32>
    %250 = math.exp %249 : vector<16x128xf32>
    %cst_88 = arith.constant 1.000000e+00 : f32
    %251 = vector.broadcast %cst_88 : f32 to vector<16x128xf32>
    %252 = arith.addf %251, %250 : vector<16x128xf32>
    %253 = arith.divf %251, %252 : vector<16x128xf32>
    %254 = vector.extract_strided_slice %245 {offsets = [0, 128], sizes = [16, 128], strides = [1, 1]} : vector<16x384xf32> to vector<16x128xf32>
    %255 = vector.extract_strided_slice %209 {offsets = [0, 128], sizes = [16, 128], strides = [1, 1]} : vector<16x384xf32> to vector<16x128xf32>
    %256 = arith.addf %254, %255 : vector<16x128xf32>
    %257 = arith.negf %256 : vector<16x128xf32>
    %258 = math.exp %257 : vector<16x128xf32>
    %cst_89 = arith.constant 1.000000e+00 : f32
    %259 = vector.broadcast %cst_89 : f32 to vector<16x128xf32>
    %260 = arith.addf %259, %258 : vector<16x128xf32>
    %261 = arith.divf %259, %260 : vector<16x128xf32>
    %262 = vector.extract_strided_slice %245 {offsets = [0, 256], sizes = [16, 128], strides = [1, 1]} : vector<16x384xf32> to vector<16x128xf32>
    %263 = vector.extract_strided_slice %209 {offsets = [0, 256], sizes = [16, 128], strides = [1, 1]} : vector<16x384xf32> to vector<16x128xf32>
    %264 = vector.broadcast %34 : vector<1x128xf32> to vector<16x128xf32>
    %265 = arith.addf %263, %264 : vector<16x128xf32>
    %266 = arith.mulf %253, %265 : vector<16x128xf32>
    %267 = arith.addf %262, %266 : vector<16x128xf32>
    %268 = math.tanh %267 : vector<16x128xf32>
    %cst_90 = arith.constant 1.000000e+00 : f32
    %269 = vector.broadcast %cst_90 : f32 to vector<16x128xf32>
    %270 = arith.subf %269, %261 : vector<16x128xf32>
    %271 = arith.mulf %270, %268 : vector<16x128xf32>
    %272 = arith.mulf %261, %194 : vector<16x128xf32>
    %273 = arith.addf %271, %272 : vector<16x128xf32>
    %274 = arith.index_cast %205 : i32 to index
    %c0_91 = arith.constant 0 : index
    %c0_92 = arith.constant 0 : index
    %275 = vector.load %arg4[%274, %c0_91, %c0_92] : memref<7x16x1xf32, #tpu.memory_space<vmem>>, vector<1x16x1xf32>
    %276 = vector.shape_cast %275 : vector<1x16x1xf32> to vector<16x1xf32>
    %277 = vector.broadcast %276 : vector<16x1xf32> to vector<16x128xf32>
    %278 = arith.mulf %273, %277 : vector<16x128xf32>
    %279 = arith.truncf %241 : vector<16x128xf32> to vector<16x128xbf16>
    %280 = arith.index_cast %c2_i32 : i32 to index
    %c0_93 = arith.constant 0 : index
    %c0_94 = arith.constant 0 : index
    %281 = vector.load %arg9[%280, %c0_93, %c0_94] : memref<7x16x128xbf16, #tpu.memory_space<vmem>>, vector<1x16x128xbf16>
    %282 = vector.shape_cast %281 : vector<1x16x128xbf16> to vector<16x128xbf16>
    %283 = vector.shape_cast %279 : vector<16x128xbf16> to vector<1x16x128xbf16>
    tpu.vector_store %arg9[%280, %c0_93, %c0_94], %283 {strides = array<i32>} : memref<7x16x128xbf16, #tpu.memory_space<vmem>>, vector<1x16x128xbf16>,
    %284 = arith.truncf %278 : vector<16x128xf32> to vector<16x128xbf16>
    %285 = arith.index_cast %205 : i32 to index
    %c0_95 = arith.constant 0 : index
    %c0_96 = arith.constant 0 : index
    %286 = vector.load %arg10[%285, %c0_95, %c0_96] : memref<7x16x128xbf16, #tpu.memory_space<vmem>>, vector<1x16x128xbf16>
    %287 = vector.shape_cast %286 : vector<1x16x128xbf16> to vector<16x128xbf16>
    %288 = vector.shape_cast %284 : vector<16x128xbf16> to vector<1x16x128xbf16>
    tpu.vector_store %arg10[%285, %c0_95, %c0_96], %288 {strides = array<i32>} : memref<7x16x128xbf16, #tpu.memory_space<vmem>>, vector<1x16x128xbf16>,
    %c3_i32 = arith.constant 3 : i32
    %c6_i32_97 = arith.constant 6 : i32
    %289 = arith.subi %c6_i32_97, %c3_i32 : i32
    %290 = arith.truncf %241 : vector<16x128xf32> to vector<16x128xbf16>
    %cst_98 = arith.constant dense<0.000000e+00> : vector<16x384xf32>
    %291 = tpu.matmul %290, %28, %cst_98 {dimension_numbers = #tpu.dot_dimension_numbers<[1], [0], [0], [1], [0, 0, 1, 1], [], []>} : vector<16x128xbf16>, vector<128x384xbf16>, vector<16x384xf32> -> vector<16x384xf32>
    %292 = arith.truncf %278 : vector<16x128xf32> to vector<16x128xbf16>
    %cst_99 = arith.constant dense<0.000000e+00> : vector<16x384xf32>
    %293 = tpu.matmul %292, %30, %cst_99 {dimension_numbers = #tpu.dot_dimension_numbers<[1], [0], [0], [1], [0, 0, 1, 1], [], []>} : vector<16x128xbf16>, vector<128x384xbf16>, vector<16x384xf32> -> vector<16x384xf32>
    %294 = arith.index_cast %c3_i32 : i32 to index
    %c0_100 = arith.constant 0 : index
    %c0_101 = arith.constant 0 : index
    %295 = vector.load %arg11[%294, %c0_100, %c0_101] : memref<7x16x384xbf16, #tpu.memory_space<vmem>>, vector<1x16x384xbf16>
    %296 = vector.shape_cast %295 : vector<1x16x384xbf16> to vector<16x384xbf16>
    %297 = arith.extf %296 : vector<16x384xbf16> to vector<16x384xf32>
    %298 = vector.extract_strided_slice %297 {offsets = [0, 0], sizes = [16, 128], strides = [1, 1]} : vector<16x384xf32> to vector<16x128xf32>
    %299 = vector.extract_strided_slice %291 {offsets = [0, 0], sizes = [16, 128], strides = [1, 1]} : vector<16x384xf32> to vector<16x128xf32>
    %300 = arith.addf %298, %299 : vector<16x128xf32>
    %301 = arith.negf %300 : vector<16x128xf32>
    %302 = math.exp %301 : vector<16x128xf32>
    %cst_102 = arith.constant 1.000000e+00 : f32
    %303 = vector.broadcast %cst_102 : f32 to vector<16x128xf32>
    %304 = arith.addf %303, %302 : vector<16x128xf32>
    %305 = arith.divf %303, %304 : vector<16x128xf32>
    %306 = vector.extract_strided_slice %297 {offsets = [0, 128], sizes = [16, 128], strides = [1, 1]} : vector<16x384xf32> to vector<16x128xf32>
    %307 = vector.extract_strided_slice %291 {offsets = [0, 128], sizes = [16, 128], strides = [1, 1]} : vector<16x384xf32> to vector<16x128xf32>
    %308 = arith.addf %306, %307 : vector<16x128xf32>
    %309 = arith.negf %308 : vector<16x128xf32>
    %310 = math.exp %309 : vector<16x128xf32>
    %cst_103 = arith.constant 1.000000e+00 : f32
    %311 = vector.broadcast %cst_103 : f32 to vector<16x128xf32>
    %312 = arith.addf %311, %310 : vector<16x128xf32>
    %313 = arith.divf %311, %312 : vector<16x128xf32>
    %314 = vector.extract_strided_slice %297 {offsets = [0, 256], sizes = [16, 128], strides = [1, 1]} : vector<16x384xf32> to vector<16x128xf32>
    %315 = vector.extract_strided_slice %291 {offsets = [0, 256], sizes = [16, 128], strides = [1, 1]} : vector<16x384xf32> to vector<16x128xf32>
    %316 = vector.broadcast %32 : vector<1x128xf32> to vector<16x128xf32>
    %317 = arith.addf %315, %316 : vector<16x128xf32>
    %318 = arith.mulf %305, %317 : vector<16x128xf32>
    %319 = arith.addf %314, %318 : vector<16x128xf32>
    %320 = math.tanh %319 : vector<16x128xf32>
    %cst_104 = arith.constant 1.000000e+00 : f32
    %321 = vector.broadcast %cst_104 : f32 to vector<16x128xf32>
    %322 = arith.subf %321, %313 : vector<16x128xf32>
    %323 = arith.mulf %322, %320 : vector<16x128xf32>
    %324 = arith.mulf %313, %241 : vector<16x128xf32>
    %325 = arith.addf %323, %324 : vector<16x128xf32>
    %326 = arith.index_cast %289 : i32 to index
    %c0_105 = arith.constant 0 : index
    %c0_106 = arith.constant 0 : index
    %327 = vector.load %arg12[%326, %c0_105, %c0_106] : memref<7x16x384xbf16, #tpu.memory_space<vmem>>, vector<1x16x384xbf16>
    %328 = vector.shape_cast %327 : vector<1x16x384xbf16> to vector<16x384xbf16>
    %329 = arith.extf %328 : vector<16x384xbf16> to vector<16x384xf32>
    %330 = vector.extract_strided_slice %329 {offsets = [0, 0], sizes = [16, 128], strides = [1, 1]} : vector<16x384xf32> to vector<16x128xf32>
    %331 = vector.extract_strided_slice %293 {offsets = [0, 0], sizes = [16, 128], strides = [1, 1]} : vector<16x384xf32> to vector<16x128xf32>
    %332 = arith.addf %330, %331 : vector<16x128xf32>
    %333 = arith.negf %332 : vector<16x128xf32>
    %334 = math.exp %333 : vector<16x128xf32>
    %cst_107 = arith.constant 1.000000e+00 : f32
    %335 = vector.broadcast %cst_107 : f32 to vector<16x128xf32>
    %336 = arith.addf %335, %334 : vector<16x128xf32>
    %337 = arith.divf %335, %336 : vector<16x128xf32>
    %338 = vector.extract_strided_slice %329 {offsets = [0, 128], sizes = [16, 128], strides = [1, 1]} : vector<16x384xf32> to vector<16x128xf32>
    %339 = vector.extract_strided_slice %293 {offsets = [0, 128], sizes = [16, 128], strides = [1, 1]} : vector<16x384xf32> to vector<16x128xf32>
    %340 = arith.addf %338, %339 : vector<16x128xf32>
    %341 = arith.negf %340 : vector<16x128xf32>
    %342 = math.exp %341 : vector<16x128xf32>
    %cst_108 = arith.constant 1.000000e+00 : f32
    %343 = vector.broadcast %cst_108 : f32 to vector<16x128xf32>
    %344 = arith.addf %343, %342 : vector<16x128xf32>
    %345 = arith.divf %343, %344 : vector<16x128xf32>
    %346 = vector.extract_strided_slice %329 {offsets = [0, 256], sizes = [16, 128], strides = [1, 1]} : vector<16x384xf32> to vector<16x128xf32>
    %347 = vector.extract_strided_slice %293 {offsets = [0, 256], sizes = [16, 128], strides = [1, 1]} : vector<16x384xf32> to vector<16x128xf32>
    %348 = vector.broadcast %34 : vector<1x128xf32> to vector<16x128xf32>
    %349 = arith.addf %347, %348 : vector<16x128xf32>
    %350 = arith.mulf %337, %349 : vector<16x128xf32>
    %351 = arith.addf %346, %350 : vector<16x128xf32>
    %352 = math.tanh %351 : vector<16x128xf32>
    %cst_109 = arith.constant 1.000000e+00 : f32
    %353 = vector.broadcast %cst_109 : f32 to vector<16x128xf32>
    %354 = arith.subf %353, %345 : vector<16x128xf32>
    %355 = arith.mulf %354, %352 : vector<16x128xf32>
    %356 = arith.mulf %345, %278 : vector<16x128xf32>
    %357 = arith.addf %355, %356 : vector<16x128xf32>
    %358 = arith.index_cast %289 : i32 to index
    %c0_110 = arith.constant 0 : index
    %c0_111 = arith.constant 0 : index
    %359 = vector.load %arg4[%358, %c0_110, %c0_111] : memref<7x16x1xf32, #tpu.memory_space<vmem>>, vector<1x16x1xf32>
    %360 = vector.shape_cast %359 : vector<1x16x1xf32> to vector<16x1xf32>
    %361 = vector.broadcast %360 : vector<16x1xf32> to vector<16x128xf32>
    %362 = arith.mulf %357, %361 : vector<16x128xf32>
    %363 = arith.truncf %325 : vector<16x128xf32> to vector<16x128xbf16>
    %364 = arith.index_cast %c3_i32 : i32 to index
    %c0_112 = arith.constant 0 : index
    %c0_113 = arith.constant 0 : index
    %365 = vector.load %arg9[%364, %c0_112, %c0_113] : memref<7x16x128xbf16, #tpu.memory_space<vmem>>, vector<1x16x128xbf16>
    %366 = vector.shape_cast %365 : vector<1x16x128xbf16> to vector<16x128xbf16>
    %367 = vector.shape_cast %363 : vector<16x128xbf16> to vector<1x16x128xbf16>
    tpu.vector_store %arg9[%364, %c0_112, %c0_113], %367 {strides = array<i32>} : memref<7x16x128xbf16, #tpu.memory_space<vmem>>, vector<1x16x128xbf16>,
    %368 = arith.truncf %362 : vector<16x128xf32> to vector<16x128xbf16>
    %369 = arith.index_cast %289 : i32 to index
    %c0_114 = arith.constant 0 : index
    %c0_115 = arith.constant 0 : index
    %370 = vector.load %arg10[%369, %c0_114, %c0_115] : memref<7x16x128xbf16, #tpu.memory_space<vmem>>, vector<1x16x128xbf16>
    %371 = vector.shape_cast %370 : vector<1x16x128xbf16> to vector<16x128xbf16>
    %372 = vector.shape_cast %368 : vector<16x128xbf16> to vector<1x16x128xbf16>
    tpu.vector_store %arg10[%369, %c0_114, %c0_115], %372 {strides = array<i32>} : memref<7x16x128xbf16, #tpu.memory_space<vmem>>, vector<1x16x128xbf16>,
    %c4_i32 = arith.constant 4 : i32
    %c6_i32_116 = arith.constant 6 : i32
    %373 = arith.subi %c6_i32_116, %c4_i32 : i32
    %374 = arith.truncf %325 : vector<16x128xf32> to vector<16x128xbf16>
    %cst_117 = arith.constant dense<0.000000e+00> : vector<16x384xf32>
    %375 = tpu.matmul %374, %28, %cst_117 {dimension_numbers = #tpu.dot_dimension_numbers<[1], [0], [0], [1], [0, 0, 1, 1], [], []>} : vector<16x128xbf16>, vector<128x384xbf16>, vector<16x384xf32> -> vector<16x384xf32>
    %376 = arith.truncf %362 : vector<16x128xf32> to vector<16x128xbf16>
    %cst_118 = arith.constant dense<0.000000e+00> : vector<16x384xf32>
    %377 = tpu.matmul %376, %30, %cst_118 {dimension_numbers = #tpu.dot_dimension_numbers<[1], [0], [0], [1], [0, 0, 1, 1], [], []>} : vector<16x128xbf16>, vector<128x384xbf16>, vector<16x384xf32> -> vector<16x384xf32>
    %378 = arith.index_cast %c4_i32 : i32 to index
    %c0_119 = arith.constant 0 : index
    %c0_120 = arith.constant 0 : index
    %379 = vector.load %arg11[%378, %c0_119, %c0_120] : memref<7x16x384xbf16, #tpu.memory_space<vmem>>, vector<1x16x384xbf16>
    %380 = vector.shape_cast %379 : vector<1x16x384xbf16> to vector<16x384xbf16>
    %381 = arith.extf %380 : vector<16x384xbf16> to vector<16x384xf32>
    %382 = vector.extract_strided_slice %381 {offsets = [0, 0], sizes = [16, 128], strides = [1, 1]} : vector<16x384xf32> to vector<16x128xf32>
    %383 = vector.extract_strided_slice %375 {offsets = [0, 0], sizes = [16, 128], strides = [1, 1]} : vector<16x384xf32> to vector<16x128xf32>
    %384 = arith.addf %382, %383 : vector<16x128xf32>
    %385 = arith.negf %384 : vector<16x128xf32>
    %386 = math.exp %385 : vector<16x128xf32>
    %cst_121 = arith.constant 1.000000e+00 : f32
    %387 = vector.broadcast %cst_121 : f32 to vector<16x128xf32>
    %388 = arith.addf %387, %386 : vector<16x128xf32>
    %389 = arith.divf %387, %388 : vector<16x128xf32>
    %390 = vector.extract_strided_slice %381 {offsets = [0, 128], sizes = [16, 128], strides = [1, 1]} : vector<16x384xf32> to vector<16x128xf32>
    %391 = vector.extract_strided_slice %375 {offsets = [0, 128], sizes = [16, 128], strides = [1, 1]} : vector<16x384xf32> to vector<16x128xf32>
    %392 = arith.addf %390, %391 : vector<16x128xf32>
    %393 = arith.negf %392 : vector<16x128xf32>
    %394 = math.exp %393 : vector<16x128xf32>
    %cst_122 = arith.constant 1.000000e+00 : f32
    %395 = vector.broadcast %cst_122 : f32 to vector<16x128xf32>
    %396 = arith.addf %395, %394 : vector<16x128xf32>
    %397 = arith.divf %395, %396 : vector<16x128xf32>
    %398 = vector.extract_strided_slice %381 {offsets = [0, 256], sizes = [16, 128], strides = [1, 1]} : vector<16x384xf32> to vector<16x128xf32>
    %399 = vector.extract_strided_slice %375 {offsets = [0, 256], sizes = [16, 128], strides = [1, 1]} : vector<16x384xf32> to vector<16x128xf32>
    %400 = vector.broadcast %32 : vector<1x128xf32> to vector<16x128xf32>
    %401 = arith.addf %399, %400 : vector<16x128xf32>
    %402 = arith.mulf %389, %401 : vector<16x128xf32>
    %403 = arith.addf %398, %402 : vector<16x128xf32>
    %404 = math.tanh %403 : vector<16x128xf32>
    %cst_123 = arith.constant 1.000000e+00 : f32
    %405 = vector.broadcast %cst_123 : f32 to vector<16x128xf32>
    %406 = arith.subf %405, %397 : vector<16x128xf32>
    %407 = arith.mulf %406, %404 : vector<16x128xf32>
    %408 = arith.mulf %397, %325 : vector<16x128xf32>
    %409 = arith.addf %407, %408 : vector<16x128xf32>
    %410 = arith.index_cast %373 : i32 to index
    %c0_124 = arith.constant 0 : index
    %c0_125 = arith.constant 0 : index
    %411 = vector.load %arg12[%410, %c0_124, %c0_125] : memref<7x16x384xbf16, #tpu.memory_space<vmem>>, vector<1x16x384xbf16>
    %412 = vector.shape_cast %411 : vector<1x16x384xbf16> to vector<16x384xbf16>
    %413 = arith.extf %412 : vector<16x384xbf16> to vector<16x384xf32>
    %414 = vector.extract_strided_slice %413 {offsets = [0, 0], sizes = [16, 128], strides = [1, 1]} : vector<16x384xf32> to vector<16x128xf32>
    %415 = vector.extract_strided_slice %377 {offsets = [0, 0], sizes = [16, 128], strides = [1, 1]} : vector<16x384xf32> to vector<16x128xf32>
    %416 = arith.addf %414, %415 : vector<16x128xf32>
    %417 = arith.negf %416 : vector<16x128xf32>
    %418 = math.exp %417 : vector<16x128xf32>
    %cst_126 = arith.constant 1.000000e+00 : f32
    %419 = vector.broadcast %cst_126 : f32 to vector<16x128xf32>
    %420 = arith.addf %419, %418 : vector<16x128xf32>
    %421 = arith.divf %419, %420 : vector<16x128xf32>
    %422 = vector.extract_strided_slice %413 {offsets = [0, 128], sizes = [16, 128], strides = [1, 1]} : vector<16x384xf32> to vector<16x128xf32>
    %423 = vector.extract_strided_slice %377 {offsets = [0, 128], sizes = [16, 128], strides = [1, 1]} : vector<16x384xf32> to vector<16x128xf32>
    %424 = arith.addf %422, %423 : vector<16x128xf32>
    %425 = arith.negf %424 : vector<16x128xf32>
    %426 = math.exp %425 : vector<16x128xf32>
    %cst_127 = arith.constant 1.000000e+00 : f32
    %427 = vector.broadcast %cst_127 : f32 to vector<16x128xf32>
    %428 = arith.addf %427, %426 : vector<16x128xf32>
    %429 = arith.divf %427, %428 : vector<16x128xf32>
    %430 = vector.extract_strided_slice %413 {offsets = [0, 256], sizes = [16, 128], strides = [1, 1]} : vector<16x384xf32> to vector<16x128xf32>
    %431 = vector.extract_strided_slice %377 {offsets = [0, 256], sizes = [16, 128], strides = [1, 1]} : vector<16x384xf32> to vector<16x128xf32>
    %432 = vector.broadcast %34 : vector<1x128xf32> to vector<16x128xf32>
    %433 = arith.addf %431, %432 : vector<16x128xf32>
    %434 = arith.mulf %421, %433 : vector<16x128xf32>
    %435 = arith.addf %430, %434 : vector<16x128xf32>
    %436 = math.tanh %435 : vector<16x128xf32>
    %cst_128 = arith.constant 1.000000e+00 : f32
    %437 = vector.broadcast %cst_128 : f32 to vector<16x128xf32>
    %438 = arith.subf %437, %429 : vector<16x128xf32>
    %439 = arith.mulf %438, %436 : vector<16x128xf32>
    %440 = arith.mulf %429, %362 : vector<16x128xf32>
    %441 = arith.addf %439, %440 : vector<16x128xf32>
    %442 = arith.index_cast %373 : i32 to index
    %c0_129 = arith.constant 0 : index
    %c0_130 = arith.constant 0 : index
    %443 = vector.load %arg4[%442, %c0_129, %c0_130] : memref<7x16x1xf32, #tpu.memory_space<vmem>>, vector<1x16x1xf32>
    %444 = vector.shape_cast %443 : vector<1x16x1xf32> to vector<16x1xf32>
    %445 = vector.broadcast %444 : vector<16x1xf32> to vector<16x128xf32>
    %446 = arith.mulf %441, %445 : vector<16x128xf32>
    %447 = arith.truncf %409 : vector<16x128xf32> to vector<16x128xbf16>
    %448 = arith.index_cast %c4_i32 : i32 to index
    %c0_131 = arith.constant 0 : index
    %c0_132 = arith.constant 0 : index
    %449 = vector.load %arg9[%448, %c0_131, %c0_132] : memref<7x16x128xbf16, #tpu.memory_space<vmem>>, vector<1x16x128xbf16>
    %450 = vector.shape_cast %449 : vector<1x16x128xbf16> to vector<16x128xbf16>
    %451 = vector.shape_cast %447 : vector<16x128xbf16> to vector<1x16x128xbf16>
    tpu.vector_store %arg9[%448, %c0_131, %c0_132], %451 {strides = array<i32>} : memref<7x16x128xbf16, #tpu.memory_space<vmem>>, vector<1x16x128xbf16>,
    %452 = arith.truncf %446 : vector<16x128xf32> to vector<16x128xbf16>
    %453 = arith.index_cast %373 : i32 to index
    %c0_133 = arith.constant 0 : index
    %c0_134 = arith.constant 0 : index
    %454 = vector.load %arg10[%453, %c0_133, %c0_134] : memref<7x16x128xbf16, #tpu.memory_space<vmem>>, vector<1x16x128xbf16>
    %455 = vector.shape_cast %454 : vector<1x16x128xbf16> to vector<16x128xbf16>
    %456 = vector.shape_cast %452 : vector<16x128xbf16> to vector<1x16x128xbf16>
    tpu.vector_store %arg10[%453, %c0_133, %c0_134], %456 {strides = array<i32>} : memref<7x16x128xbf16, #tpu.memory_space<vmem>>, vector<1x16x128xbf16>,
    %c5_i32 = arith.constant 5 : i32
    %c6_i32_135 = arith.constant 6 : i32
    %457 = arith.subi %c6_i32_135, %c5_i32 : i32
    %458 = arith.truncf %409 : vector<16x128xf32> to vector<16x128xbf16>
    %cst_136 = arith.constant dense<0.000000e+00> : vector<16x384xf32>
    %459 = tpu.matmul %458, %28, %cst_136 {dimension_numbers = #tpu.dot_dimension_numbers<[1], [0], [0], [1], [0, 0, 1, 1], [], []>} : vector<16x128xbf16>, vector<128x384xbf16>, vector<16x384xf32> -> vector<16x384xf32>
    %460 = arith.truncf %446 : vector<16x128xf32> to vector<16x128xbf16>
    %cst_137 = arith.constant dense<0.000000e+00> : vector<16x384xf32>
    %461 = tpu.matmul %460, %30, %cst_137 {dimension_numbers = #tpu.dot_dimension_numbers<[1], [0], [0], [1], [0, 0, 1, 1], [], []>} : vector<16x128xbf16>, vector<128x384xbf16>, vector<16x384xf32> -> vector<16x384xf32>
    %462 = arith.index_cast %c5_i32 : i32 to index
    %c0_138 = arith.constant 0 : index
    %c0_139 = arith.constant 0 : index
    %463 = vector.load %arg11[%462, %c0_138, %c0_139] : memref<7x16x384xbf16, #tpu.memory_space<vmem>>, vector<1x16x384xbf16>
    %464 = vector.shape_cast %463 : vector<1x16x384xbf16> to vector<16x384xbf16>
    %465 = arith.extf %464 : vector<16x384xbf16> to vector<16x384xf32>
    %466 = vector.extract_strided_slice %465 {offsets = [0, 0], sizes = [16, 128], strides = [1, 1]} : vector<16x384xf32> to vector<16x128xf32>
    %467 = vector.extract_strided_slice %459 {offsets = [0, 0], sizes = [16, 128], strides = [1, 1]} : vector<16x384xf32> to vector<16x128xf32>
    %468 = arith.addf %466, %467 : vector<16x128xf32>
    %469 = arith.negf %468 : vector<16x128xf32>
    %470 = math.exp %469 : vector<16x128xf32>
    %cst_140 = arith.constant 1.000000e+00 : f32
    %471 = vector.broadcast %cst_140 : f32 to vector<16x128xf32>
    %472 = arith.addf %471, %470 : vector<16x128xf32>
    %473 = arith.divf %471, %472 : vector<16x128xf32>
    %474 = vector.extract_strided_slice %465 {offsets = [0, 128], sizes = [16, 128], strides = [1, 1]} : vector<16x384xf32> to vector<16x128xf32>
    %475 = vector.extract_strided_slice %459 {offsets = [0, 128], sizes = [16, 128], strides = [1, 1]} : vector<16x384xf32> to vector<16x128xf32>
    %476 = arith.addf %474, %475 : vector<16x128xf32>
    %477 = arith.negf %476 : vector<16x128xf32>
    %478 = math.exp %477 : vector<16x128xf32>
    %cst_141 = arith.constant 1.000000e+00 : f32
    %479 = vector.broadcast %cst_141 : f32 to vector<16x128xf32>
    %480 = arith.addf %479, %478 : vector<16x128xf32>
    %481 = arith.divf %479, %480 : vector<16x128xf32>
    %482 = vector.extract_strided_slice %465 {offsets = [0, 256], sizes = [16, 128], strides = [1, 1]} : vector<16x384xf32> to vector<16x128xf32>
    %483 = vector.extract_strided_slice %459 {offsets = [0, 256], sizes = [16, 128], strides = [1, 1]} : vector<16x384xf32> to vector<16x128xf32>
    %484 = vector.broadcast %32 : vector<1x128xf32> to vector<16x128xf32>
    %485 = arith.addf %483, %484 : vector<16x128xf32>
    %486 = arith.mulf %473, %485 : vector<16x128xf32>
    %487 = arith.addf %482, %486 : vector<16x128xf32>
    %488 = math.tanh %487 : vector<16x128xf32>
    %cst_142 = arith.constant 1.000000e+00 : f32
    %489 = vector.broadcast %cst_142 : f32 to vector<16x128xf32>
    %490 = arith.subf %489, %481 : vector<16x128xf32>
    %491 = arith.mulf %490, %488 : vector<16x128xf32>
    %492 = arith.mulf %481, %409 : vector<16x128xf32>
    %493 = arith.addf %491, %492 : vector<16x128xf32>
    %494 = arith.index_cast %457 : i32 to index
    %c0_143 = arith.constant 0 : index
    %c0_144 = arith.constant 0 : index
    %495 = vector.load %arg12[%494, %c0_143, %c0_144] : memref<7x16x384xbf16, #tpu.memory_space<vmem>>, vector<1x16x384xbf16>
    %496 = vector.shape_cast %495 : vector<1x16x384xbf16> to vector<16x384xbf16>
    %497 = arith.extf %496 : vector<16x384xbf16> to vector<16x384xf32>
    %498 = vector.extract_strided_slice %497 {offsets = [0, 0], sizes = [16, 128], strides = [1, 1]} : vector<16x384xf32> to vector<16x128xf32>
    %499 = vector.extract_strided_slice %461 {offsets = [0, 0], sizes = [16, 128], strides = [1, 1]} : vector<16x384xf32> to vector<16x128xf32>
    %500 = arith.addf %498, %499 : vector<16x128xf32>
    %501 = arith.negf %500 : vector<16x128xf32>
    %502 = math.exp %501 : vector<16x128xf32>
    %cst_145 = arith.constant 1.000000e+00 : f32
    %503 = vector.broadcast %cst_145 : f32 to vector<16x128xf32>
    %504 = arith.addf %503, %502 : vector<16x128xf32>
    %505 = arith.divf %503, %504 : vector<16x128xf32>
    %506 = vector.extract_strided_slice %497 {offsets = [0, 128], sizes = [16, 128], strides = [1, 1]} : vector<16x384xf32> to vector<16x128xf32>
    %507 = vector.extract_strided_slice %461 {offsets = [0, 128], sizes = [16, 128], strides = [1, 1]} : vector<16x384xf32> to vector<16x128xf32>
    %508 = arith.addf %506, %507 : vector<16x128xf32>
    %509 = arith.negf %508 : vector<16x128xf32>
    %510 = math.exp %509 : vector<16x128xf32>
    %cst_146 = arith.constant 1.000000e+00 : f32
    %511 = vector.broadcast %cst_146 : f32 to vector<16x128xf32>
    %512 = arith.addf %511, %510 : vector<16x128xf32>
    %513 = arith.divf %511, %512 : vector<16x128xf32>
    %514 = vector.extract_strided_slice %497 {offsets = [0, 256], sizes = [16, 128], strides = [1, 1]} : vector<16x384xf32> to vector<16x128xf32>
    %515 = vector.extract_strided_slice %461 {offsets = [0, 256], sizes = [16, 128], strides = [1, 1]} : vector<16x384xf32> to vector<16x128xf32>
    %516 = vector.broadcast %34 : vector<1x128xf32> to vector<16x128xf32>
    %517 = arith.addf %515, %516 : vector<16x128xf32>
    %518 = arith.mulf %505, %517 : vector<16x128xf32>
    %519 = arith.addf %514, %518 : vector<16x128xf32>
    %520 = math.tanh %519 : vector<16x128xf32>
    %cst_147 = arith.constant 1.000000e+00 : f32
    %521 = vector.broadcast %cst_147 : f32 to vector<16x128xf32>
    %522 = arith.subf %521, %513 : vector<16x128xf32>
    %523 = arith.mulf %522, %520 : vector<16x128xf32>
    %524 = arith.mulf %513, %446 : vector<16x128xf32>
    %525 = arith.addf %523, %524 : vector<16x128xf32>
    %526 = arith.index_cast %457 : i32 to index
    %c0_148 = arith.constant 0 : index
    %c0_149 = arith.constant 0 : index
    %527 = vector.load %arg4[%526, %c0_148, %c0_149] : memref<7x16x1xf32, #tpu.memory_space<vmem>>, vector<1x16x1xf32>
    %528 = vector.shape_cast %527 : vector<1x16x1xf32> to vector<16x1xf32>
    %529 = vector.broadcast %528 : vector<16x1xf32> to vector<16x128xf32>
    %530 = arith.mulf %525, %529 : vector<16x128xf32>
    %531 = arith.truncf %493 : vector<16x128xf32> to vector<16x128xbf16>
    %532 = arith.index_cast %c5_i32 : i32 to index
    %c0_150 = arith.constant 0 : index
    %c0_151 = arith.constant 0 : index
    %533 = vector.load %arg9[%532, %c0_150, %c0_151] : memref<7x16x128xbf16, #tpu.memory_space<vmem>>, vector<1x16x128xbf16>
    %534 = vector.shape_cast %533 : vector<1x16x128xbf16> to vector<16x128xbf16>
    %535 = vector.shape_cast %531 : vector<16x128xbf16> to vector<1x16x128xbf16>
    tpu.vector_store %arg9[%532, %c0_150, %c0_151], %535 {strides = array<i32>} : memref<7x16x128xbf16, #tpu.memory_space<vmem>>, vector<1x16x128xbf16>,
    %536 = arith.truncf %530 : vector<16x128xf32> to vector<16x128xbf16>
    %537 = arith.index_cast %457 : i32 to index
    %c0_152 = arith.constant 0 : index
    %c0_153 = arith.constant 0 : index
    %538 = vector.load %arg10[%537, %c0_152, %c0_153] : memref<7x16x128xbf16, #tpu.memory_space<vmem>>, vector<1x16x128xbf16>
    %539 = vector.shape_cast %538 : vector<1x16x128xbf16> to vector<16x128xbf16>
    %540 = vector.shape_cast %536 : vector<16x128xbf16> to vector<1x16x128xbf16>
    tpu.vector_store %arg10[%537, %c0_152, %c0_153], %540 {strides = array<i32>} : memref<7x16x128xbf16, #tpu.memory_space<vmem>>, vector<1x16x128xbf16>,
    %c6_i32_154 = arith.constant 6 : i32
    %c6_i32_155 = arith.constant 6 : i32
    %541 = arith.subi %c6_i32_155, %c6_i32_154 : i32
    %542 = arith.truncf %493 : vector<16x128xf32> to vector<16x128xbf16>
    %cst_156 = arith.constant dense<0.000000e+00> : vector<16x384xf32>
    %543 = tpu.matmul %542, %28, %cst_156 {dimension_numbers = #tpu.dot_dimension_numbers<[1], [0], [0], [1], [0, 0, 1, 1], [], []>} : vector<16x128xbf16>, vector<128x384xbf16>, vector<16x384xf32> -> vector<16x384xf32>
    %544 = arith.truncf %530 : vector<16x128xf32> to vector<16x128xbf16>
    %cst_157 = arith.constant dense<0.000000e+00> : vector<16x384xf32>
    %545 = tpu.matmul %544, %30, %cst_157 {dimension_numbers = #tpu.dot_dimension_numbers<[1], [0], [0], [1], [0, 0, 1, 1], [], []>} : vector<16x128xbf16>, vector<128x384xbf16>, vector<16x384xf32> -> vector<16x384xf32>
    %546 = arith.index_cast %c6_i32_154 : i32 to index
    %c0_158 = arith.constant 0 : index
    %c0_159 = arith.constant 0 : index
    %547 = vector.load %arg11[%546, %c0_158, %c0_159] : memref<7x16x384xbf16, #tpu.memory_space<vmem>>, vector<1x16x384xbf16>
    %548 = vector.shape_cast %547 : vector<1x16x384xbf16> to vector<16x384xbf16>
    %549 = arith.extf %548 : vector<16x384xbf16> to vector<16x384xf32>
    %550 = vector.extract_strided_slice %549 {offsets = [0, 0], sizes = [16, 128], strides = [1, 1]} : vector<16x384xf32> to vector<16x128xf32>
    %551 = vector.extract_strided_slice %543 {offsets = [0, 0], sizes = [16, 128], strides = [1, 1]} : vector<16x384xf32> to vector<16x128xf32>
    %552 = arith.addf %550, %551 : vector<16x128xf32>
    %553 = arith.negf %552 : vector<16x128xf32>
    %554 = math.exp %553 : vector<16x128xf32>
    %cst_160 = arith.constant 1.000000e+00 : f32
    %555 = vector.broadcast %cst_160 : f32 to vector<16x128xf32>
    %556 = arith.addf %555, %554 : vector<16x128xf32>
    %557 = arith.divf %555, %556 : vector<16x128xf32>
    %558 = vector.extract_strided_slice %549 {offsets = [0, 128], sizes = [16, 128], strides = [1, 1]} : vector<16x384xf32> to vector<16x128xf32>
    %559 = vector.extract_strided_slice %543 {offsets = [0, 128], sizes = [16, 128], strides = [1, 1]} : vector<16x384xf32> to vector<16x128xf32>
    %560 = arith.addf %558, %559 : vector<16x128xf32>
    %561 = arith.negf %560 : vector<16x128xf32>
    %562 = math.exp %561 : vector<16x128xf32>
    %cst_161 = arith.constant 1.000000e+00 : f32
    %563 = vector.broadcast %cst_161 : f32 to vector<16x128xf32>
    %564 = arith.addf %563, %562 : vector<16x128xf32>
    %565 = arith.divf %563, %564 : vector<16x128xf32>
    %566 = vector.extract_strided_slice %549 {offsets = [0, 256], sizes = [16, 128], strides = [1, 1]} : vector<16x384xf32> to vector<16x128xf32>
    %567 = vector.extract_strided_slice %543 {offsets = [0, 256], sizes = [16, 128], strides = [1, 1]} : vector<16x384xf32> to vector<16x128xf32>
    %568 = vector.broadcast %32 : vector<1x128xf32> to vector<16x128xf32>
    %569 = arith.addf %567, %568 : vector<16x128xf32>
    %570 = arith.mulf %557, %569 : vector<16x128xf32>
    %571 = arith.addf %566, %570 : vector<16x128xf32>
    %572 = math.tanh %571 : vector<16x128xf32>
    %cst_162 = arith.constant 1.000000e+00 : f32
    %573 = vector.broadcast %cst_162 : f32 to vector<16x128xf32>
    %574 = arith.subf %573, %565 : vector<16x128xf32>
    %575 = arith.mulf %574, %572 : vector<16x128xf32>
    %576 = arith.mulf %565, %493 : vector<16x128xf32>
    %577 = arith.addf %575, %576 : vector<16x128xf32>
    %578 = arith.index_cast %541 : i32 to index
    %c0_163 = arith.constant 0 : index
    %c0_164 = arith.constant 0 : index
    %579 = vector.load %arg12[%578, %c0_163, %c0_164] : memref<7x16x384xbf16, #tpu.memory_space<vmem>>, vector<1x16x384xbf16>
    %580 = vector.shape_cast %579 : vector<1x16x384xbf16> to vector<16x384xbf16>
    %581 = arith.extf %580 : vector<16x384xbf16> to vector<16x384xf32>
    %582 = vector.extract_strided_slice %581 {offsets = [0, 0], sizes = [16, 128], strides = [1, 1]} : vector<16x384xf32> to vector<16x128xf32>
    %583 = vector.extract_strided_slice %545 {offsets = [0, 0], sizes = [16, 128], strides = [1, 1]} : vector<16x384xf32> to vector<16x128xf32>
    %584 = arith.addf %582, %583 : vector<16x128xf32>
    %585 = arith.negf %584 : vector<16x128xf32>
    %586 = math.exp %585 : vector<16x128xf32>
    %cst_165 = arith.constant 1.000000e+00 : f32
    %587 = vector.broadcast %cst_165 : f32 to vector<16x128xf32>
    %588 = arith.addf %587, %586 : vector<16x128xf32>
    %589 = arith.divf %587, %588 : vector<16x128xf32>
    %590 = vector.extract_strided_slice %581 {offsets = [0, 128], sizes = [16, 128], strides = [1, 1]} : vector<16x384xf32> to vector<16x128xf32>
    %591 = vector.extract_strided_slice %545 {offsets = [0, 128], sizes = [16, 128], strides = [1, 1]} : vector<16x384xf32> to vector<16x128xf32>
    %592 = arith.addf %590, %591 : vector<16x128xf32>
    %593 = arith.negf %592 : vector<16x128xf32>
    %594 = math.exp %593 : vector<16x128xf32>
    %cst_166 = arith.constant 1.000000e+00 : f32
    %595 = vector.broadcast %cst_166 : f32 to vector<16x128xf32>
    %596 = arith.addf %595, %594 : vector<16x128xf32>
    %597 = arith.divf %595, %596 : vector<16x128xf32>
    %598 = vector.extract_strided_slice %581 {offsets = [0, 256], sizes = [16, 128], strides = [1, 1]} : vector<16x384xf32> to vector<16x128xf32>
    %599 = vector.extract_strided_slice %545 {offsets = [0, 256], sizes = [16, 128], strides = [1, 1]} : vector<16x384xf32> to vector<16x128xf32>
    %600 = vector.broadcast %34 : vector<1x128xf32> to vector<16x128xf32>
    %601 = arith.addf %599, %600 : vector<16x128xf32>
    %602 = arith.mulf %589, %601 : vector<16x128xf32>
    %603 = arith.addf %598, %602 : vector<16x128xf32>
    %604 = math.tanh %603 : vector<16x128xf32>
    %cst_167 = arith.constant 1.000000e+00 : f32
    %605 = vector.broadcast %cst_167 : f32 to vector<16x128xf32>
    %606 = arith.subf %605, %597 : vector<16x128xf32>
    %607 = arith.mulf %606, %604 : vector<16x128xf32>
    %608 = arith.mulf %597, %530 : vector<16x128xf32>
    %609 = arith.addf %607, %608 : vector<16x128xf32>
    %610 = arith.index_cast %541 : i32 to index
    %c0_168 = arith.constant 0 : index
    %c0_169 = arith.constant 0 : index
    %611 = vector.load %arg4[%610, %c0_168, %c0_169] : memref<7x16x1xf32, #tpu.memory_space<vmem>>, vector<1x16x1xf32>
    %612 = vector.shape_cast %611 : vector<1x16x1xf32> to vector<16x1xf32>
    %613 = vector.broadcast %612 : vector<16x1xf32> to vector<16x128xf32>
    %614 = arith.mulf %609, %613 : vector<16x128xf32>
    %615 = arith.truncf %577 : vector<16x128xf32> to vector<16x128xbf16>
    %616 = arith.index_cast %c6_i32_154 : i32 to index
    %c0_170 = arith.constant 0 : index
    %c0_171 = arith.constant 0 : index
    %617 = vector.load %arg9[%616, %c0_170, %c0_171] : memref<7x16x128xbf16, #tpu.memory_space<vmem>>, vector<1x16x128xbf16>
    %618 = vector.shape_cast %617 : vector<1x16x128xbf16> to vector<16x128xbf16>
    %619 = vector.shape_cast %615 : vector<16x128xbf16> to vector<1x16x128xbf16>
    tpu.vector_store %arg9[%616, %c0_170, %c0_171], %619 {strides = array<i32>} : memref<7x16x128xbf16, #tpu.memory_space<vmem>>, vector<1x16x128xbf16>,
    %620 = arith.truncf %614 : vector<16x128xf32> to vector<16x128xbf16>
    %621 = arith.index_cast %541 : i32 to index
    %c0_172 = arith.constant 0 : index
    %c0_173 = arith.constant 0 : index
    %622 = vector.load %arg10[%621, %c0_172, %c0_173] : memref<7x16x128xbf16, #tpu.memory_space<vmem>>, vector<1x16x128xbf16>
    %623 = vector.shape_cast %622 : vector<1x16x128xbf16> to vector<16x128xbf16>
    %624 = vector.shape_cast %620 : vector<16x128xbf16> to vector<1x16x128xbf16>
    tpu.vector_store %arg10[%621, %c0_172, %c0_173], %624 {strides = array<i32>} : memref<7x16x128xbf16, #tpu.memory_space<vmem>>, vector<1x16x128xbf16>,
    %c7_i32 = arith.constant 7 : i32
    %c0_174 = arith.constant 0 : index
    %c0_175 = arith.constant 0 : index
    %625 = vector.load %arg13[%c0_174, %c0_175] : memref<16x128xf32, #tpu.memory_space<vmem>>, vector<16x128xf32>
    tpu.vector_store %arg13[%c0_174, %c0_175], %577 {strides = array<i32>} : memref<16x128xf32, #tpu.memory_space<vmem>>, vector<16x128xf32>,
    %c0_176 = arith.constant 0 : index
    %c0_177 = arith.constant 0 : index
    %626 = vector.load %arg14[%c0_176, %c0_177] : memref<16x128xf32, #tpu.memory_space<vmem>>, vector<16x128xf32>
    tpu.vector_store %arg14[%c0_176, %c0_177], %614 {strides = array<i32>} : memref<16x128xf32, #tpu.memory_space<vmem>>, vector<16x128xf32>,
    return
  }
  func.func @transform_0(%arg0: i32, %arg1: i32) -> (i32, i32, i32) {
    %c0_i32 = arith.constant 0 : i32
    %c0_i32_0 = arith.constant 0 : i32
    return %arg1, %arg0, %c0_i32 : i32, i32, i32
  }
  func.func @transform_1(%arg0: i32, %arg1: i32) -> (i32, i32, i32) {
    %c0_i32 = arith.constant 0 : i32
    %0 = arith.subi %c0_i32, %arg1 : i32
    %c0_i32_0 = arith.constant 0 : i32
    %c0_i32_1 = arith.constant 0 : i32
    return %0, %arg0, %c0_i32_0 : i32, i32, i32
  }
  func.func @transform_2(%arg0: i32, %arg1: i32) -> (i32, i32, i32) {
    %c0_i32 = arith.constant 0 : i32
    %0 = arith.subi %c0_i32, %arg1 : i32
    %c0_i32_0 = arith.constant 0 : i32
    %c0_i32_1 = arith.constant 0 : i32
    return %0, %arg0, %c0_i32_0 : i32, i32, i32
  }
  func.func @transform_3(%arg0: i32, %arg1: i32) -> (i32, i32, i32) {
    %c0_i32 = arith.constant 0 : i32
    %c0_i32_0 = arith.constant 0 : i32
    %c0_i32_1 = arith.constant 0 : i32
    %c0_i32_2 = arith.constant 0 : i32
    return %c0_i32, %c0_i32_0, %c0_i32_1 : i32, i32, i32
  }
  func.func @transform_4(%arg0: i32, %arg1: i32) -> (i32, i32, i32) {
    %c0_i32 = arith.constant 0 : i32
    %c0_i32_0 = arith.constant 0 : i32
    %c0_i32_1 = arith.constant 0 : i32
    %c0_i32_2 = arith.constant 0 : i32
    return %c0_i32, %c0_i32_0, %c0_i32_1 : i32, i32, i32
  }
  func.func @transform_5(%arg0: i32, %arg1: i32) -> (i32, i32, i32) {
    %c0_i32 = arith.constant 0 : i32
    %c0_i32_0 = arith.constant 0 : i32
    %c0_i32_1 = arith.constant 0 : i32
    %c0_i32_2 = arith.constant 0 : i32
    return %c0_i32, %c0_i32_0, %c0_i32_1 : i32, i32, i32
  }
  func.func @transform_6(%arg0: i32, %arg1: i32) -> (i32, i32, i32) {
    %c0_i32 = arith.constant 0 : i32
    %c0_i32_0 = arith.constant 0 : i32
    %c0_i32_1 = arith.constant 0 : i32
    %c0_i32_2 = arith.constant 0 : i32
    return %c0_i32, %c0_i32_0, %c0_i32_1 : i32, i32, i32
  }
  func.func @transform_7(%arg0: i32, %arg1: i32) -> (i32, i32, i32) {
    %c0_i32 = arith.constant 0 : i32
    %c0_i32_0 = arith.constant 0 : i32
    return %arg1, %arg0, %c0_i32 : i32, i32, i32
  }
  func.func @transform_8(%arg0: i32, %arg1: i32) -> (i32, i32, i32) {
    %c0_i32 = arith.constant 0 : i32
    %0 = arith.subi %c0_i32, %arg1 : i32
    %c0_i32_0 = arith.constant 0 : i32
    %c0_i32_1 = arith.constant 0 : i32
    return %0, %arg0, %c0_i32_0 : i32, i32, i32
  }
}

module attributes {stable_mosaic.version = 11 : i64} {
  func.func @_attention_classify_kernel(%arg0: i32, %arg1: memref<3x16x128xbf16, #tpu.memory_space<vmem>>, %arg2: memref<3x16x128xbf16, #tpu.memory_space<vmem>>, %arg3: memref<3x16x1xf32, #tpu.memory_space<vmem>>, %arg4: memref<2x128x128xbf16, #tpu.memory_space<vmem>>, %arg5: memref<1x128xf32, #tpu.memory_space<vmem>>, %arg6: memref<1x128xf32, #tpu.memory_space<vmem>>, %arg7: memref<2x128x128xbf16, #tpu.memory_space<vmem>>, %arg8: memref<1x128xf32, #tpu.memory_space<vmem>>, %arg9: memref<16x128xf32, #tpu.memory_space<vmem>>) attributes {dimension_semantics = [#tpu.dimension_semantics<parallel>], iteration_bounds = array<i64: 1>, scalar_prefetch = 0 : i64, scratch_operands = 0 : i64, tpu.core_type = #tpu.core_type<tc>, window_params = [{transform_indices = @transform_0, window_bounds = array<i64: 3, 16, 128>}, {transform_indices = @transform_1, window_bounds = array<i64: 3, 16, 128>}, {transform_indices = @transform_2, window_bounds = array<i64: 3, 16, 1>}, {pipeline_mode = #tpu.pipeline_mode<synchronous>, transform_indices = @transform_3, window_bounds = array<i64: 2, 128, 128>}, {pipeline_mode = #tpu.pipeline_mode<synchronous>, transform_indices = @transform_4, window_bounds = array<i64: 1, 128>}, {pipeline_mode = #tpu.pipeline_mode<synchronous>, transform_indices = @transform_5, window_bounds = array<i64: 1, 128>}, {pipeline_mode = #tpu.pipeline_mode<synchronous>, transform_indices = @transform_6, window_bounds = array<i64: 2, 128, 128>}, {pipeline_mode = #tpu.pipeline_mode<synchronous>, transform_indices = @transform_7, window_bounds = array<i64: 1, 128>}, {transform_indices = @transform_8, window_bounds = array<i64: 16, 128>}]} {
    %c0 = arith.constant 0 : index
    %c0_0 = arith.constant 0 : index
    %c0_1 = arith.constant 0 : index
    %0 = vector.load %arg1[%c0, %c0_0, %c0_1] : memref<3x16x128xbf16, #tpu.memory_space<vmem>>, vector<3x16x128xbf16>
    %c0_2 = arith.constant 0 : index
    %c0_3 = arith.constant 0 : index
    %c0_4 = arith.constant 0 : index
    %1 = vector.load %arg2[%c0_2, %c0_3, %c0_4] : memref<3x16x128xbf16, #tpu.memory_space<vmem>>, vector<3x16x128xbf16>
    %2 = vector.shape_cast %0 : vector<3x16x128xbf16> to vector<48x128xbf16>
    %c0_5 = arith.constant 0 : index
    %c0_6 = arith.constant 0 : index
    %c0_7 = arith.constant 0 : index
    %3 = vector.load %arg4[%c0_5, %c0_6, %c0_7] : memref<2x128x128xbf16, #tpu.memory_space<vmem>>, vector<1x128x128xbf16>
    %4 = vector.shape_cast %3 : vector<1x128x128xbf16> to vector<128x128xbf16>
    %cst = arith.constant dense<0.000000e+00> : vector<48x128xf32>
    %5 = tpu.matmul %2, %4, %cst {dimension_numbers = #tpu.dot_dimension_numbers<[1], [0], [0], [1], [0, 0, 1, 1], [], []>} : vector<48x128xbf16>, vector<128x128xbf16>, vector<48x128xf32> -> vector<48x128xf32>
    %6 = vector.shape_cast %1 : vector<3x16x128xbf16> to vector<48x128xbf16>
    %c1 = arith.constant 1 : index
    %c0_8 = arith.constant 0 : index
    %c0_9 = arith.constant 0 : index
    %7 = vector.load %arg4[%c1, %c0_8, %c0_9] : memref<2x128x128xbf16, #tpu.memory_space<vmem>>, vector<1x128x128xbf16>
    %8 = vector.shape_cast %7 : vector<1x128x128xbf16> to vector<128x128xbf16>
    %cst_10 = arith.constant dense<0.000000e+00> : vector<48x128xf32>
    %9 = tpu.matmul %6, %8, %cst_10 {dimension_numbers = #tpu.dot_dimension_numbers<[1], [0], [0], [1], [0, 0, 1, 1], [], []>} : vector<48x128xbf16>, vector<128x128xbf16>, vector<48x128xf32> -> vector<48x128xf32>
    %10 = arith.addf %5, %9 : vector<48x128xf32>
    %c0_11 = arith.constant 0 : index
    %c0_12 = arith.constant 0 : index
    %11 = vector.load %arg5[%c0_11, %c0_12] : memref<1x128xf32, #tpu.memory_space<vmem>>, vector<1x128xf32>
    %12 = vector.broadcast %11 : vector<1x128xf32> to vector<48x128xf32>
    %13 = arith.addf %10, %12 : vector<48x128xf32>
    %14 = math.tanh %13 : vector<48x128xf32>
    %15 = vector.shape_cast %14 : vector<48x128xf32> to vector<3x16x128xf32>
    %c0_13 = arith.constant 0 : index
    %c0_14 = arith.constant 0 : index
    %16 = vector.load %arg6[%c0_13, %c0_14] : memref<1x128xf32, #tpu.memory_space<vmem>>, vector<1x128xf32>
    %17 = vector.shape_cast %16 : vector<1x128xf32> to vector<1x1x128xf32>
    %18 = vector.broadcast %17 : vector<1x1x128xf32> to vector<3x16x128xf32>
    %19 = arith.mulf %15, %18 : vector<3x16x128xf32>
    %cst_15 = arith.constant dense<0.000000e+00> : vector<3x16xf32>
    %20 = vector.multi_reduction <add>, %19, %cst_15 [2] : vector<3x16x128xf32> to vector<3x16xf32>
    %21 = vector.shape_cast %20 : vector<3x16xf32> to vector<3x16x1xf32>
    %c0_16 = arith.constant 0 : index
    %c0_17 = arith.constant 0 : index
    %c0_18 = arith.constant 0 : index
    %22 = vector.load %arg3[%c0_16, %c0_17, %c0_18] : memref<3x16x1xf32, #tpu.memory_space<vmem>>, vector<3x16x1xf32>
    %cst_19 = arith.constant 0.000000e+00 : f32
    %23 = vector.broadcast %cst_19 : f32 to vector<3x16x1xf32>
    %24 = arith.cmpf ogt, %22, %23 : vector<3x16x1xf32>
    %cst_20 = arith.constant -1.000000e+30 : f32
    %25 = vector.broadcast %cst_20 : f32 to vector<3x16x1xf32>
    %26 = arith.select %24, %21, %25 : vector<3x16x1xi1>, vector<3x16x1xf32>
    %cst_21 = arith.constant dense<0xFF800000> : vector<16x1xf32>
    %27 = vector.multi_reduction <maximumf>, %26, %cst_21 [0] : vector<3x16x1xf32> to vector<16x1xf32>
    %28 = vector.shape_cast %27 : vector<16x1xf32> to vector<1x16x1xf32>
    %cst_22 = arith.constant 0.000000e+00 : f32
    %29 = vector.broadcast %cst_22 : f32 to vector<1x16x1xf32>
    %30 = arith.maximumf %28, %29 : vector<1x16x1xf32>
    %31 = vector.broadcast %30 : vector<1x16x1xf32> to vector<3x16x1xf32>
    %32 = arith.subf %21, %31 : vector<3x16x1xf32>
    %cst_23 = arith.constant 0.000000e+00 : f32
    %33 = vector.broadcast %cst_23 : f32 to vector<3x16x1xf32>
    %34 = arith.minimumf %32, %33 : vector<3x16x1xf32>
    %35 = math.exp %34 : vector<3x16x1xf32>
    %36 = arith.mulf %35, %22 : vector<3x16x1xf32>
    %cst_24 = arith.constant dense<0.000000e+00> : vector<16x1xf32>
    %37 = vector.multi_reduction <add>, %36, %cst_24 [0] : vector<3x16x1xf32> to vector<16x1xf32>
    %38 = vector.shape_cast %37 : vector<16x1xf32> to vector<1x16x1xf32>
    %cst_25 = arith.constant 0.000000e+00 : f32
    %39 = vector.broadcast %cst_25 : f32 to vector<1x16x1xf32>
    %40 = arith.subf %39, %30 : vector<1x16x1xf32>
    %41 = math.exp %40 : vector<1x16x1xf32>
    %cst_26 = arith.constant 9.99999974E-5 : f32
    %42 = vector.broadcast %cst_26 : f32 to vector<1x16x1xf32>
    %43 = arith.mulf %42, %41 : vector<1x16x1xf32>
    %44 = arith.addf %38, %43 : vector<1x16x1xf32>
    %45 = vector.broadcast %44 : vector<1x16x1xf32> to vector<3x16x1xf32>
    %46 = arith.divf %36, %45 : vector<3x16x1xf32>
    %47 = arith.extf %0 : vector<3x16x128xbf16> to vector<3x16x128xf32>
    %48 = vector.broadcast %46 : vector<3x16x1xf32> to vector<3x16x128xf32>
    %49 = arith.mulf %48, %47 : vector<3x16x128xf32>
    %cst_27 = arith.constant dense<0.000000e+00> : vector<16x128xf32>
    %50 = vector.multi_reduction <add>, %49, %cst_27 [0] : vector<3x16x128xf32> to vector<16x128xf32>
    %51 = arith.extf %1 : vector<3x16x128xbf16> to vector<3x16x128xf32>
    %52 = vector.broadcast %46 : vector<3x16x1xf32> to vector<3x16x128xf32>
    %53 = arith.mulf %52, %51 : vector<3x16x128xf32>
    %cst_28 = arith.constant dense<0.000000e+00> : vector<16x128xf32>
    %54 = vector.multi_reduction <add>, %53, %cst_28 [0] : vector<3x16x128xf32> to vector<16x128xf32>
    %55 = arith.truncf %50 : vector<16x128xf32> to vector<16x128xbf16>
    %c0_29 = arith.constant 0 : index
    %c0_30 = arith.constant 0 : index
    %c0_31 = arith.constant 0 : index
    %56 = vector.load %arg7[%c0_29, %c0_30, %c0_31] : memref<2x128x128xbf16, #tpu.memory_space<vmem>>, vector<1x128x128xbf16>
    %57 = vector.shape_cast %56 : vector<1x128x128xbf16> to vector<128x128xbf16>
    %cst_32 = arith.constant dense<0.000000e+00> : vector<16x128xf32>
    %58 = tpu.matmul %55, %57, %cst_32 {dimension_numbers = #tpu.dot_dimension_numbers<[1], [0], [0], [1], [0, 0, 1, 1], [], []>} : vector<16x128xbf16>, vector<128x128xbf16>, vector<16x128xf32> -> vector<16x128xf32>
    %59 = arith.truncf %54 : vector<16x128xf32> to vector<16x128xbf16>
    %c1_33 = arith.constant 1 : index
    %c0_34 = arith.constant 0 : index
    %c0_35 = arith.constant 0 : index
    %60 = vector.load %arg7[%c1_33, %c0_34, %c0_35] : memref<2x128x128xbf16, #tpu.memory_space<vmem>>, vector<1x128x128xbf16>
    %61 = vector.shape_cast %60 : vector<1x128x128xbf16> to vector<128x128xbf16>
    %cst_36 = arith.constant dense<0.000000e+00> : vector<16x128xf32>
    %62 = tpu.matmul %59, %61, %cst_36 {dimension_numbers = #tpu.dot_dimension_numbers<[1], [0], [0], [1], [0, 0, 1, 1], [], []>} : vector<16x128xbf16>, vector<128x128xbf16>, vector<16x128xf32> -> vector<16x128xf32>
    %63 = arith.addf %58, %62 : vector<16x128xf32>
    %c0_37 = arith.constant 0 : index
    %c0_38 = arith.constant 0 : index
    %64 = vector.load %arg8[%c0_37, %c0_38] : memref<1x128xf32, #tpu.memory_space<vmem>>, vector<1x128xf32>
    %65 = vector.broadcast %64 : vector<1x128xf32> to vector<16x128xf32>
    %66 = arith.addf %63, %65 : vector<16x128xf32>
    %c0_39 = arith.constant 0 : index
    %c0_40 = arith.constant 0 : index
    %67 = vector.load %arg9[%c0_39, %c0_40] : memref<16x128xf32, #tpu.memory_space<vmem>>, vector<16x128xf32>
    tpu.vector_store %arg9[%c0_39, %c0_40], %66 {strides = array<i32>} : memref<16x128xf32, #tpu.memory_space<vmem>>, vector<16x128xf32>,
    return
  }
  func.func @transform_0(%arg0: i32) -> (i32, i32, i32) {
    %c0_i32 = arith.constant 0 : i32
    %c0_i32_0 = arith.constant 0 : i32
    %c0_i32_1 = arith.constant 0 : i32
    return %c0_i32, %arg0, %c0_i32_0 : i32, i32, i32
  }
  func.func @transform_1(%arg0: i32) -> (i32, i32, i32) {
    %c0_i32 = arith.constant 0 : i32
    %c0_i32_0 = arith.constant 0 : i32
    %c0_i32_1 = arith.constant 0 : i32
    return %c0_i32, %arg0, %c0_i32_0 : i32, i32, i32
  }
  func.func @transform_2(%arg0: i32) -> (i32, i32, i32) {
    %c0_i32 = arith.constant 0 : i32
    %c0_i32_0 = arith.constant 0 : i32
    %c0_i32_1 = arith.constant 0 : i32
    return %c0_i32, %arg0, %c0_i32_0 : i32, i32, i32
  }
  func.func @transform_3(%arg0: i32) -> (i32, i32, i32) {
    %c0_i32 = arith.constant 0 : i32
    %c0_i32_0 = arith.constant 0 : i32
    %c0_i32_1 = arith.constant 0 : i32
    %c0_i32_2 = arith.constant 0 : i32
    return %c0_i32, %c0_i32_0, %c0_i32_1 : i32, i32, i32
  }
  func.func @transform_4(%arg0: i32) -> (i32, i32) {
    %c0_i32 = arith.constant 0 : i32
    %c0_i32_0 = arith.constant 0 : i32
    %c0_i32_1 = arith.constant 0 : i32
    return %c0_i32, %c0_i32_0 : i32, i32
  }
  func.func @transform_5(%arg0: i32) -> (i32, i32) {
    %c0_i32 = arith.constant 0 : i32
    %c0_i32_0 = arith.constant 0 : i32
    %c0_i32_1 = arith.constant 0 : i32
    return %c0_i32, %c0_i32_0 : i32, i32
  }
  func.func @transform_6(%arg0: i32) -> (i32, i32, i32) {
    %c0_i32 = arith.constant 0 : i32
    %c0_i32_0 = arith.constant 0 : i32
    %c0_i32_1 = arith.constant 0 : i32
    %c0_i32_2 = arith.constant 0 : i32
    return %c0_i32, %c0_i32_0, %c0_i32_1 : i32, i32, i32
  }
  func.func @transform_7(%arg0: i32) -> (i32, i32) {
    %c0_i32 = arith.constant 0 : i32
    %c0_i32_0 = arith.constant 0 : i32
    %c0_i32_1 = arith.constant 0 : i32
    return %c0_i32, %c0_i32_0 : i32, i32
  }
  func.func @transform_8(%arg0: i32) -> (i32, i32) {
    %c0_i32 = arith.constant 0 : i32
    %c0_i32_0 = arith.constant 0 : i32
    return %arg0, %c0_i32 : i32, i32
  }
}

module attributes {stable_mosaic.version = 11 : i64} {
  func.func @_bigru_kernel(%arg0: i32, %arg1: i32, %arg2: memref<3x16x256xbf16, #tpu.memory_space<vmem>>, %arg3: memref<3x16x256xbf16, #tpu.memory_space<vmem>>, %arg4: memref<3x16x1xf32, #tpu.memory_space<vmem>>, %arg5: memref<2x256x384xbf16, #tpu.memory_space<vmem>>, %arg6: memref<2x1x384xf32, #tpu.memory_space<vmem>>, %arg7: memref<2x128x384xbf16, #tpu.memory_space<vmem>>, %arg8: memref<2x1x128xf32, #tpu.memory_space<vmem>>, %arg9: memref<3x16x128xbf16, #tpu.memory_space<vmem>>, %arg10: memref<3x16x128xbf16, #tpu.memory_space<vmem>>, %arg11: memref<3x16x384xbf16, #tpu.memory_space<vmem>>, %arg12: memref<3x16x384xbf16, #tpu.memory_space<vmem>>, %arg13: memref<16x128xf32, #tpu.memory_space<vmem>>, %arg14: memref<16x128xf32, #tpu.memory_space<vmem>>) attributes {dimension_semantics = [#tpu.dimension_semantics<parallel>, #tpu.dimension_semantics<arbitrary>], iteration_bounds = array<i64: 1, 1>, scalar_prefetch = 0 : i64, scratch_operands = 4 : i64, tpu.core_type = #tpu.core_type<tc>, window_params = [{transform_indices = @transform_0, window_bounds = array<i64: 3, 16, 256>}, {transform_indices = @transform_1, window_bounds = array<i64: 3, 16, 256>}, {transform_indices = @transform_2, window_bounds = array<i64: 3, 16, 1>}, {pipeline_mode = #tpu.pipeline_mode<synchronous>, transform_indices = @transform_3, window_bounds = array<i64: 2, 256, 384>}, {pipeline_mode = #tpu.pipeline_mode<synchronous>, transform_indices = @transform_4, window_bounds = array<i64: 2, 1, 384>}, {pipeline_mode = #tpu.pipeline_mode<synchronous>, transform_indices = @transform_5, window_bounds = array<i64: 2, 128, 384>}, {pipeline_mode = #tpu.pipeline_mode<synchronous>, transform_indices = @transform_6, window_bounds = array<i64: 2, 1, 128>}, {transform_indices = @transform_7, window_bounds = array<i64: 3, 16, 128>}, {transform_indices = @transform_8, window_bounds = array<i64: 3, 16, 128>}]} {
    %c0_i32 = arith.constant 0 : i32
    %0 = arith.cmpi eq, %arg1, %c0_i32 : i32
    %1 = arith.extui %0 : i1 to i32
    %c0_i32_0 = arith.constant 0 : i32
    %2 = arith.cmpi ne, %1, %c0_i32_0 : i32
    scf.if %2 {
      %cst_102 = arith.constant 0.000000e+00 : f32
      %291 = vector.broadcast %cst_102 : f32 to vector<16x128xf32>
      %c0_103 = arith.constant 0 : index
      %c0_104 = arith.constant 0 : index
      %292 = vector.load %arg13[%c0_103, %c0_104] : memref<16x128xf32, #tpu.memory_space<vmem>>, vector<16x128xf32>
      tpu.vector_store %arg13[%c0_103, %c0_104], %291 {strides = array<i32>} : memref<16x128xf32, #tpu.memory_space<vmem>>, vector<16x128xf32>,
      %cst_105 = arith.constant 0.000000e+00 : f32
      %293 = vector.broadcast %cst_105 : f32 to vector<16x128xf32>
      %c0_106 = arith.constant 0 : index
      %c0_107 = arith.constant 0 : index
      %294 = vector.load %arg14[%c0_106, %c0_107] : memref<16x128xf32, #tpu.memory_space<vmem>>, vector<16x128xf32>
      tpu.vector_store %arg14[%c0_106, %c0_107], %293 {strides = array<i32>} : memref<16x128xf32, #tpu.memory_space<vmem>>, vector<16x128xf32>,
    } else {
    }
    %c0 = arith.constant 0 : index
    %c0_1 = arith.constant 0 : index
    %c0_2 = arith.constant 0 : index
    %3 = vector.load %arg2[%c0, %c0_1, %c0_2] : memref<3x16x256xbf16, #tpu.memory_space<vmem>>, vector<3x16x256xbf16>
    %4 = vector.shape_cast %3 : vector<3x16x256xbf16> to vector<48x256xbf16>
    %c0_3 = arith.constant 0 : index
    %c0_4 = arith.constant 0 : index
    %c0_5 = arith.constant 0 : index
    %5 = vector.load %arg3[%c0_3, %c0_4, %c0_5] : memref<3x16x256xbf16, #tpu.memory_space<vmem>>, vector<3x16x256xbf16>
    %6 = vector.shape_cast %5 : vector<3x16x256xbf16> to vector<48x256xbf16>
    %c0_6 = arith.constant 0 : index
    %c0_7 = arith.constant 0 : index
    %c0_8 = arith.constant 0 : index
    %7 = vector.load %arg5[%c0_6, %c0_7, %c0_8] : memref<2x256x384xbf16, #tpu.memory_space<vmem>>, vector<1x256x384xbf16>
    %8 = vector.shape_cast %7 : vector<1x256x384xbf16> to vector<256x384xbf16>
    %cst = arith.constant dense<0.000000e+00> : vector<48x384xf32>
    %9 = tpu.matmul %4, %8, %cst {dimension_numbers = #tpu.dot_dimension_numbers<[1], [0], [0], [1], [0, 0, 1, 1], [], []>} : vector<48x256xbf16>, vector<256x384xbf16>, vector<48x384xf32> -> vector<48x384xf32>
    %c0_9 = arith.constant 0 : index
    %c0_10 = arith.constant 0 : index
    %c0_11 = arith.constant 0 : index
    %10 = vector.load %arg6[%c0_9, %c0_10, %c0_11] : memref<2x1x384xf32, #tpu.memory_space<vmem>>, vector<1x1x384xf32>
    %11 = vector.shape_cast %10 : vector<1x1x384xf32> to vector<1x384xf32>
    %12 = vector.broadcast %11 : vector<1x384xf32> to vector<48x384xf32>
    %13 = arith.addf %9, %12 : vector<48x384xf32>
    %14 = vector.shape_cast %13 : vector<48x384xf32> to vector<3x16x384xf32>
    %15 = arith.truncf %14 : vector<3x16x384xf32> to vector<3x16x384xbf16>
    %c0_12 = arith.constant 0 : index
    %c0_13 = arith.constant 0 : index
    %c0_14 = arith.constant 0 : index
    %16 = vector.load %arg11[%c0_12, %c0_13, %c0_14] : memref<3x16x384xbf16, #tpu.memory_space<vmem>>, vector<3x16x384xbf16>
    tpu.vector_store %arg11[%c0_12, %c0_13, %c0_14], %15 {strides = array<i32>} : memref<3x16x384xbf16, #tpu.memory_space<vmem>>, vector<3x16x384xbf16>,
    %c1 = arith.constant 1 : index
    %c0_15 = arith.constant 0 : index
    %c0_16 = arith.constant 0 : index
    %17 = vector.load %arg5[%c1, %c0_15, %c0_16] : memref<2x256x384xbf16, #tpu.memory_space<vmem>>, vector<1x256x384xbf16>
    %18 = vector.shape_cast %17 : vector<1x256x384xbf16> to vector<256x384xbf16>
    %cst_17 = arith.constant dense<0.000000e+00> : vector<48x384xf32>
    %19 = tpu.matmul %6, %18, %cst_17 {dimension_numbers = #tpu.dot_dimension_numbers<[1], [0], [0], [1], [0, 0, 1, 1], [], []>} : vector<48x256xbf16>, vector<256x384xbf16>, vector<48x384xf32> -> vector<48x384xf32>
    %c1_18 = arith.constant 1 : index
    %c0_19 = arith.constant 0 : index
    %c0_20 = arith.constant 0 : index
    %20 = vector.load %arg6[%c1_18, %c0_19, %c0_20] : memref<2x1x384xf32, #tpu.memory_space<vmem>>, vector<1x1x384xf32>
    %21 = vector.shape_cast %20 : vector<1x1x384xf32> to vector<1x384xf32>
    %22 = vector.broadcast %21 : vector<1x384xf32> to vector<48x384xf32>
    %23 = arith.addf %19, %22 : vector<48x384xf32>
    %24 = vector.shape_cast %23 : vector<48x384xf32> to vector<3x16x384xf32>
    %25 = arith.truncf %24 : vector<3x16x384xf32> to vector<3x16x384xbf16>
    %c0_21 = arith.constant 0 : index
    %c0_22 = arith.constant 0 : index
    %c0_23 = arith.constant 0 : index
    %26 = vector.load %arg12[%c0_21, %c0_22, %c0_23] : memref<3x16x384xbf16, #tpu.memory_space<vmem>>, vector<3x16x384xbf16>
    tpu.vector_store %arg12[%c0_21, %c0_22, %c0_23], %25 {strides = array<i32>} : memref<3x16x384xbf16, #tpu.memory_space<vmem>>, vector<3x16x384xbf16>,
    %c0_24 = arith.constant 0 : index
    %c0_25 = arith.constant 0 : index
    %c0_26 = arith.constant 0 : index
    %27 = vector.load %arg7[%c0_24, %c0_25, %c0_26] : memref<2x128x384xbf16, #tpu.memory_space<vmem>>, vector<1x128x384xbf16>
    %28 = vector.shape_cast %27 : vector<1x128x384xbf16> to vector<128x384xbf16>
    %c1_27 = arith.constant 1 : index
    %c0_28 = arith.constant 0 : index
    %c0_29 = arith.constant 0 : index
    %29 = vector.load %arg7[%c1_27, %c0_28, %c0_29] : memref<2x128x384xbf16, #tpu.memory_space<vmem>>, vector<1x128x384xbf16>
    %30 = vector.shape_cast %29 : vector<1x128x384xbf16> to vector<128x384xbf16>
    %c0_30 = arith.constant 0 : index
    %c0_31 = arith.constant 0 : index
    %c0_32 = arith.constant 0 : index
    %31 = vector.load %arg8[%c0_30, %c0_31, %c0_32] : memref<2x1x128xf32, #tpu.memory_space<vmem>>, vector<1x1x128xf32>
    %32 = vector.shape_cast %31 : vector<1x1x128xf32> to vector<1x128xf32>
    %c1_33 = arith.constant 1 : index
    %c0_34 = arith.constant 0 : index
    %c0_35 = arith.constant 0 : index
    %33 = vector.load %arg8[%c1_33, %c0_34, %c0_35] : memref<2x1x128xf32, #tpu.memory_space<vmem>>, vector<1x1x128xf32>
    %34 = vector.shape_cast %33 : vector<1x1x128xf32> to vector<1x128xf32>
    %c0_36 = arith.constant 0 : index
    %c0_37 = arith.constant 0 : index
    %35 = vector.load %arg13[%c0_36, %c0_37] : memref<16x128xf32, #tpu.memory_space<vmem>>, vector<16x128xf32>
    %c0_38 = arith.constant 0 : index
    %c0_39 = arith.constant 0 : index
    %36 = vector.load %arg14[%c0_38, %c0_39] : memref<16x128xf32, #tpu.memory_space<vmem>>, vector<16x128xf32>
    %c0_i32_40 = arith.constant 0 : i32
    %c2_i32 = arith.constant 2 : i32
    %37 = arith.subi %c2_i32, %c0_i32_40 : i32
    %38 = arith.truncf %35 : vector<16x128xf32> to vector<16x128xbf16>
    %cst_41 = arith.constant dense<0.000000e+00> : vector<16x384xf32>
    %39 = tpu.matmul %38, %28, %cst_41 {dimension_numbers = #tpu.dot_dimension_numbers<[1], [0], [0], [1], [0, 0, 1, 1], [], []>} : vector<16x128xbf16>, vector<128x384xbf16>, vector<16x384xf32> -> vector<16x384xf32>
    %40 = arith.truncf %36 : vector<16x128xf32> to vector<16x128xbf16>
    %cst_42 = arith.constant dense<0.000000e+00> : vector<16x384xf32>
    %41 = tpu.matmul %40, %30, %cst_42 {dimension_numbers = #tpu.dot_dimension_numbers<[1], [0], [0], [1], [0, 0, 1, 1], [], []>} : vector<16x128xbf16>, vector<128x384xbf16>, vector<16x384xf32> -> vector<16x384xf32>
    %42 = arith.index_cast %c0_i32_40 : i32 to index
    %c0_43 = arith.constant 0 : index
    %c0_44 = arith.constant 0 : index
    %43 = vector.load %arg11[%42, %c0_43, %c0_44] : memref<3x16x384xbf16, #tpu.memory_space<vmem>>, vector<1x16x384xbf16>
    %44 = vector.shape_cast %43 : vector<1x16x384xbf16> to vector<16x384xbf16>
    %45 = arith.extf %44 : vector<16x384xbf16> to vector<16x384xf32>
    %46 = vector.extract_strided_slice %45 {offsets = [0, 0], sizes = [16, 128], strides = [1, 1]} : vector<16x384xf32> to vector<16x128xf32>
    %47 = vector.extract_strided_slice %39 {offsets = [0, 0], sizes = [16, 128], strides = [1, 1]} : vector<16x384xf32> to vector<16x128xf32>
    %48 = arith.addf %46, %47 : vector<16x128xf32>
    %49 = arith.negf %48 : vector<16x128xf32>
    %50 = math.exp %49 : vector<16x128xf32>
    %cst_45 = arith.constant 1.000000e+00 : f32
    %51 = vector.broadcast %cst_45 : f32 to vector<16x128xf32>
    %52 = arith.addf %51, %50 : vector<16x128xf32>
    %53 = arith.divf %51, %52 : vector<16x128xf32>
    %54 = vector.extract_strided_slice %45 {offsets = [0, 128], sizes = [16, 128], strides = [1, 1]} : vector<16x384xf32> to vector<16x128xf32>
    %55 = vector.extract_strided_slice %39 {offsets = [0, 128], sizes = [16, 128], strides = [1, 1]} : vector<16x384xf32> to vector<16x128xf32>
    %56 = arith.addf %54, %55 : vector<16x128xf32>
    %57 = arith.negf %56 : vector<16x128xf32>
    %58 = math.exp %57 : vector<16x128xf32>
    %cst_46 = arith.constant 1.000000e+00 : f32
    %59 = vector.broadcast %cst_46 : f32 to vector<16x128xf32>
    %60 = arith.addf %59, %58 : vector<16x128xf32>
    %61 = arith.divf %59, %60 : vector<16x128xf32>
    %62 = vector.extract_strided_slice %45 {offsets = [0, 256], sizes = [16, 128], strides = [1, 1]} : vector<16x384xf32> to vector<16x128xf32>
    %63 = vector.extract_strided_slice %39 {offsets = [0, 256], sizes = [16, 128], strides = [1, 1]} : vector<16x384xf32> to vector<16x128xf32>
    %64 = vector.broadcast %32 : vector<1x128xf32> to vector<16x128xf32>
    %65 = arith.addf %63, %64 : vector<16x128xf32>
    %66 = arith.mulf %53, %65 : vector<16x128xf32>
    %67 = arith.addf %62, %66 : vector<16x128xf32>
    %68 = math.tanh %67 : vector<16x128xf32>
    %cst_47 = arith.constant 1.000000e+00 : f32
    %69 = vector.broadcast %cst_47 : f32 to vector<16x128xf32>
    %70 = arith.subf %69, %61 : vector<16x128xf32>
    %71 = arith.mulf %70, %68 : vector<16x128xf32>
    %72 = arith.mulf %61, %35 : vector<16x128xf32>
    %73 = arith.addf %71, %72 : vector<16x128xf32>
    %74 = arith.index_cast %37 : i32 to index
    %c0_48 = arith.constant 0 : index
    %c0_49 = arith.constant 0 : index
    %75 = vector.load %arg12[%74, %c0_48, %c0_49] : memref<3x16x384xbf16, #tpu.memory_space<vmem>>, vector<1x16x384xbf16>
    %76 = vector.shape_cast %75 : vector<1x16x384xbf16> to vector<16x384xbf16>
    %77 = arith.extf %76 : vector<16x384xbf16> to vector<16x384xf32>
    %78 = vector.extract_strided_slice %77 {offsets = [0, 0], sizes = [16, 128], strides = [1, 1]} : vector<16x384xf32> to vector<16x128xf32>
    %79 = vector.extract_strided_slice %41 {offsets = [0, 0], sizes = [16, 128], strides = [1, 1]} : vector<16x384xf32> to vector<16x128xf32>
    %80 = arith.addf %78, %79 : vector<16x128xf32>
    %81 = arith.negf %80 : vector<16x128xf32>
    %82 = math.exp %81 : vector<16x128xf32>
    %cst_50 = arith.constant 1.000000e+00 : f32
    %83 = vector.broadcast %cst_50 : f32 to vector<16x128xf32>
    %84 = arith.addf %83, %82 : vector<16x128xf32>
    %85 = arith.divf %83, %84 : vector<16x128xf32>
    %86 = vector.extract_strided_slice %77 {offsets = [0, 128], sizes = [16, 128], strides = [1, 1]} : vector<16x384xf32> to vector<16x128xf32>
    %87 = vector.extract_strided_slice %41 {offsets = [0, 128], sizes = [16, 128], strides = [1, 1]} : vector<16x384xf32> to vector<16x128xf32>
    %88 = arith.addf %86, %87 : vector<16x128xf32>
    %89 = arith.negf %88 : vector<16x128xf32>
    %90 = math.exp %89 : vector<16x128xf32>
    %cst_51 = arith.constant 1.000000e+00 : f32
    %91 = vector.broadcast %cst_51 : f32 to vector<16x128xf32>
    %92 = arith.addf %91, %90 : vector<16x128xf32>
    %93 = arith.divf %91, %92 : vector<16x128xf32>
    %94 = vector.extract_strided_slice %77 {offsets = [0, 256], sizes = [16, 128], strides = [1, 1]} : vector<16x384xf32> to vector<16x128xf32>
    %95 = vector.extract_strided_slice %41 {offsets = [0, 256], sizes = [16, 128], strides = [1, 1]} : vector<16x384xf32> to vector<16x128xf32>
    %96 = vector.broadcast %34 : vector<1x128xf32> to vector<16x128xf32>
    %97 = arith.addf %95, %96 : vector<16x128xf32>
    %98 = arith.mulf %85, %97 : vector<16x128xf32>
    %99 = arith.addf %94, %98 : vector<16x128xf32>
    %100 = math.tanh %99 : vector<16x128xf32>
    %cst_52 = arith.constant 1.000000e+00 : f32
    %101 = vector.broadcast %cst_52 : f32 to vector<16x128xf32>
    %102 = arith.subf %101, %93 : vector<16x128xf32>
    %103 = arith.mulf %102, %100 : vector<16x128xf32>
    %104 = arith.mulf %93, %36 : vector<16x128xf32>
    %105 = arith.addf %103, %104 : vector<16x128xf32>
    %106 = arith.index_cast %37 : i32 to index
    %c0_53 = arith.constant 0 : index
    %c0_54 = arith.constant 0 : index
    %107 = vector.load %arg4[%106, %c0_53, %c0_54] : memref<3x16x1xf32, #tpu.memory_space<vmem>>, vector<1x16x1xf32>
    %108 = vector.shape_cast %107 : vector<1x16x1xf32> to vector<16x1xf32>
    %109 = vector.broadcast %108 : vector<16x1xf32> to vector<16x128xf32>
    %110 = arith.mulf %105, %109 : vector<16x128xf32>
    %111 = arith.truncf %73 : vector<16x128xf32> to vector<16x128xbf16>
    %112 = arith.index_cast %c0_i32_40 : i32 to index
    %c0_55 = arith.constant 0 : index
    %c0_56 = arith.constant 0 : index
    %113 = vector.load %arg9[%112, %c0_55, %c0_56] : memref<3x16x128xbf16, #tpu.memory_space<vmem>>, vector<1x16x128xbf16>
    %114 = vector.shape_cast %113 : vector<1x16x128xbf16> to vector<16x128xbf16>
    %115 = vector.shape_cast %111 : vector<16x128xbf16> to vector<1x16x128xbf16>
    tpu.vector_store %arg9[%112, %c0_55, %c0_56], %115 {strides = array<i32>} : memref<3x16x128xbf16, #tpu.memory_space<vmem>>, vector<1x16x128xbf16>,
    %116 = arith.truncf %110 : vector<16x128xf32> to vector<16x128xbf16>
    %117 = arith.index_cast %37 : i32 to index
    %c0_57 = arith.constant 0 : index
    %c0_58 = arith.constant 0 : index
    %118 = vector.load %arg10[%117, %c0_57, %c0_58] : memref<3x16x128xbf16, #tpu.memory_space<vmem>>, vector<1x16x128xbf16>
    %119 = vector.shape_cast %118 : vector<1x16x128xbf16> to vector<16x128xbf16>
    %120 = vector.shape_cast %116 : vector<16x128xbf16> to vector<1x16x128xbf16>
    tpu.vector_store %arg10[%117, %c0_57, %c0_58], %120 {strides = array<i32>} : memref<3x16x128xbf16, #tpu.memory_space<vmem>>, vector<1x16x128xbf16>,
    %c1_i32 = arith.constant 1 : i32
    %c2_i32_59 = arith.constant 2 : i32
    %121 = arith.subi %c2_i32_59, %c1_i32 : i32
    %122 = arith.truncf %73 : vector<16x128xf32> to vector<16x128xbf16>
    %cst_60 = arith.constant dense<0.000000e+00> : vector<16x384xf32>
    %123 = tpu.matmul %122, %28, %cst_60 {dimension_numbers = #tpu.dot_dimension_numbers<[1], [0], [0], [1], [0, 0, 1, 1], [], []>} : vector<16x128xbf16>, vector<128x384xbf16>, vector<16x384xf32> -> vector<16x384xf32>
    %124 = arith.truncf %110 : vector<16x128xf32> to vector<16x128xbf16>
    %cst_61 = arith.constant dense<0.000000e+00> : vector<16x384xf32>
    %125 = tpu.matmul %124, %30, %cst_61 {dimension_numbers = #tpu.dot_dimension_numbers<[1], [0], [0], [1], [0, 0, 1, 1], [], []>} : vector<16x128xbf16>, vector<128x384xbf16>, vector<16x384xf32> -> vector<16x384xf32>
    %126 = arith.index_cast %c1_i32 : i32 to index
    %c0_62 = arith.constant 0 : index
    %c0_63 = arith.constant 0 : index
    %127 = vector.load %arg11[%126, %c0_62, %c0_63] : memref<3x16x384xbf16, #tpu.memory_space<vmem>>, vector<1x16x384xbf16>
    %128 = vector.shape_cast %127 : vector<1x16x384xbf16> to vector<16x384xbf16>
    %129 = arith.extf %128 : vector<16x384xbf16> to vector<16x384xf32>
    %130 = vector.extract_strided_slice %129 {offsets = [0, 0], sizes = [16, 128], strides = [1, 1]} : vector<16x384xf32> to vector<16x128xf32>
    %131 = vector.extract_strided_slice %123 {offsets = [0, 0], sizes = [16, 128], strides = [1, 1]} : vector<16x384xf32> to vector<16x128xf32>
    %132 = arith.addf %130, %131 : vector<16x128xf32>
    %133 = arith.negf %132 : vector<16x128xf32>
    %134 = math.exp %133 : vector<16x128xf32>
    %cst_64 = arith.constant 1.000000e+00 : f32
    %135 = vector.broadcast %cst_64 : f32 to vector<16x128xf32>
    %136 = arith.addf %135, %134 : vector<16x128xf32>
    %137 = arith.divf %135, %136 : vector<16x128xf32>
    %138 = vector.extract_strided_slice %129 {offsets = [0, 128], sizes = [16, 128], strides = [1, 1]} : vector<16x384xf32> to vector<16x128xf32>
    %139 = vector.extract_strided_slice %123 {offsets = [0, 128], sizes = [16, 128], strides = [1, 1]} : vector<16x384xf32> to vector<16x128xf32>
    %140 = arith.addf %138, %139 : vector<16x128xf32>
    %141 = arith.negf %140 : vector<16x128xf32>
    %142 = math.exp %141 : vector<16x128xf32>
    %cst_65 = arith.constant 1.000000e+00 : f32
    %143 = vector.broadcast %cst_65 : f32 to vector<16x128xf32>
    %144 = arith.addf %143, %142 : vector<16x128xf32>
    %145 = arith.divf %143, %144 : vector<16x128xf32>
    %146 = vector.extract_strided_slice %129 {offsets = [0, 256], sizes = [16, 128], strides = [1, 1]} : vector<16x384xf32> to vector<16x128xf32>
    %147 = vector.extract_strided_slice %123 {offsets = [0, 256], sizes = [16, 128], strides = [1, 1]} : vector<16x384xf32> to vector<16x128xf32>
    %148 = vector.broadcast %32 : vector<1x128xf32> to vector<16x128xf32>
    %149 = arith.addf %147, %148 : vector<16x128xf32>
    %150 = arith.mulf %137, %149 : vector<16x128xf32>
    %151 = arith.addf %146, %150 : vector<16x128xf32>
    %152 = math.tanh %151 : vector<16x128xf32>
    %cst_66 = arith.constant 1.000000e+00 : f32
    %153 = vector.broadcast %cst_66 : f32 to vector<16x128xf32>
    %154 = arith.subf %153, %145 : vector<16x128xf32>
    %155 = arith.mulf %154, %152 : vector<16x128xf32>
    %156 = arith.mulf %145, %73 : vector<16x128xf32>
    %157 = arith.addf %155, %156 : vector<16x128xf32>
    %158 = arith.index_cast %121 : i32 to index
    %c0_67 = arith.constant 0 : index
    %c0_68 = arith.constant 0 : index
    %159 = vector.load %arg12[%158, %c0_67, %c0_68] : memref<3x16x384xbf16, #tpu.memory_space<vmem>>, vector<1x16x384xbf16>
    %160 = vector.shape_cast %159 : vector<1x16x384xbf16> to vector<16x384xbf16>
    %161 = arith.extf %160 : vector<16x384xbf16> to vector<16x384xf32>
    %162 = vector.extract_strided_slice %161 {offsets = [0, 0], sizes = [16, 128], strides = [1, 1]} : vector<16x384xf32> to vector<16x128xf32>
    %163 = vector.extract_strided_slice %125 {offsets = [0, 0], sizes = [16, 128], strides = [1, 1]} : vector<16x384xf32> to vector<16x128xf32>
    %164 = arith.addf %162, %163 : vector<16x128xf32>
    %165 = arith.negf %164 : vector<16x128xf32>
    %166 = math.exp %165 : vector<16x128xf32>
    %cst_69 = arith.constant 1.000000e+00 : f32
    %167 = vector.broadcast %cst_69 : f32 to vector<16x128xf32>
    %168 = arith.addf %167, %166 : vector<16x128xf32>
    %169 = arith.divf %167, %168 : vector<16x128xf32>
    %170 = vector.extract_strided_slice %161 {offsets = [0, 128], sizes = [16, 128], strides = [1, 1]} : vector<16x384xf32> to vector<16x128xf32>
    %171 = vector.extract_strided_slice %125 {offsets = [0, 128], sizes = [16, 128], strides = [1, 1]} : vector<16x384xf32> to vector<16x128xf32>
    %172 = arith.addf %170, %171 : vector<16x128xf32>
    %173 = arith.negf %172 : vector<16x128xf32>
    %174 = math.exp %173 : vector<16x128xf32>
    %cst_70 = arith.constant 1.000000e+00 : f32
    %175 = vector.broadcast %cst_70 : f32 to vector<16x128xf32>
    %176 = arith.addf %175, %174 : vector<16x128xf32>
    %177 = arith.divf %175, %176 : vector<16x128xf32>
    %178 = vector.extract_strided_slice %161 {offsets = [0, 256], sizes = [16, 128], strides = [1, 1]} : vector<16x384xf32> to vector<16x128xf32>
    %179 = vector.extract_strided_slice %125 {offsets = [0, 256], sizes = [16, 128], strides = [1, 1]} : vector<16x384xf32> to vector<16x128xf32>
    %180 = vector.broadcast %34 : vector<1x128xf32> to vector<16x128xf32>
    %181 = arith.addf %179, %180 : vector<16x128xf32>
    %182 = arith.mulf %169, %181 : vector<16x128xf32>
    %183 = arith.addf %178, %182 : vector<16x128xf32>
    %184 = math.tanh %183 : vector<16x128xf32>
    %cst_71 = arith.constant 1.000000e+00 : f32
    %185 = vector.broadcast %cst_71 : f32 to vector<16x128xf32>
    %186 = arith.subf %185, %177 : vector<16x128xf32>
    %187 = arith.mulf %186, %184 : vector<16x128xf32>
    %188 = arith.mulf %177, %110 : vector<16x128xf32>
    %189 = arith.addf %187, %188 : vector<16x128xf32>
    %190 = arith.index_cast %121 : i32 to index
    %c0_72 = arith.constant 0 : index
    %c0_73 = arith.constant 0 : index
    %191 = vector.load %arg4[%190, %c0_72, %c0_73] : memref<3x16x1xf32, #tpu.memory_space<vmem>>, vector<1x16x1xf32>
    %192 = vector.shape_cast %191 : vector<1x16x1xf32> to vector<16x1xf32>
    %193 = vector.broadcast %192 : vector<16x1xf32> to vector<16x128xf32>
    %194 = arith.mulf %189, %193 : vector<16x128xf32>
    %195 = arith.truncf %157 : vector<16x128xf32> to vector<16x128xbf16>
    %196 = arith.index_cast %c1_i32 : i32 to index
    %c0_74 = arith.constant 0 : index
    %c0_75 = arith.constant 0 : index
    %197 = vector.load %arg9[%196, %c0_74, %c0_75] : memref<3x16x128xbf16, #tpu.memory_space<vmem>>, vector<1x16x128xbf16>
    %198 = vector.shape_cast %197 : vector<1x16x128xbf16> to vector<16x128xbf16>
    %199 = vector.shape_cast %195 : vector<16x128xbf16> to vector<1x16x128xbf16>
    tpu.vector_store %arg9[%196, %c0_74, %c0_75], %199 {strides = array<i32>} : memref<3x16x128xbf16, #tpu.memory_space<vmem>>, vector<1x16x128xbf16>,
    %200 = arith.truncf %194 : vector<16x128xf32> to vector<16x128xbf16>
    %201 = arith.index_cast %121 : i32 to index
    %c0_76 = arith.constant 0 : index
    %c0_77 = arith.constant 0 : index
    %202 = vector.load %arg10[%201, %c0_76, %c0_77] : memref<3x16x128xbf16, #tpu.memory_space<vmem>>, vector<1x16x128xbf16>
    %203 = vector.shape_cast %202 : vector<1x16x128xbf16> to vector<16x128xbf16>
    %204 = vector.shape_cast %200 : vector<16x128xbf16> to vector<1x16x128xbf16>
    tpu.vector_store %arg10[%201, %c0_76, %c0_77], %204 {strides = array<i32>} : memref<3x16x128xbf16, #tpu.memory_space<vmem>>, vector<1x16x128xbf16>,
    %c2_i32_78 = arith.constant 2 : i32
    %c2_i32_79 = arith.constant 2 : i32
    %205 = arith.subi %c2_i32_79, %c2_i32_78 : i32
    %206 = arith.truncf %157 : vector<16x128xf32> to vector<16x128xbf16>
    %cst_80 = arith.constant dense<0.000000e+00> : vector<16x384xf32>
    %207 = tpu.matmul %206, %28, %cst_80 {dimension_numbers = #tpu.dot_dimension_numbers<[1], [0], [0], [1], [0, 0, 1, 1], [], []>} : vector<16x128xbf16>, vector<128x384xbf16>, vector<16x384xf32> -> vector<16x384xf32>
    %208 = arith.truncf %194 : vector<16x128xf32> to vector<16x128xbf16>
    %cst_81 = arith.constant dense<0.000000e+00> : vector<16x384xf32>
    %209 = tpu.matmul %208, %30, %cst_81 {dimension_numbers = #tpu.dot_dimension_numbers<[1], [0], [0], [1], [0, 0, 1, 1], [], []>} : vector<16x128xbf16>, vector<128x384xbf16>, vector<16x384xf32> -> vector<16x384xf32>
    %210 = arith.index_cast %c2_i32_78 : i32 to index
    %c0_82 = arith.constant 0 : index
    %c0_83 = arith.constant 0 : index
    %211 = vector.load %arg11[%210, %c0_82, %c0_83] : memref<3x16x384xbf16, #tpu.memory_space<vmem>>, vector<1x16x384xbf16>
    %212 = vector.shape_cast %211 : vector<1x16x384xbf16> to vector<16x384xbf16>
    %213 = arith.extf %212 : vector<16x384xbf16> to vector<16x384xf32>
    %214 = vector.extract_strided_slice %213 {offsets = [0, 0], sizes = [16, 128], strides = [1, 1]} : vector<16x384xf32> to vector<16x128xf32>
    %215 = vector.extract_strided_slice %207 {offsets = [0, 0], sizes = [16, 128], strides = [1, 1]} : vector<16x384xf32> to vector<16x128xf32>
    %216 = arith.addf %214, %215 : vector<16x128xf32>
    %217 = arith.negf %216 : vector<16x128xf32>
    %218 = math.exp %217 : vector<16x128xf32>
    %cst_84 = arith.constant 1.000000e+00 : f32
    %219 = vector.broadcast %cst_84 : f32 to vector<16x128xf32>
    %220 = arith.addf %219, %218 : vector<16x128xf32>
    %221 = arith.divf %219, %220 : vector<16x128xf32>
    %222 = vector.extract_strided_slice %213 {offsets = [0, 128], sizes = [16, 128], strides = [1, 1]} : vector<16x384xf32> to vector<16x128xf32>
    %223 = vector.extract_strided_slice %207 {offsets = [0, 128], sizes = [16, 128], strides = [1, 1]} : vector<16x384xf32> to vector<16x128xf32>
    %224 = arith.addf %222, %223 : vector<16x128xf32>
    %225 = arith.negf %224 : vector<16x128xf32>
    %226 = math.exp %225 : vector<16x128xf32>
    %cst_85 = arith.constant 1.000000e+00 : f32
    %227 = vector.broadcast %cst_85 : f32 to vector<16x128xf32>
    %228 = arith.addf %227, %226 : vector<16x128xf32>
    %229 = arith.divf %227, %228 : vector<16x128xf32>
    %230 = vector.extract_strided_slice %213 {offsets = [0, 256], sizes = [16, 128], strides = [1, 1]} : vector<16x384xf32> to vector<16x128xf32>
    %231 = vector.extract_strided_slice %207 {offsets = [0, 256], sizes = [16, 128], strides = [1, 1]} : vector<16x384xf32> to vector<16x128xf32>
    %232 = vector.broadcast %32 : vector<1x128xf32> to vector<16x128xf32>
    %233 = arith.addf %231, %232 : vector<16x128xf32>
    %234 = arith.mulf %221, %233 : vector<16x128xf32>
    %235 = arith.addf %230, %234 : vector<16x128xf32>
    %236 = math.tanh %235 : vector<16x128xf32>
    %cst_86 = arith.constant 1.000000e+00 : f32
    %237 = vector.broadcast %cst_86 : f32 to vector<16x128xf32>
    %238 = arith.subf %237, %229 : vector<16x128xf32>
    %239 = arith.mulf %238, %236 : vector<16x128xf32>
    %240 = arith.mulf %229, %157 : vector<16x128xf32>
    %241 = arith.addf %239, %240 : vector<16x128xf32>
    %242 = arith.index_cast %205 : i32 to index
    %c0_87 = arith.constant 0 : index
    %c0_88 = arith.constant 0 : index
    %243 = vector.load %arg12[%242, %c0_87, %c0_88] : memref<3x16x384xbf16, #tpu.memory_space<vmem>>, vector<1x16x384xbf16>
    %244 = vector.shape_cast %243 : vector<1x16x384xbf16> to vector<16x384xbf16>
    %245 = arith.extf %244 : vector<16x384xbf16> to vector<16x384xf32>
    %246 = vector.extract_strided_slice %245 {offsets = [0, 0], sizes = [16, 128], strides = [1, 1]} : vector<16x384xf32> to vector<16x128xf32>
    %247 = vector.extract_strided_slice %209 {offsets = [0, 0], sizes = [16, 128], strides = [1, 1]} : vector<16x384xf32> to vector<16x128xf32>
    %248 = arith.addf %246, %247 : vector<16x128xf32>
    %249 = arith.negf %248 : vector<16x128xf32>
    %250 = math.exp %249 : vector<16x128xf32>
    %cst_89 = arith.constant 1.000000e+00 : f32
    %251 = vector.broadcast %cst_89 : f32 to vector<16x128xf32>
    %252 = arith.addf %251, %250 : vector<16x128xf32>
    %253 = arith.divf %251, %252 : vector<16x128xf32>
    %254 = vector.extract_strided_slice %245 {offsets = [0, 128], sizes = [16, 128], strides = [1, 1]} : vector<16x384xf32> to vector<16x128xf32>
    %255 = vector.extract_strided_slice %209 {offsets = [0, 128], sizes = [16, 128], strides = [1, 1]} : vector<16x384xf32> to vector<16x128xf32>
    %256 = arith.addf %254, %255 : vector<16x128xf32>
    %257 = arith.negf %256 : vector<16x128xf32>
    %258 = math.exp %257 : vector<16x128xf32>
    %cst_90 = arith.constant 1.000000e+00 : f32
    %259 = vector.broadcast %cst_90 : f32 to vector<16x128xf32>
    %260 = arith.addf %259, %258 : vector<16x128xf32>
    %261 = arith.divf %259, %260 : vector<16x128xf32>
    %262 = vector.extract_strided_slice %245 {offsets = [0, 256], sizes = [16, 128], strides = [1, 1]} : vector<16x384xf32> to vector<16x128xf32>
    %263 = vector.extract_strided_slice %209 {offsets = [0, 256], sizes = [16, 128], strides = [1, 1]} : vector<16x384xf32> to vector<16x128xf32>
    %264 = vector.broadcast %34 : vector<1x128xf32> to vector<16x128xf32>
    %265 = arith.addf %263, %264 : vector<16x128xf32>
    %266 = arith.mulf %253, %265 : vector<16x128xf32>
    %267 = arith.addf %262, %266 : vector<16x128xf32>
    %268 = math.tanh %267 : vector<16x128xf32>
    %cst_91 = arith.constant 1.000000e+00 : f32
    %269 = vector.broadcast %cst_91 : f32 to vector<16x128xf32>
    %270 = arith.subf %269, %261 : vector<16x128xf32>
    %271 = arith.mulf %270, %268 : vector<16x128xf32>
    %272 = arith.mulf %261, %194 : vector<16x128xf32>
    %273 = arith.addf %271, %272 : vector<16x128xf32>
    %274 = arith.index_cast %205 : i32 to index
    %c0_92 = arith.constant 0 : index
    %c0_93 = arith.constant 0 : index
    %275 = vector.load %arg4[%274, %c0_92, %c0_93] : memref<3x16x1xf32, #tpu.memory_space<vmem>>, vector<1x16x1xf32>
    %276 = vector.shape_cast %275 : vector<1x16x1xf32> to vector<16x1xf32>
    %277 = vector.broadcast %276 : vector<16x1xf32> to vector<16x128xf32>
    %278 = arith.mulf %273, %277 : vector<16x128xf32>
    %279 = arith.truncf %241 : vector<16x128xf32> to vector<16x128xbf16>
    %280 = arith.index_cast %c2_i32_78 : i32 to index
    %c0_94 = arith.constant 0 : index
    %c0_95 = arith.constant 0 : index
    %281 = vector.load %arg9[%280, %c0_94, %c0_95] : memref<3x16x128xbf16, #tpu.memory_space<vmem>>, vector<1x16x128xbf16>
    %282 = vector.shape_cast %281 : vector<1x16x128xbf16> to vector<16x128xbf16>
    %283 = vector.shape_cast %279 : vector<16x128xbf16> to vector<1x16x128xbf16>
    tpu.vector_store %arg9[%280, %c0_94, %c0_95], %283 {strides = array<i32>} : memref<3x16x128xbf16, #tpu.memory_space<vmem>>, vector<1x16x128xbf16>,
    %284 = arith.truncf %278 : vector<16x128xf32> to vector<16x128xbf16>
    %285 = arith.index_cast %205 : i32 to index
    %c0_96 = arith.constant 0 : index
    %c0_97 = arith.constant 0 : index
    %286 = vector.load %arg10[%285, %c0_96, %c0_97] : memref<3x16x128xbf16, #tpu.memory_space<vmem>>, vector<1x16x128xbf16>
    %287 = vector.shape_cast %286 : vector<1x16x128xbf16> to vector<16x128xbf16>
    %288 = vector.shape_cast %284 : vector<16x128xbf16> to vector<1x16x128xbf16>
    tpu.vector_store %arg10[%285, %c0_96, %c0_97], %288 {strides = array<i32>} : memref<3x16x128xbf16, #tpu.memory_space<vmem>>, vector<1x16x128xbf16>,
    %c3_i32 = arith.constant 3 : i32
    %c0_98 = arith.constant 0 : index
    %c0_99 = arith.constant 0 : index
    %289 = vector.load %arg13[%c0_98, %c0_99] : memref<16x128xf32, #tpu.memory_space<vmem>>, vector<16x128xf32>
    tpu.vector_store %arg13[%c0_98, %c0_99], %241 {strides = array<i32>} : memref<16x128xf32, #tpu.memory_space<vmem>>, vector<16x128xf32>,
    %c0_100 = arith.constant 0 : index
    %c0_101 = arith.constant 0 : index
    %290 = vector.load %arg14[%c0_100, %c0_101] : memref<16x128xf32, #tpu.memory_space<vmem>>, vector<16x128xf32>
    tpu.vector_store %arg14[%c0_100, %c0_101], %278 {strides = array<i32>} : memref<16x128xf32, #tpu.memory_space<vmem>>, vector<16x128xf32>,
    return
  }
  func.func @transform_0(%arg0: i32, %arg1: i32) -> (i32, i32, i32) {
    %c0_i32 = arith.constant 0 : i32
    %c0_i32_0 = arith.constant 0 : i32
    return %arg1, %arg0, %c0_i32 : i32, i32, i32
  }
  func.func @transform_1(%arg0: i32, %arg1: i32) -> (i32, i32, i32) {
    %c0_i32 = arith.constant 0 : i32
    %0 = arith.subi %c0_i32, %arg1 : i32
    %c0_i32_0 = arith.constant 0 : i32
    %c0_i32_1 = arith.constant 0 : i32
    return %0, %arg0, %c0_i32_0 : i32, i32, i32
  }
  func.func @transform_2(%arg0: i32, %arg1: i32) -> (i32, i32, i32) {
    %c0_i32 = arith.constant 0 : i32
    %0 = arith.subi %c0_i32, %arg1 : i32
    %c0_i32_0 = arith.constant 0 : i32
    %c0_i32_1 = arith.constant 0 : i32
    return %0, %arg0, %c0_i32_0 : i32, i32, i32
  }
  func.func @transform_3(%arg0: i32, %arg1: i32) -> (i32, i32, i32) {
    %c0_i32 = arith.constant 0 : i32
    %c0_i32_0 = arith.constant 0 : i32
    %c0_i32_1 = arith.constant 0 : i32
    %c0_i32_2 = arith.constant 0 : i32
    return %c0_i32, %c0_i32_0, %c0_i32_1 : i32, i32, i32
  }
  func.func @transform_4(%arg0: i32, %arg1: i32) -> (i32, i32, i32) {
    %c0_i32 = arith.constant 0 : i32
    %c0_i32_0 = arith.constant 0 : i32
    %c0_i32_1 = arith.constant 0 : i32
    %c0_i32_2 = arith.constant 0 : i32
    return %c0_i32, %c0_i32_0, %c0_i32_1 : i32, i32, i32
  }
  func.func @transform_5(%arg0: i32, %arg1: i32) -> (i32, i32, i32) {
    %c0_i32 = arith.constant 0 : i32
    %c0_i32_0 = arith.constant 0 : i32
    %c0_i32_1 = arith.constant 0 : i32
    %c0_i32_2 = arith.constant 0 : i32
    return %c0_i32, %c0_i32_0, %c0_i32_1 : i32, i32, i32
  }
  func.func @transform_6(%arg0: i32, %arg1: i32) -> (i32, i32, i32) {
    %c0_i32 = arith.constant 0 : i32
    %c0_i32_0 = arith.constant 0 : i32
    %c0_i32_1 = arith.constant 0 : i32
    %c0_i32_2 = arith.constant 0 : i32
    return %c0_i32, %c0_i32_0, %c0_i32_1 : i32, i32, i32
  }
  func.func @transform_7(%arg0: i32, %arg1: i32) -> (i32, i32, i32) {
    %c0_i32 = arith.constant 0 : i32
    %c0_i32_0 = arith.constant 0 : i32
    return %arg1, %arg0, %c0_i32 : i32, i32, i32
  }
  func.func @transform_8(%arg0: i32, %arg1: i32) -> (i32, i32, i32) {
    %c0_i32 = arith.constant 0 : i32
    %0 = arith.subi %c0_i32, %arg1 : i32
    %c0_i32_0 = arith.constant 0 : i32
    %c0_i32_1 = arith.constant 0 : i32
    return %0, %arg0, %c0_i32_0 : i32, i32, i32
  }
}

</mosaic_0001>

<bundles_post_ra>
// kernel: han_forward.7
= control target key start
LH: loop header
LB: loop body
LE: loop exit
PB: predicated region body
PF: predicated region fallthrough
CT: control target
= control target key end

     0   :  { %13 = vsyncpa [#allocation3], 0  ;;  %s931_s30 = smov [#allocation2]   ;;  %s932_s10 = smov 64   ;;  %s1140_s0 = inlined_call_operand.vmem [shape: bf16[3,16,128], index: 0, kind: input, shape index: {}]   ;;  %s1141_s1 = inlined_call_operand.vmem [shape: bf16[3,16,128], index: 1, kind: input, shape index: {}]   ;;  %s1142_s2 = inlined_call_operand.vmem [shape: f32[3,16,1], index: 2, kind: input, shape index: {}]   ;;  %s1143_s3 = inlined_call_operand.vmem [shape: bf16[2,128,128], index: 3, kind: input, shape index: {}]   ;;  %s1144_s4 = inlined_call_operand.vmem [shape: f32[1,128], index: 4, kind: input, shape index: {}]   ;;  %s1145_s5 = inlined_call_operand.vmem [shape: f32[1,128], index: 5, kind: input, shape index: {}]   ;;  %s1146_s6 = inlined_call_operand.hbm [shape: bf16[2,128,128], index: 6, kind: input, shape index: {}]   ;;  %s1147_s7 = inlined_call_operand.vmem [shape: f32[1,128], index: 7, kind: input, shape index: {}]   ;;  %s1148_s8 = inlined_call_operand.vmem [shape: f32[16,128], index: 8, kind: output, shape index: {}]  }
   0x1   :  { %s30_s29 = sshll.u32 %s1146_s6, 4  ;;  %s32_s9 = sshll.u32 %s931_s30, 4  ;;  %s31_s29 = int_to_ptr.hbm [resolvable:$true] %s30_s29  ;;  %s33_s9 = int_to_ptr.vmem [resolvable:$true] %s32_s9 }
   0x2   :  { %s933_s11 = smov 4  }
   0x3   :  { %38 = dma.hbm_to_vmem [thread:$0]  %s31_s29, 2048, %s33_s9, [#allocation3], %s932_s10, %s932_s10, %s933_s11  }
   0x4   :  { %929 = dma.done.wait [#allocation3], 2048  }
   0x5   :  { %930 = vsyncadd [#allocation3], 4294965248  ;;  %v846_v0 = vld [vmem:[%s1143_s3 + $0x78] sm:$0xff]  ;;  %v845_v2 = vld [vmem:[%s1143_s3 + $0x70] sm:$0xff]  ;;  %vm326_vm3 = vcmask 7168  }
   0x6   :  { %v838_v1 = vld [vmem:[%s1143_s3 + $0x38] sm:$0xff]  ;;  %156 = vmatpush.bf16.msra.mxu0 %v846_v0  ;;  %v837_v3 = vld [vmem:[%s1143_s3 + $0x30] sm:$0xff]  ;;  %v844_v4 = vld [vmem:[%s1143_s3 + $0x68] sm:$0xff] }
   0x7   :  { %246 = vmatpush.bf16.msra.mxu1 %v838_v1  ;;  %v836_v5 = vld [vmem:[%s1143_s3 + $0x28] sm:$0xff]  ;;  %v843_v6 = vld [vmem:[%s1143_s3 + $0x60] sm:$0xff]  ;;  %v842_v8 = vld [vmem:[%s1143_s3 + $0x58] sm:$0xff] }
   0x8   :  { %v835_v7 = vld [vmem:[%s1143_s3 + $0x20] sm:$0xff]  ;;  %v834_v9 = vld [vmem:[%s1143_s3 + $0x18] sm:$0xff]  ;;  %v841_v10 = vld [vmem:[%s1143_s3 + $0x50] sm:$0xff] }
   0x9   :  { %v833_v11 = vld [vmem:[%s1143_s3 + $0x10] sm:$0xff]  ;;  %v840_v12 = vld [vmem:[%s1143_s3 + $0x48] sm:$0xff]  ;;  %v839_v14 = vld [vmem:[%s1143_s3 + $0x40] sm:$0xff] }
   0xa   :  { %157 = vmatpush.bf16.msra.mxu0 %v845_v2  ;;  %v832_v13 = vld [vmem:[%s1143_s3 + $0x8] sm:$0xff]  ;;  %v831_v15 = vld [vmem:[%s1143_s3] sm:$0xff]  ;;  %v830_v20 = vld [vmem:[%s1141_s1 + $0x10] sm:$0xff] }
   0xb   :  { %247 = vmatpush.bf16.msra.mxu1 %v837_v3  ;;  %v828_v16 = vld [vmem:[%s1141_s1] sm:$0xff]  ;;  %v829_v18 = vld [vmem:[%s1141_s1 + $0x8] sm:$0xff]  ;;  %v827_v21 = vld [vmem:[%s1140_s0 + $0x10] sm:$0xff] }
   0xc   :  { %v825_v17 = vld [vmem:[%s1140_s0] sm:$0xff]  ;;  %v826_v19 = vld [vmem:[%s1140_s0 + $0x8] sm:$0xff]  ;;  %v1063_v62 = vld [vmem:[%s1142_s2 + $0x10] sm:$0xff] }
   0xd   :  { %v870_v22 = vld [vmem:[%s1144_s4] ss:$0 sm:$0xff]  ;;  %vm316_vm1 = vcmp.gt.f32.partialorder %v1063_v62, 0.0 }
   0xe   :  { %158 = vmatpush.bf16.msra.mxu0 %v844_v4  ;;  %v871_v29 = vld [vmem:[%s1145_s5] ss:$0 sm:$0xff] }
   0xf   :  { %248 = vmatpush.bf16.msra.mxu1 %v836_v5  ;;  %v1058_v60 = vld [vmem:[%s1142_s2] sm:$0xff] }
  0x10   :  { %v1068_v63 = vld [vmem:[%s1142_s2 + $0x20] sm:$0xff]  ;;  %vm314_vm0 = vcmp.gt.f32.partialorder %v1058_v60, 0.0 }
  0x11   :  { %vm318_vm2 = vcmp.gt.f32.partialorder %v1068_v63, 0.0 }
  0x12   :  { %159 = vmatpush.bf16.msra.mxu0 %v843_v6  ;;  %v1077_v6 = vld [vmem:[%s1142_s2 + $0x8] sm:$0xff] }
  0x13   :  { %249 = vmatpush.bf16.msra.mxu1 %v835_v7  ;;  %vm315_vm4 = vcmp.gt.f32.partialorder %v1077_v6, 0.0 }
  0x16   :  { %160 = vmatpush.bf16.msra.mxu0 %v842_v8 }
  0x17   :  { %250 = vmatpush.bf16.msra.mxu1 %v834_v9  ;;  %v934_v9 = vmov 0  }
  0x18   :  { %868 = vset.pattern.permute.xlu2 %v934_v9  ;;  %867 = vset.pattern.permute.xlu0 %v934_v9 }
  0x19   :  { %869 = vset.pattern.permute.xlu1 %v934_v9 }
  0x1a   :  { %161 = vmatpush.bf16.msra.mxu0 %v841_v10 }
  0x1b   :  { %251 = vmatpush.bf16.msra.mxu1 %v833_v11  ;;  %v1084_v11 = vld [vmem:[%s1142_s2 + $0x18] sm:$0xff] }
  0x1c   :  { %vm317_vm5 = vcmp.gt.f32.partialorder %v1084_v11, 0.0 }
  0x1e   :  { %162 = vmatpush.bf16.msra.mxu0 %v840_v12  ;;  %v1089_v12 = vld [vmem:[%s1142_s2 + $0x28] sm:$0xff] }
  0x1f   :  { %252 = vmatpush.bf16.msra.mxu1 %v832_v13  ;;  %vm319_vm6 = vcmp.gt.f32.partialorder %v1089_v12, 0.0 }
  0x22   :  { %163 = vmatpush.bf16.msra.mxu0 %v839_v14 }
  0x23   :  { %253 = vmatpush.bf16.msra.mxu1 %v831_v15 }
  0x25   :  { %164 = vmatmul.bf16.vlgmr.msra.gmra.mxu0 %v828_v16 }
  0x26   :  { %254 = vmatmul.bf16.vlgmr.msra.gmra.mxu1 %v825_v17 }
  0x35   :  { %169 = vmatmul.bf16.gmra.mxu0 %v829_v18 }
  0x36   :  { %259 = vmatmul.bf16.gmra.mxu1 %v826_v19 }
  0x45   :  { %174 = vmatmul.bf16.gmra.mxu0 %v830_v20 }
  0x46   :  { %264 = vmatmul.bf16.gmra.mxu1 %v827_v21 }
  0xa2   :  { %v165_v23 = vpop.f32.mrf.mxu0 }
  0xa3   :  { %v255_v24 = vpop.f32.mrf.mxu1 }
  0xa4   :  { %v256_v25 = vadd.f32 %v255_v24, %v165_v23 }
  0xa6   :  { %v274_v26 = vadd.f32 %v870_v22, %v256_v25 }
  0xa8   :  { %873 = vtanh.f32 %v274_v26 }
  0xaa   :  { %v167_v27 = vpop.f32.mrf.mxu0 }
  0xab   :  { %v257_v28 = vpop.f32.mrf.mxu1 }
  0xac   :  { %v258_v30 = vadd.f32 %v257_v28, %v167_v27 }
  0xae   :  { %v874_v31 = vpop.eup %873  ;;  %v275_v32 = vadd.f32 %v870_v22, %v258_v30 }
  0xaf   :  { %v290_v33 = vmul.f32 %v874_v31, %v871_v29 }
  0xb0   :  { %875 = vtanh.f32 %v275_v32 }
  0xb1   :  { %296 = vadd.xlane.f32.xlu0 %v290_v33 }
  0xb2   :  { %v170_v34 = vpop.f32.mrf.mxu0 }
  0xb3   :  { %v260_v35 = vpop.f32.mrf.mxu1 }
  0xb4   :  { %v261_v36 = vadd.f32 %v260_v35, %v170_v34 }
  0xb6   :  { %v876_v37 = vpop.eup %875  ;;  %v276_v38 = vadd.f32 %v870_v22, %v261_v36 }
  0xb7   :  { %v291_v39 = vmul.f32 %v876_v37, %v871_v29 }
  0xb8   :  { %877 = vtanh.f32 %v276_v38 }
  0xb9   :  { %298 = vadd.xlane.f32.xlu0 %v291_v39 }
  0xba   :  { %v172_v40 = vpop.f32.mrf.mxu0 }
  0xbb   :  { %v262_v41 = vpop.f32.mrf.mxu1 }
  0xbc   :  { %v263_v42 = vadd.f32 %v262_v41, %v172_v40 }
  0xbe   :  { %v878_v43 = vpop.eup %877  ;;  %v277_v44 = vadd.f32 %v870_v22, %v263_v42 }
  0xbf   :  { %v292_v45 = vmul.f32 %v878_v43, %v871_v29 }
  0xc0   :  { %879 = vtanh.f32 %v277_v44 }
  0xc1   :  { %300 = vadd.xlane.f32.xlu2 %v292_v45 }
  0xc2   :  { %v175_v46 = vpop.f32.mrf.mxu0 }
  0xc3   :  { %v265_v47 = vpop.f32.mrf.mxu1 }
  0xc4   :  { %v266_v48 = vadd.f32 %v265_v47, %v175_v46 }
  0xc6   :  { %v880_v49 = vpop.eup %879  ;;  %v278_v50 = vadd.f32 %v870_v22, %v266_v48 }
  0xc7   :  { %v293_v51 = vmul.f32 %v880_v49, %v871_v29 }
  0xc8   :  { %881 = vtanh.f32 %v278_v50 }
  0xc9   :  { %302 = vadd.xlane.f32.xlu2 %v293_v51 }
  0xca   :  { %v177_v52 = vpop.f32.mrf.mxu0 }
  0xcb   :  { %v267_v53 = vpop.f32.mrf.mxu1 }
  0xcc   :  { %v268_v54 = vadd.f32 %v267_v53, %v177_v52 }
  0xce   :  { %v882_v55 = vpop.eup %881  ;;  %v279_v56 = vadd.f32 %v870_v22, %v268_v54 }
  0xcf   :  { %v294_v57 = vmul.f32 %v882_v55, %v871_v29 }
  0xd0   :  { %883 = vtanh.f32 %v279_v56 }
  0xd1   :  { %304 = vadd.xlane.f32.xlu1 %v294_v57 }
  0xd6   :  { %v884_v58 = vpop.eup %883 }
  0xd7   :  { %v295_v59 = vmul.f32 %v884_v58, %v871_v29 }
  0xd9   :  { %306 = vadd.xlane.f32.xlu1 %v295_v59 }
 0x124   :  { %v297_v61 = vpop.xlane.xlu0 %296 }
 0x125   :  { %v320_v1 = vsel %vm314_vm0, %v297_v61, -1e+30 }
 0x126   :  { %v327_v5 = vsel %vm326_vm3, %v320_v1, -inf }
 0x12c   :  { %v299_v13 = vpop.xlane.xlu0 %298 }
 0x12d   :  { %v321_v17 = vsel %vm315_vm4, %v299_v13, -1e+30 }
 0x12e   :  { %v332_v24 = vsel %vm326_vm3, %v321_v17, -inf }
 0x134   :  { %v301_v0 = vpop.xlane.xlu2 %300 }
 0x135   :  { %v322_v3 = vsel %vm316_vm1, %v301_v0, -1e+30 }
 0x136   :  { %v328_v10 = vsel %vm326_vm3, %v322_v3, -inf }
 0x13c   :  { %v303_v15 = vpop.xlane.xlu2 %302 }
 0x13d   :  { %v323_v22 = vsel %vm317_vm5, %v303_v15, -1e+30 }
 0x13e   :  { %v333_v31 = vsel %vm326_vm3, %v323_v22, -inf }
 0x144   :  { %v305_v2 = vpop.xlane.xlu1 %304 }
 0x145   :  { %v324_v4 = vsel %vm318_vm2, %v305_v2, -1e+30 }
 0x146   :  { %v329_v7 = vsel %vm326_vm3, %v324_v4, -inf }
 0x147   :  { %v330_v8 = vmax.f32 %v327_v5, %v329_v7 }
 0x149   :  { %v331_v14 = vmax.f32 %v330_v8, %v328_v10 }
 0x14b   :  { %v337_v16 = vmax.f32 %v331_v14, 0.0 }
 0x14c   :  { %v307_v18 = vpop.xlane.xlu1 %306 }
 0x14d   :  { %v339_v19 = vsub.f32 %v297_v61, %v337_v16  ;;  %v341_v20 = vsub.f32 %v301_v0, %v337_v16  ;;  %v343_v21 = vsub.f32 %v305_v2, %v337_v16  ;;  %v325_v23 = vsel %vm319_vm6, %v307_v18, -1e+30 }
 0x14e   :  { %v334_v27 = vsel %vm326_vm3, %v325_v23, -inf  ;;  %v379_v28 = vsub.f32 0.0, %v337_v16 }
 0x14f   :  { %v345_v25 = vmin.f32 %v339_v19, 0.0  ;;  %v349_v26 = vmin.f32 %v343_v21, 0.0  ;;  %v335_v29 = vmax.f32 %v332_v24, %v334_v27  ;;  %v347_v30 = vmin.f32 %v341_v20, 0.0 }
 0x150   :  { %v381_v36 = vmul.f32 1.442695, %v379_v28 }
 0x151   :  { %v351_v32 = vmul.f32 1.442695, %v345_v25  ;;  %v359_v33 = vmul.f32 1.442695, %v349_v26  ;;  %v336_v34 = vmax.f32 %v335_v29, %v333_v31  ;;  %v355_v35 = vmul.f32 1.442695, %v347_v30 }
 0x153   :  { %885 = vpow2.f32 %v351_v32  ;;  %v338_v37 = vmax.f32 %v336_v34, 0.0 }
 0x154   :  { %887 = vpow2.f32 %v359_v33 }
 0x155   :  { %889 = vpow2.f32 %v355_v35  ;;  %v340_v38 = vsub.f32 %v299_v13, %v338_v37  ;;  %v342_v39 = vsub.f32 %v303_v15, %v338_v37  ;;  %v344_v40 = vsub.f32 %v307_v18, %v338_v37 }
 0x156   :  { %891 = vpow2.f32 %v381_v36  ;;  %v380_v48 = vsub.f32 0.0, %v338_v37 }
 0x157   :  { %v346_v41 = vmin.f32 %v340_v38, 0.0  ;;  %v350_v42 = vmin.f32 %v344_v40, 0.0  ;;  %v348_v44 = vmin.f32 %v342_v39, 0.0  ;;  %v862_v39 = vld [vmem:[#allocation2 + $0x78] sm:$0xff] }
 0x158   :  { %v383_v56 = vmul.f32 1.442695, %v380_v48  ;;  %v854_v40 = vld [vmem:[#allocation2 + $0x38] sm:$0xff]  ;;  %568 = vmatpush.bf16.msra.mxu2 %v862_v39 }
 0x159   :  { %v886_v43 = vpop.eup %885  ;;  %v353_v46 = vmul.f32 1.442695, %v346_v41  ;;  %v361_v47 = vmul.f32 1.442695, %v350_v42  ;;  %v357_v51 = vmul.f32 1.442695, %v348_v44  ;;  %630 = vmatpush.bf16.msra.mxu3 %v854_v40 }
 0x15a   :  { %v888_v45 = vpop.eup %887  ;;  %v363_v49 = vmul.f32 %v886_v43, %v1058_v60  ;;  %v861_v41 = vld [vmem:[#allocation2 + $0x70] sm:$0xff]  ;;  %v860_v43 = vld [vmem:[#allocation2 + $0x68] sm:$0xff]  ;;  %v850_v48 = vld [vmem:[#allocation2 + $0x18] sm:$0xff] }
 0x15b   :  { %v890_v50 = vpop.eup %889  ;;  %v1099_v52 = vmul.f32 %v888_v45, %v1068_v63  ;;  %893 = vpow2.f32 %v353_v46  ;;  %v853_v42 = vld [vmem:[#allocation2 + $0x30] sm:$0xff]  ;;  %v852_v44 = vld [vmem:[#allocation2 + $0x28] sm:$0xff]  ;;  %v859_v45 = vld [vmem:[#allocation2 + $0x60] sm:$0xff] }
 0x15c   :  { %v365_v53 = vmul.f32 %v890_v50, %v1063_v62  ;;  %v369_v54 = vsel %vm326_vm3, %v363_v49, 0.0  ;;  %895 = vpow2.f32 %v361_v47  ;;  %v892_v55 = vpop.eup %891  ;;  %569 = vmatpush.bf16.msra.mxu2 %v861_v41  ;;  %v851_v46 = vld [vmem:[#allocation2 + $0x20] sm:$0xff]  ;;  %v858_v47 = vld [vmem:[#allocation2 + $0x58] sm:$0xff]  ;;  %v849_v50 = vld [vmem:[#allocation2 + $0x10] sm:$0xff] }
 0x15d   :  { %897 = vpow2.f32 %v357_v51  ;;  %v372_v59 = vsel %vm326_vm3, %v1099_v52, 0.0  ;;  %v385_v61 = vmul.f32 0.0001, %v892_v55  ;;  %631 = vmatpush.bf16.msra.mxu3 %v853_v42  ;;  %v856_v51 = vld [vmem:[#allocation2 + $0x48] sm:$0xff] }
 0x15e   :  { %v370_v57 = vsel %vm326_vm3, %v365_v53, 0.0  ;;  %899 = vpow2.f32 %v383_v56 }
 0x15f   :  { %v371_v58 = vadd.f32 %v370_v57, %v369_v54  ;;  %v847_v54 = vld [vmem:[#allocation2] sm:$0xff] }
 0x160   :  { %570 = vmatpush.bf16.msra.mxu2 %v860_v43  ;;  %v51_v57 = vld [vmem:[%s1141_s1] sm:$0xff]  }
 0x161   :  { %v373_v60 = vadd.f32 %v372_v59, %v371_v58  ;;  %v894_v0 = vpop.eup %893  ;;  %632 = vmatpush.bf16.msra.mxu3 %v852_v44  ;;  %v45_v58 = vld [vmem:[%s1140_s0] sm:$0xff]  }
 0x162   :  { %v896_v63 = vpop.eup %895  ;;  %v364_v62 = vmul.f32 %v894_v0, %v1077_v6  ;;  %v424_v59 = vunpack.c.h.bf16 %v45_v58  ;;  %v53_v0 = vld [vmem:[%s1141_s1 + $0x8] sm:$0xff]  }
 0x163   :  { %v387_v1 = vadd.f32 %v385_v61, %v373_v60  ;;  %v898_v2 = vpop.eup %897  ;;  %v368_v3 = vmul.f32 %v896_v63, %v1089_v12  ;;  %v470_v60 = vunpack.c.h.bf16 %v51_v57  ;;  %v47_v61 = vld [vmem:[%s1140_s0 + $0x8] sm:$0xff]  }
 0x164   :  { %v366_v4 = vmul.f32 %v898_v2, %v1084_v11  ;;  %v374_v5 = vsel %vm326_vm3, %v364_v62, 0.0  ;;  %v900_v7 = vpop.eup %899  ;;  %571 = vmatpush.bf16.msra.mxu2 %v859_v45  ;;  %v50_v2 = vld [vmem:[%s1140_s0 + $0x10] sm:$0xff]  }
 0x165   :  { %901 = vrcp.f32 %v387_v1  ;;  %v377_v10 = vsel %vm326_vm3, %v368_v3, 0.0  ;;  %v386_v15 = vmul.f32 0.0001, %v900_v7  ;;  %v400_v18 = vand.u32 2147483648, %v387_v1  ;;  %633 = vmatpush.bf16.msra.mxu3 %v851_v46 }
 0x166   :  { %v375_v8 = vsel %vm326_vm3, %v366_v4, 0.0  ;;  %v398_v12 = vand.u32 2147483647, %v387_v1  ;;  %vm394_vm8 = vweird.f32 %v387_v1 }
 0x167   :  { %v376_v9 = vadd.f32 %v375_v8, %v374_v5  ;;  %v401_v20 = vor.u32 1.1754944e-38, %v400_v18  ;;  %v423_v5 = vunpack.c.l.bf16 %v45_v58  ;;  %v425_v8 = vunpack.c.l.bf16 %v47_v61 }
 0x168   :  { %vm399_vm10 = vcmp.eq.f32.partialorder %v398_v12, 8.507059e+37  ;;  %572 = vmatpush.bf16.msra.mxu2 %v858_v47 }
 0x169   :  { %v378_v14 = vadd.f32 %v377_v10, %v376_v9  ;;  %634 = vmatpush.bf16.msra.mxu3 %v850_v48  ;;  %v471_v9 = vunpack.c.l.bf16 %v53_v0 }
 0x16b   :  { %v902_v13 = vpop.eup %901  ;;  %v388_v17 = vadd.f32 %v386_v15, %v378_v14  ;;  %v428_v14 = vunpack.c.h.bf16 %v50_v2 }
 0x16c   :  { %v390_v16 = vmul.f32 %v902_v13, %v387_v1  ;;  %vm395_vm7 = vweird.f32 %v902_v13  ;;  %v426_v1 = vunpack.c.h.bf16 %v47_v61 }
 0x16d   :  { %903 = vrcp.f32 %v388_v17  ;;  %vm396_vm9 = vmor %vm394_vm8, %vm395_vm7  ;;  %v415_v28 = vand.u32 2147483648, %v388_v17  ;;  %v413_v30 = vand.u32 2147483647, %v388_v17  ;;  %vm409_vm12 = vweird.f32 %v388_v17  ;;  %635 = vmatpush.bf16.msra.mxu3 %v849_v50 }
 0x16e   :  { %v391_v6 = vsub.f32 1.0, %v390_v16  ;;  %v427_v16 = vunpack.c.l.bf16 %v50_v2 }
 0x16f   :  { %v416_v32 = vor.u32 1.1754944e-38, %v415_v28  ;;  %vm414_vm14 = vcmp.eq.f32.partialorder %v413_v30, 8.507059e+37 }
 0x170   :  { %v392_v19 = vmul.f32 %v902_v13, %v391_v6 }
 0x172   :  { %v393_v11 = vadd.f32 %v902_v13, %v392_v19 }
 0x173   :  { %v904_v22 = vpop.eup %903 }
 0x174   :  { %v397_v21 = vsel %vm396_vm9, %v902_v13, %v393_v11  ;;  %v405_v26 = vmul.f32 %v904_v22, %v388_v17  ;;  %vm410_vm11 = vweird.f32 %v904_v22 }
 0x175   :  { %v402_v23 = vsel %vm399_vm10, %v401_v20, %v397_v21  ;;  %vm411_vm13 = vmor %vm409_vm12, %vm410_vm11 }
 0x176   :  { %v419_v24 = vmul.f32 %v402_v23, %v365_v53  ;;  %v403_v25 = vmul.f32 %v402_v23, %v363_v49  ;;  %v406_v27 = vsub.f32 1.0, %v405_v26  ;;  %v421_v38 = vmul.f32 %v402_v23, %v1099_v52  ;;  %v857_v49 = vld [vmem:[#allocation2 + $0x50] sm:$0xff]  ;;  %v848_v52 = vld [vmem:[#allocation2 + $0x8] sm:$0xff]  ;;  %v855_v53 = vld [vmem:[#allocation2 + $0x40] sm:$0xff] }
 0x177   :  { %573 = vmatpush.bf16.msra.mxu2 %v857_v49  ;;  %636 = vmatpush.bf16.msra.mxu3 %v848_v52 }
 0x178   :  { %441 = vperm.xlu2 %868, %v419_v24   ;;  %431 = vperm.xlu0 %867, %v403_v25   ;;  %v407_v29 = vmul.f32 %v904_v22, %v406_v27 }
 0x17a   :  { %v408_v31 = vadd.f32 %v904_v22, %v407_v29 }
 0x17b   :  { %574 = vmatpush.bf16.msra.mxu2 %v856_v51  ;;  %637 = vmatpush.bf16.msra.mxu3 %v847_v54 }
 0x17c   :  { %v412_v33 = vsel %vm411_vm13, %v904_v22, %v408_v31 }
 0x17d   :  { %v417_v34 = vsel %vm414_vm14, %v416_v32, %v412_v33 }
 0x17e   :  { %v420_v35 = vmul.f32 %v417_v34, %v366_v4  ;;  %v418_v36 = vmul.f32 %v417_v34, %v364_v62  ;;  %v422_v37 = vmul.f32 %v417_v34, %v368_v3  ;;  %v472_v62 = vunpack.c.h.bf16 %v53_v0  ;;  %v56_v3 = vld [vmem:[%s1141_s1 + $0x10] sm:$0xff]  }
 0x17f   :  { %575 = vmatpush.bf16.msra.mxu2 %v855_v53  ;;  %v469_v4 = vunpack.c.l.bf16 %v51_v57  ;;  %v474_v15 = vunpack.c.h.bf16 %v56_v3  ;;  %v473_v17 = vunpack.c.l.bf16 %v56_v3 }
 0x180   :  { %446 = vperm.xlu2 %868, %v420_v35   ;;  %436 = vperm.xlu1 %869, %v418_v36  }
 0x188   :  { %456 = vperm.xlu2 %868, %v422_v37   ;;  %451 = vperm.xlu1 %869, %v421_v38   ;;  %v872_v37 = vld [vmem:[%s1147_s7] ss:$0 sm:$0xff] }
 0x1d2   :  { %v442_v55 = vpop.permute.xlu2 %441 }
 0x1d3   :  { %v461_v20 = vmul.f32 %v442_v55, %v425_v8  ;;  %v477_v21 = vmul.f32 %v471_v9, %v442_v55 }
 0x1da   :  { %v447_v56 = vpop.permute.xlu2 %446 }
 0x1db   :  { %v462_v6 = vmul.f32 %v447_v56, %v426_v1  ;;  %v478_v18 = vmul.f32 %v472_v62, %v447_v56 }
 0x1e2   :  { %v457_v19 = vpop.permute.xlu2 %456 }
 0x1e3   :  { %v464_v24 = vmul.f32 %v457_v19, %v428_v14  ;;  %v480_v25 = vmul.f32 %v474_v15, %v457_v19 }
 0x1ea   :  { %v432_v7 = vpop.permute.xlu0 %431 }
 0x1eb   :  { %v459_v12 = vmul.f32 %v432_v7, %v423_v5  ;;  %v475_v11 = vmul.f32 %v469_v4, %v432_v7 }
 0x1ed   :  { %v465_v27 = vadd.f32 %v461_v20, %v459_v12  ;;  %v481_v28 = vadd.f32 %v477_v21, %v475_v11 }
 0x1f2   :  { %v437_v63 = vpop.permute.xlu1 %436 }
 0x1f3   :  { %v460_v10 = vmul.f32 %v437_v63, %v424_v59  ;;  %v476_v13 = vmul.f32 %v470_v60, %v437_v63 }
 0x1f5   :  { %v467_v22 = vadd.f32 %v462_v6, %v460_v10  ;;  %v483_v23 = vadd.f32 %v478_v18, %v476_v13 }
 0x1f7   :  { %v484_v33 = vadd.f32 %v483_v23, %v480_v25  ;;  %v468_v34 = vadd.f32 %v467_v22, %v464_v24 }
 0x1fa   :  { %v452_v26 = vpop.permute.xlu1 %451 }
 0x1fb   :  { %v463_v29 = vmul.f32 %v452_v26, %v427_v16  ;;  %v479_v30 = vmul.f32 %v473_v17, %v452_v26 }
 0x1fd   :  { %v466_v31 = vadd.f32 %v465_v27, %v463_v29  ;;  %v482_v32 = vadd.f32 %v481_v28, %v479_v30 }
 0x1ff   :  { %v502_v35 = vpack.c.bf16 %v484_v33, %v482_v32  ;;  %v485_v36 = vpack.c.bf16 %v468_v34, %v466_v31 }
 0x201   :  { %576 = vmatmul.bf16.vlgmr.msra.gmra.mxu2 %v502_v35  ;;  %638 = vmatmul.bf16.vlgmr.msra.gmra.mxu3 %v485_v36 }
 0x284   :  { %v577_v38 = vpop.f32.mrf.mxu2  ;;  %v639_v39 = vpop.f32.mrf.mxu3 }
 0x285   :  { %v640_v40 = vadd.f32 %v639_v39, %v577_v38 }
 0x287   :  { %v648_v41 = vadd.f32 %v872_v37, %v640_v40 }
 0x289   :  { %650 = vst [vmem:[%s1148_s8] sm:$0xff] %v648_v41 }
 0x28c   :  { %v579_v42 = vpop.f32.mrf.mxu2  ;;  %v641_v43 = vpop.f32.mrf.mxu3 }
 0x28d   :  { %v642_v44 = vadd.f32 %v641_v43, %v579_v42 }
 0x28f   :  { %v649_v45 = vadd.f32 %v872_v37, %v642_v44 }
 0x291   :  { %651 = vst [vmem:[%s1148_s8 + $0x8] sm:$0xff] %v649_v45 }
 0x292   :  { %656 = vsyncpa [#allocation3], 1 }

// kernel: han_forward.5
= control target key start
LH: loop header
LB: loop body
LE: loop exit
PB: predicated region body
PF: predicated region fallthrough
CT: control target
= control target key end

     0   :  { %vm472_vm3 = vcmask 7168   ;;  %s1578_s3 = inlined_call_operand.vmem [shape: bf16[2,128,128], index: 3, kind: input, shape index: {}]   ;;  %s1579_s1 = inlined_call_operand.vmem [shape: bf16[7,16,128], index: 1, kind: input, shape index: {}]   ;;  %s1580_s0 = inlined_call_operand.vmem [shape: bf16[7,16,128], index: 0, kind: input, shape index: {}]   ;;  %s1581_s4 = inlined_call_operand.vmem [shape: f32[1,128], index: 4, kind: input, shape index: {}]   ;;  %s1582_s5 = inlined_call_operand.vmem [shape: f32[1,128], index: 5, kind: input, shape index: {}]   ;;  %s1583_s2 = inlined_call_operand.vmem [shape: f32[7,16,1], index: 2, kind: input, shape index: {}]   ;;  %s1584_s6 = inlined_call_operand.vmem [shape: bf16[16,256], index: 6, kind: output, shape index: {}]  }
   0x1   :  { %v976_v0 = vld [vmem:[%s1578_s3 + $0x78] sm:$0xff]  ;;  %v975_v2 = vld [vmem:[%s1578_s3 + $0x70] sm:$0xff]  ;;  %v974_v4 = vld [vmem:[%s1578_s3 + $0x68] sm:$0xff] }
   0x2   :  { %v968_v1 = vld [vmem:[%s1578_s3 + $0x38] sm:$0xff]  ;;  %174 = vmatpush.bf16.msra.mxu0 %v976_v0  ;;  %988 = vmatpush.bf16.msra.mxu2 %v976_v0  ;;  %v967_v3 = vld [vmem:[%s1578_s3 + $0x30] sm:$0xff]  ;;  %v966_v5 = vld [vmem:[%s1578_s3 + $0x28] sm:$0xff] }
   0x3   :  { %308 = vmatpush.bf16.msra.mxu1 %v968_v1  ;;  %996 = vmatpush.bf16.msra.mxu3 %v968_v1  ;;  %v973_v6 = vld [vmem:[%s1578_s3 + $0x60] sm:$0xff]  ;;  %v972_v8 = vld [vmem:[%s1578_s3 + $0x58] sm:$0xff]  ;;  %v971_v10 = vld [vmem:[%s1578_s3 + $0x50] sm:$0xff] }
   0x4   :  { %v965_v7 = vld [vmem:[%s1578_s3 + $0x20] sm:$0xff]  ;;  %v964_v9 = vld [vmem:[%s1578_s3 + $0x18] sm:$0xff]  ;;  %v963_v11 = vld [vmem:[%s1578_s3 + $0x10] sm:$0xff] }
   0x5   :  { %v970_v12 = vld [vmem:[%s1578_s3 + $0x48] sm:$0xff]  ;;  %v969_v14 = vld [vmem:[%s1578_s3 + $0x40] sm:$0xff]  ;;  %v957_v17 = vld [vmem:[%s1579_s1 + $0x18] sm:$0xff] }
   0x6   :  { %175 = vmatpush.bf16.msra.mxu0 %v975_v2  ;;  %989 = vmatpush.bf16.msra.mxu2 %v975_v2  ;;  %v962_v13 = vld [vmem:[%s1578_s3 + $0x8] sm:$0xff]  ;;  %v961_v15 = vld [vmem:[%s1578_s3] sm:$0xff]  ;;  %v956_v24 = vld [vmem:[%s1579_s1 + $0x10] sm:$0xff] }
   0x7   :  { %309 = vmatpush.bf16.msra.mxu1 %v967_v3  ;;  %997 = vmatpush.bf16.msra.mxu3 %v967_v3  ;;  %v954_v16 = vld [vmem:[%s1579_s1] sm:$0xff]  ;;  %v955_v20 = vld [vmem:[%s1579_s1 + $0x8] sm:$0xff]  ;;  %v949_v26 = vld [vmem:[%s1580_s0 + $0x10] sm:$0xff] }
   0x8   :  { %v947_v18 = vld [vmem:[%s1580_s0] sm:$0xff]  ;;  %v948_v22 = vld [vmem:[%s1580_s0 + $0x8] sm:$0xff]  ;;  %v953_v27 = vld [vmem:[%s1580_s0 + $0x30] sm:$0xff] }
   0x9   :  { %v951_v19 = vld [vmem:[%s1580_s0 + $0x20] sm:$0xff]  ;;  %v952_v23 = vld [vmem:[%s1580_s0 + $0x28] sm:$0xff]  ;;  %v960_v28 = vld [vmem:[%s1579_s1 + $0x30] sm:$0xff] }
   0xa   :  { %176 = vmatpush.bf16.msra.mxu0 %v974_v4  ;;  %990 = vmatpush.bf16.msra.mxu2 %v974_v4  ;;  %v958_v21 = vld [vmem:[%s1579_s1 + $0x20] sm:$0xff]  ;;  %v959_v25 = vld [vmem:[%s1579_s1 + $0x28] sm:$0xff]  ;;  %v950_v29 = vld [vmem:[%s1580_s0 + $0x18] sm:$0xff] }
   0xb   :  { %310 = vmatpush.bf16.msra.mxu1 %v966_v5  ;;  %998 = vmatpush.bf16.msra.mxu3 %v966_v5  ;;  %v1203_v31 = vld [vmem:[%s1581_s4] ss:$0 sm:$0xff] }
   0xc   :  { %v1211_v38 = vld [vmem:[%s1582_s5] ss:$0 sm:$0xff] }
   0xe   :  { %177 = vmatpush.bf16.msra.mxu0 %v973_v6  ;;  %991 = vmatpush.bf16.msra.mxu2 %v973_v6 }
   0xf   :  { %311 = vmatpush.bf16.msra.mxu1 %v965_v7  ;;  %999 = vmatpush.bf16.msra.mxu3 %v965_v7 }
  0x12   :  { %178 = vmatpush.bf16.msra.mxu0 %v972_v8  ;;  %992 = vmatpush.bf16.msra.mxu2 %v972_v8 }
  0x13   :  { %312 = vmatpush.bf16.msra.mxu1 %v964_v9  ;;  %1000 = vmatpush.bf16.msra.mxu3 %v964_v9 }
  0x16   :  { %179 = vmatpush.bf16.msra.mxu0 %v971_v10  ;;  %993 = vmatpush.bf16.msra.mxu2 %v971_v10 }
  0x17   :  { %313 = vmatpush.bf16.msra.mxu1 %v963_v11  ;;  %1001 = vmatpush.bf16.msra.mxu3 %v963_v11 }
  0x1a   :  { %180 = vmatpush.bf16.msra.mxu0 %v970_v12  ;;  %994 = vmatpush.bf16.msra.mxu2 %v970_v12 }
  0x1b   :  { %314 = vmatpush.bf16.msra.mxu1 %v962_v13  ;;  %1002 = vmatpush.bf16.msra.mxu3 %v962_v13 }
  0x1e   :  { %181 = vmatpush.bf16.msra.mxu0 %v969_v14  ;;  %995 = vmatpush.bf16.msra.mxu2 %v969_v14 }
  0x1f   :  { %315 = vmatpush.bf16.msra.mxu1 %v961_v15  ;;  %1003 = vmatpush.bf16.msra.mxu3 %v961_v15 }
  0x21   :  { %182 = vmatmul.bf16.vlgmr.msra.gmra.mxu0 %v954_v16  ;;  %197 = vmatmul.bf16.vlgmr.msra.gmra.mxu2 %v957_v17 }
  0x22   :  { %316 = vmatmul.bf16.vlgmr.msra.gmra.mxu1 %v947_v18  ;;  %336 = vmatmul.bf16.vlgmr.msra.gmra.mxu3 %v951_v19 }
  0x31   :  { %187 = vmatmul.bf16.gmra.mxu0 %v955_v20  ;;  %202 = vmatmul.bf16.gmra.mxu2 %v958_v21 }
  0x32   :  { %321 = vmatmul.bf16.gmra.mxu1 %v948_v22  ;;  %341 = vmatmul.bf16.gmra.mxu3 %v952_v23 }
  0x41   :  { %192 = vmatmul.bf16.gmra.mxu0 %v956_v24  ;;  %207 = vmatmul.bf16.gmra.mxu2 %v959_v25 }
  0x42   :  { %326 = vmatmul.bf16.gmra.mxu1 %v949_v26  ;;  %346 = vmatmul.bf16.gmra.mxu3 %v953_v27 }
  0x51   :  { %212 = vmatmul.bf16.gmra.mxu2 %v960_v28 }
  0x52   :  { %331 = vmatmul.bf16.gmra.mxu1 %v950_v29 }
  0x9e   :  { %v183_v30 = vpop.f32.mrf.mxu0 }
  0x9f   :  { %v317_v32 = vpop.f32.mrf.mxu1 }
  0xa0   :  { %v318_v33 = vadd.f32 %v317_v32, %v183_v30 }
  0xa2   :  { %v356_v34 = vadd.f32 %v1203_v31, %v318_v33 }
  0xa4   :  { %1010 = vtanh.f32 %v356_v34  ;;  %v1206_v35 = vpop.f32.mrf.mxu2 }
  0xa5   :  { %v337_v42 = vpop.f32.mrf.mxu3 }
  0xa6   :  { %v185_v36 = vpop.f32.mrf.mxu0 }
  0xa7   :  { %v319_v37 = vpop.f32.mrf.mxu1 }
  0xa8   :  { %v320_v39 = vadd.f32 %v319_v37, %v185_v36 }
  0xaa   :  { %v1011_v40 = vpop.eup %1010  ;;  %v357_v41 = vadd.f32 %v1203_v31, %v320_v39 }
  0xab   :  { %v388_v43 = vmul.f32 %v1011_v40, %v1211_v38 }
  0xac   :  { %1012 = vtanh.f32 %v357_v41  ;;  %v1215_v44 = vpop.f32.mrf.mxu2 }
  0xad   :  { %402 = vadd.xlane.f32.xlu0 %v388_v43  ;;  %v339_v52 = vpop.f32.mrf.mxu3 }
  0xae   :  { %v188_v45 = vpop.f32.mrf.mxu0 }
  0xaf   :  { %v322_v46 = vpop.f32.mrf.mxu1 }
  0xb0   :  { %v323_v47 = vadd.f32 %v322_v46, %v188_v45 }
  0xb2   :  { %v1013_v48 = vpop.eup %1012  ;;  %v358_v49 = vadd.f32 %v1203_v31, %v323_v47 }
  0xb3   :  { %v389_v50 = vmul.f32 %v1013_v48, %v1211_v38 }
  0xb4   :  { %1014 = vtanh.f32 %v358_v49  ;;  %v203_v51 = vpop.f32.mrf.mxu2 }
  0xb5   :  { %v338_v53 = vadd.f32 %v337_v42, %v203_v51  ;;  %404 = vadd.xlane.f32.xlu0 %v389_v50  ;;  %v342_v0 = vpop.f32.mrf.mxu3 }
  0xb6   :  { %v190_v54 = vpop.f32.mrf.mxu0 }
  0xb7   :  { %v364_v55 = vadd.f32 %v1203_v31, %v338_v53  ;;  %v324_v56 = vpop.f32.mrf.mxu1 }
  0xb8   :  { %v325_v58 = vadd.f32 %v324_v56, %v190_v54 }
  0xb9   :  { %1016 = vtanh.f32 %v364_v55 }
  0xba   :  { %v1015_v57 = vpop.eup %1014  ;;  %v359_v62 = vadd.f32 %v1203_v31, %v325_v58 }
  0xbb   :  { %v390_v59 = vmul.f32 %v1015_v57, %v1211_v38 }
  0xbc   :  { %v205_v60 = vpop.f32.mrf.mxu2 }
  0xbd   :  { %v340_v61 = vadd.f32 %v339_v52, %v205_v60  ;;  %406 = vadd.xlane.f32.xlu2 %v390_v59  ;;  %v344_v14 = vpop.f32.mrf.mxu3  ;;  %v1261_v60 = vld [vmem:[%s1583_s2 + $0x20] sm:$0xff] }
  0xbe   :  { %v193_v63 = vpop.f32.mrf.mxu0  ;;  %vm448_vm0 = vcmp.gt.f32.partialorder %v1261_v60, 0.0 }
  0xbf   :  { %v1017_v1 = vpop.eup %1016  ;;  %v365_v2 = vadd.f32 %v1203_v31, %v340_v61  ;;  %v327_v3 = vpop.f32.mrf.mxu1  ;;  %v1271_v61 = vld [vmem:[%s1583_s2 + $0x30] sm:$0xff] }
  0xc0   :  { %v328_v4 = vadd.f32 %v327_v3, %v193_v63  ;;  %v396_v5 = vmul.f32 %v1017_v1, %v1211_v38  ;;  %vm450_vm2 = vcmp.gt.f32.partialorder %v1271_v61, 0.0  ;;  %v1284_v63 = vld [vmem:[%s1583_s2 + $0x40] sm:$0xff]  ;;  %v1291_v1 = vld [vmem:[%s1583_s2 + $0x28] sm:$0xff] }
  0xc1   :  { %1018 = vtanh.f32 %v365_v2  ;;  %vm452_vm5 = vcmp.gt.f32.partialorder %v1284_v63, 0.0  ;;  %vm449_vm6 = vcmp.gt.f32.partialorder %v1291_v1, 0.0 }
  0xc2   :  { %1020 = vtanh.f32 %v359_v62  ;;  %v360_v6 = vadd.f32 %v1203_v31, %v328_v4  ;;  %v1277_v62 = vld [vmem:[%s1583_s2 + $0x10] sm:$0xff] }
  0xc3   :  { %vm446_vm4 = vcmp.gt.f32.partialorder %v1277_v62, 0.0 }
  0xc4   :  { %1022 = vtanh.f32 %v360_v6  ;;  %v208_v7 = vpop.f32.mrf.mxu2 }
  0xc5   :  { %v343_v8 = vadd.f32 %v342_v0, %v208_v7  ;;  %418 = vadd.xlane.f32.xlu2 %v396_v5  ;;  %v347_v29 = vpop.f32.mrf.mxu3  ;;  %v1301_v5 = vld [vmem:[%s1583_s2 + $0x8] sm:$0xff]  ;;  %v1308_v7 = vld [vmem:[%s1583_s2 + $0x50] sm:$0xff] }
  0xc6   :  { %v195_v11 = vpop.f32.mrf.mxu0  ;;  %vm445_vm7 = vcmp.gt.f32.partialorder %v1301_v5, 0.0  ;;  %vm454_vm8 = vcmp.gt.f32.partialorder %v1308_v7, 0.0 }
  0xc7   :  { %v1019_v9 = vpop.eup %1018  ;;  %v366_v10 = vadd.f32 %v1203_v31, %v343_v8  ;;  %v329_v12 = vpop.f32.mrf.mxu1 }
  0xc8   :  { %v1021_v13 = vpop.eup %1020  ;;  %v397_v15 = vmul.f32 %v1019_v9, %v1211_v38  ;;  %v330_v17 = vadd.f32 %v329_v12, %v195_v11  ;;  %v1323_v12 = vld [vmem:[%s1583_s2 + $0x38] sm:$0xff] }
  0xc9   :  { %1024 = vtanh.f32 %v366_v10  ;;  %v391_v19 = vmul.f32 %v1021_v13, %v1211_v38  ;;  %v1316_v10 = vld [vmem:[%s1583_s2 + $0x18] sm:$0xff]  ;;  %v1328_v13 = vld [vmem:[%s1583_s2 + $0x60] sm:$0xff]  ;;  %vm451_vm10 = vcmp.gt.f32.partialorder %v1323_v12, 0.0 }
  0xca   :  { %v1023_v16 = vpop.eup %1022  ;;  %420 = vadd.xlane.f32.xlu0 %v397_v15  ;;  %v361_v22 = vadd.f32 %v1203_v31, %v330_v17  ;;  %v1335_v15 = vld [vmem:[%s1583_s2 + $0x48] sm:$0xff]  ;;  %vm447_vm9 = vcmp.gt.f32.partialorder %v1316_v10, 0.0  ;;  %vm456_vm11 = vcmp.gt.f32.partialorder %v1328_v13, 0.0 }
  0xcb   :  { %v392_v18 = vmul.f32 %v1023_v16, %v1211_v38  ;;  %vm453_vm12 = vcmp.gt.f32.partialorder %v1335_v15, 0.0 }
  0xcc   :  { %v210_v20 = vpop.f32.mrf.mxu2 }
  0xcd   :  { %v345_v21 = vadd.f32 %v344_v14, %v210_v20  ;;  %410 = vadd.xlane.f32.xlu1 %v392_v18  ;;  %408 = vadd.xlane.f32.xlu2 %v391_v19  ;;  %v349_v45 = vpop.f32.mrf.mxu3  ;;  %v1344_v19 = vld [vmem:[%s1583_s2 + $0x58] sm:$0xff] }
  0xce   :  { %vm455_vm13 = vcmp.gt.f32.partialorder %v1344_v19, 0.0 }
  0xcf   :  { %v1025_v23 = vpop.eup %1024  ;;  %v367_v24 = vadd.f32 %v1203_v31, %v345_v21  ;;  %v332_v25 = vpop.f32.mrf.mxu1 }
  0xd0   :  { %v333_v26 = vadd.f32 %v332_v25, %v1206_v35  ;;  %v398_v27 = vmul.f32 %v1025_v23, %v1211_v38 }
  0xd1   :  { %1026 = vtanh.f32 %v367_v24 }
  0xd2   :  { %1028 = vtanh.f32 %v361_v22  ;;  %v362_v28 = vadd.f32 %v1203_v31, %v333_v26 }
  0xd4   :  { %1030 = vtanh.f32 %v362_v28  ;;  %v213_v30 = vpop.f32.mrf.mxu2 }
  0xd5   :  { %v348_v32 = vadd.f32 %v347_v29, %v213_v30  ;;  %422 = vadd.xlane.f32.xlu1 %v398_v27 }
  0xd7   :  { %v1027_v33 = vpop.eup %1026  ;;  %v368_v34 = vadd.f32 %v1203_v31, %v348_v32  ;;  %v334_v36 = vpop.f32.mrf.mxu1 }
  0xd8   :  { %v1029_v37 = vpop.eup %1028  ;;  %v335_v39 = vadd.f32 %v334_v36, %v1215_v44  ;;  %v399_v35 = vmul.f32 %v1027_v33, %v1211_v38  ;;  %v1074_v36 = vmov 0  }
  0xd9   :  { %1032 = vtanh.f32 %v368_v34  ;;  %v393_v42 = vmul.f32 %v1029_v37, %v1211_v38  ;;  %1007 = vset.pattern.permute.xlu0 %v1074_v36  ;;  %1006 = vset.pattern.permute.xlu1 %v1074_v36 }
  0xda   :  { %v1031_v40 = vpop.eup %1030  ;;  %v363_v41 = vadd.f32 %v1203_v31, %v335_v39  ;;  %424 = vadd.xlane.f32.xlu2 %v399_v35 }
  0xdb   :  { %v394_v43 = vmul.f32 %v1031_v40, %v1211_v38  ;;  %1005 = vset.pattern.permute.xlu2 %v1074_v36 }
  0xdc   :  { %1034 = vtanh.f32 %v363_v41  ;;  %v215_v46 = vpop.f32.mrf.mxu2 }
  0xdd   :  { %v350_v47 = vadd.f32 %v349_v45, %v215_v46  ;;  %412 = vadd.xlane.f32.xlu1 %v393_v42  ;;  %414 = vadd.xlane.f32.xlu0 %v394_v43  ;;  %v1370_v45 = vld [vmem:[%s1583_s2 + $0x68] sm:$0xff] }
  0xde   :  { %vm457_vm14 = vcmp.gt.f32.partialorder %v1370_v45, 0.0 }
  0xdf   :  { %v1033_v48 = vpop.eup %1032  ;;  %v369_v44 = vadd.f32 %v1203_v31, %v350_v47 }
  0xe0   :  { %v400_v49 = vmul.f32 %v1033_v48, %v1211_v38 }
  0xe1   :  { %1036 = vtanh.f32 %v369_v44 }
  0xe2   :  { %v1035_v50 = vpop.eup %1034 }
  0xe3   :  { %v395_v51 = vmul.f32 %v1035_v50, %v1211_v38 }
  0xe5   :  { %416 = vadd.xlane.f32.xlu1 %v395_v51  ;;  %426 = vadd.xlane.f32.xlu0 %v400_v49 }
  0xe7   :  { %v1037_v52 = vpop.eup %1036 }
  0xe8   :  { %v401_v53 = vmul.f32 %v1037_v52, %v1211_v38  ;;  %v1266_v38 = vld [vmem:[%s1583_s2] sm:$0xff] }
  0xe9   :  { %vm444_vm1 = vcmp.gt.f32.partialorder %v1266_v38, 0.0 }
  0xed   :  { %428 = vadd.xlane.f32.xlu1 %v401_v53 }
 0x120   :  { %v1244_v54 = vpop.xlane.xlu0 %402 }
 0x121   :  { %v458_v4 = vsel %vm444_vm1, %v1244_v54, -1e+30 }
 0x122   :  { %v473_v14 = vsel %vm472_vm3, %v458_v4, -inf }
 0x128   :  { %v1248_v56 = vpop.xlane.xlu0 %404 }
 0x129   :  { %v459_v22 = vsel %vm445_vm7, %v1248_v56, -1e+30 }
 0x12a   :  { %v486_v40 = vsel %vm472_vm3, %v459_v22, -inf }
 0x130   :  { %v1246_v55 = vpop.xlane.xlu2 %406 }
 0x131   :  { %v460_v11 = vsel %vm446_vm4, %v1246_v55, -1e+30 }
 0x132   :  { %v474_v20 = vsel %vm472_vm3, %v460_v11, -inf }
 0x138   :  { %v1252_v31 = vpop.xlane.xlu2 %418 }
 0x139   :  { %v466_v17 = vsel %vm452_vm5, %v1252_v31, -1e+30 }
 0x13a   :  { %v479_v25 = vsel %vm472_vm3, %v466_v17, -inf }
 0x13d   :  { %v1254_v58 = vpop.xlane.xlu0 %420 }
 0x13e   :  { %v467_v46 = vsel %vm453_vm12, %v1254_v58, -1e+30 }
 0x13f   :  { %v492_v50 = vsel %vm472_vm3, %v467_v46, -inf }
 0x140   :  { %v1250_v57 = vpop.xlane.xlu1 %410  ;;  %v1303_v6 = vpop.xlane.xlu2 %408 }
 0x141   :  { %v462_v0 = vsel %vm448_vm0, %v1250_v57, -1e+30  ;;  %v461_v26 = vsel %vm447_vm9, %v1303_v6, -1e+30 }
 0x142   :  { %v475_v9 = vsel %vm472_vm3, %v462_v0, -inf  ;;  %v487_v41 = vsel %vm472_vm3, %v461_v26, -inf }
 0x143   :  { %v476_v18 = vmax.f32 %v473_v14, %v475_v9 }
 0x145   :  { %v480_v33 = vmax.f32 %v476_v18, %v479_v25 }
 0x148   :  { %v1256_v59 = vpop.xlane.xlu1 %422 }
 0x149   :  { %v468_v23 = vsel %vm454_vm8, %v1256_v59, -1e+30 }
 0x14a   :  { %v481_v37 = vsel %vm472_vm3, %v468_v23, -inf }
 0x14d   :  { %v1358_v29 = vpop.xlane.xlu2 %424 }
 0x14e   :  { %v469_v47 = vsel %vm455_vm13, %v1358_v29, -1e+30 }
 0x14f   :  { %v494_v51 = vsel %vm472_vm3, %v469_v47, -inf }
 0x150   :  { %v1293_v2 = vpop.xlane.xlu1 %412  ;;  %v1295_v3 = vpop.xlane.xlu0 %414 }
 0x151   :  { %v464_v8 = vsel %vm450_vm2, %v1295_v3, -1e+30  ;;  %v463_v21 = vsel %vm449_vm6, %v1293_v2, -1e+30 }
 0x152   :  { %v477_v16 = vsel %vm472_vm3, %v464_v8, -inf  ;;  %v488_v30 = vsel %vm472_vm3, %v463_v21, -inf }
 0x153   :  { %v478_v24 = vmax.f32 %v474_v20, %v477_v16  ;;  %v489_v48 = vmax.f32 %v486_v40, %v488_v30 }
 0x155   :  { %v482_v42 = vmax.f32 %v478_v24, %v481_v37  ;;  %v493_v4 = vmax.f32 %v489_v48, %v492_v50 }
 0x158   :  { %v1356_v27 = vpop.xlane.xlu1 %416  ;;  %v427_v28 = vpop.xlane.xlu0 %426 }
 0x159   :  { %v465_v32 = vsel %vm451_vm10, %v1356_v27, -1e+30  ;;  %v470_v34 = vsel %vm456_vm11, %v427_v28, -1e+30 }
 0x15a   :  { %v490_v39 = vsel %vm472_vm3, %v465_v32, -inf  ;;  %v483_v35 = vsel %vm472_vm3, %v470_v34, -inf }
 0x15b   :  { %v484_v43 = vmax.f32 %v480_v33, %v483_v35  ;;  %v491_v44 = vmax.f32 %v487_v41, %v490_v39 }
 0x15d   :  { %v485_v49 = vmax.f32 %v484_v43, %v482_v42  ;;  %v495_v53 = vmax.f32 %v491_v44, %v494_v51 }
 0x15f   :  { %v499_v52 = vmax.f32 %v485_v49, 0.0 }
 0x160   :  { %v429_v0 = vpop.xlane.xlu1 %428 }
 0x161   :  { %v513_v8 = vsub.f32 %v427_v28, %v499_v52  ;;  %v471_v9 = vsel %vm457_vm14, %v429_v0, -1e+30  ;;  %v501_v11 = vsub.f32 %v1244_v54, %v499_v52  ;;  %v503_v14 = vsub.f32 %v1246_v55, %v499_v52 }
 0x162   :  { %v496_v16 = vsel %vm472_vm3, %v471_v9, -inf  ;;  %v505_v17 = vsub.f32 %v1250_v57, %v499_v52  ;;  %v507_v18 = vsub.f32 %v1295_v3, %v499_v52  ;;  %v509_v20 = vsub.f32 %v1252_v31, %v499_v52 }
 0x163   :  { %v527_v21 = vmin.f32 %v513_v8, 0.0  ;;  %v497_v22 = vmax.f32 %v493_v4, %v496_v16  ;;  %v511_v23 = vsub.f32 %v1256_v59, %v499_v52  ;;  %v515_v24 = vmin.f32 %v501_v11, 0.0 }
 0x164   :  { %v517_v25 = vmin.f32 %v503_v14, 0.0  ;;  %v519_v26 = vmin.f32 %v505_v17, 0.0  ;;  %v521_v28 = vmin.f32 %v507_v18, 0.0  ;;  %v523_v30 = vmin.f32 %v509_v20, 0.0 }
 0x165   :  { %v498_v54 = vmax.f32 %v497_v22, %v495_v53  ;;  %v525_v32 = vmin.f32 %v511_v23, 0.0  ;;  %v529_v55 = vmul.f32 1.442695, %v515_v24  ;;  %v553_v3 = vmul.f32 1.442695, %v527_v21 }
 0x166   :  { %v533_v33 = vmul.f32 1.442695, %v517_v25  ;;  %v537_v34 = vmul.f32 1.442695, %v519_v26  ;;  %v541_v57 = vmul.f32 1.442695, %v521_v28 }
 0x167   :  { %v1388_v36 = vmax.f32 %v498_v54, 0.0  ;;  %1038 = vpow2.f32 %v529_v55  ;;  %v545_v31 = vmul.f32 1.442695, %v523_v30  ;;  %v597_v37 = vsub.f32 0.0, %v499_v52 }
 0x168   :  { %1040 = vpow2.f32 %v533_v33  ;;  %v549_v39 = vmul.f32 1.442695, %v525_v32 }
 0x169   :  { %v502_v59 = vsub.f32 %v1248_v56, %v1388_v36  ;;  %v504_v35 = vsub.f32 %v1303_v6, %v1388_v36  ;;  %v514_v40 = vsub.f32 %v429_v0, %v1388_v36  ;;  %1042 = vpow2.f32 %v537_v34 }
 0x16a   :  { %v506_v41 = vsub.f32 %v1293_v2, %v1388_v36  ;;  %v508_v42 = vsub.f32 %v1356_v27, %v1388_v36  ;;  %1044 = vpow2.f32 %v541_v57  ;;  %v599_v43 = vmul.f32 1.442695, %v597_v37 }
 0x16b   :  { %v510_v46 = vsub.f32 %v1254_v58, %v1388_v36  ;;  %v512_v56 = vsub.f32 %v1358_v29, %v1388_v36  ;;  %1046 = vpow2.f32 %v545_v31  ;;  %v516_v47 = vmin.f32 %v502_v59, 0.0 }
 0x16c   :  { %v518_v6 = vmin.f32 %v504_v35, 0.0  ;;  %v520_v48 = vmin.f32 %v506_v41, 0.0  ;;  %1048 = vpow2.f32 %v549_v39  ;;  %v522_v44 = vmin.f32 %v508_v42, 0.0 }
 0x16d   :  { %v524_v49 = vmin.f32 %v510_v46, 0.0  ;;  %v1039_v50 = vpop.eup %1038  ;;  %1050 = vpow2.f32 %v553_v3  ;;  %v526_v2 = vmin.f32 %v512_v56, 0.0  ;;  %v531_v51 = vmul.f32 1.442695, %v516_v47 }
 0x16e   :  { %v1041_v27 = vpop.eup %1040  ;;  %v1404_v52 = vmul.f32 %v1039_v50, %v1266_v38  ;;  %1052 = vpow2.f32 %v599_v43  ;;  %v535_v58 = vmul.f32 1.442695, %v518_v6  ;;  %v539_v53 = vmul.f32 1.442695, %v520_v48 }
 0x16f   :  { %v1043_v0 = vpop.eup %1042  ;;  %v528_v29 = vmin.f32 %v514_v40, 0.0  ;;  %v1407_v4 = vmul.f32 %v1041_v27, %v1277_v62  ;;  %1054 = vpow2.f32 %v531_v51  ;;  %v543_v8 = vmul.f32 1.442695, %v522_v44 }
 0x170   :  { %v1045_v9 = vpop.eup %1044  ;;  %v1410_v11 = vmul.f32 %v1043_v0, %v1261_v60  ;;  %v571_v14 = vsel %vm472_vm3, %v1404_v52, 0.0  ;;  %1056 = vpow2.f32 %v535_v58  ;;  %v547_v38 = vmul.f32 1.442695, %v524_v49 }
 0x171   :  { %v1047_v16 = vpop.eup %1046  ;;  %v1415_v17 = vmul.f32 %v1045_v9, %v1271_v61  ;;  %v572_v18 = vsel %vm472_vm3, %v1407_v4, 0.0  ;;  %1058 = vpow2.f32 %v539_v53  ;;  %v551_v62 = vmul.f32 1.442695, %v526_v2 }
 0x172   :  { %v1049_v20 = vpop.eup %1048  ;;  %v573_v21 = vadd.f32 %v572_v18, %v571_v14  ;;  %1060 = vpow2.f32 %v543_v8  ;;  %v555_v60 = vmul.f32 1.442695, %v528_v29  ;;  %v1420_v23 = vmul.f32 %v1047_v16, %v1284_v63 }
 0x173   :  { %v1051_v22 = vpop.eup %1050  ;;  %v574_v24 = vsel %vm472_vm3, %v1410_v11, 0.0  ;;  %1062 = vpow2.f32 %v547_v38  ;;  %v598_v26 = vsub.f32 0.0, %v1388_v36  ;;  %v1426_v30 = vmul.f32 %v1049_v20, %v1308_v7 }
 0x174   :  { %v1053_v25 = vpop.eup %1052  ;;  %v575_v61 = vadd.f32 %v574_v24, %v573_v21  ;;  %v576_v54 = vsel %vm472_vm3, %v1415_v17, 0.0  ;;  %1064 = vpow2.f32 %v551_v62  ;;  %v1434_v34 = vmul.f32 %v1051_v22, %v1328_v13 }
 0x175   :  { %v1055_v28 = vpop.eup %1054  ;;  %1066 = vpow2.f32 %v555_v60  ;;  %v578_v36 = vsel %vm472_vm3, %v1420_v23, 0.0  ;;  %v601_v37 = vmul.f32 1.442695, %v598_v26  ;;  %v580_v13 = vsel %vm472_vm3, %v1426_v30, 0.0 }
 0x176   :  { %v1057_v32 = vpop.eup %1056  ;;  %v577_v55 = vadd.f32 %v576_v54, %v575_v61  ;;  %v1431_v63 = vmul.f32 %v1055_v28, %v1301_v5  ;;  %v603_v42 = vmul.f32 0.0001, %v1053_v25 }
 0x177   :  { %v1059_v33 = vpop.eup %1058  ;;  %v1439_v7 = vmul.f32 %v1057_v32, %v1316_v10  ;;  %1068 = vpow2.f32 %v601_v37 }
 0x178   :  { %v1061_v57 = vpop.eup %1060  ;;  %v579_v3 = vadd.f32 %v578_v36, %v577_v55  ;;  %v1442_v31 = vmul.f32 %v1059_v33, %v1291_v1  ;;  %v584_v5 = vsel %vm472_vm3, %v1431_v63, 0.0  ;;  %v582_v1 = vsel %vm472_vm3, %v1434_v34, 0.0 }
 0x179   :  { %v1063_v39 = vpop.eup %1062  ;;  %v1449_v59 = vmul.f32 %v1061_v57, %v1323_v12  ;;  %v585_v10 = vsel %vm472_vm3, %v1439_v7, 0.0 }
 0x17a   :  { %v581_v35 = vadd.f32 %v580_v13, %v579_v3  ;;  %v586_v40 = vadd.f32 %v585_v10, %v584_v5  ;;  %v1065_v41 = vpop.eup %1064  ;;  %v587_v43 = vsel %vm472_vm3, %v1442_v31, 0.0  ;;  %v1458_v56 = vmul.f32 %v1063_v39, %v1335_v15 }
 0x17b   :  { %v1067_v12 = vpop.eup %1066  ;;  %v589_v6 = vsel %vm472_vm3, %v1449_v59, 0.0  ;;  %v568_v44 = vmul.f32 %v1065_v41, %v1344_v19 }
 0x17c   :  { %v583_v46 = vadd.f32 %v582_v1, %v581_v35  ;;  %v588_v47 = vadd.f32 %v587_v43, %v586_v40  ;;  %v570_v50 = vmul.f32 %v1067_v12, %v1370_v45  ;;  %v591_v2 = vsel %vm472_vm3, %v1458_v56, 0.0  ;;  %v1493_v35 = vld [vmem:[%s1580_s0 + $0x8] sm:$0xff]   ;;  %v1505_v1 = vld [vmem:[%s1580_s0 + $0x10] sm:$0xff]  }
 0x17d   :  { %v1069_v27 = vpop.eup %1068  ;;  %v593_v15 = vsel %vm472_vm3, %v568_v44, 0.0  ;;  %v651_v43 = vunpack.c.l.bf16 %v1493_v35 }
 0x17e   :  { %v605_v48 = vadd.f32 %v603_v42, %v583_v46  ;;  %v590_v49 = vadd.f32 %v589_v6, %v588_v47  ;;  %v595_v53 = vsel %vm472_vm3, %v570_v50, 0.0  ;;  %v604_v29 = vmul.f32 0.0001, %v1069_v27  ;;  %v1510_v42 = vld [vmem:[%s1579_s1 + $0x10] sm:$0xff]  }
 0x17f   :  { %v763_v47 = vunpack.c.l.bf16 %v1510_v42 }
 0x180   :  { %1070 = vrcp.f32 %v605_v48  ;;  %v592_v51 = vadd.f32 %v591_v2, %v590_v49  ;;  %v618_v38 = vand.u32 2147483648, %v605_v48  ;;  %v616_v16 = vand.u32 2147483647, %v605_v48  ;;  %v43_v49 = vld [vmem:[%s1579_s1 + $0x18] sm:$0xf] }
 0x181   :  { %vm612_vm0 = vweird.f32 %v605_v48 }
 0x182   :  { %v594_v58 = vadd.f32 %v593_v15, %v592_v51  ;;  %v619_v62 = vor.u32 1.1754944e-38, %v618_v38  ;;  %vm617_vm2 = vcmp.eq.f32.partialorder %v616_v16, 8.507059e+37  ;;  %v1540_v16 = vld [vmem:[%s1579_s1 + $0x28] sm:$0xff]  }
 0x184   :  { %v596_v0 = vadd.f32 %v595_v53, %v594_v58 }
 0x186   :  { %v1071_v8 = vpop.eup %1070  ;;  %v606_v14 = vadd.f32 %v604_v29, %v596_v0  ;;  %v765_v29 = vunpack.c.l.bf16 %v43_v49 }
 0x187   :  { %v608_v9 = vmul.f32 %v1071_v8, %v605_v48  ;;  %vm613_vm15 = vweird.f32 %v1071_v8 }
 0x188   :  { %1072 = vrcp.f32 %v606_v14  ;;  %vm614_vm1 = vmor %vm612_vm0, %vm613_vm15  ;;  %v633_v28 = vand.u32 2147483648, %v606_v14  ;;  %v631_v32 = vand.u32 2147483647, %v606_v14  ;;  %vm627_vm4 = vweird.f32 %v606_v14 }
 0x189   :  { %v609_v19 = vsub.f32 1.0, %v608_v9  ;;  %v1530_v9 = vld [vmem:[%s1579_s1 + $0x20] sm:$0xff]  }
 0x18a   :  { %v634_v33 = vor.u32 1.1754944e-38, %v633_v28  ;;  %vm632_vm6 = vcmp.eq.f32.partialorder %v631_v32, 8.507059e+37  ;;  %v35_v28 = vld [vmem:[%s1580_s0 + $0x30] sm:$0xff]  }
 0x18b   :  { %v610_v45 = vmul.f32 %v1071_v8, %v609_v19 }
 0x18d   :  { %v611_v18 = vadd.f32 %v1071_v8, %v610_v45  ;;  %v1535_v45 = vld [vmem:[%s1580_s0 + $0x28] sm:$0xff]  }
 0x18e   :  { %v1073_v20 = vpop.eup %1072 }
 0x18f   :  { %v615_v21 = vsel %vm614_vm1, %v1071_v8, %v611_v18  ;;  %v623_v60 = vmul.f32 %v1073_v20, %v606_v14  ;;  %vm628_vm3 = vweird.f32 %v1073_v20  ;;  %v1525_v8 = vld [vmem:[%s1580_s0 + $0x20] sm:$0xff]  }
 0x190   :  { %v620_v22 = vsel %vm617_vm2, %v619_v62, %v615_v21  ;;  %vm629_vm5 = vmor %vm627_vm4, %vm628_vm3  ;;  %v767_v21 = vunpack.c.l.bf16 %v1530_v9 }
 0x191   :  { %v643_v24 = vmul.f32 %v620_v22, %v1420_v23  ;;  %v637_v25 = vmul.f32 %v620_v22, %v1407_v4  ;;  %v621_v61 = vmul.f32 %v620_v22, %v1404_v52  ;;  %v624_v26 = vsub.f32 1.0, %v623_v60 }
 0x192   :  { %v645_v23 = vmul.f32 %v620_v22, %v1426_v30  ;;  %v639_v52 = vmul.f32 %v620_v22, %v1410_v11  ;;  %v641_v37 = vmul.f32 %v620_v22, %v1415_v17  ;;  %v1483_v17 = vld [vmem:[%s1579_s1] sm:$0xff]  }
 0x193   :  { %705 = vperm.xlu0 %1007, %v643_v24   ;;  %675 = vperm.xlu1 %1006, %v637_v25   ;;  %v625_v54 = vmul.f32 %v1073_v20, %v624_v26  ;;  %v759_v40 = vunpack.c.l.bf16 %v1483_v17  ;;  %v659_v24 = vunpack.c.l.bf16 %v1535_v45  ;;  %v769_v25 = vunpack.c.l.bf16 %v1540_v16 }
 0x194   :  { %665 = vperm.xlu2 %1005, %v621_v61  }
 0x195   :  { %v626_v55 = vadd.f32 %v1073_v20, %v625_v54  ;;  %v1552_v54 = vld [vmem:[%s1579_s1 + $0x30] sm:$0xff]  }
 0x197   :  { %v630_v36 = vsel %vm629_vm5, %v1073_v20, %v626_v55  ;;  %v657_v20 = vunpack.c.l.bf16 %v1525_v8 }
 0x198   :  { %v635_v57 = vsel %vm632_vm6, %v634_v33, %v630_v36  ;;  %v661_v33 = vunpack.c.l.bf16 %v35_v28  ;;  %v771_v36 = vunpack.c.l.bf16 %v1552_v54 }
 0x199   :  { %v636_v4 = vmul.f32 %v635_v57, %v1431_v63  ;;  %v640_v3 = vmul.f32 %v635_v57, %v1442_v31  ;;  %v646_v5 = vmul.f32 %v635_v57, %v568_v44  ;;  %v642_v39 = vmul.f32 %v635_v57, %v1449_v59  ;;  %v29_v44 = vld [vmem:[%s1580_s0 + $0x18] sm:$0xf] }
 0x19a   :  { %v638_v13 = vmul.f32 %v635_v57, %v1439_v7  ;;  %v648_v30 = vmul.f32 %v635_v57, %v570_v50  ;;  %v644_v11 = vmul.f32 %v635_v57, %v1458_v56  ;;  %v647_v63 = vmul.f32 %v620_v22, %v1434_v34  ;;  %v1488_v7 = vld [vmem:[%s1580_s0] sm:$0xff]   ;;  %v1498_v34 = vld [vmem:[%s1579_s1 + $0x8] sm:$0xff]  }
 0x19b   :  { %715 = vperm.xlu1 %1006, %v645_v23   ;;  %670 = vperm.xlu0 %1007, %v636_v4   ;;  %v649_v41 = vunpack.c.l.bf16 %v1488_v7  ;;  %v761_v46 = vunpack.c.l.bf16 %v1498_v34  ;;  %v653_v56 = vunpack.c.l.bf16 %v1505_v1  ;;  %v655_v0 = vunpack.c.l.bf16 %v29_v44 }
 0x19c   :  { %685 = vperm.xlu2 %1005, %v639_v52  }
 0x1a3   :  { %690 = vperm.xlu1 %1006, %v640_v3   ;;  %720 = vperm.xlu0 %1007, %v646_v5   ;;  %v650_v3 = vunpack.c.h.bf16 %v1488_v7  ;;  %v760_v5 = vunpack.c.h.bf16 %v1483_v17 }
 0x1a4   :  { %695 = vperm.xlu2 %1005, %v641_v37  }
 0x1ab   :  { %700 = vperm.xlu1 %1006, %v642_v39  }
 0x1ac   :  { %680 = vperm.xlu2 %1005, %v638_v13   ;;  %v652_v13 = vunpack.c.h.bf16 %v1493_v35 }
 0x1b3   :  { %730 = vperm.xlu1 %1006, %v648_v30   ;;  %v762_v30 = vunpack.c.h.bf16 %v1498_v34 }
 0x1b4   :  { %710 = vperm.xlu2 %1005, %v644_v11   ;;  %v654_v11 = vunpack.c.h.bf16 %v1505_v1 }
 0x1bc   :  { %725 = vperm.xlu2 %1005, %v647_v63   ;;  %v764_v63 = vunpack.c.h.bf16 %v1510_v42 }
 0x1ee   :  { %v666_v31 = vpop.permute.xlu2 %665 }
 0x1ef   :  { %v733_v6 = vmul.f32 %v666_v31, %v649_v41  ;;  %v773_v48 = vmul.f32 %v759_v40, %v666_v31 }
 0x1f6   :  { %v686_v10 = vpop.permute.xlu2 %685 }
 0x1f7   :  { %v737_v58 = vmul.f32 %v686_v10, %v653_v56  ;;  %v777_v53 = vmul.f32 %v763_v47, %v686_v10  ;;  %v30_v10 = vld [vmem:[%s1580_s0 + $0x1c] sm:$0xf] }
 0x1f8   :  { %v656_v1 = vunpack.c.l.bf16 %v30_v10 }
 0x1fe   :  { %v696_v59 = vpop.permute.xlu2 %695 }
 0x1ff   :  { %v739_v18 = vmul.f32 %v696_v59, %v655_v0  ;;  %v779_v62 = vmul.f32 %v765_v29, %v696_v59  ;;  %v44_v59 = vld [vmem:[%s1579_s1 + $0x1c] sm:$0xf]  ;;  %v770_v29 = vunpack.c.h.bf16 %v1540_v16 }
 0x200   :  { %v766_v56 = vunpack.c.l.bf16 %v44_v59 }
 0x205   :  { %v676_v12 = vpop.permute.xlu1 %675  ;;  %v706_v14 = vpop.permute.xlu0 %705 }
 0x206   :  { %v735_v50 = vmul.f32 %v676_v12, %v651_v43  ;;  %v775_v2 = vmul.f32 %v761_v46, %v676_v12  ;;  %v681_v51 = vpop.permute.xlu2 %680  ;;  %v741_v32 = vmul.f32 %v706_v14, %v657_v20  ;;  %v781_v55 = vmul.f32 %v767_v21, %v706_v14 }
 0x207   :  { %v736_v42 = vmul.f32 %v681_v51, %v652_v13  ;;  %v776_v47 = vmul.f32 %v762_v30, %v681_v51  ;;  %v660_v51 = vunpack.c.h.bf16 %v1535_v45  ;;  %v662_v20 = vunpack.c.h.bf16 %v35_v28 }
 0x208   :  { %v747_v27 = vadd.f32 %v735_v50, %v733_v6  ;;  %v787_v15 = vadd.f32 %v775_v2, %v773_v48  ;;  %v658_v50 = vunpack.c.h.bf16 %v1525_v8  ;;  %v768_v2 = vunpack.c.h.bf16 %v1530_v9 }
 0x209   :  { %v772_v21 = vunpack.c.h.bf16 %v1552_v54 }
 0x20a   :  { %v748_v19 = vadd.f32 %v747_v27, %v737_v58  ;;  %v788_v38 = vadd.f32 %v787_v15, %v777_v53 }
 0x20c   :  { %v749_v61 = vadd.f32 %v748_v19, %v739_v18  ;;  %v789_v26 = vadd.f32 %v788_v38, %v779_v62 }
 0x20d   :  { %v716_v22 = vpop.permute.xlu1 %715  ;;  %v671_v37 = vpop.permute.xlu0 %670 }
 0x20e   :  { %v711_v60 = vpop.permute.xlu2 %710  ;;  %v743_v57 = vmul.f32 %v716_v22, %v659_v24  ;;  %v750_v23 = vadd.f32 %v749_v61, %v741_v32  ;;  %v783_v4 = vmul.f32 %v769_v25, %v716_v22  ;;  %v790_v52 = vadd.f32 %v789_v26, %v781_v55 }
 0x20f   :  { %v734_v35 = vmul.f32 %v671_v37, %v650_v3  ;;  %v774_v43 = vmul.f32 %v760_v5, %v671_v37  ;;  %v742_v14 = vmul.f32 %v711_v60, %v658_v50  ;;  %v782_v19 = vmul.f32 %v768_v2, %v711_v60 }
 0x210   :  { %v751_v17 = vadd.f32 %v750_v23, %v743_v57  ;;  %v791_v7 = vadd.f32 %v790_v52, %v783_v4 }
 0x211   :  { %v753_v44 = vadd.f32 %v736_v42, %v734_v35  ;;  %v793_v49 = vadd.f32 %v776_v47, %v774_v43 }
 0x215   :  { %v691_v39 = vpop.permute.xlu1 %690  ;;  %v721_v8 = vpop.permute.xlu0 %720 }
 0x216   :  { %v726_v31 = vpop.permute.xlu2 %725  ;;  %v738_v12 = vmul.f32 %v691_v39, %v654_v11  ;;  %v778_v6 = vmul.f32 %v764_v63, %v691_v39  ;;  %v744_v22 = vmul.f32 %v721_v8, %v660_v51  ;;  %v784_v24 = vmul.f32 %v770_v29, %v721_v8 }
 0x217   :  { %v745_v40 = vmul.f32 %v726_v31, %v661_v33  ;;  %v785_v41 = vmul.f32 %v771_v36, %v726_v31 }
 0x218   :  { %v754_v15 = vadd.f32 %v753_v44, %v738_v12  ;;  %v794_v58 = vadd.f32 %v793_v49, %v778_v6 }
 0x219   :  { %v752_v34 = vadd.f32 %v751_v17, %v745_v40  ;;  %v792_v46 = vadd.f32 %v791_v7, %v785_v41 }
 0x21b   :  { %v980_v48 = vpack.c.bf16 %v792_v46, %v752_v34 }
 0x21d   :  { %981 = vst [vmem:[%s1584_s6] sm:$0xff] %v980_v48   ;;  %v701_v27 = vpop.permute.xlu1 %700 }
 0x21e   :  { %v740_v53 = vmul.f32 %v701_v27, %v656_v1  ;;  %v780_v0 = vmul.f32 %v766_v56, %v701_v27 }
 0x220   :  { %v755_v38 = vadd.f32 %v754_v15, %v740_v53  ;;  %v795_v18 = vadd.f32 %v794_v58, %v780_v0 }
 0x222   :  { %v756_v62 = vadd.f32 %v755_v38, %v742_v14  ;;  %v796_v9 = vadd.f32 %v795_v18, %v782_v19 }
 0x224   :  { %v757_v26 = vadd.f32 %v756_v62, %v744_v22  ;;  %v797_v55 = vadd.f32 %v796_v9, %v784_v24 }
 0x225   :  { %v731_v25 = vpop.permute.xlu1 %730 }
 0x226   :  { %v746_v61 = vmul.f32 %v731_v25, %v662_v20  ;;  %v786_v32 = vmul.f32 %v772_v21, %v731_v25 }
 0x228   :  { %v758_v45 = vadd.f32 %v757_v26, %v746_v61  ;;  %v798_v33 = vadd.f32 %v797_v55, %v786_v32 }
 0x22a   :  { %v985_v16 = vpack.c.bf16 %v798_v33, %v758_v45 }
 0x22c   :  { %987 = vst [vmem:[%s1584_s6 + $0x8] sm:$0xff] %v985_v16  }

// kernel: han_forward.6
= control target key start
LH: loop header
LB: loop body
LE: loop exit
PB: predicated region body
PF: predicated region fallthrough
CT: control target
= control target key end

     0   :  { %14 = vsyncpa [#allocation7], 0  ;;  %s4675_s0 = inlined_call_operand.vmem [shape: bf16[3,16,256], index: 0, kind: input, shape index: {}, may-alias: {0,1}]   ;;  %s4676_s1 = inlined_call_operand.vmem [shape: bf16[3,16,256], index: 1, kind: input, shape index: {}, may-alias: {0,1}]   ;;  %s4677_s2 = inlined_call_operand.vmem [shape: f32[3,16,1], index: 2, kind: input, shape index: {}]   ;;  %s4678_s3 = inlined_call_operand.hbm [shape: bf16[2,256,384], index: 3, kind: input, shape index: {}]   ;;  %s4679_s4 = inlined_call_operand.vmem [shape: f32[2,1,384], index: 4, kind: input, shape index: {}]   ;;  %s4680_s5 = inlined_call_operand.hbm [shape: bf16[2,128,384], index: 5, kind: input, shape index: {}]   ;;  %s4681_s6 = inlined_call_operand.vmem [shape: f32[2,1,128], index: 6, kind: input, shape index: {}]   ;;  %s4682_s7 = inlined_call_operand.vmem [shape: bf16[3,16,128], index: 7, kind: output, shape index: {0}]   ;;  %s4683_s8 = inlined_call_operand.vmem [shape: bf16[3,16,128], index: 8, kind: output, shape index: {1}]  }
   0x1   :  { %s44_s29 = sshll.u32 %s4678_s3, 4  ;;  %s45_s29 = int_to_ptr.hbm [resolvable:$true] %s44_s29 }
   0x2   :  { %15 = vsyncpa [#allocation9], 0  ;;  %s3611_s30 = smov [#allocation6]   ;;  %s59_s12 = sshll.u32 %s4680_s5, 4  ;;  %s60_s12 = int_to_ptr.hbm [resolvable:$true] %s59_s12 }
   0x3   :  { %s46_s9 = sshll.u32 %s3611_s30, 4  ;;  %s3612_s13 = smov 192   ;;  %s47_s9 = int_to_ptr.vmem [resolvable:$true] %s46_s9 }
   0x4   :  { %s3613_s14 = smov 12   ;;  %s3614_s15 = smov [#allocation8]  }
   0x5   :  { %52 = dma.hbm_to_vmem [thread:$0]  %s45_s29, 12288, %s47_s9, [#allocation7], %s3612_s13, %s3612_s13, %s3613_s14  }
   0x6   :  { %s61_s16 = sshll.u32 %s3614_s15, 4  ;;  %s62_s16 = int_to_ptr.vmem [resolvable:$true] %s61_s16 }
   0x7   :  { %67 = dma.hbm_to_vmem [thread:$0]  %s60_s12, 6144, %s62_s16, [#allocation9], %s3612_s13, %s3612_s13, %s3613_s14  }
   0x8   :  { %3607 = dma.done.wait [#allocation7], 12288  }
   0x9   :  { %3608 = vsyncadd [#allocation7], 4294955008 }
   0xa   :  { %3609 = dma.done.wait [#allocation9], 6144  }
   0xb   :  { %3610 = vsyncadd [#allocation9], 4294961152  ;;  %v2684_v0 = vld [vmem:[#allocation6 + $0xa8] sm:$0xf]  ;;  %v3270_v1 = vld [vmem:[#allocation6 + $0xb0] sm:$0xf0] }
   0xc   :  { %v2780_v2 = vld [vmem:[#allocation6 + $0x168] sm:$0xf]  ;;  %v2685_v3 = vor.u32 %v3270_v1, %v2684_v0  ;;  %v3294_v4 = vld [vmem:[#allocation6 + $0x170] sm:$0xf0]  ;;  %v3269_v5 = vld [vmem:[#allocation6 + $0xac] sm:$0xf] }
   0xd   :  { %v2686_v6 = vld [vmem:[#allocation6 + $0xb4] sm:$0xf0]  ;;  %v2781_v7 = vor.u32 %v3294_v4, %v2780_v2  ;;  %v3293_v9 = vld [vmem:[#allocation6 + $0x16c] sm:$0xf]  ;;  %v2672_v11 = vld [vmem:[#allocation6 + $0x90] sm:$0xf] }
   0xe   :  { %v2689_v8 = vor.u32 %v3269_v5, %v2686_v6  ;;  %v2782_v10 = vld [vmem:[#allocation6 + $0x174] sm:$0xf0]  ;;  %504 = vmatpush.bf16.msra.mxu0 %v2685_v3  ;;  %v3267_v13 = vld [vmem:[#allocation6 + $0x98] sm:$0xf0]  ;;  %v2768_v14 = vld [vmem:[#allocation6 + $0x150] sm:$0xf] }
   0xf   :  { %v2785_v12 = vor.u32 %v3293_v9, %v2782_v10  ;;  %v3291_v15 = vld [vmem:[#allocation6 + $0x158] sm:$0xf0]  ;;  %528 = vmatpush.bf16.msra.mxu1 %v2781_v7  ;;  %v2673_v16 = vor.u32 %v3267_v13, %v2672_v11  ;;  %v3266_v18 = vld [vmem:[#allocation6 + $0x94] sm:$0xf]  ;;  %v2674_v19 = vld [vmem:[#allocation6 + $0x9c] sm:$0xf0] }
  0x10   :  { %552 = vmatpush.bf16.msra.mxu2 %v2689_v8  ;;  %v2769_v17 = vor.u32 %v3291_v15, %v2768_v14  ;;  %v3290_v20 = vld [vmem:[#allocation6 + $0x154] sm:$0xf]  ;;  %v2677_v21 = vor.u32 %v3266_v18, %v2674_v19  ;;  %v2770_v22 = vld [vmem:[#allocation6 + $0x15c] sm:$0xf0]  ;;  %v2660_v23 = vld [vmem:[#allocation6 + $0x78] sm:$0xf] }
  0x11   :  { %576 = vmatpush.bf16.msra.mxu3 %v2785_v12  ;;  %v3264_v24 = vld [vmem:[#allocation6 + $0x80] sm:$0xf0]  ;;  %v2773_v25 = vor.u32 %v3290_v20, %v2770_v22  ;;  %v2756_v26 = vld [vmem:[#allocation6 + $0x138] sm:$0xf]  ;;  %v3263_v28 = vld [vmem:[#allocation6 + $0x7c] sm:$0xf] }
  0x12   :  { %v3288_v27 = vld [vmem:[#allocation6 + $0x140] sm:$0xf0]  ;;  %505 = vmatpush.bf16.msra.mxu0 %v2673_v16  ;;  %v2661_v29 = vor.u32 %v3264_v24, %v2660_v23  ;;  %v2662_v30 = vld [vmem:[#allocation6 + $0x84] sm:$0xf0]  ;;  %v3287_v31 = vld [vmem:[#allocation6 + $0x13c] sm:$0xf] }
  0x13   :  { %v2758_v32 = vld [vmem:[#allocation6 + $0x144] sm:$0xf0]  ;;  %529 = vmatpush.bf16.msra.mxu1 %v2769_v17  ;;  %v2757_v33 = vor.u32 %v3288_v27, %v2756_v26  ;;  %v2665_v34 = vor.u32 %v3263_v28, %v2662_v30  ;;  %v2648_v35 = vld [vmem:[#allocation6 + $0x60] sm:$0xf]  ;;  %v3261_v36 = vld [vmem:[#allocation6 + $0x68] sm:$0xf0] }
  0x14   :  { %553 = vmatpush.bf16.msra.mxu2 %v2677_v21  ;;  %v2744_v37 = vld [vmem:[#allocation6 + $0x120] sm:$0xf]  ;;  %v2761_v38 = vor.u32 %v3287_v31, %v2758_v32  ;;  %v3285_v39 = vld [vmem:[#allocation6 + $0x128] sm:$0xf0]  ;;  %v3260_v40 = vld [vmem:[#allocation6 + $0x64] sm:$0xf]  ;;  %v2649_v44 = vor.u32 %v3261_v36, %v2648_v35 }
  0x15   :  { %577 = vmatpush.bf16.msra.mxu3 %v2773_v25  ;;  %v2650_v41 = vld [vmem:[#allocation6 + $0x6c] sm:$0xf0]  ;;  %v3284_v42 = vld [vmem:[#allocation6 + $0x124] sm:$0xf]  ;;  %v2745_v45 = vor.u32 %v3285_v39, %v2744_v37  ;;  %v2636_v47 = vld [vmem:[#allocation6 + $0x48] sm:$0xf] }
  0x16   :  { %v2746_v43 = vld [vmem:[#allocation6 + $0x12c] sm:$0xf0]  ;;  %506 = vmatpush.bf16.msra.mxu0 %v2661_v29  ;;  %v2653_v46 = vor.u32 %v3260_v40, %v2650_v41  ;;  %v3258_v48 = vld [vmem:[#allocation6 + $0x50] sm:$0xf0]  ;;  %v2732_v49 = vld [vmem:[#allocation6 + $0x108] sm:$0xf] }
  0x17   :  { %530 = vmatpush.bf16.msra.mxu1 %v2757_v33  ;;  %v2749_v50 = vor.u32 %v3284_v42, %v2746_v43  ;;  %v3282_v51 = vld [vmem:[#allocation6 + $0x110] sm:$0xf0]  ;;  %v3257_v52 = vld [vmem:[#allocation6 + $0x4c] sm:$0xf]  ;;  %v2638_v53 = vld [vmem:[#allocation6 + $0x54] sm:$0xf0]  ;;  %v2637_v56 = vor.u32 %v3258_v48, %v2636_v47 }
  0x18   :  { %554 = vmatpush.bf16.msra.mxu2 %v2665_v34  ;;  %v3281_v54 = vld [vmem:[#allocation6 + $0x10c] sm:$0xf]  ;;  %v2734_v55 = vld [vmem:[#allocation6 + $0x114] sm:$0xf0]  ;;  %v2733_v57 = vor.u32 %v3282_v51, %v2732_v49  ;;  %v2641_v58 = vor.u32 %v3257_v52, %v2638_v53  ;;  %v2624_v59 = vld [vmem:[#allocation6 + $0x30] sm:$0xf] }
  0x19   :  { %578 = vmatpush.bf16.msra.mxu3 %v2761_v38  ;;  %v3255_v60 = vld [vmem:[#allocation6 + $0x38] sm:$0xf0]  ;;  %v2720_v61 = vld [vmem:[#allocation6 + $0xf0] sm:$0xf]  ;;  %v2737_v62 = vor.u32 %v3281_v54, %v2734_v55  ;;  %v3254_v0 = vld [vmem:[#allocation6 + $0x34] sm:$0xf] }
  0x1a   :  { %507 = vmatpush.bf16.msra.mxu0 %v2649_v44  ;;  %v3279_v63 = vld [vmem:[#allocation6 + $0xf8] sm:$0xf0]  ;;  %v2626_v1 = vld [vmem:[#allocation6 + $0x3c] sm:$0xf0]  ;;  %v3278_v2 = vld [vmem:[#allocation6 + $0xf4] sm:$0xf]  ;;  %v2625_v4 = vor.u32 %v3255_v60, %v2624_v59 }
  0x1b   :  { %531 = vmatpush.bf16.msra.mxu1 %v2745_v45  ;;  %v2722_v3 = vld [vmem:[#allocation6 + $0xfc] sm:$0xf0]  ;;  %v2721_v5 = vor.u32 %v3279_v63, %v2720_v61  ;;  %v2629_v6 = vor.u32 %v3254_v0, %v2626_v1  ;;  %v2612_v7 = vld [vmem:[#allocation6 + $0x18] sm:$0xf]  ;;  %v3252_v8 = vld [vmem:[#allocation6 + $0x20] sm:$0xf0] }
  0x1c   :  { %555 = vmatpush.bf16.msra.mxu2 %v2653_v46  ;;  %v2708_v9 = vld [vmem:[#allocation6 + $0xd8] sm:$0xf]  ;;  %v2725_v10 = vor.u32 %v3278_v2, %v2722_v3  ;;  %v3276_v11 = vld [vmem:[#allocation6 + $0xe0] sm:$0xf0]  ;;  %v3251_v12 = vld [vmem:[#allocation6 + $0x1c] sm:$0xf]  ;;  %v2613_v16 = vor.u32 %v3252_v8, %v2612_v7 }
  0x1d   :  { %579 = vmatpush.bf16.msra.mxu3 %v2749_v50  ;;  %v2614_v13 = vld [vmem:[#allocation6 + $0x24] sm:$0xf0]  ;;  %v3275_v14 = vld [vmem:[#allocation6 + $0xdc] sm:$0xf]  ;;  %v2600_v17 = vld [vmem:[#allocation6] sm:$0xf]  ;;  %v2709_v19 = vor.u32 %v3276_v11, %v2708_v9 }
  0x1e   :  { %508 = vmatpush.bf16.msra.mxu0 %v2637_v56  ;;  %v2710_v15 = vld [vmem:[#allocation6 + $0xe4] sm:$0xf0]  ;;  %v3249_v18 = vld [vmem:[#allocation6 + $0x8] sm:$0xf0]  ;;  %v2617_v20 = vor.u32 %v3251_v12, %v2614_v13  ;;  %v2696_v21 = vld [vmem:[#allocation6 + $0xc0] sm:$0xf] }
  0x1f   :  { %532 = vmatpush.bf16.msra.mxu1 %v2733_v57  ;;  %v3273_v22 = vld [vmem:[#allocation6 + $0xc8] sm:$0xf0]  ;;  %v3248_v23 = vld [vmem:[#allocation6 + $0x4] sm:$0xf]  ;;  %v2713_v24 = vor.u32 %v3275_v14, %v2710_v15  ;;  %v2602_v25 = vld [vmem:[#allocation6 + $0xc] sm:$0xf0]  ;;  %v2601_v31 = vor.u32 %v3249_v18, %v2600_v17 }
  0x20   :  { %556 = vmatpush.bf16.msra.mxu2 %v2641_v58  ;;  %v3272_v26 = vld [vmem:[#allocation6 + $0xc4] sm:$0xf]  ;;  %v2698_v27 = vld [vmem:[#allocation6 + $0xcc] sm:$0xf0]  ;;  %v3271_v30 = vld [vmem:[#allocation6 + $0xb8] sm:$0xf0]  ;;  %v2697_v35 = vor.u32 %v3273_v22, %v2696_v21  ;;  %v2605_v36 = vor.u32 %v3248_v23, %v2602_v25 }
  0x21   :  { %580 = vmatpush.bf16.msra.mxu3 %v2737_v62  ;;  %v2576_v28 = vld [vmem:[%s4675_s0] sm:$0xf]  ;;  %v3237_v32 = vld [vmem:[%s4675_s0 + $0x4] sm:$0xf0]  ;;  %v2997_v33 = vld [vmem:[#allocation6 + $0x2e8] sm:$0xf]  ;;  %v2701_v39 = vor.u32 %v3272_v26, %v2698_v27 }
  0x22   :  { %509 = vmatpush.bf16.msra.mxu0 %v2625_v4  ;;  %v2692_v29 = vld [vmem:[#allocation6 + $0xb0] sm:$0xf]  ;;  %v3342_v34 = vld [vmem:[#allocation6 + $0x2f0] sm:$0xf0]  ;;  %v2578_v38 = vld [vmem:[%s4675_s0 + $0x8] sm:$0xf0]  ;;  %v3680_v44 = vor.u32 %v3237_v32, %v2576_v28 }
  0x23   :  { %533 = vmatpush.bf16.msra.mxu1 %v2721_v5  ;;  %v3236_v37 = vld [vmem:[%s4675_s0 + $0x4] sm:$0xf]  ;;  %v2693_v40 = vor.u32 %v3271_v30, %v2692_v29  ;;  %v2680_v41 = vld [vmem:[#allocation6 + $0x98] sm:$0xf]  ;;  %v2788_v42 = vld [vmem:[#allocation6 + $0x170] sm:$0xf]  ;;  %v2998_v45 = vor.u32 %v3342_v34, %v2997_v33 }
  0x24   :  { %557 = vmatpush.bf16.msra.mxu2 %v2629_v6  ;;  %v3295_v43 = vld [vmem:[#allocation6 + $0x178] sm:$0xf0]  ;;  %v3268_v46 = vld [vmem:[#allocation6 + $0xa0] sm:$0xf0]  ;;  %v2901_v47 = vld [vmem:[#allocation6 + $0x228] sm:$0xf]  ;;  %v3682_v49 = vor.u32 %v3236_v37, %v2578_v38 }
  0x25   :  { %581 = vmatpush.bf16.msra.mxu3 %v2725_v10  ;;  %v3318_v48 = vld [vmem:[#allocation6 + $0x230] sm:$0xf0]  ;;  %v2985_v50 = vld [vmem:[#allocation6 + $0x2d0] sm:$0xf]  ;;  %v3339_v51 = vld [vmem:[#allocation6 + $0x2d8] sm:$0xf0]  ;;  %v2789_v52 = vor.u32 %v3295_v43, %v2788_v42  ;;  %v2681_v53 = vor.u32 %v3268_v46, %v2680_v41 }
  0x26   :  { %510 = vmatpush.bf16.msra.mxu0 %v2613_v16  ;;  %v2668_v54 = vld [vmem:[#allocation6 + $0x80] sm:$0xf]  ;;  %v2776_v55 = vld [vmem:[#allocation6 + $0x158] sm:$0xf]  ;;  %v3292_v56 = vld [vmem:[#allocation6 + $0x160] sm:$0xf0]  ;;  %v2902_v57 = vor.u32 %v3318_v48, %v2901_v47  ;;  %v2986_v58 = vor.u32 %v3339_v51, %v2985_v50 }
  0x27   :  { %534 = vmatpush.bf16.msra.mxu1 %v2709_v19  ;;  %v3265_v59 = vld [vmem:[#allocation6 + $0x88] sm:$0xf0]  ;;  %v2889_v60 = vld [vmem:[#allocation6 + $0x210] sm:$0xf]  ;;  %v3315_v61 = vld [vmem:[#allocation6 + $0x218] sm:$0xf0]  ;;  %v2777_v0 = vor.u32 %v3292_v56, %v2776_v55 }
  0x28   :  { %558 = vmatpush.bf16.msra.mxu2 %v2617_v20  ;;  %v2973_v62 = vld [vmem:[#allocation6 + $0x2b8] sm:$0xf]  ;;  %v3336_v63 = vld [vmem:[#allocation6 + $0x2c0] sm:$0xf0]  ;;  %v2669_v1 = vor.u32 %v3265_v59, %v2668_v54  ;;  %v2656_v2 = vld [vmem:[#allocation6 + $0x68] sm:$0xf]  ;;  %v2890_v5 = vor.u32 %v3315_v61, %v2889_v60 }
  0x29   :  { %582 = vmatpush.bf16.msra.mxu3 %v2713_v24  ;;  %v2764_v3 = vld [vmem:[#allocation6 + $0x140] sm:$0xf]  ;;  %v3289_v4 = vld [vmem:[#allocation6 + $0x148] sm:$0xf0]  ;;  %v2974_v6 = vor.u32 %v3336_v63, %v2973_v62  ;;  %v3262_v7 = vld [vmem:[#allocation6 + $0x70] sm:$0xf0] }
  0x2a   :  { %511 = vmatpush.bf16.msra.mxu0 %v2601_v31  ;;  %v2877_v8 = vld [vmem:[#allocation6 + $0x1f8] sm:$0xf]  ;;  %v3312_v9 = vld [vmem:[#allocation6 + $0x200] sm:$0xf0]  ;;  %v2961_v10 = vld [vmem:[#allocation6 + $0x2a0] sm:$0xf]  ;;  %v2765_v12 = vor.u32 %v3289_v4, %v2764_v3  ;;  %v2657_v14 = vor.u32 %v3262_v7, %v2656_v2 }
  0x2b   :  { %535 = vmatpush.bf16.msra.mxu1 %v2697_v35  ;;  %v3333_v11 = vld [vmem:[#allocation6 + $0x2a8] sm:$0xf0]  ;;  %v2584_v13 = vld [vmem:[%s4675_s0 + $0x10] sm:$0xf]  ;;  %v2644_v15 = vld [vmem:[#allocation6 + $0x50] sm:$0xf]  ;;  %v2878_v16 = vor.u32 %v3312_v9, %v2877_v8 }
  0x2c   :  { %559 = vmatpush.bf16.msra.mxu2 %v2605_v36  ;;  %v2752_v17 = vld [vmem:[#allocation6 + $0x128] sm:$0xf]  ;;  %v3286_v18 = vld [vmem:[#allocation6 + $0x130] sm:$0xf0]  ;;  %v2962_v19 = vor.u32 %v3333_v11, %v2961_v10  ;;  %v3259_v20 = vld [vmem:[#allocation6 + $0x58] sm:$0xf0] }
  0x2d   :  { %583 = vmatpush.bf16.msra.mxu3 %v2701_v39  ;;  %512 = vmatmul.bf16.vlgmr.msra.gmra.mxu0 %v3680_v44  ;;  %v2865_v21 = vld [vmem:[#allocation6 + $0x1e0] sm:$0xf]  ;;  %v3309_v22 = vld [vmem:[#allocation6 + $0x1e8] sm:$0xf0]  ;;  %v3239_v23 = vld [vmem:[%s4675_s0 + $0x14] sm:$0xf0]  ;;  %v2753_v28 = vor.u32 %v3286_v18, %v2752_v17  ;;  %v2645_v30 = vor.u32 %v3259_v20, %v2644_v15 }
  0x2e   :  { %600 = vmatpush.bf16.msrb.mxu0 %v2693_v40  ;;  %536 = vmatmul.bf16.vlgmr.msra.gmra.mxu1 %v3682_v49  ;;  %v2949_v24 = vld [vmem:[#allocation6 + $0x288] sm:$0xf]  ;;  %v3330_v25 = vld [vmem:[#allocation6 + $0x290] sm:$0xf0]  ;;  %v3238_v26 = vld [vmem:[%s4675_s0 + $0x14] sm:$0xf]  ;;  %v2866_v31 = vor.u32 %v3309_v22, %v2865_v21  ;;  %v3700_v35 = vor.u32 %v3239_v23, %v2584_v13 }
  0x2f   :  { %560 = vmatmul.bf16.vlgmr.msra.gmra.mxu2 %v3680_v44  ;;  %624 = vmatpush.bf16.msrb.mxu1 %v2789_v52  ;;  %v2586_v27 = vld [vmem:[%s4675_s0 + $0x18] sm:$0xf0]  ;;  %v2632_v29 = vld [vmem:[#allocation6 + $0x38] sm:$0xf]  ;;  %v3256_v32 = vld [vmem:[#allocation6 + $0x40] sm:$0xf0]  ;;  %v2950_v36 = vor.u32 %v3330_v25, %v2949_v24 }
  0x30   :  { %584 = vmatmul.bf16.vlgmr.msra.gmra.mxu3 %v3682_v49  ;;  %1032 = vmatpush.bf16.msrb.mxu2 %v2902_v57  ;;  %v2740_v33 = vld [vmem:[#allocation6 + $0x110] sm:$0xf]  ;;  %v3283_v34 = vld [vmem:[#allocation6 + $0x118] sm:$0xf0]  ;;  %v2853_v37 = vld [vmem:[#allocation6 + $0x1c8] sm:$0xf]  ;;  %v3702_v39 = vor.u32 %v3238_v26, %v2586_v27  ;;  %v2633_v43 = vor.u32 %v3256_v32, %v2632_v29 }
  0x31   :  { %1056 = vmatpush.bf16.msrb.mxu3 %v2998_v45  ;;  %v3306_v38 = vld [vmem:[#allocation6 + $0x1d0] sm:$0xf0]  ;;  %v2937_v40 = vld [vmem:[#allocation6 + $0x270] sm:$0xf]  ;;  %v3327_v41 = vld [vmem:[#allocation6 + $0x278] sm:$0xf0]  ;;  %v2741_v42 = vor.u32 %v3283_v34, %v2740_v33 }
  0x32   :  { %601 = vmatpush.bf16.msrb.mxu0 %v2681_v53  ;;  %v2854_v45 = vor.u32 %v3306_v38, %v2853_v37  ;;  %v2620_v46 = vld [vmem:[#allocation6 + $0x20] sm:$0xf]  ;;  %v2728_v47 = vld [vmem:[#allocation6 + $0xf8] sm:$0xf]  ;;  %v3280_v48 = vld [vmem:[#allocation6 + $0x100] sm:$0xf0]  ;;  %v2938_v50 = vor.u32 %v3327_v41, %v2937_v40 }
  0x33   :  { %625 = vmatpush.bf16.msrb.mxu1 %v2777_v0  ;;  %v3253_v51 = vld [vmem:[#allocation6 + $0x28] sm:$0xf0]  ;;  %v2841_v52 = vld [vmem:[#allocation6 + $0x1b0] sm:$0xf]  ;;  %v3303_v53 = vld [vmem:[#allocation6 + $0x1b8] sm:$0xf0]  ;;  %v2729_v56 = vor.u32 %v3280_v48, %v2728_v47 }
  0x34   :  { %1033 = vmatpush.bf16.msrb.mxu2 %v2890_v5  ;;  %v2925_v54 = vld [vmem:[#allocation6 + $0x258] sm:$0xf]  ;;  %v3324_v55 = vld [vmem:[#allocation6 + $0x260] sm:$0xf0]  ;;  %v2716_v57 = vld [vmem:[#allocation6 + $0xe0] sm:$0xf]  ;;  %v2842_v59 = vor.u32 %v3303_v53, %v2841_v52 }
  0x35   :  { %1057 = vmatpush.bf16.msrb.mxu3 %v2986_v58  ;;  %v2621_v58 = vor.u32 %v3253_v51, %v2620_v46  ;;  %v3277_v60 = vld [vmem:[#allocation6 + $0xe8] sm:$0xf0]  ;;  %v2829_v61 = vld [vmem:[#allocation6 + $0x198] sm:$0xf]  ;;  %v3300_v62 = vld [vmem:[#allocation6 + $0x1a0] sm:$0xf0]  ;;  %v2926_v63 = vor.u32 %v3324_v55, %v2925_v54 }
  0x36   :  { %602 = vmatpush.bf16.msrb.mxu0 %v2669_v1  ;;  %v2608_v0 = vld [vmem:[#allocation6 + $0x8] sm:$0xf]  ;;  %v3250_v1 = vld [vmem:[#allocation6 + $0x10] sm:$0xf0]  ;;  %v2913_v2 = vld [vmem:[#allocation6 + $0x240] sm:$0xf]  ;;  %v2830_v9 = vor.u32 %v3300_v62, %v2829_v61 }
  0x37   :  { %626 = vmatpush.bf16.msrb.mxu1 %v2765_v12  ;;  %v3321_v3 = vld [vmem:[#allocation6 + $0x248] sm:$0xf0]  ;;  %v2903_v5 = vld [vmem:[#allocation6 + $0x234] sm:$0xf0]  ;;  %v3005_v7 = vld [vmem:[#allocation6 + $0x2f0] sm:$0xf]  ;;  %v2609_v10 = vor.u32 %v3250_v1, %v2608_v0 }
  0x38   :  { %1034 = vmatpush.bf16.msrb.mxu2 %v2878_v16  ;;  %v3317_v4 = vld [vmem:[#allocation6 + $0x22c] sm:$0xf]  ;;  %v3343_v8 = vld [vmem:[#allocation6 + $0x2f8] sm:$0xf0]  ;;  %v2704_v11 = vld [vmem:[#allocation6 + $0xc8] sm:$0xf]  ;;  %v2914_v15 = vor.u32 %v3321_v3, %v2913_v2 }
  0x39   :  { %1058 = vmatpush.bf16.msrb.mxu3 %v2974_v6  ;;  %v2717_v6 = vor.u32 %v3277_v60, %v2716_v57  ;;  %v3274_v12 = vld [vmem:[#allocation6 + $0xd0] sm:$0xf0]  ;;  %v2817_v13 = vld [vmem:[#allocation6 + $0x180] sm:$0xf]  ;;  %v2906_v16 = vor.u32 %v3317_v4, %v2903_v5  ;;  %v3341_v17 = vld [vmem:[#allocation6 + $0x2ec] sm:$0xf]  ;;  %v3006_v21 = vor.u32 %v3343_v8, %v3005_v7 }
  0x3a   :  { %603 = vmatpush.bf16.msrb.mxu0 %v2657_v14  ;;  %v3297_v14 = vld [vmem:[#allocation6 + $0x188] sm:$0xf0]  ;;  %v2999_v18 = vld [vmem:[#allocation6 + $0x2f4] sm:$0xf0]  ;;  %v3240_v22 = vld [vmem:[%s4675_s0 + $0x24] sm:$0xf]  ;;  %v2705_v24 = vor.u32 %v3274_v12, %v2704_v11 }
  0x3b   :  { %627 = vmatpush.bf16.msrb.mxu1 %v2753_v28  ;;  %v3241_v20 = vld [vmem:[%s4675_s0 + $0x24] sm:$0xf0]  ;;  %v2594_v23 = vld [vmem:[%s4675_s0 + $0x28] sm:$0xf0]  ;;  %v2818_v25 = vor.u32 %v3297_v14, %v2817_v13  ;;  %v3314_v26 = vld [vmem:[#allocation6 + $0x214] sm:$0xf]  ;;  %v3002_v28 = vor.u32 %v3341_v17, %v2999_v18 }
  0x3c   :  { %1035 = vmatpush.bf16.msrb.mxu2 %v2866_v31  ;;  %v2891_v27 = vld [vmem:[#allocation6 + $0x21c] sm:$0xf0]  ;;  %v2993_v29 = vld [vmem:[#allocation6 + $0x2d8] sm:$0xf]  ;;  %v3340_v31 = vld [vmem:[#allocation6 + $0x2e0] sm:$0xf0]  ;;  %v3722_v34 = vor.u32 %v3240_v22, %v2594_v23 }
  0x3d   :  { %1059 = vmatpush.bf16.msrb.mxu3 %v2962_v19  ;;  %517 = vmatmul.bf16.gmra.mxu0 %v3700_v35  ;;  %v2592_v19 = vld [vmem:[%s4675_s0 + $0x20] sm:$0xf]  ;;  %v3338_v32 = vld [vmem:[#allocation6 + $0x2d4] sm:$0xf]  ;;  %v2987_v33 = vld [vmem:[#allocation6 + $0x2dc] sm:$0xf0]  ;;  %v2994_v37 = vor.u32 %v3340_v31, %v2993_v29 }
  0x3e   :  { %604 = vmatpush.bf16.msrb.mxu0 %v2645_v30  ;;  %541 = vmatmul.bf16.gmra.mxu1 %v3702_v39  ;;  %v3720_v30 = vor.u32 %v3241_v20, %v2592_v19  ;;  %v3311_v38 = vld [vmem:[#allocation6 + $0x1fc] sm:$0xf]  ;;  %v2879_v40 = vld [vmem:[#allocation6 + $0x204] sm:$0xf0]  ;;  %v2990_v41 = vor.u32 %v3338_v32, %v2987_v33  ;;  %v2981_v47 = vld [vmem:[#allocation6 + $0x2c0] sm:$0xf] }
  0x3f   :  { %565 = vmatmul.bf16.gmra.mxu2 %v3700_v35  ;;  %628 = vmatpush.bf16.msrb.mxu1 %v2741_v42  ;;  %v2909_v42 = vld [vmem:[#allocation6 + $0x230] sm:$0xf]  ;;  %v2882_v46 = vor.u32 %v3311_v38, %v2879_v40  ;;  %v3337_v48 = vld [vmem:[#allocation6 + $0x2c8] sm:$0xf0]  ;;  %v3335_v53 = vld [vmem:[#allocation6 + $0x2bc] sm:$0xf] }
  0x40   :  { %589 = vmatmul.bf16.gmra.mxu3 %v3702_v39  ;;  %1036 = vmatpush.bf16.msrb.mxu2 %v2854_v45  ;;  %v2982_v51 = vor.u32 %v3337_v48, %v2981_v47  ;;  %v2867_v52 = vld [vmem:[#allocation6 + $0x1ec] sm:$0xf0]  ;;  %v2975_v54 = vld [vmem:[#allocation6 + $0x2c4] sm:$0xf0]  ;;  %v3316_v57 = vld [vmem:[#allocation6 + $0x220] sm:$0xf0] }
  0x41   :  { %1060 = vmatpush.bf16.msrb.mxu3 %v2950_v36  ;;  %v2894_v36 = vor.u32 %v3314_v26, %v2891_v27  ;;  %v2978_v55 = vor.u32 %v3335_v53, %v2975_v54  ;;  %v3334_v60 = vld [vmem:[#allocation6 + $0x2b0] sm:$0xf0]  ;;  %v2885_v62 = vld [vmem:[#allocation6 + $0x200] sm:$0xf]  ;;  %v3332_v0 = vld [vmem:[#allocation6 + $0x2a4] sm:$0xf] }
  0x42   :  { %605 = vmatpush.bf16.msrb.mxu0 %v2633_v43  ;;  %v3319_v43 = vld [vmem:[#allocation6 + $0x238] sm:$0xf0]  ;;  %v3305_v2 = vld [vmem:[#allocation6 + $0x1cc] sm:$0xf]  ;;  %v2855_v3 = vld [vmem:[#allocation6 + $0x1d4] sm:$0xf0] }
  0x43   :  { %629 = vmatpush.bf16.msrb.mxu1 %v2729_v56  ;;  %v2910_v45 = vor.u32 %v3319_v43, %v2909_v42  ;;  %v2897_v56 = vld [vmem:[#allocation6 + $0x218] sm:$0xf]  ;;  %v2963_v4 = vld [vmem:[#allocation6 + $0x2ac] sm:$0xf0]  ;;  %v3331_v8 = vld [vmem:[#allocation6 + $0x298] sm:$0xf0]  ;;  %v2858_v14 = vor.u32 %v3305_v2, %v2855_v3 }
  0x44   :  { %1037 = vmatpush.bf16.msrb.mxu2 %v2842_v59  ;;  %v2898_v59 = vor.u32 %v3316_v57, %v2897_v56  ;;  %v2957_v7 = vld [vmem:[#allocation6 + $0x290] sm:$0xf]  ;;  %v3243_v12 = vld [vmem:[%s4676_s1 + $0x4] sm:$0xf0]  ;;  %v3242_v13 = vld [vmem:[%s4676_s1 + $0x4] sm:$0xf] }
  0x45   :  { %1061 = vmatpush.bf16.msrb.mxu3 %v2938_v50  ;;  %v3308_v50 = vld [vmem:[#allocation6 + $0x1e4] sm:$0xf]  ;;  %v2793_v11 = vld [vmem:[%s4676_s1] sm:$0xf]  ;;  %v3302_v17 = vld [vmem:[#allocation6 + $0x1b4] sm:$0xf] }
  0x46   :  { %606 = vmatpush.bf16.msrb.mxu0 %v2621_v58  ;;  %v2969_v58 = vld [vmem:[#allocation6 + $0x2a8] sm:$0xf]  ;;  %v2870_v61 = vor.u32 %v3308_v50, %v2867_v52  ;;  %v2843_v18 = vld [vmem:[#allocation6 + $0x1bc] sm:$0xf0]  ;;  %v3740_v20 = vor.u32 %v3243_v12, %v2793_v11  ;;  %v3329_v23 = vld [vmem:[#allocation6 + $0x28c] sm:$0xf] }
  0x47   :  { %630 = vmatpush.bf16.msrb.mxu1 %v2717_v6  ;;  %v2970_v1 = vor.u32 %v3334_v60, %v2969_v58  ;;  %v2966_v6 = vor.u32 %v3332_v0, %v2963_v4  ;;  %v2846_v22 = vor.u32 %v3302_v17, %v2843_v18  ;;  %v2861_v26 = vld [vmem:[#allocation6 + $0x1d0] sm:$0xf]  ;;  %v3307_v27 = vld [vmem:[#allocation6 + $0x1d8] sm:$0xf0]  ;;  %v2945_v29 = vld [vmem:[#allocation6 + $0x278] sm:$0xf] }
  0x48   :  { %1038 = vmatpush.bf16.msrb.mxu2 %v2830_v9  ;;  %v2873_v9 = vld [vmem:[#allocation6 + $0x1e8] sm:$0xf]  ;;  %v3328_v31 = vld [vmem:[#allocation6 + $0x280] sm:$0xf0]  ;;  %v3299_v32 = vld [vmem:[#allocation6 + $0x19c] sm:$0xf] }
  0x49   :  { %1062 = vmatpush.bf16.msrb.mxu3 %v2926_v63  ;;  %v3313_v63 = vld [vmem:[#allocation6 + $0x208] sm:$0xf0]  ;;  %v2946_v33 = vor.u32 %v3328_v31, %v2945_v29  ;;  %v2849_v40 = vld [vmem:[#allocation6 + $0x1b8] sm:$0xf]  ;;  %v3323_v42 = vld [vmem:[#allocation6 + $0x25c] sm:$0xf] }
  0x4a   :  { %607 = vmatpush.bf16.msrb.mxu0 %v2609_v10  ;;  %v2886_v5 = vor.u32 %v3313_v63, %v2885_v62  ;;  %v3310_v10 = vld [vmem:[#allocation6 + $0x1f0] sm:$0xf0]  ;;  %v3301_v47 = vld [vmem:[#allocation6 + $0x1a8] sm:$0xf0]  ;;  %v2933_v48 = vld [vmem:[#allocation6 + $0x260] sm:$0xf] }
  0x4b   :  { %631 = vmatpush.bf16.msrb.mxu1 %v2705_v24  ;;  %v2874_v19 = vor.u32 %v3310_v10, %v2873_v9  ;;  %v2951_v24 = vld [vmem:[#allocation6 + $0x294] sm:$0xf0]  ;;  %v3325_v50 = vld [vmem:[#allocation6 + $0x268] sm:$0xf0]  ;;  %v2819_v54 = vld [vmem:[#allocation6 + $0x18c] sm:$0xf0] }
  0x4c   :  { %1039 = vmatpush.bf16.msrb.mxu2 %v2818_v25  ;;  %v2954_v25 = vor.u32 %v3329_v23, %v2951_v24  ;;  %v2934_v53 = vor.u32 %v3325_v50, %v2933_v48  ;;  %v3320_v57 = vld [vmem:[#allocation6 + $0x244] sm:$0xf]  ;;  %v2915_v58 = vld [vmem:[#allocation6 + $0x24c] sm:$0xf0]  ;;  %v2825_v60 = vld [vmem:[#allocation6 + $0x188] sm:$0xf] }
  0x4d   :  { %1063 = vmatpush.bf16.msrb.mxu3 %v2914_v15  ;;  %522 = vmatmul.bf16.gmra.mxu0 %v3720_v30  ;;  %v2795_v15 = vld [vmem:[%s4676_s1 + $0x8] sm:$0xf0]  ;;  %v3322_v62 = vld [vmem:[#allocation6 + $0x250] sm:$0xf0]  ;;  %v2801_v63 = vld [vmem:[%s4676_s1 + $0x10] sm:$0xf]  ;;  %v2918_v4 = vor.u32 %v3320_v57, %v2915_v58 }
  0x4e   :  { %1080 = vmatpush.bf16.msra.mxu0 %v2906_v16  ;;  %546 = vmatmul.bf16.gmra.mxu1 %v3722_v34  ;;  %v2958_v16 = vor.u32 %v3331_v8, %v2957_v7  ;;  %v3245_v0 = vld [vmem:[%s4676_s1 + $0x14] sm:$0xf0]  ;;  %v3244_v2 = vld [vmem:[%s4676_s1 + $0x14] sm:$0xf]  ;;  %v2803_v3 = vld [vmem:[%s4676_s1 + $0x18] sm:$0xf0] }
  0x4f   :  { %1104 = vmatpush.bf16.msra.mxu1 %v3002_v28  ;;  %570 = vmatmul.bf16.gmra.mxu2 %v3720_v30  ;;  %v2862_v28 = vor.u32 %v3307_v27, %v2861_v26  ;;  %v3762_v7 = vor.u32 %v3244_v2, %v2803_v3  ;;  %v3094_v8 = vld [vmem:[#allocation8 + $0xa8] sm:$0xf]  ;;  %v3366_v9 = vld [vmem:[#allocation8 + $0xb0] sm:$0xf0]  ;;  %v3096_v17 = vld [vmem:[#allocation8 + $0xb4] sm:$0xf0] }
  0x50   :  { %594 = vmatmul.bf16.gmra.mxu3 %v3722_v34  ;;  %1128 = vmatpush.bf16.msra.mxu2 %v2910_v45  ;;  %v2927_v45 = vld [vmem:[#allocation6 + $0x264] sm:$0xf0]  ;;  %v3768_v11 = vor.u32 %v3366_v9, %v3094_v8  ;;  %v3390_v12 = vld [vmem:[#allocation8 + $0x170] sm:$0xf0]  ;;  %v3360_v24 = vld [vmem:[#allocation8 + $0x80] sm:$0xf0] }
  0x51   :  { %1152 = vmatpush.bf16.msra.mxu3 %v3006_v21  ;;  %v3742_v21 = vor.u32 %v3242_v13, %v2795_v15  ;;  %v2930_v52 = vor.u32 %v3323_v42, %v2927_v45  ;;  %v3190_v10 = vld [vmem:[#allocation8 + $0x168] sm:$0xf]  ;;  %v3082_v13 = vld [vmem:[#allocation8 + $0x90] sm:$0xf]  ;;  %v3084_v26 = vld [vmem:[#allocation8 + $0x9c] sm:$0xf0] }
  0x52   :  { %1081 = vmatpush.bf16.msra.mxu0 %v2894_v36  ;;  %v3326_v36 = vld [vmem:[#allocation6 + $0x274] sm:$0xf]  ;;  %v3770_v15 = vor.u32 %v3390_v12, %v3190_v10  ;;  %v2809_v29 = vld [vmem:[%s4676_s1 + $0x20] sm:$0xf]  ;;  %v3247_v31 = vld [vmem:[%s4676_s1 + $0x24] sm:$0xf0] }
  0x53   :  { %1105 = vmatpush.bf16.msra.mxu1 %v2990_v41  ;;  %v3304_v41 = vld [vmem:[#allocation6 + $0x1c0] sm:$0xf0]  ;;  %v3046_v42 = vld [vmem:[#allocation8 + $0x48] sm:$0xf]  ;;  %v3354_v45 = vld [vmem:[#allocation8 + $0x50] sm:$0xf0] }
  0x54   :  { %1129 = vmatpush.bf16.msra.mxu2 %v2898_v59  ;;  %v2850_v43 = vor.u32 %v3304_v41, %v2849_v40  ;;  %v2921_v59 = vld [vmem:[#allocation6 + $0x248] sm:$0xf]  ;;  %v3166_v40 = vld [vmem:[#allocation8 + $0x138] sm:$0xf]  ;;  %v3384_v41 = vld [vmem:[#allocation8 + $0x140] sm:$0xf0]  ;;  %v3814_v48 = vor.u32 %v3354_v45, %v3046_v42 }
  0x55   :  { %1153 = vmatpush.bf16.msra.mxu3 %v2994_v37  ;;  %v2939_v37 = vld [vmem:[#allocation6 + $0x27c] sm:$0xf0]  ;;  %v3102_v50 = vld [vmem:[#allocation8 + $0xb0] sm:$0xf]  ;;  %v3356_v58 = vld [vmem:[#allocation8 + $0x64] sm:$0xf] }
  0x56   :  { %1082 = vmatpush.bf16.msra.mxu0 %v2882_v46  ;;  %v2837_v46 = vld [vmem:[#allocation6 + $0x1a0] sm:$0xf]  ;;  %v3378_v8 = vld [vmem:[#allocation8 + $0x110] sm:$0xf0]  ;;  %v3353_v10 = vld [vmem:[#allocation8 + $0x4c] sm:$0xf] }
  0x57   :  { %1106 = vmatpush.bf16.msra.mxu1 %v2978_v55  ;;  %v2838_v55 = vor.u32 %v3301_v47, %v2837_v46  ;;  %v3359_v46 = vld [vmem:[#allocation8 + $0x7c] sm:$0xf]  ;;  %v3072_v47 = vld [vmem:[#allocation8 + $0x84] sm:$0xf0]  ;;  %v3010_v3 = vld [vmem:[#allocation8] sm:$0xf] }
  0x58   :  { %1130 = vmatpush.bf16.msra.mxu2 %v2886_v5  ;;  %v3372_v45 = vld [vmem:[#allocation8 + $0xe0] sm:$0xf0] }
  0x59   :  { %1154 = vmatpush.bf16.msra.mxu3 %v2982_v51  ;;  %v3296_v51 = vld [vmem:[#allocation6 + $0x184] sm:$0xf] }
  0x5a   :  { %1083 = vmatpush.bf16.msra.mxu0 %v2870_v61  ;;  %v2822_v56 = vor.u32 %v3296_v51, %v2819_v54  ;;  %v3298_v61 = vld [vmem:[#allocation6 + $0x190] sm:$0xf0]  ;;  %v3154_v51 = vld [vmem:[#allocation8 + $0x120] sm:$0xf]  ;;  %v3034_v54 = vld [vmem:[#allocation8 + $0x30] sm:$0xf] }
  0x5b   :  { %1107 = vmatpush.bf16.msra.mxu1 %v2966_v6  ;;  %v2826_v5 = vor.u32 %v3298_v61, %v2825_v60  ;;  %v3760_v6 = vor.u32 %v3245_v0, %v2801_v63  ;;  %v3022_v60 = vld [vmem:[#allocation8 + $0x18] sm:$0xf]  ;;  %v3364_v0 = vld [vmem:[#allocation8 + $0xa0] sm:$0xf0] }
  0x5c   :  { %1131 = vmatpush.bf16.msra.mxu2 %v2874_v19  ;;  %v3387_v19 = vld [vmem:[#allocation8 + $0x158] sm:$0xf0]  ;;  %v3090_v63 = vld [vmem:[#allocation8 + $0x98] sm:$0xf] }
  0x5d   :  { %1155 = vmatpush.bf16.msra.mxu3 %v2970_v1  ;;  %608 = vmatmul.bf16.vlgmr.msrb.gmra.mxu0 %v3680_v44  ;;  %v2831_v44 = vld [vmem:[#allocation6 + $0x1a4] sm:$0xf0]  ;;  %v2922_v1 = vor.u32 %v3322_v62, %v2921_v59  ;;  %v3060_v59 = vld [vmem:[#allocation8 + $0x6c] sm:$0xf0]  ;;  %v3348_v62 = vld [vmem:[#allocation8 + $0x20] sm:$0xf0] }
  0x5e   :  { %1084 = vmatpush.bf16.msra.mxu0 %v2858_v14  ;;  %632 = vmatmul.bf16.vlgmr.msrb.gmra.mxu1 %v3682_v49  ;;  %v2834_v38 = vor.u32 %v3299_v32, %v2831_v44  ;;  %v2942_v49 = vor.u32 %v3326_v36, %v2939_v37  ;;  %v3363_v14 = vld [vmem:[#allocation8 + $0x98] sm:$0xf0]  ;;  %v3246_v32 = vld [vmem:[%s4676_s1 + $0x24] sm:$0xf]  ;;  %v3800_v44 = vor.u32 %v3247_v31, %v2809_v29  ;;  %v3058_v37 = vld [vmem:[#allocation8 + $0x60] sm:$0xf] }
  0x5f   :  { %1040 = vmatmul.bf16.vlgmr.msrb.gmra.mxu2 %v3740_v20  ;;  %1108 = vmatpush.bf16.msra.mxu1 %v2954_v25  ;;  %v3362_v25 = vld [vmem:[#allocation8 + $0x94] sm:$0xf]  ;;  %v3828_v61 = vor.u32 %v3356_v58, %v3060_v59  ;;  %v3835_v2 = vor.u32 %v3348_v62, %v3022_v60  ;;  %v3036_v29 = vld [vmem:[#allocation8 + $0x3c] sm:$0xf0]  ;;  %v3012_v58 = vld [vmem:[#allocation8 + $0xc] sm:$0xf0] }
  0x60   :  { %1064 = vmatmul.bf16.vlgmr.msrb.gmra.mxu3 %v3742_v21  ;;  %1132 = vmatpush.bf16.msra.mxu2 %v2862_v28  ;;  %v3781_v27 = vor.u32 %v3362_v25, %v3084_v26  ;;  %v3375_v25 = vld [vmem:[#allocation8 + $0xf8] sm:$0xf0]  ;;  %v3350_v26 = vld [vmem:[#allocation8 + $0x34] sm:$0xf]  ;;  %v3106_v59 = vld [vmem:[#allocation8 + $0xc0] sm:$0xf] }
  0x61   :  { %1156 = vmatpush.bf16.msra.mxu3 %v2958_v16  ;;  %v3365_v16 = vld [vmem:[#allocation8 + $0xac] sm:$0xf]  ;;  %v3386_v31 = vld [vmem:[#allocation8 + $0x154] sm:$0xf] }
  0x62   :  { %1085 = vmatpush.bf16.msra.mxu0 %v2846_v22  ;;  %v3775_v18 = vor.u32 %v3365_v16, %v3096_v17  ;;  %v3070_v22 = vld [vmem:[#allocation8 + $0x78] sm:$0xf]  ;;  %v3369_v62 = vld [vmem:[#allocation8 + $0xc8] sm:$0xf0] }
  0x63   :  { %1109 = vmatpush.bf16.msra.mxu1 %v2942_v49  ;;  %v3784_v28 = vor.u32 %v3360_v24, %v3070_v22  ;;  %v3192_v16 = vld [vmem:[#allocation8 + $0x174] sm:$0xf0]  ;;  %v3361_v22 = vld [vmem:[#allocation8 + $0x88] sm:$0xf0] }
  0x64   :  { %1133 = vmatpush.bf16.msra.mxu2 %v2850_v43  ;;  %v3812_v43 = vor.u32 %v3384_v41, %v3166_v40  ;;  %v3024_v40 = vld [vmem:[#allocation8 + $0x24] sm:$0xf0]  ;;  %v3118_v41 = vld [vmem:[#allocation8 + $0xd8] sm:$0xf] }
  0x65   :  { %1157 = vmatpush.bf16.msra.mxu3 %v2946_v33  ;;  %v2811_v33 = vld [vmem:[%s4676_s1 + $0x28] sm:$0xf0] }
  0x66   :  { %1086 = vmatpush.bf16.msra.mxu0 %v2834_v38  ;;  %v3803_v36 = vor.u32 %v3246_v32, %v2811_v33  ;;  %v3357_v38 = vld [vmem:[#allocation8 + $0x68] sm:$0xf0]  ;;  %v3180_v32 = vld [vmem:[#allocation8 + $0x15c] sm:$0xf0]  ;;  %v3860_v33 = vor.u32 %v3350_v26, %v3036_v29  ;;  %v3352_v26 = vld [vmem:[#allocation8 + $0x40] sm:$0xf0] }
  0x67   :  { %1110 = vmatpush.bf16.msra.mxu1 %v2930_v52  ;;  %v3806_v49 = vor.u32 %v3357_v38, %v3058_v37  ;;  %v3862_v37 = vor.u32 %v3386_v31, %v3180_v32  ;;  %v3347_v38 = vld [vmem:[#allocation8 + $0x1c] sm:$0xf]  ;;  %v3186_v31 = vld [vmem:[#allocation8 + $0x158] sm:$0xf]  ;;  %v3388_v32 = vld [vmem:[#allocation8 + $0x160] sm:$0xf0] }
  0x68   :  { %1134 = vmatpush.bf16.msra.mxu2 %v2838_v55  ;;  %v3351_v55 = vld [vmem:[#allocation8 + $0x38] sm:$0xf0]  ;;  %v3867_v42 = vor.u32 %v3347_v38, %v3024_v40  ;;  %v3902_v38 = vor.u32 %v3388_v32, %v3186_v31 }
  0x69   :  { %1158 = vmatpush.bf16.msra.mxu3 %v2934_v53  ;;  %v3381_v53 = vld [vmem:[#allocation8 + $0x128] sm:$0xf0]  ;;  %v3825_v57 = vor.u32 %v3351_v55, %v3034_v54  ;;  %v3344_v55 = vld [vmem:[#allocation8 + $0x4] sm:$0xf] }
  0x6a   :  { %1087 = vmatpush.bf16.msra.mxu0 %v2822_v56  ;;  %v3823_v56 = vor.u32 %v3381_v53, %v3154_v51  ;;  %v3869_v51 = vor.u32 %v3372_v45, %v3118_v41  ;;  %v3879_v60 = vor.u32 %v3344_v55, %v3012_v58  ;;  %v3030_v41 = vld [vmem:[#allocation8 + $0x20] sm:$0xf]  ;;  %v3349_v45 = vld [vmem:[#allocation8 + $0x28] sm:$0xf0]  ;;  %v3371_v55 = vld [vmem:[#allocation8 + $0xdc] sm:$0xf] }
  0x6b   :  { %1111 = vmatpush.bf16.msra.mxu1 %v2918_v4  ;;  %v3345_v4 = vld [vmem:[#allocation8 + $0x8] sm:$0xf0]  ;;  %v3120_v58 = vld [vmem:[#allocation8 + $0xe4] sm:$0xf0] }
  0x6c   :  { %1135 = vmatpush.bf16.msra.mxu2 %v2826_v5  ;;  %v3142_v5 = vld [vmem:[#allocation8 + $0x108] sm:$0xf]  ;;  %v3840_v9 = vor.u32 %v3345_v4, %v3010_v3  ;;  %4697 = vst [vmem:[#allocation12_spill] sm:$0xff] %v3869_v51  ;;  %v3054_v4 = vld [vmem:[#allocation8 + $0x50] sm:$0xf] }
  0x6d   :  { %1159 = vmatpush.bf16.msra.mxu3 %v2922_v1  ;;  %613 = vmatmul.bf16.gmra.mxu0 %v3700_v35  ;;  %v3178_v35 = vld [vmem:[#allocation8 + $0x150] sm:$0xf]  ;;  %v3830_v1 = vor.u32 %v3364_v0, %v3090_v63  ;;  %v3844_v12 = vor.u32 %v3378_v8, %v3142_v5  ;;  %v3380_v63 = vld [vmem:[#allocation8 + $0x124] sm:$0xf]  ;;  %v3355_v5 = vld [vmem:[#allocation8 + $0x58] sm:$0xf0]  ;;  %v3883_v8 = vor.u32 %v3369_v62, %v3106_v59 }
  0x6e   :  { %637 = vmatmul.bf16.gmra.mxu1 %v3702_v39  ;;  %1401 = vmatpush.bf16.msrb.mxu0 %v3768_v11  ;;  %v3773_v39 = vor.u32 %v3363_v14, %v3082_v13  ;;  %v3778_v23 = vor.u32 %v3387_v19, %v3178_v35  ;;  %v3048_v13 = vld [vmem:[#allocation8 + $0x54] sm:$0xf0]  ;;  %v3389_v14 = vld [vmem:[#allocation8 + $0x16c] sm:$0xf]  ;;  %v3078_v19 = vld [vmem:[#allocation8 + $0x80] sm:$0xf]  ;;  %v3916_v59 = vor.u32 %v3371_v55, %v3120_v58 }
  0x6f   :  { %1045 = vmatmul.bf16.gmra.mxu2 %v3760_v6  ;;  %1415 = vmatpush.bf16.msrb.mxu1 %v3775_v18  ;;  %v3848_v17 = vor.u32 %v3353_v10, %v3048_v13  ;;  %v3850_v35 = vor.u32 %v3389_v14, %v3192_v16  ;;  %v3853_v24 = vor.u32 %v3361_v22, %v3078_v19  ;;  %v3156_v0 = vld [vmem:[#allocation8 + $0x12c] sm:$0xf0]  ;;  %v3391_v14 = vld [vmem:[#allocation8 + $0x178] sm:$0xf0]  ;;  %v3377_v19 = vld [vmem:[#allocation8 + $0x10c] sm:$0xf] }
  0x70   :  { %1069 = vmatmul.bf16.gmra.mxu3 %v3762_v7  ;;  %v3881_v3 = vor.u32 %v3380_v63, %v3156_v0  ;;  %4698 = vst [vmem:[#allocation13_spill] sm:$0xff] %v3883_v8  ;;  %v3885_v10 = vor.u32 %v3355_v5, %v3054_v4  ;;  %v3198_v13 = vld [vmem:[#allocation8 + $0x170] sm:$0xf]  ;;  %v3144_v22 = vld [vmem:[#allocation8 + $0x114] sm:$0xf0] }
  0x71   :  { %1572 = vmatpush.bf16.msrb.mxu3 %v3770_v15  ;;  %v3889_v16 = vor.u32 %v3391_v14, %v3198_v13  ;;  %4699 = vst [vmem:[#allocation14_spill] sm:$0xff] %v3916_v59  ;;  %v3018_v62 = vld [vmem:[#allocation8 + $0x8] sm:$0xf]  ;;  %v3346_v63 = vld [vmem:[#allocation8 + $0x10] sm:$0xf0] }
  0x72   :  { %1402 = vmatpush.bf16.msrb.mxu0 %v3773_v39  ;;  %v3919_v0 = vor.u32 %v3346_v63, %v3018_v62  ;;  %v3162_v4 = vld [vmem:[#allocation8 + $0x128] sm:$0xf]  ;;  %v3382_v5 = vld [vmem:[#allocation8 + $0x130] sm:$0xf0]  ;;  %v3924_v13 = vld [vmem:[%s4679_s4] sm:$0x7] }
  0x73   :  { %1416 = vmatpush.bf16.msrb.mxu1 %v3781_v27  ;;  %v3927_v14 = vor.u32 %v3382_v5, %v3162_v4  ;;  %v3934_v32 = vperm.slane %v3924_v13, 0  ;;  %v3376_v55 = vld [vmem:[#allocation8 + $0x100] sm:$0xf0] }
  0x74   :  { %4700 = vst [vmem:[#allocation15_spill] sm:$0xff] %v3919_v0 }
  0x75   :  { %1573 = vmatpush.bf16.msrb.mxu3 %v3778_v23 }
  0x76   :  { %1403 = vmatpush.bf16.msrb.mxu0 %v3784_v28 }
  0x79   :  { %1574 = vmatpush.bf16.msrb.mxu3 %v3812_v43 }
  0x7a   :  { %1404 = vmatpush.bf16.msrb.mxu0 %v3806_v49 }
  0x7d   :  { %618 = vmatmul.bf16.gmra.mxu0 %v3720_v30  ;;  %v3816_v30 = vor.u32 %v3359_v46, %v3072_v47  ;;  %1575 = vmatpush.bf16.msrb.mxu3 %v3823_v56  ;;  %v3383_v46 = vld [vmem:[#allocation8 + $0x13c] sm:$0xf]  ;;  %v3168_v47 = vld [vmem:[#allocation8 + $0x144] sm:$0xf0] }
  0x7e   :  { %642 = vmatmul.bf16.gmra.mxu1 %v3722_v34  ;;  %v3367_v34 = vld [vmem:[#allocation8 + $0xb8] sm:$0xf0]  ;;  %1405 = vmatpush.bf16.msrb.mxu0 %v3814_v48  ;;  %v3871_v53 = vor.u32 %v3383_v46, %v3168_v47  ;;  %v3909_v46 = vor.u32 %v3349_v45, %v3030_v41  ;;  %v3174_v47 = vld [vmem:[#allocation8 + $0x140] sm:$0xf]  ;;  %v3944_v45 = vperm.slane %v3924_v13, 1 }
  0x7f   :  { %1050 = vmatmul.bf16.gmra.mxu2 %v3800_v44  ;;  %v3819_v52 = vor.u32 %v3367_v34, %v3102_v50  ;;  %1417 = vmatpush.bf16.msrb.mxu1 %v3816_v30  ;;  %v3066_v50 = vld [vmem:[#allocation8 + $0x68] sm:$0xf]  ;;  %v3358_v34 = vld [vmem:[#allocation8 + $0x70] sm:$0xf0] }
  0x80   :  { %1074 = vmatmul.bf16.gmra.mxu3 %v3803_v36  ;;  %v3873_v54 = vor.u32 %v3358_v34, %v3066_v50  ;;  %v3385_v50 = vld [vmem:[#allocation8 + $0x148] sm:$0xf0] }
  0x81   :  { %1429 = vmatpush.bf16.msrb.mxu2 %v3819_v52  ;;  %1576 = vmatpush.bf16.msrb.mxu3 %v3844_v12  ;;  %v3912_v34 = vor.u32 %v3385_v50, %v3174_v47  ;;  %v3138_v50 = vld [vmem:[#allocation8 + $0xf8] sm:$0xf] }
  0x82   :  { %1406 = vmatpush.bf16.msrb.mxu0 %v3825_v57  ;;  %v3952_v62 = vor.u32 %v3376_v55, %v3138_v50  ;;  %v3114_v55 = vld [vmem:[#allocation8 + $0xc8] sm:$0xf] }
  0x83   :  { %1418 = vmatpush.bf16.msrb.mxu1 %v3828_v61 }
  0x84   :  { %4702 = vst [vmem:[#allocation17_spill] sm:$0xff] %v3952_v62 }
  0x85   :  { %1430 = vmatpush.bf16.msrb.mxu2 %v3830_v1 }
  0x86   :  { %1407 = vmatpush.bf16.msrb.mxu0 %v3835_v2 }
  0x87   :  { %1419 = vmatpush.bf16.msrb.mxu1 %v3848_v17 }
  0x89   :  { %1431 = vmatpush.bf16.msrb.mxu2 %v3853_v24 }
  0x8a   :  { %1408 = vmatpush.bf16.msrb.mxu0 %v3840_v9 }
  0x8b   :  { %1420 = vmatpush.bf16.msrb.mxu1 %v3860_v33 }
  0x8d   :  { %1088 = vmatmul.bf16.vlgmr.msra.gmra.mxu0 %v3740_v20  ;;  %1432 = vmatpush.bf16.msrb.mxu2 %v3873_v54 }
  0x8e   :  { %1112 = vmatmul.bf16.vlgmr.msra.gmra.mxu1 %v3742_v21  ;;  %1586 = vmatpush.bf16.msra.mxu0 %v3850_v35 }
  0x8f   :  { %1136 = vmatmul.bf16.vlgmr.msra.gmra.mxu2 %v3740_v20  ;;  %v3130_v20 = vld [vmem:[#allocation8 + $0xf0] sm:$0xf]  ;;  %1421 = vmatpush.bf16.msrb.mxu1 %v3867_v42 }
  0x90   :  { %1160 = vmatmul.bf16.vlgmr.msra.gmra.mxu3 %v3742_v21  ;;  %v3858_v21 = vor.u32 %v3375_v25, %v3130_v20  ;;  %v3895_v20 = vor.u32 %v3377_v19, %v3144_v22  ;;  %v3042_v25 = vld [vmem:[#allocation8 + $0x38] sm:$0xf]  ;;  %v3368_v19 = vld [vmem:[#allocation8 + $0xc4] sm:$0xf]  ;;  %v3108_v22 = vld [vmem:[#allocation8 + $0xcc] sm:$0xf0] }
  0x91   :  { %1433 = vmatpush.bf16.msrb.mxu2 %v3885_v10  ;;  %v3899_v29 = vor.u32 %v3352_v26, %v3042_v25  ;;  %v3931_v31 = vor.u32 %v3368_v19, %v3108_v22  ;;  %v3126_v22 = vld [vmem:[#allocation8 + $0xe0] sm:$0xf] }
  0x92   :  { %1577 = vmatpush.bf16.msrb.mxu3 %v3858_v21  ;;  %1587 = vmatpush.bf16.msra.mxu0 %v3862_v37 }
  0x93   :  { %1422 = vmatpush.bf16.msrb.mxu1 %v3879_v60  ;;  %4701 = vst [vmem:[#allocation16_spill] sm:$0xff] %v3931_v31 }
  0x95   :  { %1434 = vmatpush.bf16.msrb.mxu2 %v3899_v29 }
  0x96   :  { %1578 = vmatpush.bf16.msrb.mxu3 %v3869_v51  ;;  %1588 = vmatpush.bf16.msra.mxu0 %v3871_v53 }
  0x97   :  { %1600 = vmatpush.bf16.msra.mxu1 %v3889_v16 }
  0x99   :  { %1435 = vmatpush.bf16.msrb.mxu2 %v3909_v46 }
  0x9a   :  { %1589 = vmatpush.bf16.msra.mxu0 %v3881_v3  ;;  %1579 = vmatpush.bf16.msrb.mxu3 %v3883_v8 }
  0x9b   :  { %1601 = vmatpush.bf16.msra.mxu1 %v3902_v38 }
  0x9d   :  { %1093 = vmatmul.bf16.gmra.mxu0 %v3760_v6  ;;  %1436 = vmatpush.bf16.msrb.mxu2 %v3919_v0 }
  0x9e   :  { %1117 = vmatmul.bf16.gmra.mxu1 %v3762_v7  ;;  %1877 = vmatpush.bf16.msra.mxu3 %v3775_v18 }
  0x9f   :  { %1141 = vmatmul.bf16.gmra.mxu2 %v3760_v6  ;;  %v3374_v6 = vld [vmem:[#allocation8 + $0xf4] sm:$0xf]  ;;  %1590 = vmatpush.bf16.msra.mxu0 %v3895_v20 }
  0xa0   :  { %1165 = vmatmul.bf16.gmra.mxu3 %v3762_v7  ;;  %v3132_v7 = vld [vmem:[#allocation8 + $0xfc] sm:$0xf0]  ;;  %1602 = vmatpush.bf16.msra.mxu1 %v3912_v34 }
  0xa1   :  { %v3906_v40 = vor.u32 %v3374_v6, %v3132_v7  ;;  %v3150_v6 = vld [vmem:[#allocation8 + $0x110] sm:$0xf]  ;;  %v3379_v7 = vld [vmem:[#allocation8 + $0x118] sm:$0xf0]  ;;  %1863 = vmatpush.bf16.msra.mxu2 %v3768_v11 }
  0xa2   :  { %1878 = vmatpush.bf16.msra.mxu3 %v3781_v27  ;;  %v3939_v41 = vor.u32 %v3379_v7, %v3150_v6 }
  0xa3   :  { %1591 = vmatpush.bf16.msra.mxu0 %v3906_v40 }
  0xa4   :  { %1603 = vmatpush.bf16.msra.mxu1 %v3927_v14 }
  0xa5   :  { %1864 = vmatpush.bf16.msra.mxu2 %v3773_v39 }
  0xa6   :  { %1879 = vmatpush.bf16.msra.mxu3 %v3816_v30 }
  0xa7   :  { %1592 = vmatpush.bf16.msra.mxu0 %v3916_v59 }
  0xa8   :  { %1604 = vmatpush.bf16.msra.mxu1 %v3939_v41 }
  0xa9   :  { %1865 = vmatpush.bf16.msra.mxu2 %v3784_v28 }
  0xaa   :  { %v513_v25 = vpop.f32.mrf.mxu0  ;;  %1880 = vmatpush.bf16.msra.mxu3 %v3828_v61 }
  0xab   :  { %v537_v26 = vpop.f32.mrf.mxu1  ;;  %1593 = vmatpush.bf16.msra.mxu0 %v3931_v31  ;;  %v514_v47 = vadd.f32 %v513_v25, %v3934_v32  ;;  %v3373_v25 = vld [vmem:[#allocation8 + $0xe8] sm:$0xf0] }
  0xac   :  { %1605 = vmatpush.bf16.msra.mxu1 %v3952_v62  ;;  %v3958_v6 = vor.u32 %v3373_v25, %v3126_v22 }
  0xad   :  { %1098 = vmatmul.bf16.gmra.mxu0 %v3800_v44  ;;  %v538_v5 = vadd.f32 %v537_v26, %v514_v47  ;;  %1866 = vmatpush.bf16.msra.mxu2 %v3806_v49 }
  0xae   :  { %1122 = vmatmul.bf16.gmra.mxu1 %v3803_v36  ;;  %1881 = vmatpush.bf16.msra.mxu3 %v3848_v17  ;;  %4703 = vst [vmem:[#allocation18_spill] sm:$0xff] %v3958_v6 }
  0xaf   :  { %1146 = vmatmul.bf16.gmra.mxu2 %v3800_v44 }
  0xb0   :  { %1170 = vmatmul.bf16.gmra.mxu3 %v3803_v36  ;;  %1606 = vmatpush.bf16.msra.mxu1 %v3958_v6 }
  0xb1   :  { %1867 = vmatpush.bf16.msra.mxu2 %v3814_v48 }
  0xb2   :  { %v561_v58 = vpop.f32.mrf.mxu2  ;;  %v515_v4 = vpop.f32.mrf.mxu0  ;;  %1882 = vmatpush.bf16.msra.mxu3 %v3860_v33 }
  0xb3   :  { %v562_v44 = vadd.f32 %v561_v58, %v3944_v45  ;;  %v585_v63 = vpop.f32.mrf.mxu3  ;;  %v539_v36 = vpop.f32.mrf.mxu1  ;;  %v516_v50 = vadd.f32 %v515_v4, %v3934_v32  ;;  %v3370_v58 = vld [vmem:[#allocation8 + $0xd0] sm:$0xf0]  ;;  %v3615_v4 = vmov 0.0|0.0  }
  0xb4   :  { %v3966_v47 = vor.u32 %v3370_v58, %v3114_v55 }
  0xb5   :  { %v586_v19 = vadd.f32 %v585_v63, %v562_v44  ;;  %1868 = vmatpush.bf16.msra.mxu2 %v3825_v57 }
  0xb6   :  { %4705 = vst [vmem:[#allocation20_spill] sm:$0xff] %v3966_v47  ;;  %1883 = vmatpush.bf16.msra.mxu3 %v3867_v42  ;;  %1607 = vmatpush.bf16.msra.mxu1 %v3966_v47 }
  0xb7   :  { %v3960_v7 = vpack.c.bf16 %v586_v19, %v538_v5  ;;  %v540_v5 = vadd.f32 %v539_v36, %v516_v50 }
  0xb9   :  { %4704 = vst [vmem:[#allocation19_spill] sm:$0xff] %v3960_v7  ;;  %1869 = vmatpush.bf16.msra.mxu2 %v3835_v2 }
  0xba   :  { %v563_v26 = vpop.f32.mrf.mxu2  ;;  %v518_v22 = vpop.f32.mrf.mxu0  ;;  %1884 = vmatpush.bf16.msra.mxu3 %v3879_v60 }
  0xbb   :  { %v564_v44 = vadd.f32 %v563_v26, %v3944_v45  ;;  %v587_v63 = vpop.f32.mrf.mxu3  ;;  %v542_v25 = vpop.f32.mrf.mxu1  ;;  %v519_v55 = vadd.f32 %v518_v22, %v3934_v32 }
  0xbd   :  { %v588_v19 = vadd.f32 %v587_v63, %v564_v44  ;;  %1409 = vmatmul.bf16.vlgmr.msrb.gmra.mxu0 %v3615_v4  ;;  %v543_v63 = vadd.f32 %v542_v25, %v519_v55  ;;  %1870 = vmatpush.bf16.msra.mxu2 %v3840_v9 }
  0xbe   :  { %1423 = vmatmul.bf16.vlgmr.msrb.gmra.mxu1 %v3615_v4  ;;  %1891 = vmatpush.bf16.msrb.mxu0 %v3819_v52 }
  0xbf   :  { %v3972_v7 = vpack.c.bf16 %v588_v19, %v540_v5  ;;  %1437 = vmatmul.bf16.vlgmr.msrb.gmra.mxu2 %v3615_v4  ;;  %1911 = vmatpush.bf16.msrb.mxu1 %v3770_v15 }
  0xc0   :  { %1580 = vmatmul.bf16.vlgmr.msrb.gmra.mxu3 %v3615_v4 }
  0xc1   :  { %1939 = vmatpush.bf16.msrb.mxu3 %v3889_v16  ;;  %1925 = vmatpush.bf16.msrb.mxu2 %v3850_v35 }
  0xc2   :  { %v566_v36 = vpop.f32.mrf.mxu2  ;;  %v520_v26 = vpop.f32.mrf.mxu0  ;;  %1892 = vmatpush.bf16.msrb.mxu0 %v3830_v1 }
  0xc3   :  { %v567_v50 = vadd.f32 %v566_v36, %v3944_v45  ;;  %v590_v58 = vpop.f32.mrf.mxu3  ;;  %v544_v44 = vpop.f32.mrf.mxu1  ;;  %1912 = vmatpush.bf16.msrb.mxu1 %v3778_v23  ;;  %v521_v19 = vadd.f32 %v520_v26, %v3934_v32 }
  0xc5   :  { %v591_v5 = vadd.f32 %v590_v58, %v567_v50  ;;  %1940 = vmatpush.bf16.msrb.mxu3 %v3902_v38  ;;  %1926 = vmatpush.bf16.msrb.mxu2 %v3862_v37 }
  0xc6   :  { %1893 = vmatpush.bf16.msrb.mxu0 %v3853_v24 }
  0xc7   :  { %v652_v22 = vpack.c.bf16 %v591_v5, %v543_v63  ;;  %1913 = vmatpush.bf16.msrb.mxu1 %v3812_v43  ;;  %v545_v63 = vadd.f32 %v544_v44, %v521_v19 }
  0xc9   :  { %664 = vst [vmem:[#allocation2 + $0x18] sm:$0xff] %v652_v22  ;;  %1941 = vmatpush.bf16.msrb.mxu3 %v3912_v34  ;;  %1927 = vmatpush.bf16.msrb.mxu2 %v3871_v53 }
  0xca   :  { %v568_v36 = vpop.f32.mrf.mxu2  ;;  %v523_v50 = vpop.f32.mrf.mxu0  ;;  %1894 = vmatpush.bf16.msrb.mxu0 %v3873_v54 }
  0xcb   :  { %v569_v25 = vadd.f32 %v568_v36, %v3944_v45  ;;  %v592_v55 = vpop.f32.mrf.mxu3  ;;  %v547_v58 = vpop.f32.mrf.mxu1  ;;  %1914 = vmatpush.bf16.msrb.mxu1 %v3823_v56  ;;  %v524_v22 = vadd.f32 %v523_v50, %v3934_v32 }
  0xcd   :  { %v593_v5 = vadd.f32 %v592_v55, %v569_v25  ;;  %1594 = vmatmul.bf16.vlgmr.msra.gmra.mxu0 %v3615_v4  ;;  %1942 = vmatpush.bf16.msrb.mxu3 %v3927_v14 }
  0xce   :  { %1608 = vmatmul.bf16.vlgmr.msra.gmra.mxu1 %v3615_v4  ;;  %1895 = vmatpush.bf16.msrb.mxu0 %v3885_v10  ;;  %v548_v4 = vadd.f32 %v547_v58, %v524_v22  ;;  %v3616_v58 = vmov 0   ;;  %v3208_v22 = vld [vmem:[%s4677_s2 + $0x20] sm:$0xff] }
  0xcf   :  { %v654_v26 = vpack.c.bf16 %v593_v5, %v545_v63  ;;  %1915 = vmatpush.bf16.msrb.mxu1 %v3844_v12  ;;  %v4007_v5 = vperm.slane %v3924_v13, 2  ;;  %3432 = vset.pattern.permute.xlu0 %v3616_v58 }
  0xd0   :  { %1928 = vmatpush.bf16.msrb.mxu2 %v3881_v3  ;;  %1838 = vperm.xlu0 %3432, %v3208_v22  }
  0xd1   :  { %666 = vst [vmem:[#allocation2 + $0x24] sm:$0xff] %v654_v26  ;;  %1943 = vmatpush.bf16.msrb.mxu3 %v3939_v41  ;;  %3433 = vset.pattern.permute.xlu1 %v3616_v58 }
  0xd2   :  { %v571_v44 = vpop.f32.mrf.mxu2  ;;  %v525_v25 = vpop.f32.mrf.mxu0  ;;  %1896 = vmatpush.bf16.msrb.mxu0 %v3899_v29  ;;  %3434 = vset.pattern.permute.xlu2 %v3616_v58 }
  0xd3   :  { %v572_v19 = vadd.f32 %v571_v44, %v3944_v45  ;;  %v595_v36 = vpop.f32.mrf.mxu3  ;;  %v549_v55 = vpop.f32.mrf.mxu1  ;;  %1916 = vmatpush.bf16.msrb.mxu1 %v3858_v21  ;;  %v526_v26 = vadd.f32 %v525_v25, %v3934_v32 }
  0xd4   :  { %1929 = vmatpush.bf16.msrb.mxu2 %v3895_v20 }
  0xd5   :  { %v596_v63 = vadd.f32 %v595_v36, %v572_v19  ;;  %1944 = vmatpush.bf16.msrb.mxu3 %v3952_v62 }
  0xd6   :  { %1897 = vmatpush.bf16.msrb.mxu0 %v3909_v46 }
  0xd7   :  { %v656_v50 = vpack.c.bf16 %v596_v63, %v548_v4  ;;  %1917 = vmatpush.bf16.msrb.mxu1 %v3869_v51  ;;  %v550_v4 = vadd.f32 %v549_v55, %v526_v26  ;;  %v3209_v26 = vld [vmem:[%s4677_s2 + $0x28] sm:$0xff] }
  0xd8   :  { %1930 = vmatpush.bf16.msrb.mxu2 %v3906_v40  ;;  %1843 = vperm.xlu0 %3432, %v3209_v26  }
  0xd9   :  { %668 = vst [vmem:[#allocation2 + $0x30] sm:$0xff] %v656_v50  ;;  %1945 = vmatpush.bf16.msrb.mxu3 %v3958_v6 }
  0xda   :  { %v573_v44 = vpop.f32.mrf.mxu2  ;;  %v609_v36 = vpop.f32.mrf.mxu0  ;;  %1898 = vmatpush.bf16.msrb.mxu0 %v3919_v0 }
  0xdb   :  { %v574_v19 = vadd.f32 %v573_v44, %v3944_v45  ;;  %v597_v13 = vpop.f32.mrf.mxu3  ;;  %v610_v32 = vadd.f32 %v609_v36, %v4007_v5  ;;  %v633_v25 = vpop.f32.mrf.mxu1  ;;  %1918 = vmatpush.bf16.msrb.mxu1 %v3883_v8 }
  0xdc   :  { %1931 = vmatpush.bf16.msrb.mxu2 %v3916_v59 }
  0xdd   :  { %v598_v63 = vadd.f32 %v597_v13, %v574_v19  ;;  %v634_v50 = vadd.f32 %v633_v25, %v610_v32  ;;  %1946 = vmatpush.bf16.msrb.mxu3 %v3966_v47 }
  0xde   :  { %2198 = vmatpush.bf16.msra.mxu0 %v3768_v11 }
  0xdf   :  { %2212 = vmatpush.bf16.msra.mxu1 %v3775_v18  ;;  %v658_v45 = vpack.c.bf16 %v598_v63, %v550_v4  ;;  %v649_v44 = vpack.c.bf16 %v634_v50, %v634_v50 }
  0xe0   :  { %1932 = vmatpush.bf16.msrb.mxu2 %v3931_v31 }
  0xe1   :  { %670 = vst [vmem:[#allocation2 + $0x3c] sm:$0xff] %v658_v45 }
  0xe2   :  { %2199 = vmatpush.bf16.msra.mxu0 %v3773_v39  ;;  %661 = vst [vmem:[#allocation2 + $0x8] sm:$0xf] %v649_v44  ;;  %v1041_v55 = vpop.f32.mrf.mxu2  ;;  %v611_v18 = vpop.f32.mrf.mxu0 }
  0xe3   :  { %2213 = vmatpush.bf16.msra.mxu1 %v3781_v27  ;;  %v4031_v11 = vpop.f32.mrf.mxu3  ;;  %v612_v58 = vadd.f32 %v611_v18, %v4007_v5  ;;  %v635_v22 = vpop.f32.mrf.mxu1 }
  0xe5   :  { %v636_v39 = vadd.f32 %v635_v22, %v612_v58 }
  0xe6   :  { %2200 = vmatpush.bf16.msra.mxu0 %v3784_v28 }
  0xe7   :  { %2214 = vmatpush.bf16.msra.mxu1 %v3816_v30  ;;  %v651_v19 = vpack.c.bf16 %v636_v39, %v636_v39 }
  0xe9   :  { %663 = vst [vmem:[#allocation2 + $0x14] sm:$0xf] %v651_v19 }
  0xea   :  { %2201 = vmatpush.bf16.msra.mxu0 %v3806_v49  ;;  %v1043_v13 = vpop.f32.mrf.mxu2  ;;  %v614_v36 = vpop.f32.mrf.mxu0 }
  0xeb   :  { %2215 = vmatpush.bf16.msra.mxu1 %v3828_v61  ;;  %v1067_v27 = vpop.f32.mrf.mxu3  ;;  %v615_v32 = vadd.f32 %v614_v36, %v4007_v5  ;;  %v638_v25 = vpop.f32.mrf.mxu1 }
  0xed   :  { %v639_v28 = vadd.f32 %v638_v25, %v615_v32 }
  0xee   :  { %2202 = vmatpush.bf16.msra.mxu0 %v3814_v48 }
  0xef   :  { %2216 = vmatpush.bf16.msra.mxu1 %v3848_v17  ;;  %v653_v30 = vpack.c.bf16 %v639_v28, %v639_v28 }
  0xf1   :  { %665 = vst [vmem:[#allocation2 + $0x20] sm:$0xf] %v653_v30 }
  0xf2   :  { %2203 = vmatpush.bf16.msra.mxu0 %v3825_v57  ;;  %v1046_v49 = vpop.f32.mrf.mxu2  ;;  %v616_v61 = vpop.f32.mrf.mxu0 }
  0xf3   :  { %2217 = vmatpush.bf16.msra.mxu1 %v3860_v33  ;;  %v4045_v4 = vpop.f32.mrf.mxu3  ;;  %v617_v63 = vadd.f32 %v616_v61, %v4007_v5  ;;  %v640_v50 = vpop.f32.mrf.mxu1 }
  0xf5   :  { %v641_v45 = vadd.f32 %v640_v50, %v617_v63 }
  0xf6   :  { %2204 = vmatpush.bf16.msra.mxu0 %v3835_v2 }
  0xf7   :  { %2218 = vmatpush.bf16.msra.mxu1 %v3867_v42  ;;  %v655_v48 = vpack.c.bf16 %v641_v45, %v641_v45  ;;  %v2790_v42 = vld [vmem:[%s4679_s4 + $0x3] sm:$0x7] }
  0xf8   :  { %v4061_v19 = vperm.slane %v2790_v42, 0  ;;  %v4063_v25 = vperm.slane %v2790_v42, 1 }
  0xf9   :  { %667 = vst [vmem:[#allocation2 + $0x2c] sm:$0xf] %v655_v48 }
  0xfa   :  { %2205 = vmatpush.bf16.msra.mxu0 %v3840_v9  ;;  %v1048_v57 = vpop.f32.mrf.mxu2  ;;  %v619_v33 = vpop.f32.mrf.mxu0  ;;  %v1042_v28 = vadd.f32 %v1041_v55, %v4061_v19 }
  0xfb   :  { %2219 = vmatpush.bf16.msra.mxu1 %v3879_v60  ;;  %v4052_v17 = vpop.f32.mrf.mxu3  ;;  %v620_v44 = vadd.f32 %v619_v33, %v4007_v5  ;;  %v643_v26 = vpop.f32.mrf.mxu1  ;;  %v4072_v33 = vperm.slane %v2790_v42, 2  ;;  %v1047_v42 = vadd.f32 %v1046_v49, %v4061_v19 }
  0xfd   :  { %v644_v18 = vadd.f32 %v643_v26, %v620_v44  ;;  %v1044_v26 = vadd.f32 %v1043_v13, %v4061_v19 }
  0xff   :  { %v657_v58 = vpack.c.bf16 %v644_v18, %v644_v18 }
 0x101   :  { %669 = vst [vmem:[#allocation2 + $0x38] sm:$0xf] %v657_v58 }
 0x102   :  { %v1051_v2 = vpop.f32.mrf.mxu2  ;;  %v621_v9 = vpop.f32.mrf.mxu0 }
 0x103   :  { %v4058_v22 = vpop.f32.mrf.mxu3  ;;  %v622_v39 = vadd.f32 %v621_v9, %v4007_v5  ;;  %v645_v60 = vpop.f32.mrf.mxu1  ;;  %v1066_v5 = vadd.f32 %v4031_v11, %v1042_v28 }
 0x105   :  { %v646_v36 = vadd.f32 %v645_v60, %v622_v39 }
 0x107   :  { %v659_v32 = vpack.c.bf16 %v646_v36, %v646_v36 }
 0x109   :  { %671 = vst [vmem:[#allocation2 + $0x44] sm:$0xf] %v659_v32  ;;  %v1068_v32 = vadd.f32 %v1067_v27, %v1044_v26 }
 0x10a   :  { %v4066_v30 = vpop.f32.mrf.mxu2  ;;  %v1089_v63 = vpop.f32.mrf.mxu0 }
 0x10b   :  { %v4068_v61 = vpop.f32.mrf.mxu3  ;;  %v1090_v50 = vadd.f32 %v1089_v63, %v4063_v25  ;;  %v1113_v45 = vpop.f32.mrf.mxu1 }
 0x10d   :  { %v1114_v48 = vadd.f32 %v1113_v45, %v1090_v50 }
 0x10f   :  { %v1176_v44 = vpack.c.bf16 %v1114_v48, %v1066_v5 }
 0x111   :  { %1188 = vst [vmem:[#allocation3] sm:$0xff] %v1176_v44 }
 0x112   :  { %v1137_v18 = vpop.f32.mrf.mxu2  ;;  %v1091_v9 = vpop.f32.mrf.mxu0 }
 0x113   :  { %v1138_v55 = vadd.f32 %v1137_v18, %v4072_v33  ;;  %v1161_v58 = vpop.f32.mrf.mxu3  ;;  %v1092_v39 = vadd.f32 %v1091_v9, %v4063_v25  ;;  %v1115_v60 = vpop.f32.mrf.mxu1  ;;  %v1071_v18 = vadd.f32 %v4045_v4, %v1047_v42 }
 0x115   :  { %v1162_v36 = vadd.f32 %v1161_v58, %v1138_v55  ;;  %v1116_v63 = vadd.f32 %v1115_v60, %v1092_v39 }
 0x117   :  { %v1177_v47 = vpack.c.bf16 %v1162_v36, %v1162_v36  ;;  %v1178_v11 = vpack.c.bf16 %v1116_v63, %v1068_v32 }
 0x119   :  { %1189 = vst [vmem:[#allocation3 + $0x8] sm:$0xf] %v1177_v47  ;;  %v1049_v47 = vadd.f32 %v1048_v57, %v4061_v19 }
 0x11a   :  { %1190 = vst [vmem:[#allocation3 + $0xc] sm:$0xff] %v1178_v11  ;;  %v1139_v28 = vpop.f32.mrf.mxu2  ;;  %v1094_v45 = vpop.f32.mrf.mxu0 }
 0x11b   :  { %v1140_v13 = vadd.f32 %v1139_v28, %v4072_v33  ;;  %v1163_v50 = vpop.f32.mrf.mxu3  ;;  %v1095_v5 = vadd.f32 %v1094_v45, %v4063_v25  ;;  %v1118_v48 = vpop.f32.mrf.mxu1  ;;  %v1073_v63 = vadd.f32 %v4052_v17, %v1049_v47  ;;  %v1052_v28 = vadd.f32 %v1051_v2, %v4061_v19 }
 0x11c   :  { %v1054_v47 = vadd.f32 %v4066_v30, %v4061_v19 }
 0x11d   :  { %v1164_v44 = vadd.f32 %v1163_v50, %v1140_v13  ;;  %v1119_v55 = vadd.f32 %v1118_v48, %v1095_v5 }
 0x11f   :  { %v1179_v27 = vpack.c.bf16 %v1164_v44, %v1164_v44  ;;  %v4081_v26 = vpack.c.bf16 %v1119_v55, %v1071_v18  ;;  %v1076_v18 = vadd.f32 %v4058_v22, %v1052_v28  ;;  %v4708_v28 = vld [vmem:[#allocation19_spill] sm:$0xff] }
 0x121   :  { %4706 = vst [vmem:[#allocation21_spill] sm:$0xff] %v4081_v26 }
 0x122   :  { %1191 = vst [vmem:[#allocation3 + $0x14] sm:$0xf] %v1179_v27  ;;  %v1142_v49 = vpop.f32.mrf.mxu2  ;;  %v1096_v39 = vpop.f32.mrf.mxu0 }
 0x123   :  { %v1143_v58 = vadd.f32 %v1142_v49, %v4072_v33  ;;  %v1166_v9 = vpop.f32.mrf.mxu3  ;;  %v1097_v60 = vadd.f32 %v1096_v39, %v4063_v25  ;;  %v1120_v36 = vpop.f32.mrf.mxu1 }
 0x125   :  { %v1167_v32 = vadd.f32 %v1166_v9, %v1143_v58  ;;  %v1121_v11 = vadd.f32 %v1120_v36, %v1097_v60 }
 0x127   :  { %v1181_v4 = vpack.c.bf16 %v1167_v32, %v1167_v32  ;;  %v4087_v42 = vpack.c.bf16 %v1121_v11, %v1073_v63  ;;  %v1078_v32 = vadd.f32 %v4068_v61, %v1054_v47 }
 0x129   :  { %4707 = vst [vmem:[#allocation22_spill] sm:$0xff] %v4087_v42 }
 0x12a   :  { %1193 = vst [vmem:[#allocation3 + $0x20] sm:$0xf] %v1181_v4  ;;  %v1144_v13 = vpop.f32.mrf.mxu2  ;;  %v1099_v45 = vpop.f32.mrf.mxu0 }
 0x12b   :  { %v1145_v57 = vadd.f32 %v1144_v13, %v4072_v33  ;;  %v1168_v50 = vpop.f32.mrf.mxu3  ;;  %v1100_v5 = vadd.f32 %v1099_v45, %v4063_v25  ;;  %v1123_v48 = vpop.f32.mrf.mxu1  ;;  %v1618_v13 = vunpack.c.l.bf16 %v4708_v28 }
 0x12d   :  { %v1169_v44 = vadd.f32 %v1168_v50, %v1145_v57  ;;  %v1124_v55 = vadd.f32 %v1123_v48, %v1100_v5  ;;  %v1619_v50 = vunpack.c.h.bf16 %v4708_v28 }
 0x12f   :  { %v1183_v17 = vpack.c.bf16 %v1169_v44, %v1169_v44  ;;  %v4093_v27 = vpack.c.bf16 %v1124_v55, %v1076_v18 }
 0x131   :  { %1195 = vst [vmem:[#allocation3 + $0x2c] sm:$0xf] %v1183_v17  ;;  %v1728_v55 = vunpack.c.l.bf16 %v4093_v27  ;;  %v1621_v17 = vunpack.c.l.bf16 %v3972_v7 }
 0x132   :  { %v1147_v2 = vpop.f32.mrf.mxu2  ;;  %v1101_v9 = vpop.f32.mrf.mxu0 }
 0x133   :  { %v1148_v49 = vadd.f32 %v1147_v2, %v4072_v33  ;;  %v1171_v58 = vpop.f32.mrf.mxu3  ;;  %v1102_v39 = vadd.f32 %v1101_v9, %v4063_v25  ;;  %v1125_v60 = vpop.f32.mrf.mxu1  ;;  %v1622_v2 = vunpack.c.h.bf16 %v3972_v7 }
 0x135   :  { %v1172_v36 = vadd.f32 %v1171_v58, %v1148_v49  ;;  %v1126_v22 = vadd.f32 %v1125_v60, %v1102_v39 }
 0x137   :  { %v1185_v63 = vpack.c.bf16 %v1172_v36, %v1172_v36  ;;  %v4100_v11 = vpack.c.bf16 %v1126_v22, %v1078_v32 }
 0x139   :  { %1197 = vst [vmem:[#allocation3 + $0x38] sm:$0xf] %v1185_v63  ;;  %v1731_v7 = vunpack.c.l.bf16 %v4100_v11 }
 0x13a   :  { %v1149_v4 = vpop.f32.mrf.mxu2  ;;  %v1410_v57 = vpop.f32.mrf.mxu0 }
 0x13b   :  { %v1150_v19 = vadd.f32 %v1149_v4, %v4072_v33  ;;  %v1173_v30 = vpop.f32.mrf.mxu3  ;;  %v1624_v45 = vadd.f32 %v1618_v13, %v1410_v57  ;;  %v1424_v25 = vpop.f32.mrf.mxu1 }
 0x13c   :  { %v1664_v48 = vadd.f32 %v1619_v50, %v1424_v25  ;;  %v1729_v50 = vunpack.c.h.bf16 %v4093_v27 }
 0x13d   :  { %v1174_v5 = vadd.f32 %v1173_v30, %v1150_v19  ;;  %v3200_v44 = vmul.f32 -1.442695, %v1624_v45  ;;  %v4115_v19 = vld [vmem:[#allocation2 + $0x8] sm:$0xf]  ;;  %v4118_v45 = vld [vmem:[#allocation2 + $0x14] sm:$0xf] }
 0x13e   :  { %v3202_v18 = vmul.f32 -1.442695, %v1664_v48  ;;  %v4125_v48 = vld [vmem:[%s4681_s6] ss:$0 sm:$0xff] }
 0x13f   :  { %v1187_v61 = vpack.c.bf16 %v1174_v5, %v1174_v5  ;;  %3437 = vpow2.f32 %v3200_v44  ;;  %4709 = vst [vmem:[#allocation19_spill] sm:$0xff] %v4125_v48 }
 0x140   :  { %3439 = vpow2.f32 %v3202_v18  ;;  %v4120_v25 = vld [vmem:[#allocation3 + $0x38] sm:$0xf] }
 0x141   :  { %1199 = vst [vmem:[#allocation3 + $0x44] sm:$0xf] %v1187_v61 }
 0x142   :  { %v1412_v33 = vpop.f32.mrf.mxu0  ;;  %v1438_v13 = vpop.f32.mrf.mxu2 }
 0x143   :  { %v1581_v47 = vpop.f32.mrf.mxu3  ;;  %v1625_v58 = vadd.f32 %v1621_v17, %v1412_v33  ;;  %v1426_v9 = vpop.f32.mrf.mxu1  ;;  %v1732_v17 = vunpack.c.h.bf16 %v4100_v11  ;;  %v1707_v11 = vadd.f32 %v4125_v48, %v1438_v13 }
 0x144   :  { %v1734_v49 = vadd.f32 %v1728_v55, %v1581_v47  ;;  %v1665_v39 = vadd.f32 %v1622_v2, %v1426_v9  ;;  %v4157_v47 = vld [vmem:[%s4681_s6 + $0x1] ss:$0 sm:$0xff] }
 0x145   :  { %v3438_v60 = vpop.eup %3437  ;;  %v3201_v63 = vmul.f32 -1.442695, %v1625_v58 }
 0x146   :  { %v3204_v36 = vmul.f32 -1.442695, %v1734_v49  ;;  %v3440_v32 = vpop.eup %3439  ;;  %v4108_v22 = vadd.f32 1.0, %v3438_v60  ;;  %v3203_v28 = vmul.f32 -1.442695, %v1665_v39 }
 0x147   :  { %v4110_v4 = vadd.f32 1.0, %v3440_v32 }
 0x148   :  { %3441 = vpow2.f32 %v3204_v36  ;;  %v1643_v58 = vand.u32 2147483647, %v4108_v22  ;;  %v1645_v9 = vand.u32 2147483648, %v4108_v22  ;;  %vm1639_vm0 = vweird.f32 %v4108_v22 }
 0x149   :  { %3443 = vrcp.f32 %v4108_v22  ;;  %vm1679_vm1 = vweird.f32 %v4110_v4 }
 0x14a   :  { %3445 = vrcp.f32 %v4110_v4  ;;  %v1595_v57 = vpop.f32.mrf.mxu0  ;;  %vm4150_vm2 = vcmp.eq.f32.partialorder %v1643_v58, 8.507059e+37 }
 0x14b   :  { %3447 = vpow2.f32 %v3201_v63  ;;  %v1583_v30 = vpop.f32.mrf.mxu3  ;;  %v1774_v44 = vadd.f32 %v1729_v50, %v1595_v57  ;;  %v1683_v63 = vand.u32 2147483647, %v4110_v4  ;;  %v1440_v50 = vpop.f32.mrf.mxu2 }
 0x14c   :  { %3449 = vpow2.f32 %v3203_v28  ;;  %v1735_v5 = vadd.f32 %v1731_v7, %v1583_v30  ;;  %v1685_v7 = vand.u32 2147483648, %v4110_v4  ;;  %v4166_v58 = vadd.f32 %v4125_v48, %v1440_v50 }
 0x14d   :  { %v3206_v49 = vmul.f32 -1.442695, %v1774_v44  ;;  %vm4168_vm5 = vcmp.eq.f32.partialorder %v1683_v63, 8.507059e+37 }
 0x14e   :  { %v3442_v18 = vpop.eup %3441  ;;  %v3205_v55 = vmul.f32 -1.442695, %v1735_v5  ;;  %v1686_v27 = vor.u32 1.1754944e-38, %v1685_v7  ;;  %v4716_v7 = vunpack.c.l.bf16 %v4115_v19 }
 0x14f   :  { %v3444_v33 = vpop.eup %3443  ;;  %v4131_v2 = vadd.f32 1.0, %v3442_v18  ;;  %v1646_v18 = vor.u32 1.1754944e-38, %v1645_v9 }
 0x150   :  { %v4135_v39 = vpop.eup %3445  ;;  %3451 = vpow2.f32 %v3205_v55  ;;  %v1635_v60 = vmul.f32 %v3444_v33, %v4108_v22  ;;  %vm1640_vm3 = vweird.f32 %v3444_v33 }
 0x151   :  { %v3448_v36 = vpop.eup %3447  ;;  %v1675_v32 = vmul.f32 %v4135_v39, %v4110_v4  ;;  %3453 = vrcp.f32 %v4131_v2  ;;  %vm1680_vm4 = vweird.f32 %v4135_v39  ;;  %vm1641_vm6 = vmor %vm1639_vm0, %vm1640_vm3  ;;  %vm1749_vm8 = vweird.f32 %v4131_v2 }
 0x152   :  { %v3450_v28 = vpop.eup %3449  ;;  %v4146_v30 = vadd.f32 1.0, %v3448_v36  ;;  %3455 = vpow2.f32 %v3206_v49  ;;  %v1636_v57 = vsub.f32 1.0, %v1635_v60  ;;  %v1597_v55 = vpop.f32.mrf.mxu0  ;;  %v4160_v60 = vld [vmem:[#allocation3 + $0x44] sm:$0xf]  ;;  %vm4188_vm7 = vmor %vm1679_vm1, %vm1680_vm4 }
 0x153   :  { %v1676_v5 = vsub.f32 1.0, %v1675_v32  ;;  %v4148_v13 = vadd.f32 1.0, %v3450_v28  ;;  %v1775_v49 = vadd.f32 %v1732_v17, %v1597_v55  ;;  %v1609_v17 = vpop.f32.mrf.mxu1  ;;  %v4725_v28 = vunpack.c.l.bf16 %v4118_v45 }
 0x154   :  { %3457 = vrcp.f32 %v4146_v30  ;;  %v1637_v36 = vmul.f32 %v3444_v33, %v1636_v57  ;;  %v4181_v50 = vadd.f32 %v4157_v47, %v1609_v17  ;;  %v1658_v22 = vand.u32 2147483647, %v4146_v30 }
 0x155   :  { %v1677_v32 = vmul.f32 %v4135_v39, %v1676_v5  ;;  %3459 = vrcp.f32 %v4148_v13  ;;  %v3207_v61 = vmul.f32 -1.442695, %v1775_v49  ;;  %vm1654_vm9 = vweird.f32 %v4146_v30 }
 0x156   :  { %v3452_v9 = vpop.eup %3451  ;;  %v1638_v57 = vadd.f32 %v3444_v33, %v1637_v36  ;;  %v1700_v36 = vand.u32 2147483648, %v4148_v13  ;;  %vm1694_vm10 = vweird.f32 %v4148_v13  ;;  %vm4225_vm11 = vcmp.eq.f32.partialorder %v1658_v22, 8.507059e+37 }
 0x157   :  { %v4172_v55 = vpop.eup %3453  ;;  %v1678_v5 = vadd.f32 %v4135_v39, %v1677_v32  ;;  %v4175_v42 = vadd.f32 1.0, %v3452_v9  ;;  %3461 = vpow2.f32 %v3207_v61 }
 0x158   :  { %v3456_v48 = vpop.eup %3455  ;;  %v1642_v49 = vsel %vm1641_vm6, %v3444_v33, %v1638_v57  ;;  %v1660_v33 = vand.u32 2147483648, %v4146_v30  ;;  %v1745_v61 = vmul.f32 %v4172_v55, %v4131_v2  ;;  %v1753_v57 = vand.u32 2147483647, %v4131_v2 }
 0x159   :  { %3463 = vrcp.f32 %v4175_v42  ;;  %v4195_v32 = vadd.f32 1.0, %v3456_v48  ;;  %v1647_v9 = vsel %vm4150_vm2, %v1646_v18, %v1642_v49  ;;  %v1682_v4 = vsel %vm4188_vm7, %v4135_v39, %v1678_v5 }
 0x15a   :  { %v3458_v17 = vpop.eup %3457  ;;  %v1709_v63 = vmul.f32 %v1707_v11, %v1647_v9  ;;  %v4212_v44 = vsel %vm4168_vm5, %v1686_v27, %v1682_v4  ;;  %v1755_v18 = vand.u32 2147483648, %v4131_v2  ;;  %v1698_v5 = vand.u32 2147483647, %v4148_v13 }
 0x15b   :  { %v4207_v48 = vpop.eup %3459  ;;  %3465 = vrcp.f32 %v4195_v32  ;;  %v1650_v39 = vmul.f32 %v3458_v17, %v4146_v30  ;;  %v4223_v9 = vor.u32 1.1754944e-38, %v1700_v36  ;;  %v1746_v4 = vsub.f32 1.0, %v1745_v61  ;;  %v1611_v0 = vpop.f32.mrf.mxu1 }
 0x15c   :  { %v1690_v11 = vmul.f32 %v4207_v48, %v4148_v13  ;;  %v1711_v49 = vadd.f32 %v1709_v63, %v4716_v7  ;;  %v1715_v31 = vsub.f32 1.0, %v4212_v44  ;;  %vm1655_vm12 = vweird.f32 %v3458_v17 }
 0x15d   :  { %v1651_v27 = vsub.f32 1.0, %v1650_v39  ;;  %v3462_v26 = vpop.eup %3461  ;;  %v1661_v8 = vor.u32 1.1754944e-38, %v1660_v33  ;;  %v1747_v62 = vmul.f32 %v4172_v55, %v1746_v4  ;;  %vm1750_vm13 = vweird.f32 %v4172_v55  ;;  %vm1656_vm15 = vmor %vm1654_vm9, %vm1655_vm12 }
 0x15e   :  { %v1691_v6 = vsub.f32 1.0, %v1690_v11  ;;  %v4230_v63 = vadd.f32 1.0, %v3462_v26  ;;  %vm1695_vm14 = vweird.f32 %v4207_v48  ;;  %3467 = vtanh.f32 %v1711_v49  ;;  %vm1751_vm1 = vmor %vm1749_vm8, %vm1750_vm13  ;;  %v1839_v11 = vpop.permute.xlu0 %1838 }
 0x15f   :  { %v3464_v19 = vpop.eup %3463  ;;  %v1652_v7 = vmul.f32 %v3458_v17, %v1651_v27  ;;  %v1748_v26 = vadd.f32 %v4172_v55, %v1747_v62  ;;  %v1768_v33 = vand.u32 2147483647, %v4175_v42  ;;  %vm4242_vm0 = vcmp.eq.f32.partialorder %v1698_v5, 8.507059e+37  ;;  %vm4265_vm6 = vmor %vm1694_vm10, %vm1695_vm14 }
 0x160   :  { %v1692_v36 = vmul.f32 %v4207_v48, %v1691_v6  ;;  %v1760_v22 = vmul.f32 %v3464_v19, %v4175_v42  ;;  %3469 = vrcp.f32 %v4230_v63  ;;  %v1756_v49 = vor.u32 1.1754944e-38, %v1755_v18 }
 0x161   :  { %v3466_v61 = vpop.eup %3465  ;;  %v1653_v39 = vadd.f32 %v3458_v17, %v1652_v7  ;;  %v1770_v4 = vand.u32 2147483648, %v4175_v42  ;;  %v1752_v62 = vsel %vm1751_vm1, %v4172_v55, %v1748_v26  ;;  %vm1754_vm2 = vcmp.eq.f32.partialorder %v1753_v57, 8.507059e+37 }
 0x162   :  { %v1785_v6 = vmul.f32 %v3466_v61, %v4195_v32  ;;  %v1761_v27 = vsub.f32 1.0, %v1760_v22  ;;  %v1693_v30 = vadd.f32 %v4207_v48, %v1692_v36  ;;  %v1757_v59 = vsel %vm1754_vm2, %v1756_v49, %v1752_v62 }
 0x163   :  { %v1657_v7 = vsel %vm1656_vm15, %v3458_v17, %v1653_v39  ;;  %vm1765_vm3 = vweird.f32 %v3464_v19  ;;  %v1819_v18 = vmul.f32 %v4181_v50, %v1757_v59  ;;  %vm1764_vm4 = vweird.f32 %v4175_v42 }
 0x164   :  { %v1662_v5 = vsel %vm4225_vm11, %v1661_v8, %v1657_v7  ;;  %v1762_v51 = vmul.f32 %v3464_v19, %v1761_v27  ;;  %vm4257_vm5 = vcmp.eq.f32.partialorder %v1768_v33, 8.507059e+37  ;;  %v3468_v17 = vpop.eup %3467  ;;  %v1771_v57 = vor.u32 1.1754944e-38, %v1770_v4  ;;  %vm1766_vm7 = vmor %vm1764_vm4, %vm1765_vm3  ;;  %v3220_v27 = vld [vmem:[%s4677_s2 + $0x10] sm:$0xff] }
 0x165   :  { %v1710_v2 = vmul.f32 %v4166_v58, %v1662_v5  ;;  %v1818_v58 = vadd.f32 %v4157_v47, %v1611_v0  ;;  %v1786_v59 = vsub.f32 1.0, %v1785_v6  ;;  %v1697_v42 = vsel %vm4265_vm6, %v4207_v48, %v1693_v30  ;;  %2172 = vperm.xlu1 %3433, %v3220_v27  }
 0x166   :  { %v1763_v55 = vadd.f32 %v3464_v19, %v1762_v51  ;;  %v3470_v50 = vpop.eup %3469  ;;  %v4726_v39 = vunpack.c.l.bf16 %v4120_v25  ;;  %vm1790_vm8 = vweird.f32 %v3466_v61  ;;  %v1793_v0 = vand.u32 2147483647, %v4195_v32 }
 0x167   :  { %v1712_v36 = vadd.f32 %v1710_v2, %v4725_v28  ;;  %v1800_v51 = vmul.f32 %v3470_v50, %v4230_v63  ;;  %v1787_v33 = vmul.f32 %v3466_v61, %v1786_v59  ;;  %vm1789_vm9 = vweird.f32 %v4195_v32  ;;  %v3221_v59 = vld [vmem:[%s4677_s2 + $0x18] sm:$0xff] }
 0x168   :  { %v1821_v13 = vadd.f32 %v1819_v18, %v4726_v39  ;;  %v1767_v26 = vsel %vm1766_vm7, %v3464_v19, %v1763_v55  ;;  %v1795_v45 = vand.u32 2147483648, %v4195_v32  ;;  %v1717_v48 = vmul.f32 %v3468_v17, %v1715_v31  ;;  %vm1791_vm10 = vmor %vm1789_vm9, %vm1790_vm8 }
 0x169   :  { %3471 = vtanh.f32 %v1712_v36  ;;  %v1772_v6 = vsel %vm4257_vm5, %v1771_v57, %v1767_v26  ;;  %v1788_v49 = vadd.f32 %v3466_v61, %v1787_v33  ;;  %v1719_v19 = vmul.f32 0.0, %v4212_v44 }
 0x16a   :  { %3473 = vtanh.f32 %v1821_v13  ;;  %v1820_v25 = vmul.f32 %v1818_v58, %v1772_v6  ;;  %v1702_v4 = vsel %vm4242_vm0, %v4223_v9, %v1697_v42  ;;  %v1796_v30 = vor.u32 1.1754944e-38, %v1795_v45 }
 0x16b   :  { %v1801_v7 = vsub.f32 1.0, %v1800_v51  ;;  %v4727_v31 = vunpack.c.l.bf16 %v4160_v60  ;;  %v1792_v62 = vsel %vm1791_vm10, %v3466_v61, %v1788_v49  ;;  %vm1794_vm11 = vcmp.eq.f32.partialorder %v1793_v0, 8.507059e+37 }
 0x16c   :  { %v1810_v5 = vand.u32 2147483648, %v4230_v63  ;;  %v1797_v2 = vsel %vm1794_vm11, %v1796_v30, %v1792_v62  ;;  %vm1805_vm12 = vweird.f32 %v3470_v50  ;;  %v1808_v44 = vand.u32 2147483647, %v4230_v63 }
 0x16d   :  { %v1822_v32 = vadd.f32 %v1820_v25, %v4727_v31  ;;  %v1802_v18 = vmul.f32 %v3470_v50, %v1801_v7  ;;  %v4296_v22 = vadd.f32 %v1719_v19, %v1717_v48  ;;  %v1716_v9 = vsub.f32 1.0, %v1702_v4  ;;  %2177 = vperm.xlu1 %3433, %v3221_v59   ;;  %v1844_v19 = vpop.permute.xlu0 %1843 }
 0x16e   :  { %v1825_v17 = vsub.f32 1.0, %v1797_v2  ;;  %vm1804_vm13 = vweird.f32 %v4230_v63  ;;  %v1720_v57 = vmul.f32 0.0, %v1702_v4  ;;  %v1811_v58 = vor.u32 1.1754944e-38, %v1810_v5 }
 0x16f   :  { %3475 = vtanh.f32 %v1822_v32  ;;  %v3472_v8 = vpop.eup %3471  ;;  %v1803_v55 = vadd.f32 %v3470_v50, %v1802_v18  ;;  %vm1806_vm14 = vmor %vm1804_vm13, %vm1805_vm12  ;;  %v1829_v28 = vmul.f32 0.0, %v1797_v2  ;;  %vm1809_vm15 = vcmp.eq.f32.partialorder %v1808_v44, 8.507059e+37 }
 0x170   :  { %v3474_v60 = vpop.eup %3473  ;;  %v1718_v61 = vmul.f32 %v3472_v8, %v1716_v9  ;;  %v1848_v51 = vpack.c.bf16 %v4296_v22, %v4296_v22 }
 0x171   :  { %v1827_v42 = vmul.f32 %v3474_v60, %v1825_v17  ;;  %v1807_v36 = vsel %vm1806_vm14, %v3470_v50, %v1803_v55  ;;  %v4737_v17 = vld [vmem:[#allocation22_spill] sm:$0xff] }
 0x172   :  { %v4302_v39 = vadd.f32 %v1720_v57, %v1718_v61  ;;  %v1812_v13 = vsel %vm1809_vm15, %v1811_v58, %v1807_v36  ;;  %v1859_v25 = vunpack.c.l.b16 %v1848_v51  ;;  %v2068_v8 = vunpack.c.l.bf16 %v4737_v17 }
 0x173   :  { %v1831_v63 = vadd.f32 %v1829_v28, %v1827_v42  ;;  %v1826_v26 = vsub.f32 1.0, %v1812_v13  ;;  %v1830_v48 = vmul.f32 0.0, %v1812_v13 }
 0x174   :  { %v3395_v0 = vpack.c.bf16 %v4302_v39, %v4296_v22  ;;  %v1849_v6 = vpack.c.bf16 %v4302_v39, %v4302_v39 }
 0x175   :  { %v3476_v33 = vpop.eup %3475  ;;  %v4310_v45 = vmul.f32 %v1839_v11, %v1831_v63 }
 0x176   :  { %v1828_v50 = vmul.f32 %v3476_v33, %v1826_v26  ;;  %3396 = vst [vmem:[%s4682_s7] sm:$0xff] %v3395_v0   ;;  %v1860_v49 = vunpack.c.l.b16 %v1849_v6  ;;  %v4365_v26 = vld [vmem:[#allocation2 + $0x20] sm:$0xf]  ;;  %v4371_v6 = vld [vmem:[#allocation2 + $0x2c] sm:$0xf] }
 0x177   :  { %v1852_v30 = vpack.c.bf16 %v4310_v45, %v4310_v45 }
 0x178   :  { %v1832_v27 = vadd.f32 %v1830_v48, %v1828_v50  ;;  %v1861_v4 = vpack.c.b16 %v1860_v49, %v1859_v25  ;;  %v4373_v48 = vld [vmem:[#allocation3 + $0x20] sm:$0xf]  ;;  %v1960_v49 = vunpack.c.l.bf16 %v4365_v26 }
 0x179   :  { %v1907_v62 = vunpack.c.l.b16 %v1852_v30 }
 0x17a   :  { %v4317_v7 = vmul.f32 %v1844_v19, %v1832_v27  ;;  %1871 = vmatmul.bf16.vlgmr.msra.gmra.mxu2 %v1861_v4  ;;  %1885 = vmatmul.bf16.vlgmr.msra.gmra.mxu3 %v1861_v4 }
 0x17b   :  { %1899 = vmatmul.bf16.vlgmr.msrb.gmra.mxu0 %v1861_v4  ;;  %2226 = vmatpush.bf16.msra.mxu2 %v3819_v52  ;;  %v4731_v52 = vld [vmem:[#allocation17_spill] sm:$0xff]  ;;  %v1963_v4 = vunpack.c.l.bf16 %v4371_v6 }
 0x17c   :  { %v1853_v31 = vpack.c.bf16 %v4317_v7, %v4317_v7  ;;  %v3400_v32 = vpack.c.bf16 %v4317_v7, %v4310_v45  ;;  %2246 = vmatpush.bf16.msra.mxu3 %v3770_v15  ;;  %2260 = vmatpush.bf16.msrb.mxu0 %v3850_v35  ;;  %v4728_v15 = vld [vmem:[#allocation12_spill] sm:$0xff] }
 0x17d   :  { %v4735_v35 = vld [vmem:[#allocation20_spill] sm:$0xff] }
 0x17e   :  { %3422 = vst [vmem:[%s4683_s8 + $0x10] sm:$0xff] %v3400_v32   ;;  %v1908_v5 = vunpack.c.l.b16 %v1853_v31  ;;  %v2067_v31 = vunpack.c.l.bf16 %v4373_v48  ;;  %v2069_v32 = vunpack.c.h.bf16 %v4737_v17 }
 0x17f   :  { %2227 = vmatpush.bf16.msra.mxu2 %v3830_v1  ;;  %v4733_v1 = vld [vmem:[#allocation16_spill] sm:$0xff] }
 0x180   :  { %v1909_v2 = vpack.c.b16 %v1908_v5, %v1907_v62  ;;  %2247 = vmatpush.bf16.msra.mxu3 %v3778_v23  ;;  %2261 = vmatpush.bf16.msrb.mxu0 %v3862_v37  ;;  %v4729_v23 = vld [vmem:[#allocation14_spill] sm:$0xff]  ;;  %v4738_v5 = vld [vmem:[#allocation19_spill] sm:$0xff] }
 0x182   :  { %1919 = vmatmul.bf16.vlgmr.msrb.gmra.mxu1 %v1909_v2 }
 0x183   :  { %2274 = vmatpush.bf16.msrb.mxu1 %v3889_v16  ;;  %2228 = vmatpush.bf16.msra.mxu2 %v3853_v24  ;;  %v1954_v24 = vld [vmem:[#allocation2 + $0x18] sm:$0xff] }
 0x184   :  { %2248 = vmatpush.bf16.msra.mxu3 %v3812_v43  ;;  %2262 = vmatpush.bf16.msrb.mxu0 %v3871_v53  ;;  %v4730_v43 = vld [vmem:[#allocation15_spill] sm:$0xff]  ;;  %v1959_v37 = vunpack.c.h.bf16 %v1954_v24 }
 0x187   :  { %2275 = vmatpush.bf16.msrb.mxu1 %v3902_v38  ;;  %2229 = vmatpush.bf16.msra.mxu2 %v3873_v54 }
 0x188   :  { %2249 = vmatpush.bf16.msra.mxu3 %v3823_v56  ;;  %2263 = vmatpush.bf16.msrb.mxu0 %v3881_v3  ;;  %v4732_v56 = vld [vmem:[#allocation13_spill] sm:$0xff] }
 0x189   :  { %v4736_v3 = vld [vmem:[#allocation21_spill] sm:$0xff] }
 0x18a   :  { %1933 = vmatmul.bf16.vlgmr.msrb.gmra.mxu2 %v1909_v2  ;;  %1947 = vmatmul.bf16.vlgmr.msrb.gmra.mxu3 %v1909_v2  ;;  %v2066_v33 = vunpack.c.h.bf16 %v4736_v3 }
 0x18b   :  { %2230 = vmatpush.bf16.msra.mxu2 %v3885_v10  ;;  %2276 = vmatpush.bf16.msrb.mxu1 %v3912_v34  ;;  %v2065_v10 = vunpack.c.l.bf16 %v4736_v3 }
 0x18c   :  { %2250 = vmatpush.bf16.msra.mxu3 %v3844_v12  ;;  %2264 = vmatpush.bf16.msrb.mxu0 %v3895_v20  ;;  %v4734_v12 = vld [vmem:[#allocation18_spill] sm:$0xff] }
 0x18f   :  { %2231 = vmatpush.bf16.msra.mxu2 %v3899_v29  ;;  %2277 = vmatpush.bf16.msrb.mxu1 %v3927_v14  ;;  %v1956_v14 = vld [vmem:[#allocation2 + $0x24] sm:$0xff] }
 0x190   :  { %2251 = vmatpush.bf16.msra.mxu3 %v3858_v21  ;;  %2265 = vmatpush.bf16.msrb.mxu0 %v3906_v40  ;;  %v1958_v21 = vunpack.c.l.bf16 %v1954_v24  ;;  %v1961_v18 = vunpack.c.l.bf16 %v1956_v14  ;;  %v1962_v44 = vunpack.c.h.bf16 %v1956_v14 }
 0x193   :  { %2232 = vmatpush.bf16.msra.mxu2 %v3909_v46  ;;  %2278 = vmatpush.bf16.msrb.mxu1 %v3939_v41 }
 0x194   :  { %2252 = vmatpush.bf16.msra.mxu3 %v4728_v15  ;;  %2266 = vmatpush.bf16.msrb.mxu0 %v4729_v23 }
 0x197   :  { %2233 = vmatpush.bf16.msra.mxu2 %v4730_v43  ;;  %2279 = vmatpush.bf16.msrb.mxu1 %v4731_v52 }
 0x198   :  { %2253 = vmatpush.bf16.msra.mxu3 %v4732_v56  ;;  %2267 = vmatpush.bf16.msrb.mxu0 %v4733_v1 }
 0x19b   :  { %2280 = vmatpush.bf16.msrb.mxu1 %v4734_v12 }
 0x19f   :  { %2281 = vmatpush.bf16.msrb.mxu1 %v4735_v35 }
 0x1f8   :  { %v1900_v41 = vpop.f32.mrf.mxu0 }
 0x1f9   :  { %v2044_v2 = vadd.f32 %v4738_v5, %v1900_v41 }
 0x1fd   :  { %v1872_v53 = vpop.f32.mrf.mxu2  ;;  %v1886_v54 = vpop.f32.mrf.mxu3 }
 0x1fe   :  { %v1964_v16 = vadd.f32 %v1958_v21, %v1872_v53  ;;  %v2004_v20 = vadd.f32 %v1959_v37, %v1886_v54 }
 0x1ff   :  { %v1920_v29 = vpop.f32.mrf.mxu1 }
 0x200   :  { %v2071_v38 = vadd.f32 %v2065_v10, %v1920_v29  ;;  %v3212_v40 = vmul.f32 -1.442695, %v1964_v16  ;;  %v3214_v46 = vmul.f32 -1.442695, %v2004_v20  ;;  %v1902_v27 = vpop.f32.mrf.mxu0 }
 0x201   :  { %v4390_v1 = vadd.f32 %v4738_v5, %v1902_v27 }
 0x202   :  { %v3216_v34 = vmul.f32 -1.442695, %v2071_v38  ;;  %3477 = vpow2.f32 %v3212_v40 }
 0x203   :  { %3479 = vpow2.f32 %v3214_v46 }
 0x204   :  { %3481 = vpow2.f32 %v3216_v34 }
 0x205   :  { %v1874_v9 = vpop.f32.mrf.mxu2  ;;  %v1888_v11 = vpop.f32.mrf.mxu3 }
 0x206   :  { %v1965_v55 = vadd.f32 %v1961_v18, %v1874_v9  ;;  %v2005_v60 = vadd.f32 %v1962_v44, %v1888_v11 }
 0x207   :  { %v1922_v61 = vpop.f32.mrf.mxu1 }
 0x208   :  { %v2072_v57 = vadd.f32 %v2068_v8, %v1922_v61  ;;  %v3478_v58 = vpop.eup %3477  ;;  %v3213_v59 = vmul.f32 -1.442695, %v1965_v55  ;;  %v3215_v36 = vmul.f32 -1.442695, %v2005_v60 }
 0x209   :  { %v3480_v42 = vpop.eup %3479  ;;  %v4360_v28 = vadd.f32 1.0, %v3478_v58 }
 0x20a   :  { %v3482_v13 = vpop.eup %3481  ;;  %v4362_v51 = vadd.f32 1.0, %v3480_v42  ;;  %3483 = vpow2.f32 %v3213_v59  ;;  %v3217_v63 = vmul.f32 -1.442695, %v2072_v57 }
 0x20b   :  { %3485 = vrcp.f32 %v4360_v28  ;;  %v4369_v0 = vadd.f32 1.0, %v3482_v13  ;;  %v1983_v15 = vand.u32 2147483647, %v4360_v28  ;;  %v1985_v23 = vand.u32 2147483648, %v4360_v28 }
 0x20c   :  { %3487 = vrcp.f32 %v4362_v51  ;;  %vm1979_vm0 = vweird.f32 %v4360_v28  ;;  %v2023_v24 = vand.u32 2147483647, %v4362_v51  ;;  %v2025_v21 = vand.u32 2147483648, %v4362_v51 }
 0x20d   :  { %3489 = vpow2.f32 %v3215_v36  ;;  %v1934_v50 = vpop.f32.mrf.mxu2  ;;  %v1948_v3 = vpop.f32.mrf.mxu3  ;;  %v2090_v10 = vand.u32 2147483647, %v4369_v0  ;;  %v2092_v16 = vand.u32 2147483648, %v4369_v0  ;;  %vm4403_vm1 = vcmp.eq.f32.partialorder %v1983_v15, 8.507059e+37 }
 0x20e   :  { %3491 = vpow2.f32 %v3217_v63  ;;  %v2111_v25 = vadd.f32 %v2066_v33, %v1934_v50  ;;  %v1986_v38 = vor.u32 1.1754944e-38, %v1985_v23  ;;  %vm2019_vm2 = vweird.f32 %v4362_v51 }
 0x20f   :  { %3493 = vrcp.f32 %v4369_v0  ;;  %v2026_v18 = vor.u32 1.1754944e-38, %v2025_v21  ;;  %vm2086_vm4 = vweird.f32 %v4369_v0  ;;  %v2151_v44 = vadd.f32 %v4157_v47, %v1948_v3 }
 0x210   :  { %v3484_v19 = vpop.eup %3483  ;;  %v3218_v30 = vmul.f32 -1.442695, %v2111_v25  ;;  %vm4418_vm5 = vcmp.eq.f32.partialorder %v2090_v10, 8.507059e+37  ;;  %v2093_v55 = vor.u32 1.1754944e-38, %v2092_v16  ;;  %vm4426_vm8 = vcmp.eq.f32.partialorder %v2023_v24, 8.507059e+37 }
 0x211   :  { %v3486_v62 = vpop.eup %3485  ;;  %v4383_v43 = vadd.f32 1.0, %v3484_v19 }
 0x212   :  { %v4385_v52 = vpop.eup %3487  ;;  %v1975_v56 = vmul.f32 %v3486_v62, %v4360_v28  ;;  %3495 = vpow2.f32 %v3218_v30  ;;  %vm1980_vm3 = vweird.f32 %v3486_v62 }
 0x213   :  { %v3490_v12 = vpop.eup %3489  ;;  %v2015_v35 = vmul.f32 %v4385_v52, %v4362_v51  ;;  %3497 = vrcp.f32 %v4383_v43  ;;  %v1998_v14 = vand.u32 2147483647, %v4383_v43  ;;  %vm1981_vm6 = vmor %vm1979_vm0, %vm1980_vm3  ;;  %vm2020_vm7 = vweird.f32 %v4385_v52 }
 0x214   :  { %v3492_v37 = vpop.eup %3491  ;;  %v1976_v53 = vsub.f32 1.0, %v1975_v56  ;;  %v4397_v54 = vadd.f32 1.0, %v3490_v12  ;;  %vm1994_vm9 = vweird.f32 %v4383_v43  ;;  %v2000_v58 = vand.u32 2147483648, %v4383_v43  ;;  %vm4458_vm14 = vmor %vm2019_vm2, %vm2020_vm7 }
 0x215   :  { %v4401_v20 = vpop.eup %3493  ;;  %v2016_v40 = vsub.f32 1.0, %v2015_v35  ;;  %v4408_v46 = vadd.f32 1.0, %v3492_v37  ;;  %v1936_v60 = vpop.f32.mrf.mxu2  ;;  %vm4435_vm10 = vcmp.eq.f32.partialorder %v1998_v14, 8.507059e+37 }
 0x216   :  { %v1977_v34 = vmul.f32 %v3486_v62, %v1976_v53  ;;  %3499 = vrcp.f32 %v4397_v54  ;;  %v2082_v17 = vmul.f32 %v4401_v20, %v4369_v0  ;;  %v2112_v50 = vadd.f32 %v2069_v32, %v1936_v60 }
 0x217   :  { %v2017_v41 = vmul.f32 %v4385_v52, %v2016_v40  ;;  %3501 = vrcp.f32 %v4408_v46  ;;  %vm2087_vm11 = vweird.f32 %v4401_v20  ;;  %vm2034_vm13 = vweird.f32 %v4397_v54 }
 0x218   :  { %v3496_v9 = vpop.eup %3495  ;;  %v1978_v11 = vadd.f32 %v3486_v62, %v1977_v34  ;;  %v2083_v28 = vsub.f32 1.0, %v2082_v17  ;;  %v3219_v12 = vmul.f32 -1.442695, %v2112_v50  ;;  %v2038_v26 = vand.u32 2147483647, %v4397_v54  ;;  %vm2088_vm15 = vmor %vm2086_vm4, %vm2087_vm11  ;;  %v2501_v50 = vld [vmem:[%s4677_s2] sm:$0xff] }
 0x219   :  { %v3498_v61 = vpop.eup %3497  ;;  %v4432_v59 = vadd.f32 1.0, %v3496_v9  ;;  %v2018_v33 = vadd.f32 %v4385_v52, %v2017_v41  ;;  %v2040_v21 = vand.u32 2147483648, %v4397_v54  ;;  %v2107_v17 = vand.u32 2147483648, %v4408_v46  ;;  %2505 = vperm.xlu2 %3434, %v2501_v50  }
 0x21a   :  { %v1982_v42 = vsel %vm1981_vm6, %v3486_v62, %v1978_v11  ;;  %v1990_v36 = vmul.f32 %v3498_v61, %v4383_v43  ;;  %v2084_v30 = vmul.f32 %v4401_v20, %v2083_v28  ;;  %vm1995_vm12 = vweird.f32 %v3498_v61 }
 0x21b   :  { %v1987_v63 = vsel %vm4403_vm1, %v1986_v38, %v1982_v42  ;;  %3503 = vrcp.f32 %v4432_v59  ;;  %v2001_v62 = vor.u32 1.1754944e-38, %v2000_v58  ;;  %v2022_v35 = vsel %vm4458_vm14, %v4385_v52, %v2018_v33  ;;  %vm1996_vm0 = vmor %vm1994_vm9, %vm1995_vm12  ;;  %v1950_v42 = vpop.f32.mrf.mxu3 }
 0x21c   :  { %v4443_v25 = vpop.eup %3499  ;;  %v2046_v27 = vmul.f32 %v2044_v2, %v1987_v63  ;;  %v1991_v19 = vsub.f32 1.0, %v1990_v36  ;;  %v2085_v56 = vadd.f32 %v4401_v20, %v2084_v30  ;;  %v2027_v10 = vsel %vm4426_vm8, %v2026_v18, %v2022_v35 }
 0x21d   :  { %v2030_v5 = vmul.f32 %v4443_v25, %v4397_v54  ;;  %v4450_v15 = vpop.eup %3501  ;;  %vm2035_vm1 = vweird.f32 %v4443_v25  ;;  %vm4488_vm2 = vcmp.eq.f32.partialorder %v2038_v26, 8.507059e+37  ;;  %v2052_v18 = vsub.f32 1.0, %v2027_v10 }
 0x21e   :  { %v2048_v32 = vadd.f32 %v2046_v27, %v1960_v49  ;;  %v1992_v23 = vmul.f32 %v3498_v61, %v1991_v19  ;;  %v2097_v51 = vmul.f32 %v4450_v15, %v4408_v46  ;;  %v2089_v37 = vsel %vm2088_vm15, %v4401_v20, %v2085_v56  ;;  %vm4501_vm4 = vmor %vm2034_vm13, %vm2035_vm1 }
 0x21f   :  { %v2031_v24 = vsub.f32 1.0, %v2030_v5  ;;  %v2094_v0 = vsel %vm4418_vm5, %v2093_v55, %v2089_v37  ;;  %vm2102_vm3 = vweird.f32 %v4450_v15  ;;  %v2041_v9 = vor.u32 1.1754944e-38, %v2040_v21 }
 0x220   :  { %3505 = vtanh.f32 %v2048_v32  ;;  %v1993_v49 = vadd.f32 %v3498_v61, %v1992_v23  ;;  %v2098_v3 = vsub.f32 1.0, %v2097_v51  ;;  %v2153_v38 = vmul.f32 %v2151_v44, %v2094_v0 }
 0x221   :  { %v3504_v53 = vpop.eup %3503  ;;  %v2032_v52 = vmul.f32 %v4443_v25, %v2031_v24  ;;  %3507 = vpow2.f32 %v3219_v12  ;;  %vm2101_vm5 = vweird.f32 %v4408_v46  ;;  %v2105_v55 = vand.u32 2147483647, %v4408_v46  ;;  %v2502_v24 = vld [vmem:[%s4677_s2 + $0x8] sm:$0xff] }
 0x222   :  { %v1997_v16 = vsel %vm1996_vm0, %v3498_v61, %v1993_v49  ;;  %v2122_v20 = vmul.f32 %v3504_v53, %v4432_v59  ;;  %v2099_v40 = vmul.f32 %v4450_v15, %v2098_v3  ;;  %v2155_v6 = vadd.f32 %v2153_v38, %v2067_v31  ;;  %vm4514_vm6 = vmor %vm2101_vm5, %vm2102_vm3  ;;  %2510 = vperm.xlu2 %3434, %v2502_v24  }
 0x223   :  { %v2002_v29 = vsel %vm4435_vm10, %v2001_v62, %v1997_v16  ;;  %v2033_v43 = vadd.f32 %v4443_v25, %v2032_v52  ;;  %vm2126_vm7 = vweird.f32 %v4432_v59  ;;  %vm2127_vm8 = vweird.f32 %v3504_v53  ;;  %v2064_v62 = vld [vmem:[#allocation3 + $0x2c] sm:$0xf] }
 0x224   :  { %v2047_v34 = vmul.f32 %v4390_v1, %v2002_v29  ;;  %v2123_v41 = vsub.f32 1.0, %v2122_v20  ;;  %v2100_v11 = vadd.f32 %v4450_v15, %v2099_v40  ;;  %v2108_v36 = vor.u32 1.1754944e-38, %v2107_v17  ;;  %vm4522_vm9 = vmor %vm2126_vm7, %vm2127_vm8  ;;  %v2173_v29 = vpop.permute.xlu1 %2172 }
 0x225   :  { %v2037_v57 = vsel %vm4501_vm4, %v4443_v25, %v2033_v43  ;;  %v2130_v31 = vand.u32 2147483647, %v4432_v59  ;;  %v2132_v13 = vand.u32 2147483648, %v4432_v59  ;;  %vm2106_vm10 = vcmp.eq.f32.partialorder %v2105_v55, 8.507059e+37 }
 0x226   :  { %v3506_v8 = vpop.eup %3505  ;;  %v2049_v44 = vadd.f32 %v2047_v34, %v1963_v4  ;;  %v2124_v60 = vmul.f32 %v3504_v53, %v2123_v41  ;;  %v2104_v46 = vsel %vm4514_vm6, %v4450_v15, %v2100_v11  ;;  %v2042_v63 = vsel %vm4488_vm2, %v2041_v9, %v2037_v57 }
 0x227   :  { %v3508_v61 = vpop.eup %3507  ;;  %v2054_v28 = vmul.f32 %v3506_v8, %v2052_v18  ;;  %v2056_v25 = vmul.f32 %v2027_v10, %v4296_v22  ;;  %v2109_v27 = vsel %vm2106_vm10, %v2108_v36, %v2104_v46  ;;  %v2133_v19 = vor.u32 1.1754944e-38, %v2132_v13 }
 0x228   :  { %3509 = vtanh.f32 %v2049_v44  ;;  %v2120_v54 = vadd.f32 1.0, %v3508_v61  ;;  %v2125_v58 = vadd.f32 %v3504_v53, %v2124_v60  ;;  %v2152_v59 = vadd.f32 %v4157_v47, %v1950_v42 }
 0x229   :  { %vm2131_vm11 = vcmp.eq.f32.partialorder %v2130_v31, 8.507059e+37  ;;  %v2053_v30 = vsub.f32 1.0, %v2042_v63  ;;  %v4537_v15 = vadd.f32 %v2056_v25, %v2054_v28  ;;  %v2057_v23 = vmul.f32 %v2042_v63, %v4302_v39  ;;  %v2291_v63 = vld [vmem:[#allocation2 + $0x3c] sm:$0xff] }
 0x22a   :  { %3511 = vrcp.f32 %v2120_v54  ;;  %v2129_v33 = vsel %vm4522_vm9, %v3504_v53, %v2125_v58  ;;  %v2154_v2 = vmul.f32 %v2152_v59, %v2109_v27  ;;  %v2070_v35 = vunpack.c.l.bf16 %v2064_v62 }
 0x22b   :  { %3513 = vtanh.f32 %v2155_v6  ;;  %v2134_v5 = vsel %vm2131_vm11, %v2133_v19, %v2129_v33  ;;  %v2182_v51 = vpack.c.bf16 %v4537_v15, %v4537_v15  ;;  %v2145_v0 = vand.u32 2147483647, %v2120_v54 }
 0x22c   :  { %v2159_v22 = vsub.f32 1.0, %v2134_v5  ;;  %v2156_v49 = vadd.f32 %v2154_v2, %v2070_v35  ;;  %v2147_v3 = vand.u32 2147483648, %v2120_v54  ;;  %v2163_v43 = vmul.f32 %v2134_v5, %v4310_v45  ;;  %v2178_v1 = vpop.permute.xlu1 %2177 }
 0x22d   :  { %v2194_v16 = vunpack.c.l.b16 %v2182_v51  ;;  %vm2141_vm13 = vweird.f32 %v2120_v54  ;;  %vm2146_vm15 = vcmp.eq.f32.partialorder %v2145_v0, 8.507059e+37  ;;  %v2296_v33 = vunpack.c.l.bf16 %v2291_v63 }
 0x22e   :  { %v3510_v32 = vpop.eup %3509  ;;  %3515 = vtanh.f32 %v2156_v49  ;;  %v2148_v34 = vor.u32 1.1754944e-38, %v2147_v3  ;;  %v2297_v50 = vunpack.c.h.bf16 %v2291_v63 }
 0x22f   :  { %v2055_v56 = vmul.f32 %v3510_v32, %v2053_v30 }
 0x230   :  { %v3512_v12 = vpop.eup %3511 }
 0x231   :  { %v2137_v47 = vmul.f32 %v3512_v12, %v2120_v54  ;;  %v4543_v26 = vadd.f32 %v2057_v23, %v2055_v56  ;;  %v3514_v21 = vpop.eup %3513  ;;  %vm2142_vm12 = vweird.f32 %v3512_v12  ;;  %v2289_v54 = vld [vmem:[#allocation2 + $0x30] sm:$0xff]  ;;  %v2395_v23 = vld [vmem:[#allocation3] sm:$0xff] }
 0x232   :  { %v2161_v52 = vmul.f32 %v3514_v21, %v2159_v22  ;;  %vm2143_vm14 = vmor %vm2141_vm13, %vm2142_vm12  ;;  %v2293_v46 = vunpack.c.l.bf16 %v2289_v54  ;;  %v2294_v58 = vunpack.c.h.bf16 %v2289_v54  ;;  %v2399_v0 = vunpack.c.l.bf16 %v2395_v23 }
 0x233   :  { %v2138_v37 = vsub.f32 1.0, %v2137_v47  ;;  %v2183_v39 = vpack.c.bf16 %v4543_v26, %v4543_v26  ;;  %v3405_v53 = vpack.c.bf16 %v4543_v26, %v4537_v15 }
 0x234   :  { %v2165_v14 = vadd.f32 %v2163_v43, %v2161_v52  ;;  %v3516_v11 = vpop.eup %3515 }
 0x235   :  { %v2139_v10 = vmul.f32 %v3512_v12, %v2138_v37  ;;  %3423 = vst [vmem:[%s4682_s7 + $0x8] sm:$0xff] %v3405_v53   ;;  %v2195_v20 = vunpack.c.l.b16 %v2183_v39  ;;  %v2397_v39 = vld [vmem:[#allocation3 + $0xc] sm:$0xff] }
 0x236   :  { %v4555_v17 = vmul.f32 %v2173_v29, %v2165_v14 }
 0x237   :  { %v2140_v38 = vadd.f32 %v3512_v12, %v2139_v10  ;;  %v2196_v40 = vpack.c.b16 %v2195_v20, %v2194_v16 }
 0x238   :  { %v2187_v55 = vpack.c.bf16 %v4555_v17, %v4555_v17 }
 0x239   :  { %v2144_v41 = vsel %vm2143_vm14, %v3512_v12, %v2140_v38  ;;  %2206 = vmatmul.bf16.vlgmr.msra.gmra.mxu0 %v2196_v40  ;;  %2220 = vmatmul.bf16.vlgmr.msra.gmra.mxu1 %v2196_v40  ;;  %v2400_v12 = vunpack.c.h.bf16 %v2395_v23 }
 0x23a   :  { %v2149_v18 = vsel %vm2146_vm15, %v2148_v34, %v2144_v41  ;;  %2234 = vmatmul.bf16.vlgmr.msra.gmra.mxu2 %v2196_v40  ;;  %v2242_v6 = vunpack.c.l.b16 %v2187_v55  ;;  %v2403_v40 = vunpack.c.h.bf16 %v2397_v39  ;;  %v3557_v55 = vld [vmem:[%s4681_s6] ss:$0 sm:$0xff] }
 0x23b   :  { %v2160_v9 = vsub.f32 1.0, %v2149_v18  ;;  %v2164_v44 = vmul.f32 %v2149_v18, %v4317_v7  ;;  %v2290_v18 = vld [vmem:[#allocation2 + $0x38] sm:$0xf] }
 0x23d   :  { %v2162_v8 = vmul.f32 %v3516_v11, %v2160_v9 }
 0x23f   :  { %v2166_v45 = vadd.f32 %v2164_v44, %v2162_v8 }
 0x241   :  { %v4560_v60 = vmul.f32 %v2178_v1, %v2166_v45 }
 0x243   :  { %v2188_v61 = vpack.c.bf16 %v4560_v60, %v4560_v60  ;;  %v3410_v57 = vpack.c.bf16 %v4560_v60, %v4555_v17 }
 0x245   :  { %3424 = vst [vmem:[%s4683_s8 + $0x8] sm:$0xff] %v3410_v57   ;;  %v2243_v4 = vunpack.c.l.b16 %v2188_v61  ;;  %v2402_v57 = vunpack.c.l.bf16 %v2397_v39 }
 0x247   :  { %v2244_v7 = vpack.c.b16 %v2243_v4, %v2242_v6 }
 0x249   :  { %2254 = vmatmul.bf16.vlgmr.msra.gmra.mxu3 %v2244_v7  ;;  %2268 = vmatmul.bf16.vlgmr.msrb.gmra.mxu0 %v2244_v7 }
 0x24a   :  { %2282 = vmatmul.bf16.vlgmr.msrb.gmra.mxu1 %v2244_v7  ;;  %v2295_v7 = vunpack.c.l.bf16 %v2290_v18 }
 0x2b6   :  { %v2207_v42 = vpop.f32.mrf.mxu0  ;;  %v2221_v36 = vpop.f32.mrf.mxu1 }
 0x2b7   :  { %v2299_v48 = vadd.f32 %v2293_v46, %v2207_v42  ;;  %v2339_v31 = vadd.f32 %v2294_v58, %v2221_v36 }
 0x2b9   :  { %v3226_v13 = vmul.f32 -1.442695, %v2299_v48  ;;  %v3228_v28 = vmul.f32 -1.442695, %v2339_v31 }
 0x2bb   :  { %3517 = vpow2.f32 %v3226_v13 }
 0x2bc   :  { %3519 = vpow2.f32 %v3228_v28 }
 0x2bd   :  { %v2235_v20 = vpop.f32.mrf.mxu2 }
 0x2be   :  { %v2209_v25 = vpop.f32.mrf.mxu0  ;;  %v2223_v27 = vpop.f32.mrf.mxu1  ;;  %v2379_v61 = vadd.f32 %v3557_v55, %v2235_v20 }
 0x2bf   :  { %v2300_v19 = vadd.f32 %v2296_v33, %v2209_v25  ;;  %v2340_v59 = vadd.f32 %v2297_v50, %v2223_v27 }
 0x2c1   :  { %v3518_v30 = vpop.eup %3517  ;;  %v3227_v62 = vmul.f32 -1.442695, %v2300_v19  ;;  %v3229_v2 = vmul.f32 -1.442695, %v2340_v59 }
 0x2c2   :  { %v3520_v5 = vpop.eup %3519  ;;  %v2307_v32 = vadd.f32 1.0, %v3518_v30 }
 0x2c3   :  { %v4569_v56 = vadd.f32 1.0, %v3520_v5  ;;  %3521 = vpow2.f32 %v3227_v62 }
 0x2c4   :  { %3523 = vrcp.f32 %v2307_v32  ;;  %v2320_v29 = vand.u32 2147483648, %v2307_v32  ;;  %v2318_v14 = vand.u32 2147483647, %v2307_v32  ;;  %vm2314_vm1 = vweird.f32 %v2307_v32 }
 0x2c5   :  { %3525 = vrcp.f32 %v4569_v56  ;;  %vm2354_vm4 = vweird.f32 %v4569_v56  ;;  %v2358_v19 = vand.u32 2147483647, %v4569_v56  ;;  %v2237_v30 = vpop.f32.mrf.mxu2 }
 0x2c6   :  { %3527 = vpow2.f32 %v3229_v2  ;;  %v2269_v35 = vpop.f32.mrf.mxu0  ;;  %v2321_v1 = vor.u32 1.1754944e-38, %v2320_v29  ;;  %vm2319_vm3 = vcmp.eq.f32.partialorder %v2318_v14, 8.507059e+37 }
 0x2c7   :  { %v2445_v22 = vadd.f32 %v2400_v12, %v2269_v35  ;;  %v2292_v35 = vld [vmem:[#allocation2 + $0x44] sm:$0xf]  ;;  %vm2359_vm14 = vcmp.eq.f32.partialorder %v2358_v19, 8.507059e+37 }
 0x2c9   :  { %v3522_v24 = vpop.eup %3521  ;;  %v3232_v47 = vmul.f32 -1.442695, %v2445_v22 }
 0x2ca   :  { %v3524_v51 = vpop.eup %3523  ;;  %v4572_v49 = vadd.f32 1.0, %v3522_v24  ;;  %v2360_v24 = vand.u32 2147483648, %v4569_v56 }
 0x2cb   :  { %v4574_v21 = vpop.eup %3525  ;;  %v2310_v37 = vmul.f32 %v3524_v51, %v2307_v32  ;;  %3529 = vpow2.f32 %v3232_v47  ;;  %vm2315_vm0 = vweird.f32 %v3524_v51 }
 0x2cc   :  { %v3528_v53 = vpop.eup %3527  ;;  %3531 = vrcp.f32 %v4572_v49  ;;  %v2255_v52 = vpop.f32.mrf.mxu3  ;;  %v2350_v16 = vmul.f32 %v4574_v21, %v4569_v56  ;;  %vm2316_vm2 = vmor %vm2314_vm1, %vm2315_vm0  ;;  %v2335_v46 = vand.u32 2147483648, %v4572_v49  ;;  %v2333_v50 = vand.u32 2147483647, %v4572_v49 }
 0x2cd   :  { %v2311_v3 = vsub.f32 1.0, %v2310_v37  ;;  %v4577_v10 = vadd.f32 1.0, %v3528_v53  ;;  %v2405_v43 = vadd.f32 %v2399_v0, %v2255_v52  ;;  %vm2355_vm6 = vweird.f32 %v4574_v21  ;;  %v2398_v53 = vld [vmem:[#allocation3 + $0x14] sm:$0xf] }
 0x2ce   :  { %v2271_v38 = vpop.f32.mrf.mxu0  ;;  %v2351_v45 = vsub.f32 1.0, %v2350_v16  ;;  %vm2329_vm7 = vweird.f32 %v4572_v49  ;;  %v2336_v2 = vor.u32 1.1754944e-38, %v2335_v46  ;;  %vm2334_vm9 = vcmp.eq.f32.partialorder %v2333_v50, 8.507059e+37  ;;  %vm4613_vm11 = vmor %vm2354_vm4, %vm2355_vm6 }
 0x2cf   :  { %v2312_v34 = vmul.f32 %v3524_v51, %v2311_v3  ;;  %3533 = vrcp.f32 %v4577_v10  ;;  %v3230_v11 = vmul.f32 -1.442695, %v2405_v43  ;;  %v2446_v8 = vadd.f32 %v2403_v40, %v2271_v38 }
 0x2d0   :  { %v2352_v63 = vmul.f32 %v4574_v21, %v2351_v45  ;;  %v2375_v52 = vand.u32 2147483648, %v4577_v10  ;;  %v2298_v0 = vunpack.c.l.bf16 %v2292_v35  ;;  %vm2369_vm12 = vweird.f32 %v4577_v10  ;;  %v2283_v45 = vpop.f32.mrf.mxu1 }
 0x2d1   :  { %v3530_v41 = vpop.eup %3529  ;;  %v2313_v9 = vadd.f32 %v3524_v51, %v2312_v34  ;;  %3535 = vpow2.f32 %v3230_v11  ;;  %v3233_v42 = vmul.f32 -1.442695, %v2446_v8  ;;  %v2373_v20 = vand.u32 2147483647, %v4577_v10 }
 0x2d2   :  { %v3532_v44 = vpop.eup %3531  ;;  %v4589_v13 = vadd.f32 1.0, %v3530_v41  ;;  %v2353_v23 = vadd.f32 %v4574_v21, %v2352_v63  ;;  %v2361_v43 = vor.u32 1.1754944e-38, %v2360_v24  ;;  %v2376_v14 = vor.u32 1.1754944e-38, %v2375_v52  ;;  %v3558_v63 = vld [vmem:[%s4681_s6 + $0x1] ss:$0 sm:$0xff] }
 0x2d3   :  { %v2317_v6 = vsel %vm2316_vm2, %v3524_v51, %v2313_v9  ;;  %v2325_v4 = vmul.f32 %v3532_v44, %v4572_v49  ;;  %vm2330_vm5 = vweird.f32 %v3532_v44  ;;  %3537 = vpow2.f32 %v3233_v42 }
 0x2d4   :  { %v2322_v54 = vsel %vm2319_vm3, %v2321_v1, %v2317_v6  ;;  %v2257_v58 = vpop.f32.mrf.mxu3  ;;  %3539 = vrcp.f32 %v4589_v13  ;;  %vm2331_vm8 = vmor %vm2329_vm7, %vm2330_vm5  ;;  %v2380_v51 = vadd.f32 %v3557_v55, %v2237_v30  ;;  %v2357_v16 = vsel %vm4613_vm11, %v4574_v21, %v2353_v23 }
 0x2d5   :  { %v4587_v36 = vpop.eup %3533  ;;  %v2381_v48 = vmul.f32 %v2379_v61, %v2322_v54  ;;  %v2326_v31 = vsub.f32 1.0, %v2325_v4  ;;  %v2406_v28 = vadd.f32 %v2402_v57, %v2257_v58  ;;  %v2362_v21 = vsel %vm2359_vm14, %v2361_v43, %v2357_v16 }
 0x2d6   :  { %v2365_v33 = vmul.f32 %v4587_v36, %v4577_v10  ;;  %vm2370_vm10 = vweird.f32 %v4587_v36  ;;  %vm2374_vm15 = vcmp.eq.f32.partialorder %v2373_v20, 8.507059e+37  ;;  %v2391_v42 = vmul.f32 %v2362_v21, %v4537_v15 }
 0x2d7   :  { %v2327_v25 = vmul.f32 %v3532_v44, %v2326_v31  ;;  %v3231_v27 = vmul.f32 -1.442695, %v2406_v28  ;;  %v3536_v62 = vpop.eup %3535  ;;  %v2383_v5 = vadd.f32 %v2381_v48, %v2295_v7  ;;  %vm2371_vm13 = vmor %vm2369_vm12, %vm2370_vm10 }
 0x2d8   :  { %v2366_v59 = vsub.f32 1.0, %v2365_v33  ;;  %v4603_v22 = vadd.f32 1.0, %v3536_v62  ;;  %v2485_v33 = vadd.f32 %v3558_v63, %v2283_v45 }
 0x2d9   :  { %v2328_v32 = vadd.f32 %v3532_v44, %v2327_v25  ;;  %3541 = vpow2.f32 %v3231_v27  ;;  %v3538_v39 = vpop.eup %3537  ;;  %v2396_v27 = vld [vmem:[#allocation3 + $0x8] sm:$0xf] }
 0x2da   :  { %v2367_v12 = vmul.f32 %v4587_v36, %v2366_v59  ;;  %3543 = vrcp.f32 %v4603_v22  ;;  %v4623_v29 = vadd.f32 1.0, %v3538_v39  ;;  %v4625_v56 = vpop.eup %3539  ;;  %v2424_v6 = vand.u32 2147483647, %v4603_v22 }
 0x2db   :  { %v2332_v47 = vsel %vm2331_vm8, %v3532_v44, %v2328_v32  ;;  %3545 = vtanh.f32 %v2383_v5  ;;  %v2456_v11 = vmul.f32 %v4625_v56, %v4589_v13  ;;  %v2387_v44 = vsub.f32 1.0, %v2362_v21 }
 0x2dc   :  { %v2368_v49 = vadd.f32 %v4587_v36, %v2367_v12  ;;  %v2337_v37 = vsel %vm2334_vm9, %v2336_v2, %v2332_v47  ;;  %3547 = vrcp.f32 %v4623_v29  ;;  %v2426_v4 = vand.u32 2147483648, %v4603_v22  ;;  %v2285_v47 = vpop.f32.mrf.mxu1 }
 0x2dd   :  { %v2382_v3 = vmul.f32 %v2380_v51, %v2337_v37  ;;  %v2457_v58 = vsub.f32 1.0, %v2456_v11  ;;  %vm2420_vm1 = vweird.f32 %v4603_v22  ;;  %vm2425_vm3 = vcmp.eq.f32.partialorder %v2424_v6, 8.507059e+37 }
 0x2de   :  { %v2372_v34 = vsel %vm2371_vm13, %v4587_v36, %v2368_v49  ;;  %v2427_v19 = vor.u32 1.1754944e-38, %v2426_v4  ;;  %v2401_v2 = vunpack.c.l.bf16 %v2396_v27  ;;  %vm2461_vm5 = vweird.f32 %v4625_v56 }
 0x2df   :  { %v2384_v38 = vadd.f32 %v2382_v3, %v2298_v0  ;;  %v3542_v40 = vpop.eup %3541  ;;  %v2377_v9 = vsel %vm2374_vm15, %v2376_v14, %v2372_v34  ;;  %v2466_v39 = vand.u32 2147483648, %v4589_v13  ;;  %vm2460_vm8 = vweird.f32 %v4589_v13 }
 0x2e0   :  { %v4631_v41 = vadd.f32 1.0, %v3542_v40  ;;  %v3544_v10 = vpop.eup %3543  ;;  %v2388_v57 = vsub.f32 1.0, %v2377_v9  ;;  %v2392_v48 = vmul.f32 %v2377_v9, %v4543_v26  ;;  %v2458_v26 = vmul.f32 %v4625_v56, %v2457_v58  ;;  %vm2462_vm10 = vmor %vm2460_vm8, %vm2461_vm5  ;;  %v2506_v9 = vpop.permute.xlu2 %2505 }
 0x2e1   :  { %3549 = vtanh.f32 %v2384_v38  ;;  %v3546_v18 = vpop.eup %3545  ;;  %v2416_v8 = vmul.f32 %v3544_v10, %v4603_v22  ;;  %vm2421_vm0 = vweird.f32 %v3544_v10  ;;  %v2464_v0 = vand.u32 2147483647, %v4589_v13 }
 0x2e2   :  { %3551 = vrcp.f32 %v4631_v41  ;;  %v4637_v55 = vpop.eup %3547  ;;  %v2389_v61 = vmul.f32 %v3546_v18, %v2387_v44  ;;  %vm2422_vm2 = vmor %vm2420_vm1, %vm2421_vm0  ;;  %v2441_v12 = vand.u32 2147483648, %v4631_v41  ;;  %v2439_v22 = vand.u32 2147483647, %v4631_v41 }
 0x2e3   :  { %v2417_v1 = vsub.f32 1.0, %v2416_v8  ;;  %v2471_v46 = vmul.f32 %v4637_v55, %v4623_v29  ;;  %v2459_v51 = vadd.f32 %v4625_v56, %v2458_v26  ;;  %vm2435_vm6 = vweird.f32 %v4631_v41 }
 0x2e4   :  { %v2393_v50 = vadd.f32 %v2391_v42, %v2389_v61  ;;  %v2442_v52 = vor.u32 1.1754944e-38, %v2441_v12  ;;  %vm2440_vm9 = vcmp.eq.f32.partialorder %v2439_v22, 8.507059e+37  ;;  %v2486_v16 = vadd.f32 %v3558_v63, %v2285_v47 }
 0x2e5   :  { %v2418_v54 = vmul.f32 %v3544_v10, %v2417_v1  ;;  %v2472_v30 = vsub.f32 1.0, %v2471_v46  ;;  %v2463_v43 = vsel %vm2462_vm10, %v4625_v56, %v2459_v51  ;;  %vm2476_vm11 = vweird.f32 %v4637_v55 }
 0x2e6   :  { %v2404_v40 = vunpack.c.l.bf16 %v2398_v53  ;;  %v2467_v21 = vor.u32 1.1754944e-38, %v2466_v39  ;;  %v2481_v14 = vand.u32 2147483648, %v4623_v29  ;;  %vm2465_vm12 = vcmp.eq.f32.partialorder %v2464_v0, 8.507059e+37 }
 0x2e7   :  { %v3550_v7 = vpop.eup %3549  ;;  %v2419_v28 = vadd.f32 %v3544_v10, %v2418_v54  ;;  %v2473_v49 = vmul.f32 %v4637_v55, %v2472_v30  ;;  %vm2475_vm13 = vweird.f32 %v4623_v29  ;;  %v2479_v13 = vand.u32 2147483647, %v4623_v29 }
 0x2e8   :  { %v2390_v36 = vmul.f32 %v3550_v7, %v2388_v57  ;;  %v3552_v31 = vpop.eup %3551  ;;  %vm2477_vm14 = vmor %vm2475_vm13, %vm2476_vm11  ;;  %v2482_v11 = vor.u32 1.1754944e-38, %v2481_v14  ;;  %v2511_v54 = vpop.permute.xlu2 %2510 }
 0x2e9   :  { %v2431_v59 = vmul.f32 %v3552_v31, %v4631_v41  ;;  %v2423_v15 = vsel %vm2422_vm2, %v3544_v10, %v2419_v28  ;;  %vm2436_vm4 = vweird.f32 %v3552_v31  ;;  %v2474_v38 = vadd.f32 %v4637_v55, %v2473_v49 }
 0x2ea   :  { %v2394_v25 = vadd.f32 %v2392_v48, %v2390_v36  ;;  %v2428_v5 = vsel %vm2425_vm3, %v2427_v19, %v2423_v15  ;;  %vm2437_vm7 = vmor %vm2435_vm6, %vm2436_vm4  ;;  %v2468_v10 = vsel %vm2465_vm12, %v2467_v21, %v2463_v43  ;;  %vm2480_vm15 = vcmp.eq.f32.partialorder %v2479_v13, 8.507059e+37 }
 0x2eb   :  { %v2432_v32 = vsub.f32 1.0, %v2431_v59  ;;  %v2487_v23 = vmul.f32 %v2485_v33, %v2428_v5  ;;  %v2478_v18 = vsel %vm2477_vm14, %v4637_v55, %v2474_v38  ;;  %v2493_v8 = vsub.f32 1.0, %v2468_v10 }
 0x2ec   :  { %v3415_v62 = vpack.c.bf16 %v2394_v25, %v2393_v50  ;;  %v2483_v44 = vsel %vm2480_vm15, %v2482_v11, %v2478_v18  ;;  %v2497_v1 = vmul.f32 %v2468_v10, %v4555_v17 }
 0x2ed   :  { %v2433_v35 = vmul.f32 %v3552_v31, %v2432_v32  ;;  %v2489_v24 = vadd.f32 %v2487_v23, %v2401_v2  ;;  %v2494_v61 = vsub.f32 1.0, %v2483_v44  ;;  %v2498_v29 = vmul.f32 %v2483_v44, %v4560_v60 }
 0x2ee   :  { %3425 = vst [vmem:[%s4682_s7 + $0x10] sm:$0xff] %v3415_v62  }
 0x2ef   :  { %v2434_v37 = vadd.f32 %v3552_v31, %v2433_v35  ;;  %3553 = vtanh.f32 %v2489_v24 }
 0x2f1   :  { %v2438_v3 = vsel %vm2437_vm7, %v3552_v31, %v2434_v37 }
 0x2f2   :  { %v2443_v20 = vsel %vm2440_vm9, %v2442_v52, %v2438_v3 }
 0x2f3   :  { %v2488_v34 = vmul.f32 %v2486_v16, %v2443_v20 }
 0x2f5   :  { %v2490_v41 = vadd.f32 %v2488_v34, %v2404_v40  ;;  %v3554_v56 = vpop.eup %3553 }
 0x2f6   :  { %v2495_v45 = vmul.f32 %v3554_v56, %v2493_v8 }
 0x2f7   :  { %3555 = vtanh.f32 %v2490_v41 }
 0x2f8   :  { %v2499_v6 = vadd.f32 %v2497_v1, %v2495_v45 }
 0x2fa   :  { %v2513_v46 = vmul.f32 %v2506_v9, %v2499_v6 }
 0x2fd   :  { %v3556_v57 = vpop.eup %3555 }
 0x2fe   :  { %v2496_v4 = vmul.f32 %v3556_v57, %v2494_v61 }
 0x300   :  { %v2500_v7 = vadd.f32 %v2498_v29, %v2496_v4 }
 0x302   :  { %v2514_v55 = vmul.f32 %v2511_v54, %v2500_v7 }
 0x304   :  { %v3420_v58 = vpack.c.bf16 %v2514_v55, %v2513_v46 }
 0x306   :  { %3421 = vst [vmem:[%s4683_s8] sm:$0xff] %v3420_v58  }
 0x307   :  { %2552 = vsyncpa [#allocation7], 1 }
 0x308   :  { %2553 = vsyncpa [#allocation9], 1 }

// kernel: han_forward.4
= control target key start
LH: loop header
LB: loop body
LE: loop exit
PB: predicated region body
PF: predicated region fallthrough
CT: control target
= control target key end

     0   :  { %vm194_vm0 = vcmask 130048   ;;  %s5978_s3 = inlined_call_operand.vmem [shape: bf16[2,16,384], index: 3, kind: input, shape index: {}]   ;;  %s5979_s0 = inlined_call_operand.vmem [shape: bf16[7,16,16], index: 0, kind: input, shape index: {}, may-alias: {0,1}]   ;;  %s5980_s1 = inlined_call_operand.vmem [shape: bf16[7,16,16], index: 1, kind: input, shape index: {}, may-alias: {0,1}]   ;;  %s5981_s5 = inlined_call_operand.vmem [shape: bf16[2,128,384], index: 5, kind: input, shape index: {}]   ;;  %s5982_s4 = inlined_call_operand.vmem [shape: f32[2,1,384], index: 4, kind: input, shape index: {}]   ;;  %s5983_s6 = inlined_call_operand.vmem [shape: f32[2,1,128], index: 6, kind: input, shape index: {}]   ;;  %s5984_s2 = inlined_call_operand.vmem [shape: f32[7,16,1], index: 2, kind: input, shape index: {}]   ;;  %s5985_s7 = inlined_call_operand.vmem [shape: bf16[7,16,128], index: 7, kind: output, shape index: {0}]   ;;  %s5986_s8 = inlined_call_operand.vmem [shape: bf16[7,16,128], index: 8, kind: output, shape index: {1}]  }
   0x1   :  { %v3420_v0 = vld [vmem:[%s5978_s3] sm:$0xf]  ;;  %v3849_v1 = vld [vmem:[%s5978_s3 + $0x8] sm:$0xf0]  ;;  %v3848_v2 = vld [vmem:[%s5978_s3 + $0x4] sm:$0xf] }
   0x2   :  { %v3421_v3 = vor.u32 %v3849_v1, %v3420_v0  ;;  %v3422_v4 = vld [vmem:[%s5978_s3 + $0xc] sm:$0xf0]  ;;  %v3428_v5 = vld [vmem:[%s5978_s3 + $0x8] sm:$0xf]  ;;  %v3850_v6 = vld [vmem:[%s5978_s3 + $0x10] sm:$0xf0] }
   0x3   :  { %v3425_v7 = vor.u32 %v3848_v2, %v3422_v4  ;;  %v3429_v8 = vor.u32 %v3850_v6, %v3428_v5  ;;  %v3486_v9 = vld [vmem:[%s5978_s3 + $0x18] sm:$0xf]  ;;  %v3852_v10 = vld [vmem:[%s5978_s3 + $0x20] sm:$0xf0]  ;;  %v3851_v13 = vld [vmem:[%s5978_s3 + $0x1c] sm:$0xf] }
   0x4   :  { %v3834_v11 = vld [vmem:[%s5979_s0] sm:$0xff]  ;;  %223 = vmatpush.bf16.msra.mxu0 %v3421_v3  ;;  %v3487_v12 = vor.u32 %v3852_v10, %v3486_v9  ;;  %v3488_v14 = vld [vmem:[%s5978_s3 + $0x24] sm:$0xf0]  ;;  %v3853_v18 = vld [vmem:[%s5978_s3 + $0x28] sm:$0xf0] }
   0x5   :  { %267 = vmatpush.bf16.msra.mxu1 %v3425_v7  ;;  %311 = vmatpush.bf16.msra.mxu2 %v3429_v8  ;;  %v4360_v15 = vld [vmem:[%s5980_s1] sm:$0xff]  ;;  %v3491_v16 = vor.u32 %v3851_v13, %v3488_v14  ;;  %v3835_v20 = vld [vmem:[%s5979_s0 + $0x8] sm:$0xff]  ;;  %v3836_v22 = vld [vmem:[%s5979_s0 + $0x10] sm:$0xff] }
   0x6   :  { %497 = vmatpush.bf16.msra.mxu3 %v3487_v12  ;;  %v3494_v17 = vld [vmem:[%s5978_s3 + $0x20] sm:$0xf]  ;;  %v4379_v21 = vld [vmem:[%s5980_s1 + $0x8] sm:$0xff]  ;;  %v4392_v23 = vld [vmem:[%s5980_s1 + $0x10] sm:$0xff] }
   0x7   :  { %3430 = vmatmul.msk.bf16.vlgmr.msra.gmra.mxu0 %vm194_vm0, %v3834_v11  ;;  %v3495_v19 = vor.u32 %v3853_v18, %v3494_v17  ;;  %v3837_v24 = vld [vmem:[%s5979_s0 + $0x18] sm:$0xff]  ;;  %v3636_v26 = vld [vmem:[%s5981_s5 + $0xa8] sm:$0xf]  ;;  %v3876_v27 = vld [vmem:[%s5981_s5 + $0xb0] sm:$0xf0] }
   0x8   :  { %3437 = vmatmul.msk.bf16.vlgmr.msra.gmra.mxu1 %vm194_vm0, %v3834_v11  ;;  %3444 = vmatmul.msk.bf16.vlgmr.msra.gmra.mxu2 %vm194_vm0, %v3834_v11  ;;  %v4405_v25 = vld [vmem:[%s5980_s1 + $0x18] sm:$0xff]  ;;  %v4414_v28 = vor.u32 %v3876_v27, %v3636_v26  ;;  %v3875_v29 = vld [vmem:[%s5981_s5 + $0xac] sm:$0xf]  ;;  %v3624_v32 = vld [vmem:[%s5981_s5 + $0x90] sm:$0xf] }
   0x9   :  { %3496 = vmatmul.msk.bf16.vlgmr.msra.gmra.mxu3 %vm194_vm0, %v4360_v15  ;;  %541 = vmatpush.bf16.msrb.mxu0 %v3491_v16  ;;  %v3638_v30 = vld [vmem:[%s5981_s5 + $0xb4] sm:$0xf0]  ;;  %v3873_v33 = vld [vmem:[%s5981_s5 + $0x98] sm:$0xf0]  ;;  %v3872_v34 = vld [vmem:[%s5981_s5 + $0x94] sm:$0xf] }
   0xa   :  { %585 = vmatpush.bf16.msrb.mxu1 %v3495_v19  ;;  %6046 = vst [vmem:[#allocation6_spill] sm:$0xff] %v4414_v28  ;;  %v4424_v31 = vor.u32 %v3875_v29, %v3638_v30  ;;  %879 = vmatpush.bf16.msrb.mxu2 %v4414_v28  ;;  %v4439_v35 = vor.u32 %v3873_v33, %v3624_v32  ;;  %v3626_v36 = vld [vmem:[%s5981_s5 + $0x9c] sm:$0xf0]  ;;  %v3612_v37 = vld [vmem:[%s5981_s5 + $0x78] sm:$0xf]  ;;  %v3839_v16 = vld [vmem:[%s5979_s0 + $0x28] sm:$0xff] }
   0xb   :  { %v3870_v38 = vld [vmem:[%s5981_s5 + $0x80] sm:$0xf0]  ;;  %v4450_v39 = vor.u32 %v3872_v34, %v3626_v36  ;;  %v3869_v40 = vld [vmem:[%s5981_s5 + $0x7c] sm:$0xf]  ;;  %v3614_v41 = vld [vmem:[%s5981_s5 + $0x84] sm:$0xf0] }
   0xc   :  { %893 = vmatpush.bf16.msrb.mxu3 %v4424_v31  ;;  %6047 = vst [vmem:[#allocation7_spill] sm:$0xff] %v4439_v35  ;;  %v4459_v42 = vor.u32 %v3870_v38, %v3612_v37  ;;  %v4462_v43 = vor.u32 %v3869_v40, %v3614_v41  ;;  %v3600_v44 = vld [vmem:[%s5981_s5 + $0x60] sm:$0xf]  ;;  %v3867_v45 = vld [vmem:[%s5981_s5 + $0x68] sm:$0xf0]  ;;  %v3840_v32 = vld [vmem:[%s5979_s0 + $0x30] sm:$0xff] }
   0xd   :  { %6048 = vst [vmem:[#allocation8_spill] sm:$0xff] %v4450_v39  ;;  %v3866_v46 = vld [vmem:[%s5981_s5 + $0x64] sm:$0xf]  ;;  %v3602_v47 = vld [vmem:[%s5981_s5 + $0x6c] sm:$0xf0]  ;;  %v4477_v48 = vor.u32 %v3867_v45, %v3600_v44  ;;  %v4582_v17 = vld [vmem:[%s5980_s1 + $0x28] sm:$0xff] }
   0xe   :  { %880 = vmatpush.bf16.msrb.mxu2 %v4439_v35  ;;  %6049 = vst [vmem:[#allocation9_spill] sm:$0xff] %v4459_v42  ;;  %v4480_v49 = vor.u32 %v3866_v46, %v3602_v47  ;;  %v3838_v50 = vld [vmem:[%s5979_s0 + $0x20] sm:$0xff]  ;;  %v3588_v52 = vld [vmem:[%s5981_s5 + $0x48] sm:$0xf]  ;;  %v3864_v53 = vld [vmem:[%s5981_s5 + $0x50] sm:$0xf0] }
   0xf   :  { %6050 = vst [vmem:[#allocation10_spill] sm:$0xff] %v4462_v43  ;;  %v4488_v51 = vld [vmem:[%s5980_s1 + $0x20] sm:$0xff]  ;;  %v4499_v54 = vor.u32 %v3864_v53, %v3588_v52  ;;  %v3863_v55 = vld [vmem:[%s5981_s5 + $0x4c] sm:$0xf]  ;;  %v3590_v56 = vld [vmem:[%s5981_s5 + $0x54] sm:$0xf0] }
  0x10   :  { %894 = vmatpush.bf16.msrb.mxu3 %v4450_v39  ;;  %6051 = vst [vmem:[#allocation11_spill] sm:$0xff] %v4477_v48  ;;  %v4509_v57 = vor.u32 %v3863_v55, %v3590_v56  ;;  %v3576_v58 = vld [vmem:[%s5981_s5 + $0x30] sm:$0xf]  ;;  %v3861_v59 = vld [vmem:[%s5981_s5 + $0x38] sm:$0xf0]  ;;  %v5987_v53 = vmov 0.0|0.0  }
  0x11   :  { %6052 = vst [vmem:[#allocation12_spill] sm:$0xff] %v4480_v49  ;;  %v3860_v60 = vld [vmem:[%s5981_s5 + $0x34] sm:$0xf]  ;;  %v4524_v61 = vor.u32 %v3861_v59, %v3576_v58  ;;  %v3578_v62 = vld [vmem:[%s5981_s5 + $0x3c] sm:$0xf0] }
  0x12   :  { %881 = vmatpush.bf16.msrb.mxu2 %v4459_v42  ;;  %6053 = vst [vmem:[#allocation13_spill] sm:$0xff] %v4499_v54  ;;  %v3564_v63 = vld [vmem:[%s5981_s5 + $0x18] sm:$0xf]  ;;  %v3858_v0 = vld [vmem:[%s5981_s5 + $0x20] sm:$0xf0]  ;;  %v4535_v1 = vor.u32 %v3860_v60, %v3578_v62  ;;  %v4636_v37 = vld [vmem:[%s5980_s1 + $0x30] sm:$0xff] }
  0x13   :  { %6054 = vst [vmem:[#allocation14_spill] sm:$0xff] %v4509_v57  ;;  %v3857_v2 = vld [vmem:[%s5981_s5 + $0x1c] sm:$0xf]  ;;  %v3566_v3 = vld [vmem:[%s5981_s5 + $0x24] sm:$0xf0]  ;;  %v4544_v4 = vor.u32 %v3858_v0, %v3564_v63 }
  0x14   :  { %895 = vmatpush.bf16.msrb.mxu3 %v4462_v43  ;;  %6055 = vst [vmem:[#allocation15_spill] sm:$0xff] %v4524_v61  ;;  %v3644_v5 = vld [vmem:[%s5981_s5 + $0xb0] sm:$0xf]  ;;  %v3877_v6 = vld [vmem:[%s5981_s5 + $0xb8] sm:$0xf0]  ;;  %v4553_v7 = vor.u32 %v3857_v2, %v3566_v3 }
  0x15   :  { %6056 = vst [vmem:[#allocation16_spill] sm:$0xff] %v4535_v1  ;;  %v3552_v8 = vld [vmem:[%s5981_s5] sm:$0xf]  ;;  %v3855_v9 = vld [vmem:[%s5981_s5 + $0x8] sm:$0xf0]  ;;  %v4561_v10 = vor.u32 %v3877_v6, %v3644_v5 }
  0x16   :  { %882 = vmatpush.bf16.msrb.mxu2 %v4477_v48  ;;  %6057 = vst [vmem:[#allocation17_spill] sm:$0xff] %v4544_v4  ;;  %v3854_v11 = vld [vmem:[%s5981_s5 + $0x4] sm:$0xf]  ;;  %v3554_v12 = vld [vmem:[%s5981_s5 + $0xc] sm:$0xf0]  ;;  %v4571_v13 = vor.u32 %v3855_v9, %v3552_v8 }
  0x17   :  { %3431 = vmatmul.msk.bf16.gmra.mxu0 %vm194_vm0, %v3835_v20  ;;  %6058 = vst [vmem:[#allocation18_spill] sm:$0xff] %v4553_v7  ;;  %v4574_v14 = vor.u32 %v3854_v11, %v3554_v12  ;;  %v3632_v18 = vld [vmem:[%s5981_s5 + $0x98] sm:$0xf]  ;;  %v3874_v19 = vld [vmem:[%s5981_s5 + $0xa0] sm:$0xf0] }
  0x18   :  { %3438 = vmatmul.msk.bf16.gmra.mxu1 %vm194_vm0, %v3835_v20  ;;  %3445 = vmatmul.msk.bf16.gmra.mxu2 %vm194_vm0, %v3835_v20  ;;  %6059 = vst [vmem:[#allocation19_spill] sm:$0xff] %v4571_v13  ;;  %v4596_v20 = vor.u32 %v3874_v19, %v3632_v18  ;;  %v3608_v27 = vld [vmem:[%s5981_s5 + $0x68] sm:$0xf]  ;;  %v3868_v29 = vld [vmem:[%s5981_s5 + $0x70] sm:$0xf0] }
  0x19   :  { %3497 = vmatmul.msk.bf16.gmra.mxu3 %vm194_vm0, %v4379_v21  ;;  %1369 = vmatpush.bf16.msra.mxu0 %v4561_v10  ;;  %6060 = vst [vmem:[#allocation20_spill] sm:$0xff] %v4574_v14  ;;  %v4617_v30 = vor.u32 %v3868_v29, %v3608_v27  ;;  %v3596_v33 = vld [vmem:[%s5981_s5 + $0x50] sm:$0xf]  ;;  %v3865_v34 = vld [vmem:[%s5981_s5 + $0x58] sm:$0xf0] }
  0x1a   :  { %896 = vmatpush.bf16.msrb.mxu3 %v4480_v49  ;;  %883 = vmatpush.bf16.msrb.mxu2 %v4499_v54  ;;  %v4631_v36 = vor.u32 %v3865_v34, %v3596_v33  ;;  %v3584_v38 = vld [vmem:[%s5981_s5 + $0x38] sm:$0xf]  ;;  %v3862_v40 = vld [vmem:[%s5981_s5 + $0x40] sm:$0xf0]  ;;  %v3572_v44 = vld [vmem:[%s5981_s5 + $0x20] sm:$0xf] }
  0x1b   :  { %v4649_v41 = vor.u32 %v3862_v40, %v3584_v38  ;;  %v3859_v45 = vld [vmem:[%s5981_s5 + $0x28] sm:$0xf0]  ;;  %v3560_v47 = vld [vmem:[%s5981_s5 + $0x8] sm:$0xf]  ;;  %v135_v55 = vld [vmem:[%s5982_s4] sm:$0x7] }
  0x1c   :  { %v4661_v46 = vor.u32 %v3859_v45, %v3572_v44  ;;  %v4686_v56 = vperm.slane %v135_v55, 0  ;;  %v4689_v58 = vperm.slane %v135_v55, 1  ;;  %v4698_v0 = vperm.slane %v135_v55, 2 }
  0x1d   :  { %1370 = vmatpush.bf16.msra.mxu0 %v4596_v20  ;;  %6061 = vst [vmem:[#allocation21_spill] sm:$0xff] %v4649_v41 }
  0x1e   :  { %897 = vmatpush.bf16.msrb.mxu3 %v4509_v57  ;;  %884 = vmatpush.bf16.msrb.mxu2 %v4524_v61  ;;  %6062 = vst [vmem:[#allocation22_spill] sm:$0xff] %v4661_v46 }
  0x22   :  { %898 = vmatpush.bf16.msrb.mxu3 %v4535_v1  ;;  %885 = vmatpush.bf16.msrb.mxu2 %v4544_v4 }
  0x26   :  { %899 = vmatpush.bf16.msrb.mxu3 %v4553_v7  ;;  %886 = vmatpush.bf16.msrb.mxu2 %v4571_v13 }
  0x27   :  { %3432 = vmatmul.msk.bf16.gmra.mxu0 %vm194_vm0, %v3836_v22 }
  0x28   :  { %3439 = vmatmul.msk.bf16.gmra.mxu1 %vm194_vm0, %v3836_v22  ;;  %3446 = vmatmul.msk.bf16.gmra.mxu2 %vm194_vm0, %v3836_v22  ;;  %v3620_v22 = vld [vmem:[%s5981_s5 + $0x80] sm:$0xf] }
  0x29   :  { %3498 = vmatmul.msk.bf16.gmra.mxu3 %vm194_vm0, %v4392_v23 }
  0x2a   :  { %900 = vmatpush.bf16.msrb.mxu3 %v4574_v14  ;;  %907 = vmatpush.bf16.msra.mxu2 %v4561_v10 }
  0x2e   :  { %908 = vmatpush.bf16.msra.mxu2 %v4596_v20 }
  0x37   :  { %3433 = vmatmul.msk.bf16.gmra.mxu0 %vm194_vm0, %v3837_v24 }
  0x38   :  { %3440 = vmatmul.msk.bf16.gmra.mxu1 %vm194_vm0, %v3837_v24  ;;  %3447 = vmatmul.msk.bf16.gmra.mxu2 %vm194_vm0, %v3837_v24  ;;  %v3871_v24 = vld [vmem:[%s5981_s5 + $0x88] sm:$0xf0] }
  0x39   :  { %3499 = vmatmul.msk.bf16.gmra.mxu3 %vm194_vm0, %v4405_v25  ;;  %v4607_v26 = vor.u32 %v3871_v24, %v3620_v22  ;;  %v3720_v22 = vld [vmem:[%s5981_s5 + $0x150] sm:$0xf]  ;;  %v3897_v24 = vld [vmem:[%s5981_s5 + $0x158] sm:$0xf0] }
  0x3a   :  { %v4729_v29 = vor.u32 %v3897_v24, %v3720_v22 }
  0x3b   :  { %909 = vmatpush.bf16.msra.mxu2 %v4607_v26  ;;  %1371 = vmatpush.bf16.msra.mxu0 %v4607_v26 }
  0x3f   :  { %910 = vmatpush.bf16.msra.mxu2 %v4617_v30  ;;  %1372 = vmatpush.bf16.msra.mxu0 %v4617_v30 }
  0x43   :  { %911 = vmatpush.bf16.msra.mxu2 %v4631_v36  ;;  %1373 = vmatpush.bf16.msra.mxu0 %v4631_v36 }
  0x47   :  { %3434 = vmatmul.msk.bf16.gmra.mxu0 %vm194_vm0, %v3838_v50  ;;  %912 = vmatpush.bf16.msra.mxu2 %v4649_v41 }
  0x48   :  { %3441 = vmatmul.msk.bf16.gmra.mxu1 %vm194_vm0, %v3838_v50  ;;  %3448 = vmatmul.msk.bf16.gmra.mxu2 %vm194_vm0, %v3838_v50  ;;  %v3856_v50 = vld [vmem:[%s5981_s5 + $0x10] sm:$0xf0] }
  0x49   :  { %3500 = vmatmul.msk.bf16.gmra.mxu3 %vm194_vm0, %v4488_v51  ;;  %1374 = vmatpush.bf16.msra.mxu0 %v4649_v41  ;;  %v4671_v52 = vor.u32 %v3856_v50, %v3560_v47  ;;  %v3708_v47 = vld [vmem:[%s5981_s5 + $0x138] sm:$0xf]  ;;  %v3894_v50 = vld [vmem:[%s5981_s5 + $0x140] sm:$0xf0] }
  0x4a   :  { %v4747_v55 = vor.u32 %v3894_v50, %v3708_v47 }
  0x4b   :  { %913 = vmatpush.bf16.msra.mxu2 %v4661_v46  ;;  %6063 = vst [vmem:[#allocation23_spill] sm:$0xff] %v4671_v52 }
  0x4d   :  { %1375 = vmatpush.bf16.msra.mxu0 %v4661_v46 }
  0x4f   :  { %914 = vmatpush.bf16.msra.mxu2 %v4671_v52 }
  0x51   :  { %1376 = vmatpush.bf16.msra.mxu0 %v4671_v52 }
  0x57   :  { %3435 = vmatmul.msk.bf16.gmra.mxu0 %vm194_vm0, %v3839_v16 }
  0x58   :  { %3442 = vmatmul.msk.bf16.gmra.mxu1 %vm194_vm0, %v3839_v16  ;;  %3449 = vmatmul.msk.bf16.gmra.mxu2 %vm194_vm0, %v3839_v16  ;;  %v3900_v16 = vld [vmem:[%s5981_s5 + $0x170] sm:$0xf0] }
  0x59   :  { %3501 = vmatmul.msk.bf16.gmra.mxu3 %vm194_vm0, %v4582_v17 }
  0x67   :  { %3436 = vmatmul.msk.bf16.gmra.mxu0 %vm194_vm0, %v3840_v32 }
  0x68   :  { %3443 = vmatmul.msk.bf16.gmra.mxu1 %vm194_vm0, %v3840_v32  ;;  %3450 = vmatmul.msk.bf16.gmra.mxu2 %vm194_vm0, %v3840_v32 }
  0x69   :  { %3502 = vmatmul.msk.bf16.gmra.mxu3 %vm194_vm0, %v4636_v37 }
  0x77   :  { %3503 = vmatmul.msk.bf16.vlgmr.msrb.gmra.mxu0 %vm194_vm0, %v4360_v15 }
  0x78   :  { %887 = vmatmul.bf16.vlgmr.msrb.gmra.mxu2 %v5987_v53  ;;  %3510 = vmatmul.msk.bf16.vlgmr.msrb.gmra.mxu1 %vm194_vm0, %v4360_v15 }
  0x79   :  { %901 = vmatmul.bf16.vlgmr.msrb.gmra.mxu3 %v5987_v53  ;;  %1676 = vmatpush.bf16.msrb.mxu0 %v4414_v28 }
  0x7d   :  { %1677 = vmatpush.bf16.msrb.mxu0 %v4439_v35 }
  0x81   :  { %1678 = vmatpush.bf16.msrb.mxu0 %v4459_v42 }
  0x84   :  { %v225_v59 = vpop.f32.mrf.mxu0 }
  0x85   :  { %v226_v60 = vadd.f32 %v225_v59, %v4686_v56  ;;  %v269_v15 = vpop.f32.mrf.mxu1  ;;  %1679 = vmatpush.bf16.msrb.mxu0 %v4477_v48  ;;  %v3899_v59 = vld [vmem:[%s5981_s5 + $0x16c] sm:$0xf] }
  0x86   :  { %v270_v62 = vadd.f32 %v269_v15, %v4689_v58 }
  0x87   :  { %3504 = vmatmul.msk.bf16.gmra.mxu0 %vm194_vm0, %v4379_v21 }
  0x88   :  { %v4696_v63 = vpack.c.bf16 %v270_v62, %v226_v60  ;;  %915 = vmatmul.bf16.vlgmr.msra.gmra.mxu2 %v5987_v53  ;;  %3511 = vmatmul.msk.bf16.gmra.mxu1 %vm194_vm0, %v4379_v21  ;;  %v3732_v21 = vld [vmem:[%s5981_s5 + $0x168] sm:$0xf]  ;;  %v3734_v60 = vld [vmem:[%s5981_s5 + $0x174] sm:$0xf0] }
  0x89   :  { %1680 = vmatpush.bf16.msrb.mxu0 %v4499_v54  ;;  %v4716_v18 = vor.u32 %v3900_v16, %v3732_v21  ;;  %v4757_v62 = vor.u32 %v3899_v59, %v3734_v60  ;;  %v3672_v59 = vld [vmem:[%s5981_s5 + $0xf0] sm:$0xf]  ;;  %v3885_v60 = vld [vmem:[%s5981_s5 + $0xf8] sm:$0xf0] }
  0x8b   :  { %v313_v2 = vpop.f32.mrf.mxu2  ;;  %1050 = vmatpush.bf16.msra.mxu3 %v4716_v18  ;;  %1389 = vmatpush.bf16.msra.mxu1 %v4716_v18 }
  0x8c   :  { %v314_v3 = vadd.f32 %v313_v2, %v4698_v0  ;;  %v4705_v5 = vpop.f32.mrf.mxu3  ;;  %v227_v6 = vpop.f32.mrf.mxu0  ;;  %1064 = vmatpush.bf16.msrb.mxu2 %v4757_v62  ;;  %v3696_v2 = vld [vmem:[%s5981_s5 + $0x120] sm:$0xf] }
  0x8d   :  { %v228_v8 = vadd.f32 %v227_v6, %v4686_v56  ;;  %v271_v9 = vpop.f32.mrf.mxu1  ;;  %1681 = vmatpush.bf16.msrb.mxu0 %v4524_v61 }
  0x8e   :  { %v349_v11 = vpack.c.bf16 %v314_v3, %v314_v3  ;;  %v272_v12 = vadd.f32 %v271_v9, %v4689_v58  ;;  %v3891_v3 = vld [vmem:[%s5981_s5 + $0x128] sm:$0xf0]  ;;  %v3722_v9 = vld [vmem:[%s5981_s5 + $0x15c] sm:$0xf0] }
  0x8f   :  { %1051 = vmatpush.bf16.msra.mxu3 %v4729_v29  ;;  %1390 = vmatpush.bf16.msra.mxu1 %v4729_v29 }
  0x90   :  { %377 = vst [vmem:[#allocation2 + $0x8] sm:$0xf] %v349_v11  ;;  %v4718_v19 = vpack.c.bf16 %v272_v12, %v228_v8  ;;  %v4768_v8 = vor.u32 %v3891_v3, %v3696_v2  ;;  %v4811_v2 = vor.u32 %v3885_v60, %v3672_v59  ;;  %v3890_v3 = vld [vmem:[%s5981_s5 + $0x124] sm:$0xf] }
  0x91   :  { %1682 = vmatpush.bf16.msrb.mxu0 %v4544_v4 }
  0x92   :  { %6064 = vst [vmem:[#allocation24_spill] sm:$0xff] %v4811_v2 }
  0x93   :  { %v315_v27 = vpop.f32.mrf.mxu2  ;;  %1052 = vmatpush.bf16.msra.mxu3 %v4747_v55  ;;  %1391 = vmatpush.bf16.msra.mxu1 %v4747_v55 }
  0x94   :  { %v316_v32 = vadd.f32 %v315_v27, %v4698_v0  ;;  %v4732_v33 = vpop.f32.mrf.mxu3  ;;  %v230_v34 = vpop.f32.mrf.mxu0 }
  0x95   :  { %v231_v38 = vadd.f32 %v230_v34, %v4686_v56  ;;  %v274_v40 = vpop.f32.mrf.mxu1  ;;  %1683 = vmatpush.bf16.msrb.mxu0 %v4571_v13  ;;  %v3684_v34 = vld [vmem:[%s5981_s5 + $0x108] sm:$0xf] }
  0x96   :  { %v351_v44 = vpack.c.bf16 %v316_v32, %v316_v32  ;;  %v275_v45 = vadd.f32 %v274_v40, %v4689_v58 }
  0x97   :  { %3505 = vmatmul.msk.bf16.gmra.mxu0 %vm194_vm0, %v4392_v23  ;;  %1053 = vmatpush.bf16.msra.mxu3 %v4768_v8 }
  0x98   :  { %379 = vst [vmem:[#allocation2 + $0x14] sm:$0xf] %v351_v44  ;;  %v352_v15 = vpack.c.bf16 %v275_v45, %v231_v38  ;;  %3512 = vmatmul.msk.bf16.gmra.mxu1 %vm194_vm0, %v4392_v23  ;;  %v3896_v23 = vld [vmem:[%s5981_s5 + $0x154] sm:$0xf]  ;;  %v3893_v44 = vld [vmem:[%s5981_s5 + $0x13c] sm:$0xf] }
  0x99   :  { %v4779_v16 = vor.u32 %v3896_v23, %v3722_v9  ;;  %1392 = vmatpush.bf16.msra.mxu1 %v4768_v8  ;;  %v3888_v38 = vld [vmem:[%s5981_s5 + $0x110] sm:$0xf0]  ;;  %v3710_v45 = vld [vmem:[%s5981_s5 + $0x144] sm:$0xf0] }
  0x9a   :  { %380 = vst [vmem:[#allocation2 + $0x18] sm:$0xff] %v352_v15  ;;  %v4792_v40 = vor.u32 %v3888_v38, %v3684_v34  ;;  %v4800_v50 = vor.u32 %v3893_v44, %v3710_v45  ;;  %v3660_v34 = vld [vmem:[%s5981_s5 + $0xd8] sm:$0xf]  ;;  %v3882_v38 = vld [vmem:[%s5981_s5 + $0xe0] sm:$0xf0] }
  0x9b   :  { %v318_v6 = vpop.f32.mrf.mxu2  ;;  %1065 = vmatpush.bf16.msrb.mxu2 %v4779_v16  ;;  %v4837_v44 = vor.u32 %v3882_v38, %v3660_v34  ;;  %v3887_v45 = vld [vmem:[%s5981_s5 + $0x10c] sm:$0xf]  ;;  %v3901_v38 = vld [vmem:[%s5981_s5 + $0x178] sm:$0xf0] }
  0x9c   :  { %v319_v11 = vadd.f32 %v318_v6, %v4698_v0  ;;  %v4777_v12 = vpop.f32.mrf.mxu3  ;;  %v232_v21 = vpop.f32.mrf.mxu0  ;;  %1054 = vmatpush.bf16.msra.mxu3 %v4792_v40  ;;  %v3698_v6 = vld [vmem:[%s5981_s5 + $0x12c] sm:$0xf0] }
  0x9d   :  { %v233_v22 = vadd.f32 %v232_v21, %v4686_v56  ;;  %v276_v24 = vpop.f32.mrf.mxu1  ;;  %1393 = vmatpush.bf16.msra.mxu1 %v4792_v40  ;;  %v4822_v21 = vor.u32 %v3890_v3, %v3698_v6  ;;  %6065 = vst [vmem:[#allocation25_spill] sm:$0xff] %v4837_v44  ;;  %v3879_v3 = vld [vmem:[%s5981_s5 + $0xc8] sm:$0xf0] }
  0x9e   :  { %v353_v27 = vpack.c.bf16 %v319_v11, %v319_v11  ;;  %v277_v32 = vadd.f32 %v276_v24, %v4689_v58 }
  0x9f   :  { %1066 = vmatpush.bf16.msrb.mxu2 %v4800_v50 }
  0xa0   :  { %381 = vst [vmem:[#allocation2 + $0x20] sm:$0xf] %v353_v27  ;;  %v354_v47 = vpack.c.bf16 %v277_v32, %v233_v22  ;;  %1055 = vmatpush.bf16.msra.mxu3 %v4811_v2 }
  0xa1   :  { %1394 = vmatpush.bf16.msra.mxu1 %v4811_v2 }
  0xa2   :  { %382 = vst [vmem:[#allocation2 + $0x24] sm:$0xff] %v354_v47  ;;  %v3686_v47 = vld [vmem:[%s5981_s5 + $0x114] sm:$0xf0] }
  0xa3   :  { %v320_v15 = vpop.f32.mrf.mxu2  ;;  %1067 = vmatpush.bf16.msrb.mxu2 %v4822_v21  ;;  %v4847_v60 = vor.u32 %v3887_v45, %v3686_v47 }
  0xa4   :  { %v321_v23 = vadd.f32 %v320_v15, %v4698_v0  ;;  %v4820_v9 = vpop.f32.mrf.mxu3  ;;  %v235_v11 = vpop.f32.mrf.mxu0  ;;  %1056 = vmatpush.bf16.msra.mxu3 %v4837_v44  ;;  %v3648_v15 = vld [vmem:[%s5981_s5 + $0xc0] sm:$0xf] }
  0xa5   :  { %v236_v22 = vadd.f32 %v235_v11, %v4686_v56  ;;  %v279_v24 = vpop.f32.mrf.mxu1  ;;  %1395 = vmatpush.bf16.msra.mxu1 %v4837_v44  ;;  %v3674_v11 = vld [vmem:[%s5981_s5 + $0xfc] sm:$0xf0] }
  0xa6   :  { %v355_v27 = vpack.c.bf16 %v321_v23, %v321_v23  ;;  %v280_v32 = vadd.f32 %v279_v24, %v4689_v58  ;;  %v4858_v23 = vor.u32 %v3879_v3, %v3648_v15 }
  0xa7   :  { %3506 = vmatmul.msk.bf16.gmra.mxu0 %vm194_vm0, %v4405_v25  ;;  %1068 = vmatpush.bf16.msrb.mxu2 %v4847_v60 }
  0xa8   :  { %383 = vst [vmem:[#allocation2 + $0x2c] sm:$0xf] %v355_v27  ;;  %v356_v59 = vpack.c.bf16 %v280_v32, %v236_v22  ;;  %3513 = vmatmul.msk.bf16.gmra.mxu1 %vm194_vm0, %v4405_v25  ;;  %v3884_v25 = vld [vmem:[%s5981_s5 + $0xf4] sm:$0xf]  ;;  %v3740_v22 = vld [vmem:[%s5981_s5 + $0x170] sm:$0xf]  ;;  %1057 = vmatpush.bf16.msra.mxu3 %v4858_v23 }
  0xa9   :  { %6066 = vst [vmem:[#allocation26_spill] sm:$0xff] %v4858_v23  ;;  %v4872_v34 = vor.u32 %v3884_v25, %v3674_v11  ;;  %1396 = vmatpush.bf16.msra.mxu1 %v4858_v23  ;;  %v3662_v25 = vld [vmem:[%s5981_s5 + $0xe4] sm:$0xf0]  ;;  %v3728_v11 = vld [vmem:[%s5981_s5 + $0x158] sm:$0xf] }
  0xaa   :  { %384 = vst [vmem:[#allocation2 + $0x30] sm:$0xff] %v356_v59  ;;  %v4879_v59 = vor.u32 %v3901_v38, %v3740_v22 }
  0xab   :  { %v323_v6 = vpop.f32.mrf.mxu2  ;;  %1069 = vmatpush.bf16.msrb.mxu2 %v4872_v34  ;;  %1058 = vmatmul.bf16.vlgmr.msra.gmra.mxu3 %v5987_v53 }
  0xac   :  { %v324_v24 = vadd.f32 %v323_v6, %v4698_v0  ;;  %v4870_v27 = vpop.f32.mrf.mxu3  ;;  %v237_v32 = vpop.f32.mrf.mxu0  ;;  %1078 = vmatpush.bf16.msrb.mxu3 %v4879_v59  ;;  %v3881_v6 = vld [vmem:[%s5981_s5 + $0xdc] sm:$0xf] }
  0xad   :  { %v238_v45 = vadd.f32 %v237_v32, %v4686_v56  ;;  %v281_v47 = vpop.f32.mrf.mxu1  ;;  %1690 = vmatpush.bf16.msrb.mxu1 %v4424_v31  ;;  %v3898_v32 = vld [vmem:[%s5981_s5 + $0x160] sm:$0xf0] }
  0xae   :  { %v357_v15 = vpack.c.bf16 %v324_v24, %v324_v24  ;;  %v282_v3 = vadd.f32 %v281_v47, %v4689_v58  ;;  %v4896_v24 = vor.u32 %v3881_v6, %v3662_v25  ;;  %v4901_v38 = vor.u32 %v3898_v32, %v3728_v11  ;;  %v3895_v32 = vld [vmem:[%s5981_s5 + $0x148] sm:$0xf0] }
  0xb0   :  { %385 = vst [vmem:[#allocation2 + $0x38] sm:$0xf] %v357_v15  ;;  %v358_v22 = vpack.c.bf16 %v282_v3, %v238_v45  ;;  %1070 = vmatpush.bf16.msrb.mxu2 %v4896_v24  ;;  %1079 = vmatpush.bf16.msrb.mxu3 %v4901_v38  ;;  %v3878_v45 = vld [vmem:[%s5981_s5 + $0xc4] sm:$0xf]  ;;  %v3650_v15 = vld [vmem:[%s5981_s5 + $0xcc] sm:$0xf0] }
  0xb1   :  { %1691 = vmatpush.bf16.msrb.mxu1 %v4450_v39  ;;  %v3716_v3 = vld [vmem:[%s5981_s5 + $0x140] sm:$0xf] }
  0xb2   :  { %386 = vst [vmem:[#allocation2 + $0x3c] sm:$0xff] %v358_v22  ;;  %v4918_v22 = vor.u32 %v3878_v45, %v3650_v15  ;;  %v4924_v52 = vor.u32 %v3895_v32, %v3716_v3  ;;  %v3892_v45 = vld [vmem:[%s5981_s5 + $0x130] sm:$0xf0]  ;;  %v6070_v3 = vmov 0.0|0.0  }
  0xb3   :  { %v325_v47 = vpop.f32.mrf.mxu2 }
  0xb4   :  { %v326_v6 = vadd.f32 %v325_v47, %v4698_v0  ;;  %v4916_v25 = vpop.f32.mrf.mxu3  ;;  %v240_v11 = vpop.f32.mrf.mxu0  ;;  %6067 = vst [vmem:[#allocation27_spill] sm:$0xff] %v4918_v22  ;;  %1071 = vmatpush.bf16.msrb.mxu2 %v4918_v22  ;;  %1080 = vmatpush.bf16.msrb.mxu3 %v4924_v52  ;;  %v3704_v47 = vld [vmem:[%s5981_s5 + $0x128] sm:$0xf] }
  0xb5   :  { %v241_v53 = vadd.f32 %v240_v11, %v4686_v56  ;;  %v284_v23 = vpop.f32.mrf.mxu1  ;;  %6068 = vst [vmem:[#allocation28_spill] sm:$0xff] %v4924_v52  ;;  %1692 = vmatpush.bf16.msrb.mxu1 %v4462_v43 }
  0xb6   :  { %v359_v44 = vpack.c.bf16 %v326_v6, %v326_v6  ;;  %v285_v46 = vadd.f32 %v284_v23, %v4689_v58  ;;  %v4940_v23 = vor.u32 %v3892_v45, %v3704_v47 }
  0xb7   :  { %3507 = vmatmul.msk.bf16.gmra.mxu0 %vm194_vm0, %v4488_v51  ;;  %1072 = vmatmul.bf16.vlgmr.msrb.gmra.mxu2 %v6070_v3 }
  0xb8   :  { %387 = vst [vmem:[#allocation2 + $0x44] sm:$0xf] %v359_v44  ;;  %v360_v15 = vpack.c.bf16 %v285_v46, %v241_v53  ;;  %3514 = vmatmul.msk.bf16.gmra.mxu1 %vm194_vm0, %v4488_v51  ;;  %1341 = vmatpush.bf16.msra.mxu2 %v4414_v28  ;;  %v3692_v44 = vld [vmem:[%s5981_s5 + $0x110] sm:$0xf]  ;;  %v3889_v51 = vld [vmem:[%s5981_s5 + $0x118] sm:$0xf0] }
  0xb9   :  { %6069 = vst [vmem:[#allocation29_spill] sm:$0xff] %v4940_v23  ;;  %1693 = vmatpush.bf16.msrb.mxu1 %v4480_v49  ;;  %1081 = vmatpush.bf16.msrb.mxu3 %v4940_v23  ;;  %v4955_v32 = vor.u32 %v3889_v51, %v3692_v44  ;;  %v3886_v44 = vld [vmem:[%s5981_s5 + $0x100] sm:$0xf0] }
  0xba   :  { %388 = vst [vmem:[#allocation2 + $0x48] sm:$0xff] %v360_v15 }
  0xbb   :  { %v328_v6 = vpop.f32.mrf.mxu2  ;;  %6071 = vst [vmem:[#allocation30_spill] sm:$0xff] %v4955_v32 }
  0xbc   :  { %v329_v46 = vadd.f32 %v328_v6, %v4698_v0  ;;  %v4953_v53 = vpop.f32.mrf.mxu3  ;;  %v242_v11 = vpop.f32.mrf.mxu0  ;;  %1342 = vmatpush.bf16.msra.mxu2 %v4439_v35  ;;  %v3680_v6 = vld [vmem:[%s5981_s5 + $0xf8] sm:$0xf] }
  0xbd   :  { %v243_v47 = vadd.f32 %v242_v11, %v4686_v56  ;;  %v286_v45 = vpop.f32.mrf.mxu1  ;;  %1694 = vmatpush.bf16.msrb.mxu1 %v4509_v57  ;;  %1082 = vmatpush.bf16.msrb.mxu3 %v4955_v32  ;;  %v4968_v35 = vor.u32 %v3886_v44, %v3680_v6  ;;  %v3668_v11 = vld [vmem:[%s5981_s5 + $0xe0] sm:$0xf] }
  0xbe   :  { %v361_v15 = vpack.c.bf16 %v329_v46, %v329_v46  ;;  %v287_v28 = vadd.f32 %v286_v45, %v4689_v58  ;;  %v3883_v45 = vld [vmem:[%s5981_s5 + $0xe8] sm:$0xf0] }
  0xbf   :  { %6072 = vst [vmem:[#allocation31_spill] sm:$0xff] %v4968_v35  ;;  %v4982_v6 = vor.u32 %v3883_v45, %v3668_v11  ;;  %v3880_v11 = vld [vmem:[%s5981_s5 + $0xd0] sm:$0xf0] }
  0xc0   :  { %389 = vst [vmem:[#allocation2 + $0x50] sm:$0xf] %v361_v15  ;;  %v362_v51 = vpack.c.bf16 %v287_v28, %v243_v47  ;;  %1343 = vmatpush.bf16.msra.mxu2 %v4459_v42 }
  0xc1   :  { %1695 = vmatpush.bf16.msrb.mxu1 %v4535_v1  ;;  %1083 = vmatpush.bf16.msrb.mxu3 %v4968_v35  ;;  %6073 = vst [vmem:[#allocation32_spill] sm:$0xff] %v4982_v6 }
  0xc2   :  { %390 = vst [vmem:[#allocation2 + $0x54] sm:$0xff] %v362_v51 }
  0xc3   :  { %v330_v46 = vpop.f32.mrf.mxu2 }
  0xc4   :  { %v331_v28 = vadd.f32 %v330_v46, %v4698_v0  ;;  %v4980_v47 = vpop.f32.mrf.mxu3  ;;  %v245_v15 = vpop.f32.mrf.mxu0  ;;  %1344 = vmatpush.bf16.msra.mxu2 %v4477_v48  ;;  %v3656_v46 = vld [vmem:[%s5981_s5 + $0xc8] sm:$0xf] }
  0xc5   :  { %v246_v44 = vadd.f32 %v245_v15, %v4686_v56  ;;  %v289_v51 = vpop.f32.mrf.mxu1  ;;  %1696 = vmatpush.bf16.msrb.mxu1 %v4553_v7  ;;  %1084 = vmatpush.bf16.msrb.mxu3 %v4982_v6 }
  0xc6   :  { %v363_v42 = vpack.c.bf16 %v331_v28, %v331_v28  ;;  %v290_v2 = vadd.f32 %v289_v51, %v4689_v58  ;;  %v4999_v28 = vor.u32 %v3880_v11, %v3656_v46 }
  0xc7   :  { %3508 = vmatmul.msk.bf16.gmra.mxu0 %vm194_vm0, %v4582_v17 }
  0xc8   :  { %391 = vst [vmem:[#allocation2 + $0x5c] sm:$0xf] %v363_v42  ;;  %v364_v45 = vpack.c.bf16 %v290_v2, %v246_v44  ;;  %3515 = vmatmul.msk.bf16.gmra.mxu1 %vm194_vm0, %v4582_v17  ;;  %1345 = vmatpush.bf16.msra.mxu2 %v4499_v54 }
  0xc9   :  { %6074 = vst [vmem:[#allocation33_spill] sm:$0xff] %v4999_v28  ;;  %1697 = vmatpush.bf16.msrb.mxu1 %v4574_v14  ;;  %1085 = vmatpush.bf16.msrb.mxu3 %v4999_v28 }
  0xca   :  { %392 = vst [vmem:[#allocation2 + $0x60] sm:$0xff] %v364_v45 }
  0xcb   :  { %v333_v15 = vpop.f32.mrf.mxu2 }
  0xcc   :  { %v334_v51 = vadd.f32 %v333_v15, %v4698_v0  ;;  %v5005_v48 = vpop.f32.mrf.mxu3  ;;  %v247_v41 = vpop.f32.mrf.mxu0  ;;  %1346 = vmatpush.bf16.msra.mxu2 %v4524_v61  ;;  %1086 = vmatmul.bf16.vlgmr.msrb.gmra.mxu3 %v6070_v3 }
  0xcd   :  { %1355 = vmatpush.bf16.msra.mxu3 %v4424_v31  ;;  %v248_v42 = vadd.f32 %v247_v41, %v4686_v56  ;;  %v291_v17 = vpop.f32.mrf.mxu1 }
  0xce   :  { %v365_v2 = vpack.c.bf16 %v334_v51, %v334_v51  ;;  %v292_v44 = vadd.f32 %v291_v17, %v4689_v58  ;;  %v4278_v17 = vmov 0  }
  0xcf   :  { %3986 = vset.pattern.permute.xlu0 %v4278_v17  ;;  %3987 = vset.pattern.permute.xlu1 %v4278_v17 }
  0xd0   :  { %393 = vst [vmem:[#allocation2 + $0x68] sm:$0xf] %v365_v2  ;;  %v366_v46 = vpack.c.bf16 %v292_v44, %v248_v42  ;;  %1347 = vmatpush.bf16.msra.mxu2 %v4544_v4  ;;  %v3750_v2 = vld [vmem:[%s5984_s2 + $0x60] sm:$0xff]  ;;  %3988 = vset.pattern.permute.xlu2 %v4278_v17  ;;  %v3751_v17 = vld [vmem:[%s5984_s2 + $0x68] sm:$0xff] }
  0xd1   :  { %1356 = vmatpush.bf16.msra.mxu3 %v4450_v39  ;;  %1316 = vperm.xlu0 %3986, %v3750_v2  }
  0xd2   :  { %394 = vst [vmem:[#allocation2 + $0x6c] sm:$0xff] %v366_v46 }
  0xd3   :  { %v335_v11 = vpop.f32.mrf.mxu2 }
  0xd4   :  { %v336_v45 = vadd.f32 %v335_v11, %v4698_v0  ;;  %v5015_v15 = vpop.f32.mrf.mxu3  ;;  %v250_v61 = vpop.f32.mrf.mxu0  ;;  %1348 = vmatpush.bf16.msra.mxu2 %v4571_v13 }
  0xd5   :  { %1357 = vmatpush.bf16.msra.mxu3 %v4462_v43  ;;  %v251_v41 = vadd.f32 %v250_v61, %v4686_v56  ;;  %v294_v3 = vpop.f32.mrf.mxu1 }
  0xd6   :  { %v367_v51 = vpack.c.bf16 %v336_v45, %v336_v45  ;;  %v295_v42 = vadd.f32 %v294_v3, %v4689_v58 }
  0xd7   :  { %3509 = vmatmul.msk.bf16.gmra.mxu0 %vm194_vm0, %v4636_v37 }
  0xd8   :  { %1403 = vmatpush.bf16.msrb.mxu2 %v4757_v62  ;;  %395 = vst [vmem:[#allocation2 + $0x74] sm:$0xf] %v367_v51  ;;  %v368_v44 = vpack.c.bf16 %v295_v42, %v251_v41  ;;  %3516 = vmatmul.msk.bf16.gmra.mxu1 %vm194_vm0, %v4636_v37 }
  0xd9   :  { %1358 = vmatpush.bf16.msra.mxu3 %v4480_v49  ;;  %1321 = vperm.xlu0 %3986, %v3751_v17  }
  0xda   :  { %396 = vst [vmem:[#allocation2 + $0x78] sm:$0xff] %v368_v44 }
  0xdb   :  { %v338_v61 = vpop.f32.mrf.mxu2 }
  0xdc   :  { %1404 = vmatpush.bf16.msrb.mxu2 %v4779_v16  ;;  %v339_v46 = vadd.f32 %v338_v61, %v4698_v0  ;;  %v5032_v11 = vpop.f32.mrf.mxu3  ;;  %v252_v45 = vpop.f32.mrf.mxu0 }
  0xdd   :  { %1359 = vmatpush.bf16.msra.mxu3 %v4509_v57  ;;  %v253_v3 = vadd.f32 %v252_v45, %v4686_v56  ;;  %v296_v41 = vpop.f32.mrf.mxu1 }
  0xde   :  { %v369_v37 = vpack.c.bf16 %v339_v46, %v339_v46  ;;  %v297_v51 = vadd.f32 %v296_v41, %v4689_v58 }
  0xe0   :  { %1405 = vmatpush.bf16.msrb.mxu2 %v4800_v50  ;;  %397 = vst [vmem:[#allocation2 + $0x80] sm:$0xf] %v369_v37  ;;  %v370_v42 = vpack.c.bf16 %v297_v51, %v253_v3 }
  0xe1   :  { %1360 = vmatpush.bf16.msra.mxu3 %v4535_v1 }
  0xe2   :  { %398 = vst [vmem:[#allocation2 + $0x84] sm:$0xff] %v370_v42  ;;  %v3790_v42 = vld [vmem:[%s5984_s2 + $0x30] sm:$0xff] }
  0xe3   :  { %v340_v2 = vpop.f32.mrf.mxu2  ;;  %2320 = vperm.xlu0 %3986, %v3790_v42  }
  0xe4   :  { %1406 = vmatpush.bf16.msrb.mxu2 %v4822_v21  ;;  %v341_v44 = vadd.f32 %v340_v2, %v4698_v0  ;;  %v5044_v61 = vpop.f32.mrf.mxu3  ;;  %v255_v46 = vpop.f32.mrf.mxu0 }
  0xe5   :  { %1361 = vmatpush.bf16.msra.mxu3 %v4553_v7  ;;  %v256_v45 = vadd.f32 %v255_v46, %v4686_v56  ;;  %v299_v3 = vpop.f32.mrf.mxu1 }
  0xe6   :  { %v371_v41 = vpack.c.bf16 %v341_v44, %v341_v44  ;;  %v300_v37 = vadd.f32 %v299_v3, %v4689_v58 }
  0xe8   :  { %1407 = vmatpush.bf16.msrb.mxu2 %v4847_v60  ;;  %399 = vst [vmem:[#allocation2 + $0x8c] sm:$0xf] %v371_v41  ;;  %v372_v51 = vpack.c.bf16 %v300_v37, %v256_v45  ;;  %v3455_v41 = vld [vmem:[%s5982_s4 + $0x3] sm:$0x7] }
  0xe9   :  { %1362 = vmatpush.bf16.msra.mxu3 %v4574_v14  ;;  %v5069_v14 = vperm.slane %v3455_v41, 0 }
  0xea   :  { %400 = vst [vmem:[#allocation2 + $0x90] sm:$0xff] %v372_v51 }
  0xeb   :  { %v343_v17 = vpop.f32.mrf.mxu2  ;;  %v512_v54 = vadd.f32 %v4916_v25, %v5069_v14 }
  0xec   :  { %1408 = vmatpush.bf16.msrb.mxu2 %v4872_v34  ;;  %v344_v2 = vadd.f32 %v343_v17, %v4698_v0  ;;  %v5057_v44 = vpop.f32.mrf.mxu3  ;;  %v257_v46 = vpop.f32.mrf.mxu0  ;;  %v3805_v17 = vld [vmem:[%s5984_s2 + $0x28] sm:$0xff] }
  0xed   :  { %1417 = vmatpush.bf16.msrb.mxu3 %v4879_v59  ;;  %v258_v45 = vadd.f32 %v257_v46, %v4686_v56  ;;  %v301_v3 = vpop.f32.mrf.mxu1  ;;  %v5071_v56 = vperm.slane %v3455_v41, 1  ;;  %2660 = vperm.xlu0 %3986, %v3805_v17   ;;  %v5074_v46 = vperm.slane %v3455_v41, 2 }
  0xee   :  { %v373_v37 = vpack.c.bf16 %v344_v2, %v344_v2  ;;  %v302_v51 = vadd.f32 %v301_v3, %v4689_v58 }
  0xf0   :  { %1409 = vmatpush.bf16.msrb.mxu2 %v4896_v24  ;;  %401 = vst [vmem:[#allocation2 + $0x98] sm:$0xf] %v373_v37  ;;  %v374_v42 = vpack.c.bf16 %v302_v51, %v258_v45  ;;  %v500_v37 = vadd.f32 %v4705_v5, %v5069_v14  ;;  %v1096_v5 = vunpack.c.l.bf16 %v4696_v63 }
  0xf1   :  { %1418 = vmatpush.bf16.msrb.mxu3 %v4901_v38 }
  0xf2   :  { %402 = vst [vmem:[#allocation2 + $0x9c] sm:$0xff] %v374_v42 }
  0xf3   :  { %v345_v58 = vpop.f32.mrf.mxu2 }
  0xf4   :  { %1410 = vmatpush.bf16.msrb.mxu2 %v4918_v22  ;;  %v346_v2 = vadd.f32 %v345_v58, %v4698_v0  ;;  %v5078_v45 = vpop.f32.mrf.mxu3  ;;  %v543_v3 = vpop.f32.mrf.mxu0  ;;  %v3319_v0 = vld [vmem:[%s5984_s2] sm:$0xff] }
  0xf5   :  { %1419 = vmatpush.bf16.msrb.mxu3 %v4924_v52  ;;  %v544_v51 = vadd.f32 %v543_v3, %v5071_v56  ;;  %v587_v13 = vpop.f32.mrf.mxu1  ;;  %3323 = vperm.xlu0 %3986, %v3319_v0   ;;  %v1097_v3 = vunpack.c.h.bf16 %v4696_v63  ;;  %v1099_v63 = vunpack.c.l.bf16 %v4718_v19 }
  0xf6   :  { %v375_v17 = vpack.c.bf16 %v346_v2, %v346_v2  ;;  %v588_v41 = vadd.f32 %v587_v13, %v5074_v46 }
  0xf7   :  { %v622_v42 = vpack.c.bf16 %v544_v51, %v500_v37  ;;  %v502_v37 = vadd.f32 %v4732_v33, %v5069_v14  ;;  %v1100_v33 = vunpack.c.h.bf16 %v4718_v19 }
  0xf8   :  { %403 = vst [vmem:[#allocation2 + $0xa4] sm:$0xf] %v375_v17  ;;  %v623_v7 = vpack.c.bf16 %v588_v41, %v588_v41 }
  0xf9   :  { %1420 = vmatpush.bf16.msrb.mxu3 %v4940_v23  ;;  %650 = vst [vmem:[#allocation3] sm:$0xff] %v622_v42 }
  0xfa   :  { %651 = vst [vmem:[#allocation3 + $0x8] sm:$0xf] %v623_v7 }
  0xfb   :  { %v888_v58 = vpop.f32.mrf.mxu2 }
  0xfc   :  { %v1102_v2 = vadd.f32 %v1096_v5, %v888_v58  ;;  %v902_v4 = vpop.f32.mrf.mxu3  ;;  %v545_v13 = vpop.f32.mrf.mxu0 }
  0xfd   :  { %1421 = vmatpush.bf16.msrb.mxu3 %v4955_v32  ;;  %v1142_v51 = vadd.f32 %v1097_v3, %v902_v4  ;;  %v546_v17 = vadd.f32 %v545_v13, %v5071_v56  ;;  %v589_v41 = vpop.f32.mrf.mxu1 }
  0xfe   :  { %v3742_v42 = vmul.f32 -1.442695, %v1102_v2  ;;  %v590_v0 = vadd.f32 %v589_v41, %v5074_v46  ;;  %v505_v2 = vadd.f32 %v4777_v12, %v5069_v14 }
  0xff   :  { %v3744_v1 = vmul.f32 -1.442695, %v1142_v51  ;;  %v624_v7 = vpack.c.bf16 %v546_v17, %v502_v37 }
 0x100   :  { %3991 = vpow2.f32 %v3742_v42  ;;  %v625_v57 = vpack.c.bf16 %v590_v0, %v590_v0 }
 0x101   :  { %1422 = vmatpush.bf16.msrb.mxu3 %v4968_v35  ;;  %3993 = vpow2.f32 %v3744_v1  ;;  %652 = vst [vmem:[#allocation3 + $0xc] sm:$0xff] %v624_v7 }
 0x102   :  { %653 = vst [vmem:[#allocation3 + $0x14] sm:$0xf] %v625_v57 }
 0x103   :  { %v890_v4 = vpop.f32.mrf.mxu2 }
 0x104   :  { %v1103_v5 = vadd.f32 %v1099_v63, %v890_v4  ;;  %v904_v58 = vpop.f32.mrf.mxu3  ;;  %v548_v3 = vpop.f32.mrf.mxu0  ;;  %v507_v4 = vadd.f32 %v4820_v9, %v5069_v14 }
 0x105   :  { %1423 = vmatpush.bf16.msrb.mxu3 %v4982_v6  ;;  %v1143_v13 = vadd.f32 %v1100_v33, %v904_v58  ;;  %v549_v37 = vadd.f32 %v548_v3, %v5071_v56  ;;  %v592_v51 = vpop.f32.mrf.mxu1 }
 0x106   :  { %v3992_v1 = vpop.eup %3991  ;;  %v3743_v17 = vmul.f32 -1.442695, %v1103_v5  ;;  %v593_v41 = vadd.f32 %v592_v51, %v5074_v46 }
 0x107   :  { %v3994_v57 = vpop.eup %3993  ;;  %v1110_v42 = vadd.f32 1.0, %v3992_v1  ;;  %v3745_v0 = vmul.f32 -1.442695, %v1143_v13  ;;  %v626_v19 = vpack.c.bf16 %v549_v37, %v505_v2 }
 0x108   :  { %v5104_v7 = vadd.f32 1.0, %v3994_v57  ;;  %3995 = vpow2.f32 %v3743_v17  ;;  %v627_v63 = vpack.c.bf16 %v593_v41, %v593_v41 }
 0x109   :  { %1424 = vmatpush.bf16.msrb.mxu3 %v4999_v28  ;;  %3997 = vrcp.f32 %v1110_v42  ;;  %654 = vst [vmem:[#allocation3 + $0x18] sm:$0xff] %v626_v19  ;;  %vm1117_vm2 = vweird.f32 %v1110_v42 }
 0x10a   :  { %3999 = vrcp.f32 %v5104_v7  ;;  %655 = vst [vmem:[#allocation3 + $0x20] sm:$0xf] %v627_v63  ;;  %v5123_v63 = vld [vmem:[%s5983_s6] ss:$0 sm:$0xff]  ;;  %vm1157_vm4 = vweird.f32 %v5104_v7 }
 0x10b   :  { %4001 = vpow2.f32 %v3745_v0  ;;  %v916_v9 = vpop.f32.mrf.mxu2 }
 0x10c   :  { %v550_v12 = vpop.f32.mrf.mxu0  ;;  %v1185_v28 = vadd.f32 %v5123_v63, %v916_v9 }
 0x10d   :  { %v551_v33 = vadd.f32 %v550_v12, %v5071_v56  ;;  %v594_v5 = vpop.f32.mrf.mxu1 }
 0x10e   :  { %v3996_v58 = vpop.eup %3995  ;;  %v595_v3 = vadd.f32 %v594_v5, %v5074_v46  ;;  %v1123_v5 = vand.u32 2147483648, %v1110_v42 }
 0x10f   :  { %v3998_v2 = vpop.eup %3997  ;;  %v5111_v13 = vadd.f32 1.0, %v3996_v58  ;;  %v628_v37 = vpack.c.bf16 %v551_v33, %v507_v4  ;;  %v510_v4 = vadd.f32 %v4870_v27, %v5069_v14 }
 0x110   :  { %v5113_v51 = vpop.eup %3999  ;;  %v1113_v1 = vmul.f32 %v3998_v2, %v1110_v42  ;;  %v629_v17 = vpack.c.bf16 %v595_v3, %v595_v3  ;;  %v1093_v3 = vld [vmem:[#allocation2 + $0x8] sm:$0xf]  ;;  %vm1118_vm1 = vweird.f32 %v3998_v2 }
 0x111   :  { %v4002_v41 = vpop.eup %4001  ;;  %v1153_v57 = vmul.f32 %v5113_v51, %v5104_v7  ;;  %4003 = vrcp.f32 %v5111_v13  ;;  %656 = vst [vmem:[#allocation3 + $0x24] sm:$0xff] %v628_v37  ;;  %v1098_v32 = vunpack.c.l.bf16 %v1093_v3  ;;  %vm1119_vm3 = vmor %vm1117_vm2, %vm1118_vm1  ;;  %vm1158_vm6 = vweird.f32 %v5113_v51 }
 0x112   :  { %v5118_v0 = vadd.f32 1.0, %v4002_v41  ;;  %v1114_v19 = vsub.f32 1.0, %v1113_v1  ;;  %657 = vst [vmem:[#allocation3 + $0x2c] sm:$0xf] %v629_v17  ;;  %v1121_v1 = vand.u32 2147483647, %v1110_v42  ;;  %vm1132_vm8 = vweird.f32 %v5111_v13  ;;  %vm5152_vm9 = vmor %vm1157_vm4, %vm1158_vm6 }
 0x113   :  { %v1154_v12 = vsub.f32 1.0, %v1153_v57 }
 0x114   :  { %4005 = vrcp.f32 %v5118_v0  ;;  %v553_v33 = vpop.f32.mrf.mxu0  ;;  %v1115_v37 = vmul.f32 %v3998_v2, %v1114_v19  ;;  %vm1122_vm5 = vcmp.eq.f32.partialorder %v1121_v1, 8.507059e+37  ;;  %vm1172_vm14 = vweird.f32 %v5118_v0 }
 0x115   :  { %v554_v58 = vadd.f32 %v553_v33, %v5071_v56  ;;  %v597_v41 = vpop.f32.mrf.mxu1  ;;  %v1155_v17 = vmul.f32 %v5113_v51, %v1154_v12  ;;  %v1124_v33 = vor.u32 1.1754944e-38, %v1123_v5  ;;  %v1161_v12 = vand.u32 2147483647, %v5104_v7 }
 0x116   :  { %v1116_v35 = vadd.f32 %v3998_v2, %v1115_v37  ;;  %v598_v27 = vadd.f32 %v597_v41, %v5074_v46  ;;  %v1138_v37 = vand.u32 2147483648, %v5111_v13  ;;  %v918_v41 = vpop.f32.mrf.mxu2 }
 0x117   :  { %v4004_v6 = vpop.eup %4003  ;;  %v630_v57 = vpack.c.bf16 %v554_v58, %v510_v4  ;;  %v1156_v25 = vadd.f32 %v5113_v51, %v1155_v17  ;;  %vm1162_vm12 = vcmp.eq.f32.partialorder %v1161_v12, 8.507059e+37 }
 0x118   :  { %v1128_v19 = vmul.f32 %v4004_v6, %v5111_v13  ;;  %v1120_v42 = vsel %vm1119_vm3, %v3998_v2, %v1116_v35  ;;  %v631_v9 = vpack.c.bf16 %v598_v27, %v598_v27  ;;  %v1163_v35 = vand.u32 2147483648, %v5104_v7 }
 0x119   :  { %658 = vst [vmem:[#allocation3 + $0x30] sm:$0xff] %v630_v57  ;;  %v1125_v4 = vsel %vm1122_vm5, %v1124_v33, %v1120_v42  ;;  %vm1133_vm7 = vweird.f32 %v4004_v6  ;;  %v1136_v57 = vand.u32 2147483647, %v5111_v13  ;;  %v1160_v13 = vsel %vm5152_vm9, %v5113_v51, %v1156_v25 }
 0x11a   :  { %v5136_v49 = vpop.eup %4005  ;;  %v1129_v58 = vsub.f32 1.0, %v1128_v19  ;;  %v1187_v3 = vmul.f32 %v1185_v28, %v1125_v4  ;;  %659 = vst [vmem:[#allocation3 + $0x38] sm:$0xf] %v631_v9  ;;  %v1139_v9 = vor.u32 1.1754944e-38, %v1138_v37  ;;  %v1186_v4 = vadd.f32 %v5123_v63, %v918_v41  ;;  %vm1134_vm10 = vmor %vm1132_vm8, %vm1133_vm7 }
 0x11b   :  { %v1168_v5 = vmul.f32 %v5136_v49, %v5118_v0  ;;  %v1164_v7 = vor.u32 1.1754944e-38, %v1163_v35  ;;  %vm1137_vm11 = vcmp.eq.f32.partialorder %v1136_v57, 8.507059e+37  ;;  %vm1173_vm13 = vweird.f32 %v5136_v49 }
 0x11c   :  { %v555_v2 = vpop.f32.mrf.mxu0  ;;  %v1130_v1 = vmul.f32 %v4004_v6, %v1129_v58  ;;  %v1189_v33 = vadd.f32 %v1187_v3, %v1098_v32  ;;  %v1095_v3 = vld [vmem:[#allocation2 + $0x14] sm:$0xf]  ;;  %vm5168_vm15 = vmor %vm1172_vm14, %vm1173_vm13 }
 0x11d   :  { %v1169_v27 = vsub.f32 1.0, %v1168_v5  ;;  %v556_v19 = vadd.f32 %v555_v2, %v5071_v56  ;;  %v599_v17 = vpop.f32.mrf.mxu1  ;;  %v1101_v51 = vunpack.c.l.bf16 %v1095_v3 }
 0x11e   :  { %v1131_v42 = vadd.f32 %v4004_v6, %v1130_v1  ;;  %v600_v58 = vadd.f32 %v599_v17, %v5074_v46  ;;  %4007 = vtanh.f32 %v1189_v33  ;;  %v1165_v17 = vsel %vm1162_vm12, %v1164_v7, %v1160_v13 }
 0x11f   :  { %v1170_v32 = vmul.f32 %v5136_v49, %v1169_v27  ;;  %v632_v5 = vpack.c.bf16 %v556_v19, %v512_v54  ;;  %v1178_v27 = vand.u32 2147483648, %v5118_v0  ;;  %v1176_v54 = vand.u32 2147483647, %v5118_v0 }
 0x120   :  { %v1135_v2 = vsel %vm1134_vm10, %v4004_v6, %v1131_v42  ;;  %v633_v1 = vpack.c.bf16 %v600_v58, %v600_v58  ;;  %v515_v33 = vadd.f32 %v4953_v53, %v5069_v14  ;;  %v1193_v19 = vsub.f32 1.0, %v1165_v17 }
 0x121   :  { %v1171_v37 = vadd.f32 %v5136_v49, %v1170_v32  ;;  %660 = vst [vmem:[#allocation3 + $0x3c] sm:$0xff] %v632_v5  ;;  %v1140_v41 = vsel %vm1137_vm11, %v1139_v9, %v1135_v2  ;;  %vm1177_vm0 = vcmp.eq.f32.partialorder %v1176_v54, 8.507059e+37  ;;  %v1197_v3 = vmul.f32 0.0, %v1165_v17 }
 0x122   :  { %v1188_v25 = vmul.f32 %v1186_v4, %v1140_v41  ;;  %661 = vst [vmem:[#allocation3 + $0x44] sm:$0xf] %v633_v1  ;;  %v1179_v4 = vor.u32 1.1754944e-38, %v1178_v27  ;;  %v517_v1 = vadd.f32 %v4980_v47, %v5069_v14 }
 0x123   :  { %v1175_v28 = vsel %vm5168_vm15, %v5136_v49, %v1171_v37 }
 0x124   :  { %v1190_v12 = vadd.f32 %v1188_v25, %v1101_v51  ;;  %v558_v35 = vpop.f32.mrf.mxu0  ;;  %v4008_v57 = vpop.eup %4007  ;;  %v1180_v13 = vsel %vm1177_vm0, %v1179_v4, %v1175_v28  ;;  %v520_v28 = vadd.f32 %v5005_v48, %v5069_v14 }
 0x125   :  { %v559_v42 = vadd.f32 %v558_v35, %v5071_v56  ;;  %v602_v9 = vpop.f32.mrf.mxu1  ;;  %v1195_v58 = vmul.f32 %v4008_v57, %v1193_v19  ;;  %v1194_v7 = vsub.f32 1.0, %v1180_v13  ;;  %v1198_v41 = vmul.f32 0.0, %v1180_v13 }
 0x126   :  { %4009 = vtanh.f32 %v1190_v12  ;;  %v603_v0 = vadd.f32 %v602_v9, %v5074_v46  ;;  %v522_v13 = vadd.f32 %v5015_v15, %v5069_v14 }
 0x127   :  { %v634_v32 = vpack.c.bf16 %v559_v42, %v515_v33  ;;  %v5179_v53 = vadd.f32 %v1197_v3, %v1195_v58 }
 0x128   :  { %v635_v5 = vpack.c.bf16 %v603_v0, %v603_v0 }
 0x129   :  { %662 = vst [vmem:[#allocation3 + $0x48] sm:$0xff] %v634_v32  ;;  %v1326_v6 = vpack.c.bf16 %v5179_v53, %v5179_v53 }
 0x12a   :  { %663 = vst [vmem:[#allocation3 + $0x50] sm:$0xf] %v635_v5 }
 0x12b   :  { %v1337_v57 = vunpack.c.l.b16 %v1326_v6  ;;  %v527_v6 = vadd.f32 %v5044_v61, %v5069_v14 }
 0x12c   :  { %v4010_v2 = vpop.eup %4009  ;;  %v560_v49 = vpop.f32.mrf.mxu0 }
 0x12d   :  { %v1196_v37 = vmul.f32 %v4010_v2, %v1194_v7  ;;  %v561_v27 = vadd.f32 %v560_v49, %v5071_v56  ;;  %v604_v51 = vpop.f32.mrf.mxu1 }
 0x12e   :  { %v605_v25 = vadd.f32 %v604_v51, %v5074_v46 }
 0x12f   :  { %v5185_v54 = vadd.f32 %v1198_v41, %v1196_v37  ;;  %v636_v17 = vpack.c.bf16 %v561_v27, %v517_v1  ;;  %v525_v1 = vadd.f32 %v5032_v11, %v5069_v14 }
 0x130   :  { %v637_v12 = vpack.c.bf16 %v605_v25, %v605_v25 }
 0x131   :  { %v3905_v35 = vpack.c.bf16 %v5185_v54, %v5179_v53  ;;  %664 = vst [vmem:[#allocation3 + $0x54] sm:$0xff] %v636_v17  ;;  %v1327_v47 = vpack.c.bf16 %v5185_v54, %v5185_v54  ;;  %v6079_v17 = vld [vmem:[#allocation21_spill] sm:$0xff] }
 0x132   :  { %665 = vst [vmem:[#allocation3 + $0x5c] sm:$0xf] %v637_v12 }
 0x133   :  { %3906 = vst [vmem:[%s5985_s7] sm:$0xff] %v3905_v35   ;;  %v1338_v33 = vunpack.c.l.b16 %v1327_v47  ;;  %v6080_v47 = vld [vmem:[#allocation24_spill] sm:$0xff] }
 0x134   :  { %v563_v19 = vpop.f32.mrf.mxu0 }
 0x135   :  { %v564_v42 = vadd.f32 %v563_v19, %v5071_v56  ;;  %v1339_v9 = vpack.c.b16 %v1338_v33, %v1337_v57  ;;  %v607_v4 = vpop.f32.mrf.mxu1 }
 0x136   :  { %v608_v0 = vadd.f32 %v607_v4, %v5074_v46  ;;  %v530_v4 = vadd.f32 %v5057_v44, %v5069_v14  ;;  %v532_v44 = vadd.f32 %v5078_v45, %v5069_v14 }
 0x137   :  { %v638_v58 = vpack.c.bf16 %v564_v42, %v520_v28  ;;  %1349 = vmatmul.bf16.vlgmr.msra.gmra.mxu2 %v1339_v9  ;;  %1363 = vmatmul.bf16.vlgmr.msra.gmra.mxu3 %v1339_v9  ;;  %v6081_v28 = vld [vmem:[#allocation22_spill] sm:$0xff]  ;;  %v6082_v42 = vld [vmem:[#allocation25_spill] sm:$0xff] }
 0x138   :  { %1377 = vmatmul.bf16.vlgmr.msra.gmra.mxu0 %v1339_v9  ;;  %v639_v32 = vpack.c.bf16 %v608_v0, %v608_v0  ;;  %1704 = vmatpush.bf16.msra.mxu2 %v4561_v10  ;;  %v6083_v9 = vld [vmem:[#allocation23_spill] sm:$0xff] }
 0x139   :  { %666 = vst [vmem:[#allocation3 + $0x60] sm:$0xff] %v638_v58  ;;  %1724 = vmatpush.bf16.msra.mxu3 %v4716_v18  ;;  %1738 = vmatpush.bf16.msra.mxu0 %v4757_v62 }
 0x13a   :  { %667 = vst [vmem:[#allocation3 + $0x68] sm:$0xf] %v639_v32  ;;  %v6084_v32 = vld [vmem:[#allocation26_spill] sm:$0xff] }
 0x13c   :  { %v565_v48 = vpop.f32.mrf.mxu0  ;;  %1705 = vmatpush.bf16.msra.mxu2 %v4596_v20 }
 0x13d   :  { %v566_v5 = vadd.f32 %v565_v48, %v5071_v56  ;;  %v609_v3 = vpop.f32.mrf.mxu1  ;;  %1725 = vmatpush.bf16.msra.mxu3 %v4729_v29  ;;  %1739 = vmatpush.bf16.msra.mxu0 %v4779_v16  ;;  %v1073_v48 = vpop.f32.mrf.mxu2 }
 0x13e   :  { %v610_v7 = vadd.f32 %v609_v3, %v5074_v46  ;;  %v1059_v3 = vpop.f32.mrf.mxu3 }
 0x13f   :  { %v640_v2 = vpack.c.bf16 %v566_v5, %v522_v13 }
 0x140   :  { %v641_v49 = vpack.c.bf16 %v610_v7, %v610_v7  ;;  %1706 = vmatpush.bf16.msra.mxu2 %v4607_v26 }
 0x141   :  { %668 = vst [vmem:[#allocation3 + $0x6c] sm:$0xff] %v640_v2  ;;  %1726 = vmatpush.bf16.msra.mxu3 %v4747_v55  ;;  %1740 = vmatpush.bf16.msra.mxu0 %v4800_v50 }
 0x142   :  { %669 = vst [vmem:[#allocation3 + $0x74] sm:$0xf] %v641_v49 }
 0x144   :  { %v568_v15 = vpop.f32.mrf.mxu0  ;;  %1707 = vmatpush.bf16.msra.mxu2 %v4617_v30 }
 0x145   :  { %v569_v37 = vadd.f32 %v568_v15, %v5071_v56  ;;  %v612_v41 = vpop.f32.mrf.mxu1  ;;  %1727 = vmatpush.bf16.msra.mxu3 %v4768_v8  ;;  %1741 = vmatpush.bf16.msra.mxu0 %v4822_v21 }
 0x146   :  { %v613_v27 = vadd.f32 %v612_v41, %v5074_v46 }
 0x147   :  { %v5220_v51 = vpack.c.bf16 %v569_v37, %v525_v1 }
 0x148   :  { %v643_v25 = vpack.c.bf16 %v613_v27, %v613_v27  ;;  %1708 = vmatpush.bf16.msra.mxu2 %v4631_v36 }
 0x149   :  { %1728 = vmatpush.bf16.msra.mxu3 %v4792_v40  ;;  %1742 = vmatpush.bf16.msra.mxu0 %v4847_v60 }
 0x14a   :  { %671 = vst [vmem:[#allocation3 + $0x80] sm:$0xf] %v643_v25 }
 0x14c   :  { %v570_v11 = vpop.f32.mrf.mxu0  ;;  %1709 = vmatpush.bf16.msra.mxu2 %v6079_v17 }
 0x14d   :  { %v571_v12 = vadd.f32 %v570_v11, %v5071_v56  ;;  %v614_v35 = vpop.f32.mrf.mxu1  ;;  %1729 = vmatpush.bf16.msra.mxu3 %v6080_v47  ;;  %1743 = vmatpush.bf16.msra.mxu0 %v4872_v34 }
 0x14e   :  { %v615_v57 = vadd.f32 %v614_v35, %v5074_v46  ;;  %v1075_v35 = vpop.f32.mrf.mxu2 }
 0x14f   :  { %v5232_v33 = vpack.c.bf16 %v571_v12, %v527_v6 }
 0x150   :  { %v645_v19 = vpack.c.bf16 %v615_v57, %v615_v57  ;;  %1710 = vmatpush.bf16.msra.mxu2 %v6081_v28 }
 0x151   :  { %1730 = vmatpush.bf16.msra.mxu3 %v6082_v42  ;;  %1744 = vmatpush.bf16.msra.mxu0 %v4896_v24 }
 0x152   :  { %673 = vst [vmem:[#allocation3 + $0x8c] sm:$0xf] %v645_v19 }
 0x154   :  { %v573_v61 = vpop.f32.mrf.mxu0  ;;  %1711 = vmatpush.bf16.msra.mxu2 %v6083_v9 }
 0x155   :  { %v574_v0 = vadd.f32 %v573_v61, %v5071_v56  ;;  %v617_v58 = vpop.f32.mrf.mxu1  ;;  %1731 = vmatpush.bf16.msra.mxu3 %v6084_v32  ;;  %1745 = vmatpush.bf16.msra.mxu0 %v4918_v22 }
 0x156   :  { %v618_v13 = vadd.f32 %v617_v58, %v5074_v46 }
 0x157   :  { %v646_v5 = vpack.c.bf16 %v574_v0, %v530_v4  ;;  %v1061_v4 = vpop.f32.mrf.mxu3 }
 0x158   :  { %v647_v7 = vpack.c.bf16 %v618_v13, %v618_v13 }
 0x159   :  { %v1206_v2 = vunpack.c.l.bf16 %v646_v5  ;;  %v1207_v49 = vunpack.c.h.bf16 %v646_v5 }
 0x15a   :  { %675 = vst [vmem:[#allocation3 + $0x98] sm:$0xf] %v647_v7 }
 0x15b   :  { %v1212_v15 = vadd.f32 %v1206_v2, %v1059_v3  ;;  %v1252_v1 = vadd.f32 %v1207_v49, %v1073_v48 }
 0x15c   :  { %v575_v37 = vpop.f32.mrf.mxu0 }
 0x15d   :  { %v3746_v41 = vmul.f32 -1.442695, %v1212_v15  ;;  %v576_v27 = vadd.f32 %v575_v37, %v5071_v56  ;;  %v3748_v25 = vmul.f32 -1.442695, %v1252_v1  ;;  %v619_v11 = vpop.f32.mrf.mxu1 }
 0x15e   :  { %v620_v6 = vadd.f32 %v619_v11, %v5074_v46 }
 0x15f   :  { %4011 = vpow2.f32 %v3746_v41  ;;  %v648_v12 = vpack.c.bf16 %v576_v27, %v532_v44  ;;  %v1087_v27 = vpop.f32.mrf.mxu3 }
 0x160   :  { %4013 = vpow2.f32 %v3748_v25  ;;  %v649_v57 = vpack.c.bf16 %v620_v6, %v620_v6  ;;  %v5253_v25 = vld [vmem:[%s5983_s6 + $0x1] ss:$0 sm:$0xff] }
 0x161   :  { %v1209_v19 = vunpack.c.l.bf16 %v648_v12  ;;  %v1210_v61 = vunpack.c.h.bf16 %v648_v12 }
 0x162   :  { %677 = vst [vmem:[#allocation3 + $0xa4] sm:$0xf] %v649_v57  ;;  %v1203_v57 = vld [vmem:[#allocation3 + $0x98] sm:$0xf] }
 0x163   :  { %v1213_v0 = vadd.f32 %v1209_v19, %v1061_v4  ;;  %v1253_v58 = vadd.f32 %v1210_v61, %v1075_v35  ;;  %v1295_v4 = vadd.f32 %v5253_v25, %v1087_v27 }
 0x165   :  { %v4012_v48 = vpop.eup %4011  ;;  %v3747_v14 = vmul.f32 -1.442695, %v1213_v0  ;;  %v3749_v56 = vmul.f32 -1.442695, %v1253_v58 }
 0x166   :  { %v4014_v45 = vpop.eup %4013  ;;  %v1220_v13 = vadd.f32 1.0, %v4012_v48  ;;  %v1208_v48 = vunpack.c.l.bf16 %v1203_v57 }
 0x167   :  { %4015 = vpow2.f32 %v3747_v14  ;;  %v1260_v5 = vadd.f32 1.0, %v4014_v45 }
 0x168   :  { %4017 = vrcp.f32 %v1220_v13  ;;  %v1233_v11 = vand.u32 2147483648, %v1220_v13  ;;  %v1231_v12 = vand.u32 2147483647, %v1220_v13  ;;  %vm1227_vm2 = vweird.f32 %v1220_v13 }
 0x169   :  { %4019 = vrcp.f32 %v1260_v5  ;;  %vm1267_vm4 = vweird.f32 %v1260_v5 }
 0x16a   :  { %4021 = vpow2.f32 %v3749_v56  ;;  %v1234_v0 = vor.u32 1.1754944e-38, %v1233_v11  ;;  %vm1232_vm5 = vcmp.eq.f32.partialorder %v1231_v12, 8.507059e+37 }
 0x16d   :  { %v4016_v46 = vpop.eup %4015 }
 0x16e   :  { %v4018_v3 = vpop.eup %4017  ;;  %v1221_v7 = vadd.f32 1.0, %v4016_v46 }
 0x16f   :  { %v4020_v2 = vpop.eup %4019  ;;  %v1223_v49 = vmul.f32 %v4018_v3, %v1220_v13  ;;  %vm1228_vm1 = vweird.f32 %v4018_v3  ;;  %v1271_v13 = vand.u32 2147483647, %v1260_v5 }
 0x170   :  { %v4022_v15 = vpop.eup %4021  ;;  %4023 = vrcp.f32 %v1221_v7  ;;  %v1263_v1 = vmul.f32 %v4020_v2, %v1260_v5  ;;  %vm1229_vm3 = vmor %vm1227_vm2, %vm1228_vm1  ;;  %vm1268_vm6 = vweird.f32 %v4020_v2  ;;  %v1246_v27 = vand.u32 2147483647, %v1221_v7 }
 0x171   :  { %v5248_v37 = vadd.f32 1.0, %v4022_v15  ;;  %v1224_v44 = vsub.f32 1.0, %v1223_v49  ;;  %v1273_v15 = vand.u32 2147483648, %v1260_v5  ;;  %vm5259_vm8 = vmor %vm1267_vm4, %vm1268_vm6  ;;  %vm1242_vm9 = vweird.f32 %v1221_v7 }
 0x172   :  { %v1264_v41 = vsub.f32 1.0, %v1263_v1  ;;  %vm1272_vm11 = vcmp.eq.f32.partialorder %v1271_v13, 8.507059e+37  ;;  %vm1247_vm12 = vcmp.eq.f32.partialorder %v1246_v27, 8.507059e+37  ;;  %v1317_v27 = vpop.permute.xlu0 %1316 }
 0x173   :  { %4025 = vrcp.f32 %v5248_v37  ;;  %v1225_v6 = vmul.f32 %v4018_v3, %v1224_v44  ;;  %vm1282_vm14 = vweird.f32 %v5248_v37 }
 0x174   :  { %v1265_v35 = vmul.f32 %v4020_v2, %v1264_v41  ;;  %v1248_v41 = vand.u32 2147483648, %v1221_v7 }
 0x175   :  { %v1226_v61 = vadd.f32 %v4018_v3, %v1225_v6 }
 0x176   :  { %v4024_v19 = vpop.eup %4023  ;;  %v1266_v56 = vadd.f32 %v4020_v2, %v1265_v35  ;;  %v1089_v35 = vpop.f32.mrf.mxu3 }
 0x177   :  { %v1238_v58 = vmul.f32 %v4024_v19, %v1221_v7  ;;  %v1230_v14 = vsel %vm1229_vm3, %v4018_v3, %v1226_v61  ;;  %vm1243_vm7 = vweird.f32 %v4024_v19  ;;  %v1286_v7 = vand.u32 2147483647, %v5248_v37 }
 0x178   :  { %v1235_v46 = vsel %vm1232_vm5, %v1234_v0, %v1230_v14  ;;  %v1270_v57 = vsel %vm5259_vm8, %v4020_v2, %v1266_v56  ;;  %v1274_v0 = vor.u32 1.1754944e-38, %v1273_v15  ;;  %vm1244_vm10 = vmor %vm1242_vm9, %vm1243_vm7  ;;  %v1249_v14 = vor.u32 1.1754944e-38, %v1248_v41 }
 0x179   :  { %v4026_v45 = vpop.eup %4025  ;;  %v1239_v49 = vsub.f32 1.0, %v1238_v58  ;;  %v1297_v44 = vmul.f32 %v1295_v4, %v1235_v46  ;;  %v1205_v58 = vld [vmem:[#allocation3 + $0xa4] sm:$0xf]  ;;  %v1296_v46 = vadd.f32 %v5253_v25, %v1089_v35  ;;  %vm1287_vm0 = vcmp.eq.f32.partialorder %v1286_v7, 8.507059e+37  ;;  %v3763_v7 = vld [vmem:[%s5984_s2 + $0x58] sm:$0xff] }
 0x17a   :  { %v1278_v1 = vmul.f32 %v4026_v45, %v5248_v37  ;;  %vm1283_vm13 = vweird.f32 %v4026_v45  ;;  %v1211_v2 = vunpack.c.l.bf16 %v1205_v58 }
 0x17b   :  { %v1240_v6 = vmul.f32 %v4024_v19, %v1239_v49  ;;  %v1299_v12 = vadd.f32 %v1297_v44, %v1208_v48  ;;  %v1275_v48 = vsel %vm1272_vm11, %v1274_v0, %v1270_v57  ;;  %v1288_v44 = vand.u32 2147483648, %v5248_v37  ;;  %vm1284_vm15 = vmor %vm1282_vm14, %vm1283_vm13 }
 0x17c   :  { %v1279_v3 = vsub.f32 1.0, %v1278_v1  ;;  %v1303_v15 = vsub.f32 1.0, %v1275_v48 }
 0x17d   :  { %v1241_v61 = vadd.f32 %v4024_v19, %v1240_v6  ;;  %4027 = vtanh.f32 %v1299_v12  ;;  %v1289_v6 = vor.u32 1.1754944e-38, %v1288_v44 }
 0x17e   :  { %v1280_v4 = vmul.f32 %v4026_v45, %v1279_v3  ;;  %v1307_v3 = vmul.f32 0.0, %v1275_v48  ;;  %v3762_v48 = vld [vmem:[%s5984_s2 + $0x50] sm:$0xff] }
 0x17f   :  { %v1245_v5 = vsel %vm1244_vm10, %v4024_v19, %v1241_v61  ;;  %1650 = vperm.xlu1 %3987, %v3762_v48   ;;  %v6103_v48 = vld [vmem:[#allocation20_spill] sm:$0xff] }
 0x180   :  { %v1281_v49 = vadd.f32 %v4026_v45, %v1280_v4  ;;  %v1250_v1 = vsel %vm1247_vm12, %v1249_v14, %v1245_v5  ;;  %v1322_v14 = vpop.permute.xlu0 %1321 }
 0x181   :  { %v1298_v56 = vmul.f32 %v1296_v46, %v1250_v1 }
 0x182   :  { %v1285_v19 = vsel %vm1284_vm15, %v4026_v45, %v1281_v49 }
 0x183   :  { %v1300_v41 = vadd.f32 %v1298_v56, %v1211_v2  ;;  %v4028_v13 = vpop.eup %4027  ;;  %v1290_v12 = vsel %vm1287_vm0, %v1289_v6, %v1285_v19  ;;  %v6087_v56 = vld [vmem:[#allocation6_spill] sm:$0xff]  ;;  %v6090_v19 = vld [vmem:[#allocation11_spill] sm:$0xff]  ;;  %v6091_v6 = vld [vmem:[#allocation12_spill] sm:$0xff] }
 0x184   :  { %v1305_v11 = vmul.f32 %v4028_v13, %v1303_v15  ;;  %v1304_v57 = vsub.f32 1.0, %v1290_v12  ;;  %v1308_v58 = vmul.f32 0.0, %v1290_v12  ;;  %v6088_v15 = vld [vmem:[#allocation7_spill] sm:$0xff]  ;;  %v3818_v12 = vld [vmem:[%s5984_s2 + $0x10] sm:$0xff] }
 0x185   :  { %4029 = vtanh.f32 %v1300_v41  ;;  %v6089_v41 = vld [vmem:[#allocation9_spill] sm:$0xff]  ;;  %v3791_v13 = vld [vmem:[%s5984_s2 + $0x38] sm:$0xff] }
 0x186   :  { %v1309_v35 = vadd.f32 %v1307_v3, %v1305_v11  ;;  %v6093_v11 = vld [vmem:[#allocation13_spill] sm:$0xff]  ;;  %v6094_v3 = vld [vmem:[#allocation14_spill] sm:$0xff] }
 0x187   :  { %1655 = vperm.xlu1 %3987, %v3763_v7  }
 0x188   :  { %v5269_v0 = vmul.f32 %v1317_v27, %v1309_v35  ;;  %v6092_v27 = vld [vmem:[#allocation30_spill] sm:$0xff]  ;;  %v6095_v35 = vld [vmem:[#allocation31_spill] sm:$0xff] }
 0x18a   :  { %v1330_v45 = vpack.c.bf16 %v5269_v0, %v5269_v0 }
 0x18b   :  { %v4030_v61 = vpop.eup %4029 }
 0x18c   :  { %v1306_v4 = vmul.f32 %v4030_v61, %v1304_v57  ;;  %v1385_v1 = vunpack.c.l.b16 %v1330_v45  ;;  %v6096_v57 = vld [vmem:[#allocation15_spill] sm:$0xff]  ;;  %v6097_v61 = vld [vmem:[#allocation16_spill] sm:$0xff]  ;;  %v6101_v45 = vld [vmem:[#allocation33_spill] sm:$0xff] }
 0x18e   :  { %v1310_v37 = vadd.f32 %v1308_v58, %v1306_v4  ;;  %v6098_v4 = vld [vmem:[#allocation32_spill] sm:$0xff]  ;;  %v6099_v58 = vld [vmem:[#allocation17_spill] sm:$0xff] }
 0x18f   :  { %2325 = vperm.xlu1 %3987, %v3791_v13  }
 0x190   :  { %v5271_v5 = vmul.f32 %v1322_v14, %v1310_v37  ;;  %v6100_v37 = vld [vmem:[#allocation18_spill] sm:$0xff]  ;;  %v3320_v14 = vld [vmem:[%s5984_s2 + $0x8] sm:$0xff] }
 0x192   :  { %v3910_v46 = vpack.c.bf16 %v5271_v5, %v5269_v0  ;;  %v1331_v49 = vpack.c.bf16 %v5271_v5, %v5271_v5 }
 0x194   :  { %v1386_v44 = vunpack.c.l.b16 %v1331_v49  ;;  %3972 = vst [vmem:[%s5986_s8 + $0x30] sm:$0xff] %v3910_v46   ;;  %v1432_v46 = vld [vmem:[#allocation2 + $0x18] sm:$0xff] }
 0x195   :  { %v6102_v49 = vld [vmem:[#allocation19_spill] sm:$0xff] }
 0x196   :  { %v1387_v2 = vpack.c.b16 %v1386_v44, %v1385_v1  ;;  %v1436_v1 = vunpack.c.l.bf16 %v1432_v46  ;;  %v1437_v44 = vunpack.c.h.bf16 %v1432_v46 }
 0x197   :  { %2990 = vperm.xlu1 %3987, %v3818_v12  }
 0x198   :  { %1397 = vmatmul.bf16.vlgmr.msra.gmra.mxu1 %v1387_v2  ;;  %1411 = vmatmul.bf16.vlgmr.msrb.gmra.mxu2 %v1387_v2 }
 0x199   :  { %1425 = vmatmul.bf16.vlgmr.msrb.gmra.mxu3 %v1387_v2  ;;  %1752 = vmatpush.bf16.msra.mxu1 %v4879_v59 }
 0x19a   :  { %2011 = vmatpush.bf16.msrb.mxu2 %v6087_v56  ;;  %2025 = vmatpush.bf16.msrb.mxu3 %v4424_v31 }
 0x19d   :  { %1753 = vmatpush.bf16.msra.mxu1 %v4901_v38 }
 0x19e   :  { %2012 = vmatpush.bf16.msrb.mxu2 %v6088_v15  ;;  %2026 = vmatpush.bf16.msrb.mxu3 %v4450_v39 }
 0x19f   :  { %3328 = vperm.xlu1 %3987, %v3320_v14  }
 0x1a1   :  { %1754 = vmatpush.bf16.msra.mxu1 %v4924_v52 }
 0x1a2   :  { %2013 = vmatpush.bf16.msrb.mxu2 %v6089_v41  ;;  %2027 = vmatpush.bf16.msrb.mxu3 %v4462_v43 }
 0x1a5   :  { %1755 = vmatpush.bf16.msra.mxu1 %v4940_v23 }
 0x1a6   :  { %2014 = vmatpush.bf16.msrb.mxu2 %v6090_v19  ;;  %2028 = vmatpush.bf16.msrb.mxu3 %v6091_v6 }
 0x1a9   :  { %1756 = vmatpush.bf16.msra.mxu1 %v6092_v27 }
 0x1aa   :  { %2015 = vmatpush.bf16.msrb.mxu2 %v6093_v11  ;;  %2029 = vmatpush.bf16.msrb.mxu3 %v6094_v3 }
 0x1ad   :  { %1757 = vmatpush.bf16.msra.mxu1 %v6095_v35 }
 0x1ae   :  { %2016 = vmatpush.bf16.msrb.mxu2 %v6096_v57  ;;  %2030 = vmatpush.bf16.msrb.mxu3 %v6097_v61 }
 0x1b1   :  { %1758 = vmatpush.bf16.msra.mxu1 %v6098_v4  ;;  %v1434_v4 = vld [vmem:[#allocation2 + $0x24] sm:$0xff] }
 0x1b2   :  { %2017 = vmatpush.bf16.msrb.mxu2 %v6099_v58  ;;  %2031 = vmatpush.bf16.msrb.mxu3 %v6100_v37  ;;  %v1439_v61 = vunpack.c.l.bf16 %v1434_v4  ;;  %v1440_v14 = vunpack.c.h.bf16 %v1434_v4 }
 0x1b5   :  { %1759 = vmatpush.bf16.msra.mxu1 %v6101_v45 }
 0x1b6   :  { %2018 = vmatpush.bf16.msrb.mxu2 %v6102_v49  ;;  %2032 = vmatpush.bf16.msrb.mxu3 %v6103_v48 }
 0x1ba   :  { %v1350_v2 = vpop.f32.mrf.mxu2  ;;  %v1364_v7 = vpop.f32.mrf.mxu3 }
 0x1bb   :  { %v1442_v13 = vadd.f32 %v1436_v1, %v1350_v2  ;;  %v1482_v12 = vadd.f32 %v1437_v44, %v1364_v7 }
 0x1bd   :  { %v3754_v58 = vmul.f32 -1.442695, %v1442_v13  ;;  %v3756_v37 = vmul.f32 -1.442695, %v1482_v12  ;;  %v1433_v12 = vld [vmem:[#allocation2 + $0x20] sm:$0xf] }
 0x1bf   :  { %4031 = vpow2.f32 %v3754_v58 }
 0x1c0   :  { %4033 = vpow2.f32 %v3756_v37 }
 0x1c2   :  { %v1352_v57 = vpop.f32.mrf.mxu2  ;;  %v1366_v45 = vpop.f32.mrf.mxu3 }
 0x1c3   :  { %v1443_v35 = vadd.f32 %v1439_v61, %v1352_v57  ;;  %v1483_v3 = vadd.f32 %v1440_v14, %v1366_v45 }
 0x1c5   :  { %v4032_v49 = vpop.eup %4031  ;;  %v3755_v11 = vmul.f32 -1.442695, %v1443_v35  ;;  %v3757_v46 = vmul.f32 -1.442695, %v1483_v3  ;;  %v1378_v3 = vpop.f32.mrf.mxu0 }
 0x1c6   :  { %v4034_v48 = vpop.eup %4033  ;;  %v1450_v27 = vadd.f32 1.0, %v4032_v49 }
 0x1c7   :  { %v5321_v6 = vadd.f32 1.0, %v4034_v48  ;;  %4035 = vpow2.f32 %v3755_v11 }
 0x1c8   :  { %4037 = vrcp.f32 %v1450_v27  ;;  %v1463_v45 = vand.u32 2147483648, %v1450_v27  ;;  %v1461_v48 = vand.u32 2147483647, %v1450_v27  ;;  %vm1457_vm2 = vweird.f32 %v1450_v27 }
 0x1c9   :  { %4039 = vrcp.f32 %v5321_v6  ;;  %v1503_v43 = vand.u32 2147483648, %v5321_v6  ;;  %vm1497_vm7 = vweird.f32 %v5321_v6 }
 0x1ca   :  { %4041 = vpow2.f32 %v3757_v46  ;;  %v1464_v14 = vor.u32 1.1754944e-38, %v1463_v45  ;;  %vm1462_vm4 = vcmp.eq.f32.partialorder %v1461_v48, 8.507059e+37 }
 0x1cd   :  { %v4036_v58 = vpop.eup %4035 }
 0x1ce   :  { %v4038_v37 = vpop.eup %4037  ;;  %v1451_v1 = vadd.f32 1.0, %v4036_v58  ;;  %v1522_v58 = vadd.f32 %v5123_v63, %v1378_v3  ;;  %v1380_v3 = vpop.f32.mrf.mxu0 }
 0x1cf   :  { %v4040_v4 = vpop.eup %4039  ;;  %v1453_v44 = vmul.f32 %v4038_v37, %v1450_v27  ;;  %vm1458_vm1 = vweird.f32 %v4038_v37 }
 0x1d0   :  { %v4042_v2 = vpop.eup %4041  ;;  %v1493_v57 = vmul.f32 %v4040_v4, %v5321_v6  ;;  %4043 = vrcp.f32 %v1451_v1  ;;  %vm1459_vm3 = vmor %vm1457_vm2, %vm1458_vm1  ;;  %vm1498_vm5 = vweird.f32 %v4040_v4  ;;  %v1478_v27 = vand.u32 2147483648, %v1451_v1 }
 0x1d1   :  { %v1454_v35 = vsub.f32 1.0, %v1453_v44  ;;  %v5325_v61 = vadd.f32 1.0, %v4042_v2  ;;  %vm5333_vm8 = vmor %vm1497_vm7, %vm1498_vm5  ;;  %vm1472_vm9 = vweird.f32 %v1451_v1 }
 0x1d2   :  { %v1494_v49 = vsub.f32 1.0, %v1493_v57  ;;  %v1438_v57 = vunpack.c.l.bf16 %v1433_v12 }
 0x1d3   :  { %v1455_v11 = vmul.f32 %v4038_v37, %v1454_v35  ;;  %4045 = vrcp.f32 %v5325_v61  ;;  %vm1512_vm14 = vweird.f32 %v5325_v61 }
 0x1d4   :  { %v1495_v46 = vmul.f32 %v4040_v4, %v1494_v49  ;;  %v1476_v49 = vand.u32 2147483647, %v1451_v1 }
 0x1d5   :  { %v1456_v7 = vadd.f32 %v4038_v37, %v1455_v11 }
 0x1d6   :  { %v4044_v13 = vpop.eup %4043  ;;  %v1496_v52 = vadd.f32 %v4040_v4, %v1495_v46  ;;  %vm1477_vm11 = vcmp.eq.f32.partialorder %v1476_v49, 8.507059e+37 }
 0x1d7   :  { %v1460_v44 = vsel %vm1459_vm3, %v4038_v37, %v1456_v7  ;;  %v1468_v2 = vmul.f32 %v4044_v13, %v1451_v1  ;;  %vm1473_vm6 = vweird.f32 %v4044_v13  ;;  %v1501_v37 = vand.u32 2147483647, %v5321_v6 }
 0x1d8   :  { %v1465_v19 = vsel %vm1462_vm4, %v1464_v14, %v1460_v44  ;;  %v1500_v12 = vsel %vm5333_vm8, %v4040_v4, %v1496_v52  ;;  %v1435_v14 = vld [vmem:[#allocation2 + $0x2c] sm:$0xf]  ;;  %vm1474_vm10 = vmor %vm1472_vm9, %vm1473_vm6  ;;  %v1523_v44 = vadd.f32 %v5123_v63, %v1380_v3  ;;  %v1518_v1 = vand.u32 2147483648, %v5325_v61 }
 0x1d9   :  { %v4046_v23 = vpop.eup %4045  ;;  %v1524_v35 = vmul.f32 %v1522_v58, %v1465_v19  ;;  %v1469_v41 = vsub.f32 1.0, %v1468_v2  ;;  %v1504_v58 = vor.u32 1.1754944e-38, %v1503_v43  ;;  %vm1502_vm12 = vcmp.eq.f32.partialorder %v1501_v37, 8.507059e+37 }
 0x1da   :  { %v1508_v11 = vmul.f32 %v4046_v23, %v5325_v61  ;;  %vm1513_vm13 = vweird.f32 %v4046_v23  ;;  %v1516_v52 = vand.u32 2147483647, %v5325_v61 }
 0x1db   :  { %v1526_v39 = vadd.f32 %v1524_v35, %v1438_v57  ;;  %v1470_v45 = vmul.f32 %v4044_v13, %v1469_v41  ;;  %v1479_v41 = vor.u32 1.1754944e-38, %v1478_v27  ;;  %v1505_v57 = vsel %vm1502_vm12, %v1504_v58, %v1500_v12  ;;  %vm1514_vm15 = vmor %vm1512_vm14, %vm1513_vm13 }
 0x1dc   :  { %v1509_v48 = vsub.f32 1.0, %v1508_v11  ;;  %v1441_v35 = vunpack.c.l.bf16 %v1435_v14  ;;  %v1530_v43 = vsub.f32 1.0, %v1505_v57  ;;  %vm1517_vm0 = vcmp.eq.f32.partialorder %v1516_v52, 8.507059e+37 }
 0x1dd   :  { %4047 = vtanh.f32 %v1526_v39  ;;  %v1471_v7 = vadd.f32 %v4044_v13, %v1470_v45  ;;  %v1534_v37 = vmul.f32 %v1505_v57, %v5179_v53 }
 0x1de   :  { %v1510_v46 = vmul.f32 %v4046_v23, %v1509_v48 }
 0x1df   :  { %v1475_v6 = vsel %vm1474_vm10, %v4044_v13, %v1471_v7  ;;  %v1519_v13 = vor.u32 1.1754944e-38, %v1518_v1 }
 0x1e0   :  { %v1480_v39 = vsel %vm1477_vm11, %v1479_v41, %v1475_v6  ;;  %v1511_v2 = vadd.f32 %v4046_v23, %v1510_v46 }
 0x1e1   :  { %v1525_v11 = vmul.f32 %v1523_v44, %v1480_v39 }
 0x1e2   :  { %v1515_v63 = vsel %vm1514_vm15, %v4046_v23, %v1511_v2  ;;  %v1544_v2 = vunpack.c.h.bf16 %v5220_v51 }
 0x1e3   :  { %v4048_v4 = vpop.eup %4047  ;;  %v1527_v27 = vadd.f32 %v1525_v11, %v1441_v35  ;;  %v1520_v49 = vsel %vm1517_vm0, %v1519_v13, %v1515_v63  ;;  %v1546_v11 = vunpack.c.l.bf16 %v5232_v33  ;;  %v1547_v13 = vunpack.c.h.bf16 %v5232_v33 }
 0x1e4   :  { %v1532_v45 = vmul.f32 %v4048_v4, %v1530_v43  ;;  %v1531_v3 = vsub.f32 1.0, %v1520_v49  ;;  %v1535_v7 = vmul.f32 %v1520_v49, %v5185_v54  ;;  %v1543_v54 = vunpack.c.l.bf16 %v5220_v51 }
 0x1e5   :  { %4049 = vtanh.f32 %v1527_v27 }
 0x1e6   :  { %v5344_v48 = vadd.f32 %v1534_v37, %v1532_v45 }
 0x1e8   :  { %v1660_v14 = vpack.c.bf16 %v5344_v48, %v5344_v48 }
 0x1ea   :  { %v1672_v53 = vunpack.c.l.b16 %v1660_v14 }
 0x1eb   :  { %v4050_v19 = vpop.eup %4049 }
 0x1ec   :  { %v1533_v12 = vmul.f32 %v4050_v19, %v1531_v3 }
 0x1ee   :  { %v5347_v61 = vadd.f32 %v1535_v7, %v1533_v12 }
 0x1f0   :  { %v1661_v23 = vpack.c.bf16 %v5347_v61, %v5347_v61  ;;  %v3915_v41 = vpack.c.bf16 %v5347_v61, %v5344_v48 }
 0x1f2   :  { %3973 = vst [vmem:[%s5985_s7 + $0x8] sm:$0xff] %v3915_v41   ;;  %v1673_v46 = vunpack.c.l.b16 %v1661_v23 }
 0x1f4   :  { %v1674_v58 = vpack.c.b16 %v1673_v46, %v1672_v53 }
 0x1f6   :  { %1684 = vmatmul.bf16.vlgmr.msrb.gmra.mxu0 %v1674_v58  ;;  %1698 = vmatmul.bf16.vlgmr.msrb.gmra.mxu1 %v1674_v58 }
 0x1f7   :  { %1712 = vmatmul.bf16.vlgmr.msra.gmra.mxu2 %v1674_v58  ;;  %2039 = vmatpush.bf16.msrb.mxu0 %v4561_v10 }
 0x1f8   :  { %2059 = vmatpush.bf16.msrb.mxu1 %v4716_v18  ;;  %2073 = vmatpush.bf16.msra.mxu2 %v4757_v62 }
 0x1fb   :  { %2040 = vmatpush.bf16.msrb.mxu0 %v4596_v20 }
 0x1fc   :  { %2060 = vmatpush.bf16.msrb.mxu1 %v4729_v29  ;;  %2074 = vmatpush.bf16.msra.mxu2 %v4779_v16 }
 0x1ff   :  { %2041 = vmatpush.bf16.msrb.mxu0 %v4607_v26 }
 0x200   :  { %2061 = vmatpush.bf16.msrb.mxu1 %v4747_v55  ;;  %2075 = vmatpush.bf16.msra.mxu2 %v4800_v50 }
 0x203   :  { %2042 = vmatpush.bf16.msrb.mxu0 %v4617_v30 }
 0x204   :  { %2062 = vmatpush.bf16.msrb.mxu1 %v4768_v8  ;;  %2076 = vmatpush.bf16.msra.mxu2 %v4822_v21 }
 0x207   :  { %2043 = vmatpush.bf16.msrb.mxu0 %v4631_v36 }
 0x208   :  { %2063 = vmatpush.bf16.msrb.mxu1 %v4792_v40  ;;  %2077 = vmatpush.bf16.msra.mxu2 %v4847_v60 }
 0x20b   :  { %2044 = vmatpush.bf16.msrb.mxu0 %v6079_v17 }
 0x20c   :  { %2064 = vmatpush.bf16.msrb.mxu1 %v6080_v47  ;;  %2078 = vmatpush.bf16.msra.mxu2 %v4872_v34 }
 0x20f   :  { %2045 = vmatpush.bf16.msrb.mxu0 %v6081_v28 }
 0x210   :  { %2065 = vmatpush.bf16.msrb.mxu1 %v6082_v42  ;;  %2079 = vmatpush.bf16.msra.mxu2 %v4896_v24 }
 0x213   :  { %2046 = vmatpush.bf16.msrb.mxu0 %v6083_v9 }
 0x214   :  { %2066 = vmatpush.bf16.msrb.mxu1 %v6084_v32  ;;  %2080 = vmatpush.bf16.msra.mxu2 %v4918_v22 }
 0x215   :  { %v1398_v44 = vpop.f32.mrf.mxu1 }
 0x216   :  { %v1549_v6 = vadd.f32 %v1543_v54, %v1398_v44 }
 0x218   :  { %v3758_v39 = vmul.f32 -1.442695, %v1549_v6 }
 0x21a   :  { %4051 = vpow2.f32 %v3758_v39  ;;  %v1540_v39 = vld [vmem:[#allocation3 + $0x80] sm:$0xf] }
 0x21b   :  { %v1412_v57 = vpop.f32.mrf.mxu2 }
 0x21c   :  { %v1589_v35 = vadd.f32 %v1544_v2, %v1412_v57  ;;  %v1426_v23 = vpop.f32.mrf.mxu3 }
 0x21d   :  { %v1400_v1 = vpop.f32.mrf.mxu1 }
 0x21e   :  { %v3760_v52 = vmul.f32 -1.442695, %v1589_v35  ;;  %v1550_v4 = vadd.f32 %v1546_v11, %v1400_v1  ;;  %v1629_v11 = vadd.f32 %v5253_v25, %v1426_v23 }
 0x220   :  { %v4052_v27 = vpop.eup %4051  ;;  %4053 = vpow2.f32 %v3760_v52  ;;  %v3759_v43 = vmul.f32 -1.442695, %v1550_v4 }
 0x221   :  { %v1557_v63 = vadd.f32 1.0, %v4052_v27  ;;  %v1545_v27 = vunpack.c.l.bf16 %v1540_v39 }
 0x222   :  { %4055 = vpow2.f32 %v3759_v43 }
 0x223   :  { %4057 = vrcp.f32 %v1557_v63  ;;  %v1414_v45 = vpop.f32.mrf.mxu2  ;;  %v1570_v53 = vand.u32 2147483648, %v1557_v63  ;;  %v1568_v33 = vand.u32 2147483647, %v1557_v63  ;;  %vm1564_vm2 = vweird.f32 %v1557_v63 }
 0x224   :  { %v1590_v49 = vadd.f32 %v1547_v13, %v1414_v45  ;;  %v1428_v23 = vpop.f32.mrf.mxu3 }
 0x225   :  { %v1571_v35 = vor.u32 1.1754944e-38, %v1570_v53  ;;  %vm1569_vm4 = vcmp.eq.f32.partialorder %v1568_v33, 8.507059e+37 }
 0x226   :  { %v4054_v37 = vpop.eup %4053  ;;  %v3761_v3 = vmul.f32 -1.442695, %v1590_v49 }
 0x227   :  { %v1597_v51 = vadd.f32 1.0, %v4054_v37 }
 0x228   :  { %v4056_v19 = vpop.eup %4055  ;;  %4059 = vpow2.f32 %v3761_v3 }
 0x229   :  { %v4058_v7 = vpop.eup %4057  ;;  %4061 = vrcp.f32 %v1597_v51  ;;  %v1558_v12 = vadd.f32 1.0, %v4056_v19  ;;  %v1610_v13 = vand.u32 2147483648, %v1597_v51  ;;  %vm1604_vm6 = vweird.f32 %v1597_v51 }
 0x22a   :  { %v1560_v14 = vmul.f32 %v4058_v7, %v1557_v63  ;;  %vm1565_vm1 = vweird.f32 %v4058_v7  ;;  %v1608_v63 = vand.u32 2147483647, %v1597_v51 }
 0x22b   :  { %4063 = vrcp.f32 %v1558_v12  ;;  %vm1566_vm3 = vmor %vm1564_vm2, %vm1565_vm1  ;;  %v1583_v3 = vand.u32 2147483647, %v1558_v12  ;;  %v1585_v19 = vand.u32 2147483648, %v1558_v12  ;;  %vm1579_vm9 = vweird.f32 %v1558_v12 }
 0x22c   :  { %v1561_v41 = vsub.f32 1.0, %v1560_v14  ;;  %vm1609_vm10 = vcmp.eq.f32.partialorder %v1608_v63, 8.507059e+37 }
 0x22d   :  { %vm1584_vm12 = vcmp.eq.f32.partialorder %v1583_v3, 8.507059e+37 }
 0x22e   :  { %v4060_v46 = vpop.eup %4059  ;;  %v1562_v58 = vmul.f32 %v4058_v7, %v1561_v41 }
 0x22f   :  { %v4062_v54 = vpop.eup %4061  ;;  %v5386_v44 = vadd.f32 1.0, %v4060_v46  ;;  %v1611_v46 = vor.u32 1.1754944e-38, %v1610_v13 }
 0x230   :  { %v1600_v6 = vmul.f32 %v4062_v54, %v1597_v51  ;;  %v1563_v2 = vadd.f32 %v4058_v7, %v1562_v58  ;;  %vm1605_vm5 = vweird.f32 %v4062_v54  ;;  %v1586_v51 = vor.u32 1.1754944e-38, %v1585_v19 }
 0x231   :  { %v4064_v57 = vpop.eup %4063  ;;  %4065 = vrcp.f32 %v5386_v44  ;;  %vm1606_vm8 = vmor %vm1604_vm6, %vm1605_vm5  ;;  %v1623_v13 = vand.u32 2147483647, %v5386_v44  ;;  %vm1619_vm14 = vweird.f32 %v5386_v44 }
 0x232   :  { %v1567_v1 = vsel %vm1566_vm3, %v4058_v7, %v1563_v2  ;;  %v1601_v52 = vsub.f32 1.0, %v1600_v6  ;;  %v1575_v4 = vmul.f32 %v4064_v57, %v1558_v12  ;;  %vm1580_vm7 = vweird.f32 %v4064_v57  ;;  %v1542_v6 = vld [vmem:[#allocation3 + $0x8c] sm:$0xf] }
 0x233   :  { %v1572_v43 = vsel %vm1569_vm4, %v1571_v35, %v1567_v1  ;;  %vm1581_vm11 = vmor %vm1579_vm9, %vm1580_vm7  ;;  %v1630_v2 = vadd.f32 %v5253_v25, %v1428_v23  ;;  %v1625_v12 = vand.u32 2147483648, %v5386_v44  ;;  %vm1624_vm0 = vcmp.eq.f32.partialorder %v1623_v13, 8.507059e+37  ;;  %v6114_v13 = vld [vmem:[#allocation13_spill] sm:$0xff] }
 0x234   :  { %v1631_v45 = vmul.f32 %v1629_v11, %v1572_v43  ;;  %v1602_v49 = vmul.f32 %v4062_v54, %v1601_v52  ;;  %v1576_v37 = vsub.f32 1.0, %v1575_v4  ;;  %v1548_v52 = vunpack.c.l.bf16 %v1542_v6 }
 0x235   :  { %v1626_v3 = vor.u32 1.1754944e-38, %v1625_v12  ;;  %v6112_v12 = vld [vmem:[#allocation12_spill] sm:$0xff] }
 0x236   :  { %v1633_v14 = vadd.f32 %v1631_v45, %v1545_v27  ;;  %v1603_v41 = vadd.f32 %v4062_v54, %v1602_v49  ;;  %v1577_v53 = vmul.f32 %v4064_v57, %v1576_v37 }
 0x237   :  { %v4066_v7 = vpop.eup %4065 }
 0x238   :  { %4067 = vtanh.f32 %v1633_v14  ;;  %v1607_v58 = vsel %vm1606_vm8, %v4062_v54, %v1603_v41  ;;  %v1615_v33 = vmul.f32 %v4066_v7, %v5386_v44  ;;  %v1578_v39 = vadd.f32 %v4064_v57, %v1577_v53 }
 0x239   :  { %v1612_v35 = vsel %vm1609_vm10, %v1611_v46, %v1607_v58  ;;  %vm1620_vm13 = vweird.f32 %v4066_v7 }
 0x23a   :  { %v1582_v11 = vsel %vm1581_vm11, %v4064_v57, %v1578_v39  ;;  %v1616_v1 = vsub.f32 1.0, %v1615_v33  ;;  %v1637_v54 = vsub.f32 1.0, %v1612_v35  ;;  %vm1621_vm15 = vmor %vm1619_vm14, %vm1620_vm13  ;;  %v1651_v57 = vpop.permute.xlu1 %1650  ;;  %v1641_v19 = vmul.f32 %v1612_v35, %v5269_v0 }
 0x23b   :  { %v1587_v4 = vsel %vm1584_vm12, %v1586_v51, %v1582_v11  ;;  %v6106_v11 = vld [vmem:[#allocation8_spill] sm:$0xff] }
 0x23c   :  { %v1632_v27 = vmul.f32 %v1630_v2, %v1587_v4  ;;  %v1617_v43 = vmul.f32 %v4066_v7, %v1616_v1  ;;  %v6107_v1 = vld [vmem:[#allocation28_spill] sm:$0xff]  ;;  %v6109_v4 = vld [vmem:[#allocation10_spill] sm:$0xff] }
 0x23e   :  { %v4068_v45 = vpop.eup %4067  ;;  %v1634_v49 = vadd.f32 %v1632_v27, %v1548_v52  ;;  %v1618_v37 = vadd.f32 %v4066_v7, %v1617_v43  ;;  %v6108_v52 = vld [vmem:[#allocation9_spill] sm:$0xff]  ;;  %v6111_v43 = vld [vmem:[#allocation11_spill] sm:$0xff] }
 0x23f   :  { %v1639_v25 = vmul.f32 %v4068_v45, %v1637_v54  ;;  %v6110_v27 = vld [vmem:[#allocation29_spill] sm:$0xff]  ;;  %v6113_v54 = vld [vmem:[#allocation30_spill] sm:$0xff] }
 0x240   :  { %4069 = vtanh.f32 %v1634_v49  ;;  %v1622_v63 = vsel %vm1621_vm15, %v4066_v7, %v1618_v37  ;;  %v6115_v45 = vld [vmem:[#allocation14_spill] sm:$0xff]  ;;  %v6116_v49 = vld [vmem:[#allocation31_spill] sm:$0xff] }
 0x241   :  { %v1627_v14 = vsel %vm1624_vm0, %v1626_v3, %v1622_v63  ;;  %v1643_v41 = vadd.f32 %v1641_v19, %v1639_v25  ;;  %v6117_v37 = vld [vmem:[#allocation15_spill] sm:$0xff]  ;;  %v6118_v25 = vld [vmem:[#allocation16_spill] sm:$0xff]  ;;  %v6120_v63 = vld [vmem:[#allocation17_spill] sm:$0xff] }
 0x242   :  { %v1638_v23 = vsub.f32 1.0, %v1627_v14  ;;  %v1642_v33 = vmul.f32 %v1627_v14, %v5271_v5  ;;  %v1656_v44 = vpop.permute.xlu1 %1655  ;;  %v6121_v3 = vld [vmem:[#allocation18_spill] sm:$0xff]  ;;  %v6122_v14 = vld [vmem:[#allocation33_spill] sm:$0xff] }
 0x243   :  { %v5396_v46 = vmul.f32 %v1651_v57, %v1643_v41  ;;  %v6119_v57 = vld [vmem:[#allocation32_spill] sm:$0xff]  ;;  %v1767_v19 = vld [vmem:[#allocation2 + $0x30] sm:$0xff]  ;;  %v6123_v41 = vld [vmem:[#allocation19_spill] sm:$0xff] }
 0x245   :  { %v1665_v39 = vpack.c.bf16 %v5396_v46, %v5396_v46 }
 0x246   :  { %v4070_v53 = vpop.eup %4069 }
 0x247   :  { %v1640_v58 = vmul.f32 %v4070_v53, %v1638_v23  ;;  %v1720_v2 = vunpack.c.l.b16 %v1665_v39  ;;  %v6124_v23 = vld [vmem:[#allocation20_spill] sm:$0xff]  ;;  %v1771_v53 = vunpack.c.l.bf16 %v1767_v19 }
 0x249   :  { %v1644_v6 = vadd.f32 %v1642_v33, %v1640_v58  ;;  %v1772_v58 = vunpack.c.h.bf16 %v1767_v19 }
 0x24b   :  { %v5401_v51 = vmul.f32 %v1656_v44, %v1644_v6 }
 0x24d   :  { %v1666_v0 = vpack.c.bf16 %v5401_v51, %v5401_v51  ;;  %v3920_v7 = vpack.c.bf16 %v5401_v51, %v5396_v46 }
 0x24f   :  { %3974 = vst [vmem:[%s5986_s8 + $0x28] sm:$0xff] %v3920_v7   ;;  %v1721_v35 = vunpack.c.l.b16 %v1666_v0  ;;  %v3776_v0 = vld [vmem:[%s5984_s2 + $0x40] sm:$0xff] }
 0x250   :  { %1985 = vperm.xlu2 %3988, %v3776_v0  }
 0x251   :  { %v1722_v5 = vpack.c.b16 %v1721_v35, %v1720_v2  ;;  %v1769_v35 = vld [vmem:[#allocation2 + $0x3c] sm:$0xff] }
 0x253   :  { %1732 = vmatmul.bf16.vlgmr.msra.gmra.mxu3 %v1722_v5  ;;  %1746 = vmatmul.bf16.vlgmr.msra.gmra.mxu0 %v1722_v5 }
 0x254   :  { %1760 = vmatmul.bf16.vlgmr.msra.gmra.mxu1 %v1722_v5  ;;  %2087 = vmatpush.bf16.msra.mxu3 %v4879_v59  ;;  %v1774_v5 = vunpack.c.l.bf16 %v1769_v35 }
 0x255   :  { %2346 = vmatpush.bf16.msra.mxu0 %v6087_v56  ;;  %2360 = vmatpush.bf16.msra.mxu1 %v4424_v31 }
 0x258   :  { %2088 = vmatpush.bf16.msra.mxu3 %v4901_v38 }
 0x259   :  { %2347 = vmatpush.bf16.msra.mxu0 %v6088_v15  ;;  %2361 = vmatpush.bf16.msra.mxu1 %v6106_v11 }
 0x25c   :  { %2089 = vmatpush.bf16.msra.mxu3 %v6107_v1 }
 0x25d   :  { %2348 = vmatpush.bf16.msra.mxu0 %v6108_v52  ;;  %2362 = vmatpush.bf16.msra.mxu1 %v6109_v4 }
 0x260   :  { %2090 = vmatpush.bf16.msra.mxu3 %v6110_v27 }
 0x261   :  { %2349 = vmatpush.bf16.msra.mxu0 %v6111_v43  ;;  %2363 = vmatpush.bf16.msra.mxu1 %v6112_v12 }
 0x264   :  { %2091 = vmatpush.bf16.msra.mxu3 %v6113_v54 }
 0x265   :  { %2350 = vmatpush.bf16.msra.mxu0 %v6114_v13  ;;  %2364 = vmatpush.bf16.msra.mxu1 %v6115_v45 }
 0x268   :  { %2092 = vmatpush.bf16.msra.mxu3 %v6116_v49 }
 0x269   :  { %2351 = vmatpush.bf16.msra.mxu0 %v6117_v37  ;;  %2365 = vmatpush.bf16.msra.mxu1 %v6118_v25 }
 0x26c   :  { %2093 = vmatpush.bf16.msra.mxu3 %v6119_v57 }
 0x26d   :  { %2352 = vmatpush.bf16.msra.mxu0 %v6120_v63  ;;  %2366 = vmatpush.bf16.msra.mxu1 %v6121_v3 }
 0x270   :  { %2094 = vmatpush.bf16.msra.mxu3 %v6122_v14 }
 0x271   :  { %2353 = vmatpush.bf16.msra.mxu0 %v6123_v41  ;;  %2367 = vmatpush.bf16.msra.mxu1 %v6124_v23  ;;  %v1775_v41 = vunpack.c.h.bf16 %v1769_v35 }
 0x273   :  { %v1685_v33 = vpop.f32.mrf.mxu0  ;;  %v1699_v6 = vpop.f32.mrf.mxu1 }
 0x274   :  { %v1777_v44 = vadd.f32 %v1771_v53, %v1685_v33  ;;  %v1817_v39 = vadd.f32 %v1772_v58, %v1699_v6  ;;  %v3777_v53 = vld [vmem:[%s5984_s2 + $0x48] sm:$0xff] }
 0x275   :  { %1990 = vperm.xlu2 %3988, %v3777_v53  }
 0x276   :  { %v3768_v7 = vmul.f32 -1.442695, %v1777_v44  ;;  %v3770_v2 = vmul.f32 -1.442695, %v1817_v39 }
 0x278   :  { %4071 = vpow2.f32 %v3768_v7 }
 0x279   :  { %4073 = vpow2.f32 %v3770_v2 }
 0x27b   :  { %v1687_v14 = vpop.f32.mrf.mxu0  ;;  %v1701_v23 = vpop.f32.mrf.mxu1 }
 0x27c   :  { %v1778_v3 = vadd.f32 %v1774_v5, %v1687_v14  ;;  %v1818_v19 = vadd.f32 %v1775_v41, %v1701_v23  ;;  %v3804_v14 = vld [vmem:[%s5984_s2 + $0x20] sm:$0xff] }
 0x27d   :  { %2655 = vperm.xlu2 %3988, %v3804_v14   ;;  %v3819_v14 = vld [vmem:[%s5984_s2 + $0x18] sm:$0xff] }
 0x27e   :  { %v4072_v58 = vpop.eup %4071  ;;  %v3769_v33 = vmul.f32 -1.442695, %v1778_v3  ;;  %v3771_v39 = vmul.f32 -1.442695, %v1818_v19 }
 0x27f   :  { %v4074_v6 = vpop.eup %4073  ;;  %v1785_v44 = vadd.f32 1.0, %v4072_v58 }
 0x280   :  { %v5440_v0 = vadd.f32 1.0, %v4074_v6  ;;  %4075 = vpow2.f32 %v3769_v33  ;;  %v1713_v33 = vpop.f32.mrf.mxu2 }
 0x281   :  { %4077 = vrcp.f32 %v1785_v44  ;;  %v1798_v6 = vand.u32 2147483648, %v1785_v44  ;;  %v1796_v63 = vand.u32 2147483647, %v1785_v44  ;;  %vm1792_vm2 = vweird.f32 %v1785_v44 }
 0x282   :  { %4079 = vrcp.f32 %v5440_v0  ;;  %vm1832_vm7 = vweird.f32 %v5440_v0 }
 0x283   :  { %4081 = vpow2.f32 %v3771_v39  ;;  %vm1797_vm4 = vcmp.eq.f32.partialorder %v1796_v63, 8.507059e+37 }
 0x285   :  { %2995 = vperm.xlu2 %3988, %v3819_v14  }
 0x286   :  { %v4076_v41 = vpop.eup %4075 }
 0x287   :  { %v4078_v23 = vpop.eup %4077  ;;  %v1786_v7 = vadd.f32 1.0, %v4076_v41 }
 0x288   :  { %v5446_v3 = vpop.eup %4079  ;;  %v1788_v2 = vmul.f32 %v4078_v23, %v1785_v44  ;;  %vm1793_vm1 = vweird.f32 %v4078_v23  ;;  %v1838_v44 = vand.u32 2147483648, %v5440_v0 }
 0x289   :  { %v4082_v35 = vpop.eup %4081  ;;  %v1828_v5 = vmul.f32 %v5446_v3, %v5440_v0  ;;  %4083 = vrcp.f32 %v1786_v7  ;;  %vm1794_vm3 = vmor %vm1792_vm2, %vm1793_vm1  ;;  %vm1833_vm5 = vweird.f32 %v5446_v3  ;;  %v1811_v12 = vand.u32 2147483647, %v1786_v7 }
 0x28a   :  { %v1789_v19 = vsub.f32 1.0, %v1788_v2  ;;  %v5450_v53 = vadd.f32 1.0, %v4082_v35  ;;  %v1768_v35 = vld [vmem:[#allocation2 + $0x38] sm:$0xf]  ;;  %vm5469_vm8 = vmor %vm1832_vm7, %vm1833_vm5  ;;  %vm1807_vm9 = vweird.f32 %v1786_v7 }
 0x28b   :  { %v1829_v58 = vsub.f32 1.0, %v1828_v5  ;;  %v1799_v5 = vor.u32 1.1754944e-38, %v1798_v6  ;;  %v1773_v14 = vunpack.c.l.bf16 %v1768_v35  ;;  %vm1812_vm11 = vcmp.eq.f32.partialorder %v1811_v12, 8.507059e+37 }
 0x28c   :  { %v1790_v39 = vmul.f32 %v4078_v23, %v1789_v19  ;;  %4085 = vrcp.f32 %v5450_v53  ;;  %v5460_v19 = vld [vmem:[%s5983_s6] ss:$0 sm:$0xff]  ;;  %vm1847_vm14 = vweird.f32 %v5450_v53 }
 0x28d   :  { %v1830_v2 = vmul.f32 %v5446_v3, %v1829_v58  ;;  %v1857_v37 = vadd.f32 %v5460_v19, %v1713_v33 }
 0x28e   :  { %v1791_v41 = vadd.f32 %v4078_v23, %v1790_v39 }
 0x28f   :  { %v4084_v57 = vpop.eup %4083  ;;  %v1831_v54 = vadd.f32 %v5446_v3, %v1830_v2  ;;  %v1770_v2 = vld [vmem:[#allocation2 + $0x44] sm:$0xf] }
 0x290   :  { %v1795_v25 = vsel %vm1794_vm3, %v4078_v23, %v1791_v41  ;;  %v1803_v49 = vmul.f32 %v4084_v57, %v1786_v7  ;;  %v1813_v23 = vand.u32 2147483648, %v1786_v7  ;;  %vm1808_vm6 = vweird.f32 %v4084_v57 }
 0x291   :  { %v1800_v45 = vsel %vm1797_vm4, %v1799_v5, %v1795_v25  ;;  %v1836_v25 = vand.u32 2147483647, %v5440_v0  ;;  %v1715_v5 = vpop.f32.mrf.mxu2  ;;  %vm1809_vm10 = vmor %vm1807_vm9, %vm1808_vm6  ;;  %v1853_v7 = vand.u32 2147483648, %v5450_v53 }
 0x292   :  { %v4086_v39 = vpop.eup %4085  ;;  %v1859_v13 = vmul.f32 %v1857_v37, %v1800_v45  ;;  %v1804_v58 = vsub.f32 1.0, %v1803_v49  ;;  %v1814_v35 = vor.u32 1.1754944e-38, %v1813_v23  ;;  %v1858_v0 = vadd.f32 %v5460_v19, %v1715_v5 }
 0x293   :  { %v1843_v63 = vmul.f32 %v4086_v39, %v5450_v53  ;;  %vm1837_vm12 = vcmp.eq.f32.partialorder %v1836_v25, 8.507059e+37  ;;  %vm1848_vm13 = vweird.f32 %v4086_v39  ;;  %v1854_v23 = vor.u32 1.1754944e-38, %v1853_v7  ;;  %v1876_v7 = vld [vmem:[#allocation3 + $0x6c] sm:$0xff] }
 0x294   :  { %v1861_v6 = vadd.f32 %v1859_v13, %v1773_v14  ;;  %v1805_v41 = vmul.f32 %v4084_v57, %v1804_v58  ;;  %v1835_v13 = vsel %vm5469_vm8, %v5446_v3, %v1831_v54  ;;  %v1839_v14 = vor.u32 1.1754944e-38, %v1838_v44  ;;  %vm1849_vm15 = vmor %vm1847_vm14, %vm1848_vm13 }
 0x295   :  { %v1844_v33 = vsub.f32 1.0, %v1843_v63  ;;  %v1851_v54 = vand.u32 2147483647, %v5450_v53 }
 0x296   :  { %4087 = vtanh.f32 %v1861_v6  ;;  %v1806_v49 = vadd.f32 %v4084_v57, %v1805_v41  ;;  %v1840_v6 = vsel %vm1837_vm12, %v1839_v14, %v1835_v13  ;;  %v1776_v41 = vunpack.c.l.bf16 %v1770_v2 }
 0x297   :  { %v1845_v37 = vmul.f32 %v4086_v39, %v1844_v33  ;;  %vm1852_vm0 = vcmp.eq.f32.partialorder %v1851_v54, 8.507059e+37  ;;  %v1869_v5 = vmul.f32 %v1840_v6, %v5344_v48 }
 0x298   :  { %v1810_v58 = vsel %vm1809_vm10, %v4084_v57, %v1806_v49  ;;  %v1865_v57 = vsub.f32 1.0, %v1840_v6 }
 0x299   :  { %v1846_v63 = vadd.f32 %v4086_v39, %v1845_v37  ;;  %v1815_v43 = vsel %vm1812_vm11, %v1814_v35, %v1810_v58 }
 0x29a   :  { %v1860_v27 = vmul.f32 %v1858_v0, %v1815_v43 }
 0x29b   :  { %v1850_v12 = vsel %vm1849_vm15, %v4086_v39, %v1846_v63 }
 0x29c   :  { %v4088_v3 = vpop.eup %4087  ;;  %v1862_v44 = vadd.f32 %v1860_v27, %v1776_v41  ;;  %v1855_v33 = vsel %vm1852_vm0, %v1854_v23, %v1850_v12 }
 0x29d   :  { %v1867_v25 = vmul.f32 %v4088_v3, %v1865_v57  ;;  %v1866_v49 = vsub.f32 1.0, %v1855_v33  ;;  %v1870_v37 = vmul.f32 %v1855_v33, %v5347_v61  ;;  %v1874_v61 = vld [vmem:[#allocation3 + $0x60] sm:$0xff] }
 0x29e   :  { %4089 = vtanh.f32 %v1862_v44  ;;  %v1879_v58 = vunpack.c.h.bf16 %v1874_v61  ;;  %v1878_v41 = vunpack.c.l.bf16 %v1874_v61  ;;  %v1882_v44 = vunpack.c.h.bf16 %v1876_v7 }
 0x29f   :  { %v5481_v45 = vadd.f32 %v1869_v5, %v1867_v25 }
 0x2a1   :  { %v1995_v27 = vpack.c.bf16 %v5481_v45, %v5481_v45 }
 0x2a3   :  { %v2007_v48 = vunpack.c.l.b16 %v1995_v27 }
 0x2a4   :  { %v4090_v43 = vpop.eup %4089 }
 0x2a5   :  { %v1868_v13 = vmul.f32 %v4090_v43, %v1866_v49  ;;  %v1881_v49 = vunpack.c.l.bf16 %v1876_v7 }
 0x2a7   :  { %v5484_v53 = vadd.f32 %v1870_v37, %v1868_v13 }
 0x2a9   :  { %v3925_v39 = vpack.c.bf16 %v5484_v53, %v5481_v45  ;;  %v1996_v2 = vpack.c.bf16 %v5484_v53, %v5484_v53 }
 0x2ab   :  { %3975 = vst [vmem:[%s5985_s7 + $0x10] sm:$0xff] %v3925_v39   ;;  %v2008_v35 = vunpack.c.l.b16 %v1996_v2 }
 0x2ad   :  { %v2009_v14 = vpack.c.b16 %v2008_v35, %v2007_v48 }
 0x2af   :  { %2019 = vmatmul.bf16.vlgmr.msrb.gmra.mxu2 %v2009_v14  ;;  %2033 = vmatmul.bf16.vlgmr.msrb.gmra.mxu3 %v2009_v14 }
 0x2b0   :  { %2047 = vmatmul.bf16.vlgmr.msrb.gmra.mxu0 %v2009_v14  ;;  %2374 = vmatpush.bf16.msrb.mxu2 %v4561_v10 }
 0x2b1   :  { %2394 = vmatpush.bf16.msrb.mxu3 %v4716_v18  ;;  %2408 = vmatpush.bf16.msrb.mxu0 %v4757_v62 }
 0x2b4   :  { %2375 = vmatpush.bf16.msrb.mxu2 %v4596_v20 }
 0x2b5   :  { %2395 = vmatpush.bf16.msrb.mxu3 %v4729_v29  ;;  %2409 = vmatpush.bf16.msrb.mxu0 %v4779_v16 }
 0x2b8   :  { %2376 = vmatpush.bf16.msrb.mxu2 %v4607_v26 }
 0x2b9   :  { %2396 = vmatpush.bf16.msrb.mxu3 %v4747_v55  ;;  %2410 = vmatpush.bf16.msrb.mxu0 %v4800_v50 }
 0x2bc   :  { %2377 = vmatpush.bf16.msrb.mxu2 %v4617_v30 }
 0x2bd   :  { %2397 = vmatpush.bf16.msrb.mxu3 %v4768_v8  ;;  %2411 = vmatpush.bf16.msrb.mxu0 %v4822_v21 }
 0x2c0   :  { %2378 = vmatpush.bf16.msrb.mxu2 %v4631_v36 }
 0x2c1   :  { %2398 = vmatpush.bf16.msrb.mxu3 %v4792_v40  ;;  %2412 = vmatpush.bf16.msrb.mxu0 %v4847_v60 }
 0x2c4   :  { %2379 = vmatpush.bf16.msrb.mxu2 %v6079_v17 }
 0x2c5   :  { %2399 = vmatpush.bf16.msrb.mxu3 %v6080_v47  ;;  %2413 = vmatpush.bf16.msrb.mxu0 %v4872_v34 }
 0x2c8   :  { %2380 = vmatpush.bf16.msrb.mxu2 %v6081_v28 }
 0x2c9   :  { %2400 = vmatpush.bf16.msrb.mxu3 %v6082_v42  ;;  %2414 = vmatpush.bf16.msrb.mxu0 %v4896_v24 }
 0x2cc   :  { %2381 = vmatpush.bf16.msrb.mxu2 %v6083_v9 }
 0x2cd   :  { %2401 = vmatpush.bf16.msrb.mxu3 %v6084_v32  ;;  %2415 = vmatpush.bf16.msrb.mxu0 %v4918_v22 }
 0x2d0   :  { %v1747_v0 = vpop.f32.mrf.mxu0 }
 0x2d1   :  { %v1924_v63 = vadd.f32 %v1879_v58, %v1747_v0 }
 0x2d3   :  { %v3774_v6 = vmul.f32 -1.442695, %v1924_v63 }
 0x2d5   :  { %4091 = vpow2.f32 %v3774_v6 }
 0x2d6   :  { %v1733_v54 = vpop.f32.mrf.mxu3 }
 0x2d7   :  { %v1884_v3 = vadd.f32 %v1878_v41, %v1733_v54  ;;  %v1761_v54 = vpop.f32.mrf.mxu1 }
 0x2d8   :  { %v1749_v57 = vpop.f32.mrf.mxu0 }
 0x2d9   :  { %v3772_v12 = vmul.f32 -1.442695, %v1884_v3  ;;  %v1925_v23 = vadd.f32 %v1882_v44, %v1749_v57 }
 0x2db   :  { %v4092_v25 = vpop.eup %4091  ;;  %4093 = vpow2.f32 %v3772_v12  ;;  %v3775_v33 = vmul.f32 -1.442695, %v1925_v23 }
 0x2dc   :  { %v5519_v5 = vadd.f32 1.0, %v4092_v25 }
 0x2dd   :  { %4095 = vpow2.f32 %v3775_v33 }
 0x2de   :  { %v1735_v43 = vpop.f32.mrf.mxu3  ;;  %4097 = vrcp.f32 %v5519_v5  ;;  %vm1939_vm6 = vweird.f32 %v5519_v5  ;;  %v1943_v22 = vand.u32 2147483647, %v5519_v5 }
 0x2df   :  { %v1885_v13 = vadd.f32 %v1881_v49, %v1735_v43  ;;  %v1875_v43 = vld [vmem:[#allocation3 + $0x68] sm:$0xf] }
 0x2e0   :  { %vm1944_vm11 = vcmp.eq.f32.partialorder %v1943_v22, 8.507059e+37 }
 0x2e1   :  { %v4094_v37 = vpop.eup %4093  ;;  %v3773_v27 = vmul.f32 -1.442695, %v1885_v13  ;;  %v5533_v13 = vld [vmem:[%s5983_s6 + $0x1] ss:$0 sm:$0xff] }
 0x2e2   :  { %v1892_v39 = vadd.f32 1.0, %v4094_v37  ;;  %v1964_v37 = vadd.f32 %v5533_v13, %v1761_v54 }
 0x2e3   :  { %v4096_v2 = vpop.eup %4095  ;;  %4099 = vpow2.f32 %v3773_v27 }
 0x2e4   :  { %4101 = vrcp.f32 %v1892_v39  ;;  %v4098_v48 = vpop.eup %4097  ;;  %v5522_v35 = vadd.f32 1.0, %v4096_v2  ;;  %v1905_v3 = vand.u32 2147483648, %v1892_v39  ;;  %v1903_v57 = vand.u32 2147483647, %v1892_v39 }
 0x2e5   :  { %v1935_v14 = vmul.f32 %v4098_v48, %v5519_v5  ;;  %vm1899_vm2 = vweird.f32 %v1892_v39  ;;  %vm1940_vm5 = vweird.f32 %v4098_v48 }
 0x2e6   :  { %4103 = vrcp.f32 %v5522_v35  ;;  %v1906_v49 = vor.u32 1.1754944e-38, %v1905_v3  ;;  %vm1904_vm4 = vcmp.eq.f32.partialorder %v1903_v57, 8.507059e+37  ;;  %vm5539_vm8 = vmor %vm1939_vm6, %vm1940_vm5  ;;  %vm1954_vm14 = vweird.f32 %v5522_v35 }
 0x2e7   :  { %v1936_v6 = vsub.f32 1.0, %v1935_v14  ;;  %v1958_v22 = vand.u32 2147483647, %v5522_v35 }
 0x2e9   :  { %v4100_v61 = vpop.eup %4099  ;;  %v1937_v23 = vmul.f32 %v4098_v48, %v1936_v6  ;;  %vm1959_vm0 = vcmp.eq.f32.partialorder %v1958_v22, 8.507059e+37  ;;  %v6134_v22 = vld [vmem:[#allocation14_spill] sm:$0xff] }
 0x2ea   :  { %v4102_v58 = vpop.eup %4101  ;;  %v1893_v0 = vadd.f32 1.0, %v4100_v61 }
 0x2eb   :  { %v1895_v63 = vmul.f32 %v4102_v58, %v1892_v39  ;;  %vm1900_vm1 = vweird.f32 %v4102_v58  ;;  %v1938_v61 = vadd.f32 %v4098_v48, %v1937_v23  ;;  %v1880_v39 = vunpack.c.l.bf16 %v1875_v43  ;;  %v1763_v23 = vpop.f32.mrf.mxu1 }
 0x2ec   :  { %4105 = vrcp.f32 %v1893_v0  ;;  %v5526_v7 = vpop.eup %4103  ;;  %vm1901_vm3 = vmor %vm1899_vm2, %vm1900_vm1  ;;  %v1918_v54 = vand.u32 2147483647, %v1893_v0  ;;  %vm1914_vm9 = vweird.f32 %v1893_v0 }
 0x2ed   :  { %v1896_v41 = vsub.f32 1.0, %v1895_v63  ;;  %v1950_v12 = vmul.f32 %v5526_v7, %v5522_v35  ;;  %vm1955_vm13 = vweird.f32 %v5526_v7 }
 0x2ee   :  { %vm1919_vm12 = vcmp.eq.f32.partialorder %v1918_v54, 8.507059e+37  ;;  %vm1956_vm15 = vmor %vm1954_vm14, %vm1955_vm13 }
 0x2ef   :  { %v1897_v44 = vmul.f32 %v4102_v58, %v1896_v41  ;;  %v1951_v63 = vsub.f32 1.0, %v1950_v12  ;;  %v1945_v41 = vand.u32 2147483648, %v5519_v5  ;;  %v1942_v12 = vsel %vm5539_vm8, %v4098_v48, %v1938_v61 }
 0x2f1   :  { %v1898_v25 = vadd.f32 %v4102_v58, %v1897_v44  ;;  %v1920_v44 = vand.u32 2147483648, %v1893_v0  ;;  %v1946_v43 = vor.u32 1.1754944e-38, %v1945_v41 }
 0x2f2   :  { %v4106_v33 = vpop.eup %4105 }
 0x2f3   :  { %v1910_v27 = vmul.f32 %v4106_v33, %v1893_v0  ;;  %v1902_v2 = vsel %vm1901_vm3, %v4102_v58, %v1898_v25  ;;  %vm1915_vm7 = vweird.f32 %v4106_v33  ;;  %v1952_v25 = vmul.f32 %v5526_v7, %v1951_v63 }
 0x2f4   :  { %v1907_v14 = vsel %vm1904_vm4, %v1906_v49, %v1902_v2  ;;  %vm1916_vm10 = vmor %vm1914_vm9, %vm1915_vm7  ;;  %v1921_v5 = vor.u32 1.1754944e-38, %v1920_v44  ;;  %v1947_v2 = vsel %vm1944_vm11, %v1946_v43, %v1942_v12  ;;  %v1986_v44 = vpop.permute.xlu2 %1985 }
 0x2f5   :  { %v1911_v6 = vsub.f32 1.0, %v1910_v27  ;;  %v1966_v3 = vmul.f32 %v1964_v37, %v1907_v14  ;;  %v1877_v37 = vld [vmem:[#allocation3 + $0x74] sm:$0xf]  ;;  %v1965_v27 = vadd.f32 %v5533_v13, %v1763_v23  ;;  %v1972_v61 = vsub.f32 1.0, %v1947_v2 }
 0x2f6   :  { %v1883_v48 = vunpack.c.l.bf16 %v1877_v37  ;;  %v1976_v57 = vmul.f32 %v1947_v2, %v5396_v46 }
 0x2f7   :  { %v1912_v32 = vmul.f32 %v4106_v33, %v1911_v6  ;;  %v1968_v58 = vadd.f32 %v1966_v3, %v1880_v39  ;;  %v1953_v39 = vadd.f32 %v5526_v7, %v1952_v25 }
 0x2f9   :  { %v1913_v49 = vadd.f32 %v4106_v33, %v1912_v32  ;;  %4107 = vtanh.f32 %v1968_v58  ;;  %v1960_v32 = vand.u32 2147483648, %v5522_v35 }
 0x2fb   :  { %v1917_v14 = vsel %vm1916_vm10, %v4106_v33, %v1913_v49  ;;  %v1957_v33 = vsel %vm1956_vm15, %v5526_v7, %v1953_v39  ;;  %v1961_v54 = vor.u32 1.1754944e-38, %v1960_v32  ;;  %v6129_v39 = vld [vmem:[#allocation29_spill] sm:$0xff]  ;;  %v6131_v32 = vld [vmem:[#allocation12_spill] sm:$0xff] }
 0x2fc   :  { %v1922_v6 = vsel %vm1919_vm12, %v1921_v5, %v1917_v14  ;;  %v1991_v37 = vpop.permute.xlu2 %1990 }
 0x2fd   :  { %v1967_v0 = vmul.f32 %v1965_v27, %v1922_v6  ;;  %v1962_v58 = vsel %vm1959_vm0, %v1961_v54, %v1957_v33  ;;  %v6138_v33 = vld [vmem:[#allocation32_spill] sm:$0xff]  ;;  %v6139_v54 = vld [vmem:[#allocation17_spill] sm:$0xff] }
 0x2fe   :  { %v1973_v12 = vsub.f32 1.0, %v1962_v58  ;;  %v1977_v35 = vmul.f32 %v1962_v58, %v5401_v51 }
 0x2ff   :  { %v4108_v63 = vpop.eup %4107  ;;  %v1969_v41 = vadd.f32 %v1967_v0, %v1883_v48  ;;  %v6130_v48 = vld [vmem:[#allocation11_spill] sm:$0xff]  ;;  %v6132_v0 = vld [vmem:[#allocation30_spill] sm:$0xff] }
 0x300   :  { %v1974_v3 = vmul.f32 %v4108_v63, %v1972_v61  ;;  %v6133_v61 = vld [vmem:[#allocation13_spill] sm:$0xff]  ;;  %v6135_v63 = vld [vmem:[#allocation31_spill] sm:$0xff] }
 0x301   :  { %4109 = vtanh.f32 %v1969_v41  ;;  %v6136_v41 = vld [vmem:[#allocation15_spill] sm:$0xff] }
 0x302   :  { %v1978_v23 = vadd.f32 %v1976_v57, %v1974_v3  ;;  %v6137_v3 = vld [vmem:[#allocation16_spill] sm:$0xff]  ;;  %v6140_v57 = vld [vmem:[#allocation18_spill] sm:$0xff] }
 0x304   :  { %v5554_v49 = vmul.f32 %v1986_v44, %v1978_v23  ;;  %v2102_v44 = vld [vmem:[#allocation2 + $0x48] sm:$0xff] }
 0x305   :  { %v2106_v58 = vunpack.c.l.bf16 %v2102_v44  ;;  %v2107_v23 = vunpack.c.h.bf16 %v2102_v44 }
 0x306   :  { %v2000_v7 = vpack.c.bf16 %v5554_v49, %v5554_v49 }
 0x307   :  { %v4110_v25 = vpop.eup %4109 }
 0x308   :  { %v1975_v43 = vmul.f32 %v4110_v25, %v1973_v12  ;;  %v2055_v14 = vunpack.c.l.b16 %v2000_v7  ;;  %v6141_v12 = vld [vmem:[#allocation33_spill] sm:$0xff] }
 0x30a   :  { %v1979_v5 = vadd.f32 %v1977_v35, %v1975_v43  ;;  %v6142_v35 = vld [vmem:[#allocation19_spill] sm:$0xff] }
 0x30c   :  { %v5559_v27 = vmul.f32 %v1991_v37, %v1979_v5  ;;  %v6143_v5 = vld [vmem:[#allocation20_spill] sm:$0xff] }
 0x30e   :  { %v2001_v46 = vpack.c.bf16 %v5559_v27, %v5559_v27  ;;  %v3930_v2 = vpack.c.bf16 %v5559_v27, %v5554_v49 }
 0x310   :  { %3976 = vst [vmem:[%s5986_s8 + $0x20] sm:$0xff] %v3930_v2   ;;  %v2056_v6 = vunpack.c.l.b16 %v2001_v46 }
 0x312   :  { %v2057_v51 = vpack.c.b16 %v2056_v6, %v2055_v14  ;;  %v2104_v14 = vld [vmem:[#allocation2 + $0x54] sm:$0xff] }
 0x313   :  { %v2109_v6 = vunpack.c.l.bf16 %v2104_v14 }
 0x314   :  { %2067 = vmatmul.bf16.vlgmr.msrb.gmra.mxu1 %v2057_v51  ;;  %2081 = vmatmul.bf16.vlgmr.msra.gmra.mxu2 %v2057_v51 }
 0x315   :  { %2095 = vmatmul.bf16.vlgmr.msra.gmra.mxu3 %v2057_v51  ;;  %2422 = vmatpush.bf16.msrb.mxu1 %v4879_v59  ;;  %v2110_v51 = vunpack.c.h.bf16 %v2104_v14 }
 0x316   :  { %2681 = vmatpush.bf16.msra.mxu2 %v6087_v56  ;;  %2695 = vmatpush.bf16.msra.mxu3 %v4424_v31 }
 0x319   :  { %2423 = vmatpush.bf16.msrb.mxu1 %v4901_v38 }
 0x31a   :  { %2682 = vmatpush.bf16.msra.mxu2 %v6088_v15  ;;  %2696 = vmatpush.bf16.msra.mxu3 %v6106_v11 }
 0x31d   :  { %2424 = vmatpush.bf16.msrb.mxu1 %v6107_v1 }
 0x31e   :  { %2683 = vmatpush.bf16.msra.mxu2 %v6108_v52  ;;  %2697 = vmatpush.bf16.msra.mxu3 %v6109_v4 }
 0x321   :  { %2425 = vmatpush.bf16.msrb.mxu1 %v6129_v39 }
 0x322   :  { %2684 = vmatpush.bf16.msra.mxu2 %v6130_v48  ;;  %2698 = vmatpush.bf16.msra.mxu3 %v6131_v32 }
 0x325   :  { %2426 = vmatpush.bf16.msrb.mxu1 %v6132_v0 }
 0x326   :  { %2685 = vmatpush.bf16.msra.mxu2 %v6133_v61  ;;  %2699 = vmatpush.bf16.msra.mxu3 %v6134_v22 }
 0x329   :  { %2427 = vmatpush.bf16.msrb.mxu1 %v6135_v63 }
 0x32a   :  { %2686 = vmatpush.bf16.msra.mxu2 %v6136_v41  ;;  %2700 = vmatpush.bf16.msra.mxu3 %v6137_v3 }
 0x32d   :  { %2428 = vmatpush.bf16.msrb.mxu1 %v6138_v33 }
 0x32e   :  { %2687 = vmatpush.bf16.msra.mxu2 %v6139_v54  ;;  %2701 = vmatpush.bf16.msra.mxu3 %v6140_v57 }
 0x331   :  { %2429 = vmatpush.bf16.msrb.mxu1 %v6141_v12 }
 0x332   :  { %v2020_v25 = vpop.f32.mrf.mxu2  ;;  %v2034_v43 = vpop.f32.mrf.mxu3  ;;  %2688 = vmatpush.bf16.msra.mxu2 %v6142_v35  ;;  %2702 = vmatpush.bf16.msra.mxu3 %v6143_v5 }
 0x333   :  { %v2112_v37 = vadd.f32 %v2106_v58, %v2020_v25  ;;  %v2152_v7 = vadd.f32 %v2107_v23, %v2034_v43 }
 0x335   :  { %v3782_v46 = vmul.f32 -1.442695, %v2112_v37  ;;  %v3784_v2 = vmul.f32 -1.442695, %v2152_v7 }
 0x337   :  { %4111 = vpow2.f32 %v3782_v46 }
 0x338   :  { %4113 = vpow2.f32 %v3784_v2 }
 0x33a   :  { %v2022_v57 = vpop.f32.mrf.mxu2  ;;  %v2036_v54 = vpop.f32.mrf.mxu3 }
 0x33b   :  { %v2113_v44 = vadd.f32 %v2109_v6, %v2022_v57  ;;  %v2153_v33 = vadd.f32 %v2110_v51, %v2036_v54  ;;  %v2103_v6 = vld [vmem:[#allocation2 + $0x50] sm:$0xf] }
 0x33d   :  { %v4112_v12 = vpop.eup %4111  ;;  %v3783_v3 = vmul.f32 -1.442695, %v2113_v44  ;;  %v3785_v35 = vmul.f32 -1.442695, %v2153_v33  ;;  %v2048_v33 = vpop.f32.mrf.mxu0 }
 0x33e   :  { %v4114_v41 = vpop.eup %4113  ;;  %v2120_v63 = vadd.f32 1.0, %v4112_v12 }
 0x33f   :  { %v5592_v22 = vadd.f32 1.0, %v4114_v41  ;;  %4115 = vpow2.f32 %v3783_v3 }
 0x340   :  { %4117 = vrcp.f32 %v2120_v63  ;;  %v2133_v41 = vand.u32 2147483648, %v2120_v63  ;;  %v2131_v2 = vand.u32 2147483647, %v2120_v63  ;;  %vm2127_vm2 = vweird.f32 %v2120_v63 }
 0x341   :  { %4119 = vrcp.f32 %v5592_v22  ;;  %v2173_v0 = vand.u32 2147483648, %v5592_v22  ;;  %vm2167_vm7 = vweird.f32 %v5592_v22 }
 0x342   :  { %4121 = vpow2.f32 %v3785_v35  ;;  %v2134_v51 = vor.u32 1.1754944e-38, %v2133_v41  ;;  %vm2132_vm4 = vcmp.eq.f32.partialorder %v2131_v2, 8.507059e+37 }
 0x345   :  { %v4116_v58 = vpop.eup %4115 }
 0x346   :  { %v4118_v23 = vpop.eup %4117  ;;  %v2121_v25 = vadd.f32 1.0, %v4116_v58  ;;  %v2192_v58 = vadd.f32 %v5460_v19, %v2048_v33  ;;  %v2050_v33 = vpop.f32.mrf.mxu0 }
 0x347   :  { %v4120_v43 = vpop.eup %4119  ;;  %v2123_v37 = vmul.f32 %v4118_v23, %v2120_v63  ;;  %vm2128_vm1 = vweird.f32 %v4118_v23 }
 0x348   :  { %v4122_v7 = vpop.eup %4121  ;;  %v2163_v54 = vmul.f32 %v4120_v43, %v5592_v22  ;;  %4123 = vrcp.f32 %v2121_v25  ;;  %vm2129_vm3 = vmor %vm2127_vm2, %vm2128_vm1  ;;  %vm2168_vm5 = vweird.f32 %v4120_v43  ;;  %v2148_v63 = vand.u32 2147483648, %v2121_v25 }
 0x349   :  { %v2124_v57 = vsub.f32 1.0, %v2123_v37  ;;  %v5596_v46 = vadd.f32 1.0, %v4122_v7  ;;  %vm5604_vm8 = vmor %vm2167_vm7, %vm2168_vm5  ;;  %vm2142_vm9 = vweird.f32 %v2121_v25 }
 0x34a   :  { %v2164_v12 = vsub.f32 1.0, %v2163_v54  ;;  %v2108_v54 = vunpack.c.l.bf16 %v2103_v6 }
 0x34b   :  { %v2125_v3 = vmul.f32 %v4118_v23, %v2124_v57  ;;  %4125 = vrcp.f32 %v5596_v46  ;;  %vm2182_vm14 = vweird.f32 %v5596_v46 }
 0x34c   :  { %v2165_v44 = vmul.f32 %v4120_v43, %v2164_v12  ;;  %v2146_v12 = vand.u32 2147483647, %v2121_v25 }
 0x34d   :  { %v2126_v35 = vadd.f32 %v4118_v23, %v2125_v3 }
 0x34e   :  { %v4124_v14 = vpop.eup %4123  ;;  %v2166_v48 = vadd.f32 %v4120_v43, %v2165_v44  ;;  %vm2147_vm11 = vcmp.eq.f32.partialorder %v2146_v12, 8.507059e+37 }
 0x34f   :  { %v2130_v37 = vsel %vm2129_vm3, %v4118_v23, %v2126_v35  ;;  %v2138_v7 = vmul.f32 %v4124_v14, %v2121_v25  ;;  %vm2143_vm6 = vweird.f32 %v4124_v14  ;;  %v2171_v23 = vand.u32 2147483647, %v5592_v22 }
 0x350   :  { %v2135_v5 = vsel %vm2132_vm4, %v2134_v51, %v2130_v37  ;;  %v2170_v6 = vsel %vm5604_vm8, %v4120_v43, %v2166_v48  ;;  %v2105_v51 = vld [vmem:[#allocation2 + $0x5c] sm:$0xf]  ;;  %vm2144_vm10 = vmor %vm2142_vm9, %vm2143_vm6  ;;  %v2193_v37 = vadd.f32 %v5460_v19, %v2050_v33  ;;  %v2188_v25 = vand.u32 2147483648, %v5596_v46 }
 0x351   :  { %v4126_v61 = vpop.eup %4125  ;;  %v2194_v57 = vmul.f32 %v2192_v58, %v2135_v5  ;;  %v2139_v32 = vsub.f32 1.0, %v2138_v7  ;;  %v2174_v58 = vor.u32 1.1754944e-38, %v2173_v0  ;;  %vm2172_vm12 = vcmp.eq.f32.partialorder %v2171_v23, 8.507059e+37 }
 0x352   :  { %v2178_v3 = vmul.f32 %v4126_v61, %v5596_v46  ;;  %vm2183_vm13 = vweird.f32 %v4126_v61  ;;  %v2186_v48 = vand.u32 2147483647, %v5596_v46 }
 0x353   :  { %v2196_v39 = vadd.f32 %v2194_v57, %v2108_v54  ;;  %v2140_v41 = vmul.f32 %v4124_v14, %v2139_v32  ;;  %v2149_v32 = vor.u32 1.1754944e-38, %v2148_v63  ;;  %v2175_v54 = vsel %vm2172_vm12, %v2174_v58, %v2170_v6  ;;  %vm2184_vm15 = vmor %vm2182_vm14, %vm2183_vm13 }
 0x354   :  { %v2179_v2 = vsub.f32 1.0, %v2178_v3  ;;  %v2111_v57 = vunpack.c.l.bf16 %v2105_v51  ;;  %v2200_v0 = vsub.f32 1.0, %v2175_v54  ;;  %vm2187_vm0 = vcmp.eq.f32.partialorder %v2186_v48, 8.507059e+37 }
 0x355   :  { %4127 = vtanh.f32 %v2196_v39  ;;  %v2141_v35 = vadd.f32 %v4124_v14, %v2140_v41  ;;  %v2204_v23 = vmul.f32 %v2175_v54, %v5481_v45 }
 0x356   :  { %v2180_v44 = vmul.f32 %v4126_v61, %v2179_v2 }
 0x357   :  { %v2145_v22 = vsel %vm2144_vm10, %v4124_v14, %v2141_v35  ;;  %v2189_v14 = vor.u32 1.1754944e-38, %v2188_v25 }
 0x358   :  { %v2150_v39 = vsel %vm2147_vm11, %v2149_v32, %v2145_v22  ;;  %v2181_v7 = vadd.f32 %v4126_v61, %v2180_v44  ;;  %v2209_v22 = vld [vmem:[#allocation3 + $0x48] sm:$0xff] }
 0x359   :  { %v2195_v3 = vmul.f32 %v2193_v37, %v2150_v39  ;;  %v6147_v37 = vld [vmem:[#allocation27_spill] sm:$0xff]  ;;  %v2213_v39 = vunpack.c.l.bf16 %v2209_v22  ;;  %v2214_v25 = vunpack.c.h.bf16 %v2209_v22 }
 0x35a   :  { %v2185_v19 = vsel %vm2184_vm15, %v4126_v61, %v2181_v7 }
 0x35b   :  { %v4128_v43 = vpop.eup %4127  ;;  %v2197_v63 = vadd.f32 %v2195_v3, %v2111_v57  ;;  %v2190_v12 = vsel %vm2187_vm0, %v2189_v14, %v2185_v19  ;;  %v2211_v3 = vld [vmem:[#allocation3 + $0x54] sm:$0xff] }
 0x35c   :  { %v2202_v41 = vmul.f32 %v4128_v43, %v2200_v0  ;;  %v2201_v33 = vsub.f32 1.0, %v2190_v12  ;;  %v2205_v35 = vmul.f32 %v2190_v12, %v5484_v53  ;;  %v6146_v53 = vld [vmem:[#allocation26_spill] sm:$0xff] }
 0x35d   :  { %4129 = vtanh.f32 %v2197_v63  ;;  %v2216_v63 = vunpack.c.l.bf16 %v2211_v3 }
 0x35e   :  { %v5615_v2 = vadd.f32 %v2204_v23, %v2202_v41 }
 0x360   :  { %v2330_v51 = vpack.c.bf16 %v5615_v2, %v5615_v2 }
 0x362   :  { %v2342_v45 = vunpack.c.l.b16 %v2330_v51 }
 0x363   :  { %v4130_v5 = vpop.eup %4129 }
 0x364   :  { %v2203_v6 = vmul.f32 %v4130_v5, %v2201_v33  ;;  %v2217_v33 = vunpack.c.h.bf16 %v2211_v3 }
 0x366   :  { %v5618_v46 = vadd.f32 %v2205_v35, %v2203_v6 }
 0x368   :  { %v2331_v61 = vpack.c.bf16 %v5618_v46, %v5618_v46  ;;  %v3935_v32 = vpack.c.bf16 %v5618_v46, %v5615_v2 }
 0x36a   :  { %3977 = vst [vmem:[%s5985_s7 + $0x18] sm:$0xff] %v3935_v32   ;;  %v2343_v44 = vunpack.c.l.b16 %v2331_v61 }
 0x36c   :  { %v2344_v58 = vpack.c.b16 %v2343_v44, %v2342_v45 }
 0x36e   :  { %2354 = vmatmul.bf16.vlgmr.msra.gmra.mxu0 %v2344_v58  ;;  %2368 = vmatmul.bf16.vlgmr.msra.gmra.mxu1 %v2344_v58 }
 0x36f   :  { %2382 = vmatmul.bf16.vlgmr.msrb.gmra.mxu2 %v2344_v58  ;;  %2709 = vmatpush.bf16.msra.mxu0 %v4561_v10 }
 0x370   :  { %2729 = vmatpush.bf16.msra.mxu1 %v4716_v18  ;;  %2743 = vmatpush.bf16.msrb.mxu2 %v4757_v62 }
 0x373   :  { %2710 = vmatpush.bf16.msra.mxu0 %v4596_v20 }
 0x374   :  { %2730 = vmatpush.bf16.msra.mxu1 %v4729_v29  ;;  %2744 = vmatpush.bf16.msrb.mxu2 %v4779_v16 }
 0x377   :  { %2711 = vmatpush.bf16.msra.mxu0 %v4607_v26 }
 0x378   :  { %2731 = vmatpush.bf16.msra.mxu1 %v4747_v55  ;;  %2745 = vmatpush.bf16.msrb.mxu2 %v4800_v50 }
 0x37b   :  { %2712 = vmatpush.bf16.msra.mxu0 %v4617_v30 }
 0x37c   :  { %2732 = vmatpush.bf16.msra.mxu1 %v4768_v8  ;;  %2746 = vmatpush.bf16.msrb.mxu2 %v4822_v21 }
 0x37f   :  { %2713 = vmatpush.bf16.msra.mxu0 %v4631_v36 }
 0x380   :  { %2733 = vmatpush.bf16.msra.mxu1 %v4792_v40  ;;  %2747 = vmatpush.bf16.msrb.mxu2 %v4847_v60 }
 0x383   :  { %2714 = vmatpush.bf16.msra.mxu0 %v6079_v17 }
 0x384   :  { %2734 = vmatpush.bf16.msra.mxu1 %v6080_v47  ;;  %2748 = vmatpush.bf16.msrb.mxu2 %v4872_v34 }
 0x387   :  { %2715 = vmatpush.bf16.msra.mxu0 %v6081_v28 }
 0x388   :  { %2735 = vmatpush.bf16.msra.mxu1 %v6082_v42  ;;  %2749 = vmatpush.bf16.msrb.mxu2 %v4896_v24 }
 0x38b   :  { %2716 = vmatpush.bf16.msra.mxu0 %v6083_v9 }
 0x38c   :  { %2736 = vmatpush.bf16.msra.mxu1 %v6146_v53  ;;  %2750 = vmatpush.bf16.msrb.mxu2 %v6147_v37 }
 0x391   :  { %v2068_v7 = vpop.f32.mrf.mxu1 }
 0x392   :  { %v2219_v54 = vadd.f32 %v2213_v39, %v2068_v7 }
 0x394   :  { %v3786_v57 = vmul.f32 -1.442695, %v2219_v54 }
 0x396   :  { %4131 = vpow2.f32 %v3786_v57 }
 0x397   :  { %v2082_v48 = vpop.f32.mrf.mxu2 }
 0x398   :  { %v2259_v43 = vadd.f32 %v2214_v25, %v2082_v48  ;;  %v2096_v54 = vpop.f32.mrf.mxu3 }
 0x399   :  { %v2070_v0 = vpop.f32.mrf.mxu1 }
 0x39a   :  { %v3788_v19 = vmul.f32 -1.442695, %v2259_v43  ;;  %v2220_v14 = vadd.f32 %v2216_v63, %v2070_v0  ;;  %v2210_v0 = vld [vmem:[#allocation3 + $0x50] sm:$0xf] }
 0x39c   :  { %v4132_v41 = vpop.eup %4131  ;;  %4133 = vpow2.f32 %v3788_v19  ;;  %v3787_v12 = vmul.f32 -1.442695, %v2220_v14 }
 0x39d   :  { %v2227_v23 = vadd.f32 1.0, %v4132_v41 }
 0x39e   :  { %4135 = vpow2.f32 %v3787_v12 }
 0x39f   :  { %4137 = vrcp.f32 %v2227_v23  ;;  %v2084_v5 = vpop.f32.mrf.mxu2  ;;  %v2240_v39 = vand.u32 2147483648, %v2227_v23  ;;  %v2238_v3 = vand.u32 2147483647, %v2227_v23  ;;  %vm2234_vm2 = vweird.f32 %v2227_v23 }
 0x3a0   :  { %v2260_v35 = vadd.f32 %v2217_v33, %v2084_v5  ;;  %v2299_v33 = vadd.f32 %v5533_v13, %v2096_v54 }
 0x3a1   :  { %v2241_v19 = vor.u32 1.1754944e-38, %v2240_v39  ;;  %vm2239_vm4 = vcmp.eq.f32.partialorder %v2238_v3, 8.507059e+37 }
 0x3a2   :  { %v4134_v6 = vpop.eup %4133  ;;  %v3789_v51 = vmul.f32 -1.442695, %v2260_v35 }
 0x3a3   :  { %v2267_v61 = vadd.f32 1.0, %v4134_v6 }
 0x3a4   :  { %v4136_v32 = vpop.eup %4135  ;;  %4139 = vpow2.f32 %v3789_v51  ;;  %v2215_v51 = vunpack.c.l.bf16 %v2210_v0  ;;  %v2098_v0 = vpop.f32.mrf.mxu3 }
 0x3a5   :  { %v4138_v45 = vpop.eup %4137  ;;  %4141 = vrcp.f32 %v2267_v61  ;;  %v2228_v58 = vadd.f32 1.0, %v4136_v32  ;;  %vm2274_vm6 = vweird.f32 %v2267_v61 }
 0x3a6   :  { %v2230_v44 = vmul.f32 %v4138_v45, %v2227_v23  ;;  %vm2235_vm1 = vweird.f32 %v4138_v45 }
 0x3a7   :  { %4143 = vrcp.f32 %v2228_v58  ;;  %vm2236_vm3 = vmor %vm2234_vm2, %vm2235_vm1  ;;  %v2253_v54 = vand.u32 2147483647, %v2228_v58  ;;  %vm2249_vm9 = vweird.f32 %v2228_v58 }
 0x3a8   :  { %v2231_v22 = vsub.f32 1.0, %v2230_v44  ;;  %v2280_v44 = vand.u32 2147483648, %v2267_v61 }
 0x3a9   :  { %vm2254_vm12 = vcmp.eq.f32.partialorder %v2253_v54, 8.507059e+37 }
 0x3aa   :  { %v4140_v7 = vpop.eup %4139  ;;  %v2232_v57 = vmul.f32 %v4138_v45, %v2231_v22 }
 0x3ab   :  { %v4142_v25 = vpop.eup %4141  ;;  %v5653_v48 = vadd.f32 1.0, %v4140_v7  ;;  %v2278_v7 = vand.u32 2147483647, %v2267_v61 }
 0x3ac   :  { %v2270_v43 = vmul.f32 %v4142_v25, %v2267_v61  ;;  %v2233_v63 = vadd.f32 %v4138_v45, %v2232_v57  ;;  %vm2275_vm5 = vweird.f32 %v4142_v25  ;;  %v2255_v57 = vand.u32 2147483648, %v2228_v58 }
 0x3ad   :  { %4145 = vrcp.f32 %v5653_v48  ;;  %v4144_v14 = vpop.eup %4143  ;;  %vm5657_vm7 = vmor %vm2274_vm6, %vm2275_vm5  ;;  %vm2279_vm10 = vcmp.eq.f32.partialorder %v2278_v7, 8.507059e+37  ;;  %vm2289_vm14 = vweird.f32 %v5653_v48  ;;  %v2293_v7 = vand.u32 2147483647, %v5653_v48 }
 0x3ae   :  { %v2271_v41 = vsub.f32 1.0, %v2270_v43  ;;  %v2237_v12 = vsel %vm2236_vm3, %v4138_v45, %v2233_v63  ;;  %v2245_v35 = vmul.f32 %v4144_v14, %v2228_v58  ;;  %vm2250_vm8 = vweird.f32 %v4144_v14 }
 0x3af   :  { %v2242_v5 = vsel %vm2239_vm4, %v2241_v19, %v2237_v12  ;;  %v2281_v19 = vor.u32 1.1754944e-38, %v2280_v44  ;;  %v2212_v12 = vld [vmem:[#allocation3 + $0x5c] sm:$0xf]  ;;  %vm2251_vm11 = vmor %vm2249_vm9, %vm2250_vm8  ;;  %vm2294_vm0 = vcmp.eq.f32.partialorder %v2293_v7, 8.507059e+37  ;;  %v6160_v7 = vld [vmem:[#allocation17_spill] sm:$0xff] }
 0x3b0   :  { %v2272_v6 = vmul.f32 %v4142_v25, %v2271_v41  ;;  %v2301_v32 = vmul.f32 %v2299_v33, %v2242_v5  ;;  %v2246_v23 = vsub.f32 1.0, %v2245_v35  ;;  %v2256_v33 = vor.u32 1.1754944e-38, %v2255_v57 }
 0x3b2   :  { %v2273_v22 = vadd.f32 %v4142_v25, %v2272_v6  ;;  %v2303_v39 = vadd.f32 %v2301_v32, %v2215_v51  ;;  %v2247_v45 = vmul.f32 %v4144_v14, %v2246_v23  ;;  %v2300_v6 = vadd.f32 %v5533_v13, %v2098_v0 }
 0x3b3   :  { %v4146_v37 = vpop.eup %4145  ;;  %v2295_v32 = vand.u32 2147483648, %v5653_v48  ;;  %v2218_v23 = vunpack.c.l.bf16 %v2212_v12 }
 0x3b4   :  { %v2277_v3 = vsel %vm5657_vm7, %v4142_v25, %v2273_v22  ;;  %4147 = vtanh.f32 %v2303_v39  ;;  %v2285_v63 = vmul.f32 %v4146_v37, %v5653_v48  ;;  %v2248_v41 = vadd.f32 %v4144_v14, %v2247_v45 }
 0x3b5   :  { %v2282_v5 = vsel %vm2279_vm10, %v2281_v19, %v2277_v3  ;;  %vm2290_vm13 = vweird.f32 %v4146_v37  ;;  %v2296_v45 = vor.u32 1.1754944e-38, %v2295_v32  ;;  %v2321_v19 = vpop.permute.xlu0 %2320  ;;  %v6151_v32 = vld [vmem:[#allocation11_spill] sm:$0xff] }
 0x3b6   :  { %v2286_v61 = vsub.f32 1.0, %v2285_v63  ;;  %v2252_v35 = vsel %vm2251_vm11, %v4144_v14, %v2248_v41  ;;  %v2307_v39 = vsub.f32 1.0, %v2282_v5  ;;  %vm2291_vm15 = vmor %vm2289_vm14, %vm2290_vm13  ;;  %v2311_v13 = vmul.f32 %v2282_v5, %v5554_v49 }
 0x3b7   :  { %v2257_v25 = vsel %vm2254_vm12, %v2256_v33, %v2252_v35  ;;  %v2326_v33 = vpop.permute.xlu1 %2325 }
 0x3b8   :  { %v2287_v51 = vmul.f32 %v4146_v37, %v2286_v61  ;;  %v2302_v22 = vmul.f32 %v2300_v6, %v2257_v25  ;;  %v6150_v25 = vld [vmem:[#allocation29_spill] sm:$0xff] }
 0x3ba   :  { %v4148_v44 = vpop.eup %4147  ;;  %v2288_v58 = vadd.f32 %v4146_v37, %v2287_v51  ;;  %v2304_v57 = vadd.f32 %v2302_v22, %v2218_v23  ;;  %v6152_v23 = vld [vmem:[#allocation12_spill] sm:$0xff]  ;;  %v6155_v22 = vld [vmem:[#allocation14_spill] sm:$0xff] }
 0x3bb   :  { %v2309_v14 = vmul.f32 %v4148_v44, %v2307_v39  ;;  %v6158_v44 = vld [vmem:[#allocation16_spill] sm:$0xff] }
 0x3bc   :  { %v2292_v43 = vsel %vm2291_vm15, %v4146_v37, %v2288_v58  ;;  %4149 = vtanh.f32 %v2304_v57  ;;  %v6161_v57 = vld [vmem:[#allocation18_spill] sm:$0xff] }
 0x3bd   :  { %v2297_v54 = vsel %vm2294_vm0, %v2296_v45, %v2292_v43  ;;  %v2313_v3 = vadd.f32 %v2311_v13, %v2309_v14 }
 0x3be   :  { %v2308_v63 = vsub.f32 1.0, %v2297_v54  ;;  %v2312_v12 = vmul.f32 %v2297_v54, %v5559_v27  ;;  %v6162_v54 = vld [vmem:[#allocation33_spill] sm:$0xff] }
 0x3bf   :  { %v5669_v41 = vmul.f32 %v2321_v19, %v2313_v3  ;;  %v6164_v19 = vld [vmem:[#allocation20_spill] sm:$0xff] }
 0x3c1   :  { %v2335_v37 = vpack.c.bf16 %v5669_v41, %v5669_v41 }
 0x3c2   :  { %v4150_v0 = vpop.eup %4149 }
 0x3c3   :  { %v2310_v61 = vmul.f32 %v4150_v0, %v2308_v63  ;;  %v2390_v6 = vunpack.c.l.b16 %v2335_v37  ;;  %v6163_v0 = vld [vmem:[#allocation19_spill] sm:$0xff] }
 0x3c5   :  { %v2314_v48 = vadd.f32 %v2312_v12, %v2310_v61  ;;  %v2439_v61 = vld [vmem:[#allocation2 + $0x6c] sm:$0xff] }
 0x3c6   :  { %v2444_v12 = vunpack.c.l.bf16 %v2439_v61 }
 0x3c7   :  { %v5672_v35 = vmul.f32 %v2326_v33, %v2314_v48  ;;  %v2445_v48 = vunpack.c.h.bf16 %v2439_v61 }
 0x3c9   :  { %v3940_v49 = vpack.c.bf16 %v5672_v35, %v5669_v41  ;;  %v2336_v5 = vpack.c.bf16 %v5672_v35, %v5672_v35 }
 0x3cb   :  { %3978 = vst [vmem:[%s5986_s8 + $0x18] sm:$0xff] %v3940_v49   ;;  %v2391_v51 = vunpack.c.l.b16 %v2336_v5 }
 0x3cd   :  { %v2392_v27 = vpack.c.b16 %v2391_v51, %v2390_v6 }
 0x3cf   :  { %2402 = vmatmul.bf16.vlgmr.msrb.gmra.mxu3 %v2392_v27  ;;  %2416 = vmatmul.bf16.vlgmr.msrb.gmra.mxu0 %v2392_v27 }
 0x3d0   :  { %2430 = vmatmul.bf16.vlgmr.msrb.gmra.mxu1 %v2392_v27  ;;  %2757 = vmatpush.bf16.msrb.mxu3 %v4879_v59 }
 0x3d1   :  { %3016 = vmatpush.bf16.msrb.mxu0 %v6087_v56  ;;  %3030 = vmatpush.bf16.msrb.mxu1 %v4424_v31  ;;  %v6153_v56 = vld [vmem:[#allocation30_spill] sm:$0xff]  ;;  %v6154_v31 = vld [vmem:[#allocation13_spill] sm:$0xff] }
 0x3d4   :  { %2758 = vmatpush.bf16.msrb.mxu3 %v4901_v38 }
 0x3d5   :  { %3017 = vmatpush.bf16.msrb.mxu0 %v6088_v15  ;;  %3031 = vmatpush.bf16.msrb.mxu1 %v6106_v11  ;;  %v6156_v15 = vld [vmem:[#allocation31_spill] sm:$0xff] }
 0x3d6   :  { %v6157_v11 = vld [vmem:[#allocation15_spill] sm:$0xff] }
 0x3d8   :  { %2759 = vmatpush.bf16.msrb.mxu3 %v6107_v1 }
 0x3d9   :  { %3018 = vmatpush.bf16.msrb.mxu0 %v6108_v52  ;;  %3032 = vmatpush.bf16.msrb.mxu1 %v6109_v4  ;;  %v2437_v52 = vld [vmem:[#allocation2 + $0x60] sm:$0xff] }
 0x3da   :  { %v6159_v4 = vld [vmem:[#allocation32_spill] sm:$0xff]  ;;  %v2441_v39 = vunpack.c.l.bf16 %v2437_v52  ;;  %v2442_v58 = vunpack.c.h.bf16 %v2437_v52 }
 0x3dc   :  { %2760 = vmatpush.bf16.msrb.mxu3 %v6150_v25 }
 0x3dd   :  { %3019 = vmatpush.bf16.msrb.mxu0 %v6151_v32  ;;  %3033 = vmatpush.bf16.msrb.mxu1 %v6152_v23 }
 0x3e0   :  { %2761 = vmatpush.bf16.msrb.mxu3 %v6153_v56 }
 0x3e1   :  { %3020 = vmatpush.bf16.msrb.mxu0 %v6154_v31  ;;  %3034 = vmatpush.bf16.msrb.mxu1 %v6155_v22 }
 0x3e4   :  { %2762 = vmatpush.bf16.msrb.mxu3 %v6156_v15 }
 0x3e5   :  { %3021 = vmatpush.bf16.msrb.mxu0 %v6157_v11  ;;  %3035 = vmatpush.bf16.msrb.mxu1 %v6158_v44 }
 0x3e8   :  { %2763 = vmatpush.bf16.msrb.mxu3 %v6159_v4 }
 0x3e9   :  { %3022 = vmatpush.bf16.msrb.mxu0 %v6160_v7  ;;  %3036 = vmatpush.bf16.msrb.mxu1 %v6161_v57 }
 0x3eb   :  { %v2355_v14 = vpop.f32.mrf.mxu0  ;;  %v2369_v43 = vpop.f32.mrf.mxu1 }
 0x3ec   :  { %v2447_v45 = vadd.f32 %v2441_v39, %v2355_v14  ;;  %v2487_v13 = vadd.f32 %v2442_v58, %v2369_v43  ;;  %2764 = vmatpush.bf16.msrb.mxu3 %v6162_v54 }
 0x3ed   :  { %3023 = vmatpush.bf16.msrb.mxu0 %v6163_v0  ;;  %3037 = vmatpush.bf16.msrb.mxu1 %v6164_v19 }
 0x3ee   :  { %v3796_v3 = vmul.f32 -1.442695, %v2447_v45  ;;  %v3798_v63 = vmul.f32 -1.442695, %v2487_v13 }
 0x3f0   :  { %4151 = vpow2.f32 %v3796_v3 }
 0x3f1   :  { %4153 = vpow2.f32 %v3798_v63 }
 0x3f2   :  { %v2383_v45 = vpop.f32.mrf.mxu2 }
 0x3f3   :  { %v2357_v33 = vpop.f32.mrf.mxu0  ;;  %v2371_v37 = vpop.f32.mrf.mxu1 }
 0x3f4   :  { %v2448_v49 = vadd.f32 %v2444_v12, %v2357_v33  ;;  %v2488_v5 = vadd.f32 %v2445_v48, %v2371_v37  ;;  %v2438_v12 = vld [vmem:[#allocation2 + $0x68] sm:$0xf]  ;;  %v5721_v37 = vld [vmem:[%s5983_s6] ss:$0 sm:$0xff] }
 0x3f6   :  { %v4152_v6 = vpop.eup %4151  ;;  %v3797_v51 = vmul.f32 -1.442695, %v2448_v49  ;;  %v3799_v23 = vmul.f32 -1.442695, %v2488_v5  ;;  %v2527_v49 = vadd.f32 %v5721_v37, %v2383_v45 }
 0x3f7   :  { %v4154_v27 = vpop.eup %4153  ;;  %v2455_v32 = vadd.f32 1.0, %v4152_v6 }
 0x3f8   :  { %v5707_v31 = vadd.f32 1.0, %v4154_v27  ;;  %4155 = vpow2.f32 %v3797_v51 }
 0x3f9   :  { %4157 = vrcp.f32 %v2455_v32  ;;  %v2468_v13 = vand.u32 2147483648, %v2455_v32  ;;  %v2466_v63 = vand.u32 2147483647, %v2455_v32  ;;  %vm2462_vm2 = vweird.f32 %v2455_v32 }
 0x3fa   :  { %4159 = vrcp.f32 %v5707_v31  ;;  %v2508_v27 = vand.u32 2147483648, %v5707_v31  ;;  %vm2502_vm7 = vweird.f32 %v5707_v31  ;;  %v2506_v45 = vand.u32 2147483647, %v5707_v31 }
 0x3fb   :  { %4161 = vpow2.f32 %v3799_v23  ;;  %v2469_v48 = vor.u32 1.1754944e-38, %v2468_v13  ;;  %vm2467_vm4 = vcmp.eq.f32.partialorder %v2466_v63, 8.507059e+37 }
 0x3fc   :  { %vm2507_vm12 = vcmp.eq.f32.partialorder %v2506_v45, 8.507059e+37 }
 0x3fe   :  { %v4156_v22 = vpop.eup %4155 }
 0x3ff   :  { %v4158_v11 = vpop.eup %4157  ;;  %v2456_v44 = vadd.f32 1.0, %v4156_v22 }
 0x400   :  { %v5710_v52 = vpop.eup %4159  ;;  %v2458_v39 = vmul.f32 %v4158_v11, %v2455_v32  ;;  %vm2463_vm1 = vweird.f32 %v4158_v11  ;;  %v2443_v32 = vunpack.c.l.bf16 %v2438_v12 }
 0x401   :  { %v4162_v58 = vpop.eup %4161  ;;  %v2498_v7 = vmul.f32 %v5710_v52, %v5707_v31  ;;  %4163 = vrcp.f32 %v2456_v44  ;;  %vm2464_vm3 = vmor %vm2462_vm2, %vm2463_vm1  ;;  %vm2503_vm5 = vweird.f32 %v5710_v52  ;;  %vm2477_vm9 = vweird.f32 %v2456_v44 }
 0x402   :  { %v2459_v57 = vsub.f32 1.0, %v2458_v39  ;;  %v5714_v14 = vadd.f32 1.0, %v4162_v58  ;;  %v2483_v58 = vand.u32 2147483648, %v2456_v44  ;;  %vm5730_vm8 = vmor %vm2502_vm7, %vm2503_vm5 }
 0x403   :  { %v2499_v43 = vsub.f32 1.0, %v2498_v7 }
 0x404   :  { %v2460_v3 = vmul.f32 %v4158_v11, %v2459_v57  ;;  %4165 = vrcp.f32 %v5714_v14  ;;  %vm2517_vm14 = vweird.f32 %v5714_v14 }
 0x405   :  { %v2500_v61 = vmul.f32 %v5710_v52, %v2499_v43  ;;  %v2481_v43 = vand.u32 2147483647, %v2456_v44 }
 0x406   :  { %v2461_v0 = vadd.f32 %v4158_v11, %v2460_v3  ;;  %v2385_v3 = vpop.f32.mrf.mxu2 }
 0x407   :  { %v4164_v19 = vpop.eup %4163  ;;  %v2501_v39 = vadd.f32 %v5710_v52, %v2500_v61  ;;  %vm2482_vm11 = vcmp.eq.f32.partialorder %v2481_v43, 8.507059e+37  ;;  %v2528_v31 = vadd.f32 %v5721_v37, %v2385_v3 }
 0x408   :  { %v2465_v33 = vsel %vm2464_vm3, %v4158_v11, %v2461_v0  ;;  %v2473_v5 = vmul.f32 %v4164_v19, %v2456_v44  ;;  %vm2478_vm6 = vweird.f32 %v4164_v19  ;;  %v2523_v44 = vand.u32 2147483648, %v5714_v14 }
 0x409   :  { %v2470_v6 = vsel %vm2467_vm4, %v2469_v48, %v2465_v33  ;;  %v2505_v61 = vsel %vm5730_vm8, %v5710_v52, %v2501_v39  ;;  %v2440_v48 = vld [vmem:[#allocation2 + $0x74] sm:$0xf]  ;;  %vm2479_vm10 = vmor %vm2477_vm9, %vm2478_vm6  ;;  %v2484_v33 = vor.u32 1.1754944e-38, %v2483_v58  ;;  %v2521_v52 = vand.u32 2147483647, %v5714_v14 }
 0x40a   :  { %v4166_v51 = vpop.eup %4165  ;;  %v2529_v23 = vmul.f32 %v2527_v49, %v2470_v6  ;;  %v2474_v22 = vsub.f32 1.0, %v2473_v5  ;;  %v2509_v49 = vor.u32 1.1754944e-38, %v2508_v27 }
 0x40b   :  { %v2513_v11 = vmul.f32 %v4166_v51, %v5714_v14  ;;  %vm2518_vm13 = vweird.f32 %v4166_v51  ;;  %vm2522_vm0 = vcmp.eq.f32.partialorder %v2521_v52, 8.507059e+37 }
 0x40c   :  { %v2531_v7 = vadd.f32 %v2529_v23, %v2443_v32  ;;  %v2475_v57 = vmul.f32 %v4164_v19, %v2474_v22  ;;  %v2510_v23 = vsel %vm2507_vm12, %v2509_v49, %v2505_v61  ;;  %v2446_v22 = vunpack.c.l.bf16 %v2440_v48  ;;  %vm2519_vm15 = vmor %vm2517_vm14, %vm2518_vm13 }
 0x40d   :  { %v2514_v13 = vsub.f32 1.0, %v2513_v11  ;;  %v2539_v45 = vmul.f32 %v2510_v23, %v5615_v2 }
 0x40e   :  { %4167 = vtanh.f32 %v2531_v7  ;;  %v2476_v0 = vadd.f32 %v4164_v19, %v2475_v57  ;;  %v2524_v7 = vor.u32 1.1754944e-38, %v2523_v44 }
 0x40f   :  { %v2515_v12 = vmul.f32 %v4166_v51, %v2514_v13 }
 0x410   :  { %v2480_v5 = vsel %vm2479_vm10, %v4164_v19, %v2476_v0  ;;  %v2535_v19 = vsub.f32 1.0, %v2510_v23 }
 0x411   :  { %v2516_v6 = vadd.f32 %v4166_v51, %v2515_v12  ;;  %v2485_v32 = vsel %vm2482_vm11, %v2484_v33, %v2480_v5 }
 0x412   :  { %v2530_v11 = vmul.f32 %v2528_v31, %v2485_v32 }
 0x413   :  { %v2520_v58 = vsel %vm2519_vm15, %v4166_v51, %v2516_v6 }
 0x414   :  { %v4168_v39 = vpop.eup %4167  ;;  %v2532_v27 = vadd.f32 %v2530_v11, %v2446_v22  ;;  %v2525_v43 = vsel %vm2522_vm0, %v2524_v7, %v2520_v58 }
 0x415   :  { %v2537_v57 = vmul.f32 %v4168_v39, %v2535_v19  ;;  %v2536_v3 = vsub.f32 1.0, %v2525_v43  ;;  %v2540_v61 = vmul.f32 %v2525_v43, %v5618_v46 }
 0x416   :  { %4169 = vtanh.f32 %v2532_v27 }
 0x417   :  { %v5742_v13 = vadd.f32 %v2539_v45, %v2537_v57 }
 0x419   :  { %v2665_v12 = vpack.c.bf16 %v5742_v13, %v5742_v13 }
 0x41b   :  { %v2677_v2 = vunpack.c.l.b16 %v2665_v12 }
 0x41c   :  { %v4170_v63 = vpop.eup %4169 }
 0x41d   :  { %v2538_v0 = vmul.f32 %v4170_v63, %v2536_v3  ;;  %v2545_v63 = vld [vmem:[#allocation3 + $0x38] sm:$0xf] }
 0x41f   :  { %v5745_v14 = vadd.f32 %v2540_v61, %v2538_v0  ;;  %v5794_v61 = vld [vmem:[%s5983_s6 + $0x1] ss:$0 sm:$0xff] }
 0x421   :  { %v3945_v51 = vpack.c.bf16 %v5745_v14, %v5742_v13  ;;  %v2666_v48 = vpack.c.bf16 %v5745_v14, %v5745_v14 }
 0x423   :  { %3979 = vst [vmem:[%s5985_s7 + $0x20] sm:$0xff] %v3945_v51   ;;  %v2678_v33 = vunpack.c.l.b16 %v2666_v48 }
 0x425   :  { %v2679_v49 = vpack.c.b16 %v2678_v33, %v2677_v2 }
 0x427   :  { %2689 = vmatmul.bf16.vlgmr.msra.gmra.mxu2 %v2679_v49  ;;  %2703 = vmatmul.bf16.vlgmr.msra.gmra.mxu3 %v2679_v49 }
 0x428   :  { %2717 = vmatmul.bf16.vlgmr.msra.gmra.mxu0 %v2679_v49  ;;  %3044 = vmatpush.bf16.msra.mxu2 %v4561_v10  ;;  %v6167_v10 = vld [vmem:[#allocation27_spill] sm:$0xff] }
 0x429   :  { %3064 = vmatpush.bf16.msra.mxu3 %v4716_v18  ;;  %3078 = vmatpush.bf16.msra.mxu0 %v4757_v62 }
 0x42c   :  { %3045 = vmatpush.bf16.msra.mxu2 %v4596_v20  ;;  %v2544_v20 = vld [vmem:[#allocation3 + $0x30] sm:$0xff] }
 0x42d   :  { %3065 = vmatpush.bf16.msra.mxu3 %v4729_v29  ;;  %3079 = vmatpush.bf16.msra.mxu0 %v4779_v16  ;;  %v2546_v29 = vld [vmem:[#allocation3 + $0x3c] sm:$0xff] }
 0x42e   :  { %v2552_v16 = vunpack.c.h.bf16 %v2546_v29 }
 0x430   :  { %3046 = vmatpush.bf16.msra.mxu2 %v4607_v26  ;;  %v2549_v26 = vunpack.c.h.bf16 %v2544_v20 }
 0x431   :  { %3066 = vmatpush.bf16.msra.mxu3 %v4747_v55  ;;  %3080 = vmatpush.bf16.msra.mxu0 %v4800_v50  ;;  %v2548_v55 = vunpack.c.l.bf16 %v2544_v20  ;;  %v2550_v20 = vunpack.c.l.bf16 %v2545_v63 }
 0x434   :  { %3047 = vmatpush.bf16.msra.mxu2 %v4617_v30 }
 0x435   :  { %3067 = vmatpush.bf16.msra.mxu3 %v4768_v8  ;;  %3081 = vmatpush.bf16.msra.mxu0 %v4822_v21 }
 0x438   :  { %3048 = vmatpush.bf16.msra.mxu2 %v4631_v36 }
 0x439   :  { %3068 = vmatpush.bf16.msra.mxu3 %v4792_v40  ;;  %3082 = vmatpush.bf16.msra.mxu0 %v4847_v60 }
 0x43c   :  { %3049 = vmatpush.bf16.msra.mxu2 %v6079_v17  ;;  %v2551_v17 = vunpack.c.l.bf16 %v2546_v29 }
 0x43d   :  { %3069 = vmatpush.bf16.msra.mxu3 %v6080_v47  ;;  %3083 = vmatpush.bf16.msra.mxu0 %v4872_v34 }
 0x440   :  { %3050 = vmatpush.bf16.msra.mxu2 %v6081_v28 }
 0x441   :  { %3070 = vmatpush.bf16.msra.mxu3 %v6082_v42  ;;  %3084 = vmatpush.bf16.msra.mxu0 %v4896_v24 }
 0x444   :  { %3051 = vmatpush.bf16.msra.mxu2 %v6083_v9 }
 0x445   :  { %3071 = vmatpush.bf16.msra.mxu3 %v6146_v53  ;;  %3085 = vmatpush.bf16.msra.mxu0 %v6167_v10 }
 0x44c   :  { %v2417_v30 = vpop.f32.mrf.mxu0 }
 0x44d   :  { %v2594_v36 = vadd.f32 %v2549_v26, %v2417_v30  ;;  %v2431_v27 = vpop.f32.mrf.mxu1 }
 0x44e   :  { %v2634_v12 = vadd.f32 %v5794_v61, %v2431_v27 }
 0x44f   :  { %v3802_v18 = vmul.f32 -1.442695, %v2594_v36 }
 0x451   :  { %4171 = vpow2.f32 %v3802_v18 }
 0x452   :  { %v2403_v62 = vpop.f32.mrf.mxu3 }
 0x453   :  { %v2554_v8 = vadd.f32 %v2548_v55, %v2403_v62 }
 0x454   :  { %v2419_v40 = vpop.f32.mrf.mxu0 }
 0x455   :  { %v3800_v50 = vmul.f32 -1.442695, %v2554_v8  ;;  %v2595_v21 = vadd.f32 %v2552_v16, %v2419_v40 }
 0x457   :  { %v4172_v60 = vpop.eup %4171  ;;  %4173 = vpow2.f32 %v3800_v50  ;;  %v3803_v34 = vmul.f32 -1.442695, %v2595_v21  ;;  %v2433_v50 = vpop.f32.mrf.mxu1 }
 0x458   :  { %v5780_v24 = vadd.f32 1.0, %v4172_v60 }
 0x459   :  { %4175 = vpow2.f32 %v3803_v34  ;;  %v2547_v34 = vld [vmem:[#allocation3 + $0x44] sm:$0xf] }
 0x45a   :  { %v2405_v47 = vpop.f32.mrf.mxu3  ;;  %4177 = vrcp.f32 %v5780_v24  ;;  %v2615_v10 = vand.u32 2147483648, %v5780_v24  ;;  %vm2609_vm6 = vweird.f32 %v5780_v24  ;;  %v2613_v36 = vand.u32 2147483647, %v5780_v24 }
 0x45b   :  { %v2555_v28 = vadd.f32 %v2551_v17, %v2405_v47  ;;  %v2635_v47 = vadd.f32 %v5794_v61, %v2433_v50 }
 0x45c   :  { %v2616_v21 = vor.u32 1.1754944e-38, %v2615_v10  ;;  %vm2614_vm10 = vcmp.eq.f32.partialorder %v2613_v36, 8.507059e+37 }
 0x45d   :  { %v4174_v42 = vpop.eup %4173  ;;  %v3801_v9 = vmul.f32 -1.442695, %v2555_v28 }
 0x45e   :  { %v2562_v46 = vadd.f32 1.0, %v4174_v42 }
 0x45f   :  { %v4176_v53 = vpop.eup %4175  ;;  %4179 = vpow2.f32 %v3801_v9 }
 0x460   :  { %4181 = vrcp.f32 %v2562_v46  ;;  %v4178_v5 = vpop.eup %4177  ;;  %v5783_v31 = vadd.f32 1.0, %v4176_v53  ;;  %v2575_v19 = vand.u32 2147483648, %v2562_v46  ;;  %v2573_v7 = vand.u32 2147483647, %v2562_v46 }
 0x461   :  { %v2605_v6 = vmul.f32 %v4178_v5, %v5780_v24  ;;  %vm2569_vm2 = vweird.f32 %v2562_v46  ;;  %vm2610_vm5 = vweird.f32 %v4178_v5  ;;  %v2553_v53 = vunpack.c.l.bf16 %v2547_v34 }
 0x462   :  { %4183 = vrcp.f32 %v5783_v31  ;;  %v2576_v0 = vor.u32 1.1754944e-38, %v2575_v19  ;;  %vm2574_vm4 = vcmp.eq.f32.partialorder %v2573_v7, 8.507059e+37  ;;  %vm5800_vm7 = vmor %vm2609_vm6, %vm2610_vm5  ;;  %vm2624_vm14 = vweird.f32 %v5783_v31 }
 0x463   :  { %v2606_v11 = vsub.f32 1.0, %v2605_v6 }
 0x465   :  { %v4180_v32 = vpop.eup %4179  ;;  %v2607_v57 = vmul.f32 %v4178_v5, %v2606_v11 }
 0x466   :  { %v4182_v23 = vpop.eup %4181  ;;  %v2563_v44 = vadd.f32 1.0, %v4180_v32  ;;  %v2628_v32 = vand.u32 2147483647, %v5783_v31 }
 0x467   :  { %v2565_v22 = vmul.f32 %v4182_v23, %v2562_v46  ;;  %vm2570_vm1 = vweird.f32 %v4182_v23  ;;  %v2608_v2 = vadd.f32 %v4178_v5, %v2607_v57  ;;  %v2630_v46 = vand.u32 2147483648, %v5783_v31 }
 0x468   :  { %4185 = vrcp.f32 %v2563_v44  ;;  %v5787_v52 = vpop.eup %4183  ;;  %vm2571_vm3 = vmor %vm2569_vm2, %vm2570_vm1  ;;  %v2590_v18 = vand.u32 2147483648, %v2563_v44  ;;  %v2588_v8 = vand.u32 2147483647, %v2563_v44  ;;  %vm2584_vm9 = vweird.f32 %v2563_v44 }
 0x469   :  { %v2566_v39 = vsub.f32 1.0, %v2565_v22  ;;  %v2620_v43 = vmul.f32 %v5787_v52, %v5783_v31  ;;  %v2612_v16 = vsel %vm5800_vm7, %v4178_v5, %v2608_v2  ;;  %vm2625_vm13 = vweird.f32 %v5787_v52 }
 0x46a   :  { %v2591_v24 = vor.u32 1.1754944e-38, %v2590_v18  ;;  %v2617_v17 = vsel %vm2614_vm10, %v2616_v21, %v2612_v16  ;;  %vm2589_vm12 = vcmp.eq.f32.partialorder %v2588_v8, 8.507059e+37  ;;  %vm2626_vm15 = vmor %vm2624_vm14, %vm2625_vm13  ;;  %vm2629_vm0 = vcmp.eq.f32.partialorder %v2628_v32, 8.507059e+37 }
 0x46b   :  { %v2567_v58 = vmul.f32 %v4182_v23, %v2566_v39  ;;  %v2621_v49 = vsub.f32 1.0, %v2620_v43  ;;  %v2642_v6 = vsub.f32 1.0, %v2617_v17  ;;  %v2631_v39 = vor.u32 1.1754944e-38, %v2630_v46  ;;  %v2656_v43 = vpop.permute.xlu2 %2655 }
 0x46c   :  { %v2646_v27 = vmul.f32 %v2617_v17, %v5669_v41 }
 0x46d   :  { %v2568_v45 = vadd.f32 %v4182_v23, %v2567_v58  ;;  %v2622_v40 = vmul.f32 %v5787_v52, %v2621_v49 }
 0x46e   :  { %v4186_v3 = vpop.eup %4185 }
 0x46f   :  { %v2572_v51 = vsel %vm2571_vm3, %v4182_v23, %v2568_v45  ;;  %v2580_v48 = vmul.f32 %v4186_v3, %v2563_v44  ;;  %vm2585_vm8 = vweird.f32 %v4186_v3  ;;  %v2623_v42 = vadd.f32 %v5787_v52, %v2622_v40 }
 0x470   :  { %v2577_v33 = vsel %vm2574_vm4, %v2576_v0, %v2572_v51  ;;  %vm2586_vm11 = vmor %vm2584_vm9, %vm2585_vm8  ;;  %v2661_v0 = vpop.permute.xlu0 %2660 }
 0x471   :  { %v2636_v26 = vmul.f32 %v2634_v12, %v2577_v33  ;;  %v2581_v30 = vsub.f32 1.0, %v2580_v48  ;;  %v2627_v22 = vsel %vm2626_vm15, %v5787_v52, %v2623_v42  ;;  %v2772_v33 = vld [vmem:[#allocation2 + $0x78] sm:$0xff] }
 0x472   :  { %v2632_v19 = vsel %vm2629_vm0, %v2631_v39, %v2627_v22  ;;  %v2776_v49 = vunpack.c.l.bf16 %v2772_v33  ;;  %v2777_v10 = vunpack.c.h.bf16 %v2772_v33 }
 0x473   :  { %v2638_v55 = vadd.f32 %v2636_v26, %v2550_v20  ;;  %v2582_v62 = vmul.f32 %v4186_v3, %v2581_v30  ;;  %v2643_v7 = vsub.f32 1.0, %v2632_v19  ;;  %v2647_v45 = vmul.f32 %v2632_v19, %v5672_v35 }
 0x475   :  { %4187 = vtanh.f32 %v2638_v55  ;;  %v2583_v60 = vadd.f32 %v4186_v3, %v2582_v62 }
 0x477   :  { %v2587_v28 = vsel %vm2586_vm11, %v4186_v3, %v2583_v60 }
 0x478   :  { %v2592_v9 = vsel %vm2589_vm12, %v2591_v24, %v2587_v28 }
 0x479   :  { %v2637_v5 = vmul.f32 %v2635_v47, %v2592_v9 }
 0x47b   :  { %v4188_v23 = vpop.eup %4187  ;;  %v2639_v44 = vadd.f32 %v2637_v5, %v2553_v53 }
 0x47c   :  { %v2644_v11 = vmul.f32 %v4188_v23, %v2642_v6 }
 0x47d   :  { %4189 = vtanh.f32 %v2639_v44  ;;  %v2773_v44 = vld [vmem:[#allocation2 + $0x80] sm:$0xf] }
 0x47e   :  { %v2648_v58 = vadd.f32 %v2646_v27, %v2644_v11 }
 0x480   :  { %v5816_v31 = vmul.f32 %v2656_v43, %v2648_v58 }
 0x482   :  { %v2670_v52 = vpack.c.bf16 %v5816_v31, %v5816_v31 }
 0x483   :  { %v4190_v57 = vpop.eup %4189 }
 0x484   :  { %v2645_v3 = vmul.f32 %v4190_v57, %v2643_v7  ;;  %v2725_v35 = vunpack.c.l.b16 %v2670_v52  ;;  %v2778_v57 = vunpack.c.l.bf16 %v2773_v44 }
 0x486   :  { %v2649_v63 = vadd.f32 %v2647_v45, %v2645_v3 }
 0x488   :  { %v5818_v12 = vmul.f32 %v2661_v0, %v2649_v63 }
 0x48a   :  { %v2671_v41 = vpack.c.bf16 %v5818_v12, %v5818_v12  ;;  %v3950_v51 = vpack.c.bf16 %v5818_v12, %v5816_v31 }
 0x48c   :  { %3980 = vst [vmem:[%s5986_s8 + $0x10] sm:$0xff] %v3950_v51   ;;  %v2726_v48 = vunpack.c.l.b16 %v2671_v41 }
 0x48e   :  { %v2727_v2 = vpack.c.b16 %v2726_v48, %v2725_v35 }
 0x490   :  { %2737 = vmatmul.bf16.vlgmr.msra.gmra.mxu1 %v2727_v2  ;;  %2751 = vmatmul.bf16.vlgmr.msrb.gmra.mxu2 %v2727_v2 }
 0x491   :  { %2765 = vmatmul.bf16.vlgmr.msrb.gmra.mxu3 %v2727_v2  ;;  %3092 = vmatpush.bf16.msra.mxu1 %v4879_v59 }
 0x495   :  { %3093 = vmatpush.bf16.msra.mxu1 %v4901_v38  ;;  %v2774_v38 = vld [vmem:[#allocation2 + $0x84] sm:$0xff] }
 0x499   :  { %3094 = vmatpush.bf16.msra.mxu1 %v6107_v1  ;;  %v2779_v1 = vunpack.c.l.bf16 %v2774_v38 }
 0x49d   :  { %3095 = vmatpush.bf16.msra.mxu1 %v6150_v25  ;;  %v2780_v25 = vunpack.c.h.bf16 %v2774_v38 }
 0x4a1   :  { %3096 = vmatpush.bf16.msra.mxu1 %v6153_v56 }
 0x4a5   :  { %3097 = vmatpush.bf16.msra.mxu1 %v6156_v15  ;;  %v2718_v9 = vpop.f32.mrf.mxu0 }
 0x4a6   :  { %v2862_v39 = vadd.f32 %v5721_v37, %v2718_v9 }
 0x4a9   :  { %3098 = vmatpush.bf16.msra.mxu1 %v6159_v4 }
 0x4aa   :  { %v2690_v20 = vpop.f32.mrf.mxu2  ;;  %v2704_v26 = vpop.f32.mrf.mxu3 }
 0x4ab   :  { %v2782_v30 = vadd.f32 %v2776_v49, %v2690_v20  ;;  %v2822_v36 = vadd.f32 %v2777_v10, %v2704_v26  ;;  %v2775_v26 = vld [vmem:[#allocation2 + $0x8c] sm:$0xf] }
 0x4ad   :  { %v3810_v59 = vmul.f32 -1.442695, %v2782_v30  ;;  %v3812_v18 = vmul.f32 -1.442695, %v2822_v36  ;;  %3099 = vmatpush.bf16.msra.mxu1 %v6162_v54  ;;  %v2720_v2 = vpop.f32.mrf.mxu0 }
 0x4af   :  { %4191 = vpow2.f32 %v3810_v59 }
 0x4b0   :  { %4193 = vpow2.f32 %v3812_v18  ;;  %v2863_v18 = vadd.f32 %v5721_v37, %v2720_v2 }
 0x4b2   :  { %v2692_v56 = vpop.f32.mrf.mxu2  ;;  %v2706_v29 = vpop.f32.mrf.mxu3 }
 0x4b3   :  { %v2783_v15 = vadd.f32 %v2779_v1, %v2692_v56  ;;  %v2823_v55 = vadd.f32 %v2780_v25, %v2706_v29  ;;  %v2781_v29 = vunpack.c.l.bf16 %v2775_v26 }
 0x4b5   :  { %v4192_v62 = vpop.eup %4191  ;;  %v3811_v8 = vmul.f32 -1.442695, %v2783_v15  ;;  %v3813_v4 = vmul.f32 -1.442695, %v2823_v55 }
 0x4b6   :  { %v4194_v16 = vpop.eup %4193  ;;  %v2790_v40 = vadd.f32 1.0, %v4192_v62 }
 0x4b7   :  { %v5837_v50 = vadd.f32 1.0, %v4194_v16  ;;  %4195 = vpow2.f32 %v3811_v8 }
 0x4b8   :  { %4197 = vrcp.f32 %v2790_v40  ;;  %v2803_v46 = vand.u32 2147483648, %v2790_v40  ;;  %v2801_v6 = vand.u32 2147483647, %v2790_v40  ;;  %vm2797_vm2 = vweird.f32 %v2790_v40 }
 0x4b9   :  { %4199 = vrcp.f32 %v5837_v50  ;;  %v2843_v45 = vand.u32 2147483648, %v5837_v50  ;;  %vm2837_vm7 = vweird.f32 %v5837_v50  ;;  %v2841_v48 = vand.u32 2147483647, %v5837_v50 }
 0x4ba   :  { %4201 = vpow2.f32 %v3813_v4  ;;  %v2804_v22 = vor.u32 1.1754944e-38, %v2803_v46  ;;  %vm2802_vm4 = vcmp.eq.f32.partialorder %v2801_v6, 8.507059e+37 }
 0x4bb   :  { %v2844_v59 = vor.u32 1.1754944e-38, %v2843_v45  ;;  %vm2842_vm12 = vcmp.eq.f32.partialorder %v2841_v48, 8.507059e+37 }
 0x4bd   :  { %v4196_v54 = vpop.eup %4195 }
 0x4be   :  { %v4198_v21 = vpop.eup %4197  ;;  %v2791_v60 = vadd.f32 1.0, %v4196_v54 }
 0x4bf   :  { %v4200_v34 = vpop.eup %4199  ;;  %v2793_v24 = vmul.f32 %v4198_v21, %v2790_v40  ;;  %vm2798_vm1 = vweird.f32 %v4198_v21 }
 0x4c0   :  { %v4202_v17 = vpop.eup %4201  ;;  %v2833_v47 = vmul.f32 %v4200_v34, %v5837_v50  ;;  %4203 = vrcp.f32 %v2791_v60  ;;  %vm2799_vm3 = vmor %vm2797_vm2, %vm2798_vm1  ;;  %vm2838_vm5 = vweird.f32 %v4200_v34  ;;  %v2818_v0 = vand.u32 2147483648, %v2791_v60 }
 0x4c1   :  { %v2794_v28 = vsub.f32 1.0, %v2793_v24  ;;  %v5841_v42 = vadd.f32 1.0, %v4202_v17  ;;  %v2816_v35 = vand.u32 2147483647, %v2791_v60  ;;  %vm5849_vm8 = vmor %vm2837_vm7, %vm2838_vm5  ;;  %vm2812_vm9 = vweird.f32 %v2791_v60 }
 0x4c2   :  { %v2834_v53 = vsub.f32 1.0, %v2833_v47  ;;  %v2819_v30 = vor.u32 1.1754944e-38, %v2818_v0 }
 0x4c3   :  { %v2795_v5 = vmul.f32 %v4198_v21, %v2794_v28  ;;  %4205 = vrcp.f32 %v5841_v42  ;;  %vm2817_vm11 = vcmp.eq.f32.partialorder %v2816_v35, 8.507059e+37  ;;  %v2858_v55 = vand.u32 2147483648, %v5841_v42 }
 0x4c4   :  { %v2835_v11 = vmul.f32 %v4200_v34, %v2834_v53  ;;  %vm2852_vm14 = vweird.f32 %v5841_v42  ;;  %v2856_v62 = vand.u32 2147483647, %v5841_v42 }
 0x4c5   :  { %v2796_v32 = vadd.f32 %v4198_v21, %v2795_v5  ;;  %v2859_v4 = vor.u32 1.1754944e-38, %v2858_v55 }
 0x4c6   :  { %v4204_v23 = vpop.eup %4203  ;;  %v2836_v63 = vadd.f32 %v4200_v34, %v2835_v11  ;;  %vm2857_vm0 = vcmp.eq.f32.partialorder %v2856_v62, 8.507059e+37 }
 0x4c7   :  { %v2800_v27 = vsel %vm2799_vm3, %v4198_v21, %v2796_v32  ;;  %v2808_v19 = vmul.f32 %v4204_v23, %v2791_v60  ;;  %vm2813_vm6 = vweird.f32 %v4204_v23 }
 0x4c8   :  { %v2805_v58 = vsel %vm2802_vm4, %v2804_v22, %v2800_v27  ;;  %v2840_v20 = vsel %vm5849_vm8, %v4200_v34, %v2836_v63  ;;  %vm2814_vm10 = vmor %vm2812_vm9, %vm2813_vm6  ;;  %v2881_v22 = vld [vmem:[#allocation3 + $0x24] sm:$0xff] }
 0x4c9   :  { %v4206_v7 = vpop.eup %4205  ;;  %v2864_v43 = vmul.f32 %v2862_v39, %v2805_v58  ;;  %v2809_v3 = vsub.f32 1.0, %v2808_v19  ;;  %v2845_v56 = vsel %vm2842_vm12, %v2844_v59, %v2840_v20  ;;  %v2886_v19 = vunpack.c.l.bf16 %v2881_v22 }
 0x4ca   :  { %v2848_v52 = vmul.f32 %v4206_v7, %v5841_v42  ;;  %vm2853_vm13 = vweird.f32 %v4206_v7  ;;  %v2870_v40 = vsub.f32 1.0, %v2845_v56  ;;  %v2874_v21 = vmul.f32 %v2845_v56, %v5742_v13  ;;  %v2880_v56 = vld [vmem:[#allocation3 + $0x20] sm:$0xf] }
 0x4cb   :  { %v2866_v41 = vadd.f32 %v2864_v43, %v2778_v57  ;;  %v2810_v51 = vmul.f32 %v4204_v23, %v2809_v3  ;;  %vm2854_vm15 = vmor %vm2852_vm14, %vm2853_vm13  ;;  %v2887_v63 = vunpack.c.h.bf16 %v2881_v22 }
 0x4cc   :  { %v2849_v33 = vsub.f32 1.0, %v2848_v52 }
 0x4cd   :  { %4207 = vtanh.f32 %v2866_v41  ;;  %v2811_v10 = vadd.f32 %v4204_v23, %v2810_v51 }
 0x4ce   :  { %v2850_v36 = vmul.f32 %v4206_v7, %v2849_v33 }
 0x4cf   :  { %v2815_v38 = vsel %vm2814_vm10, %v4204_v23, %v2811_v10 }
 0x4d0   :  { %v2820_v1 = vsel %vm2817_vm11, %v2819_v30, %v2815_v38  ;;  %v2851_v25 = vadd.f32 %v4206_v7, %v2850_v36 }
 0x4d1   :  { %v2865_v15 = vmul.f32 %v2863_v18, %v2820_v1 }
 0x4d2   :  { %v2855_v37 = vsel %vm2854_vm15, %v4206_v7, %v2851_v25 }
 0x4d3   :  { %v4208_v8 = vpop.eup %4207  ;;  %v2867_v16 = vadd.f32 %v2865_v15, %v2781_v29  ;;  %v2860_v54 = vsel %vm2857_vm0, %v2859_v4, %v2855_v37  ;;  %v2885_v4 = vunpack.c.l.bf16 %v2880_v56 }
 0x4d4   :  { %v2872_v50 = vmul.f32 %v4208_v8, %v2870_v40  ;;  %v2871_v60 = vsub.f32 1.0, %v2860_v54  ;;  %v2875_v17 = vmul.f32 %v2860_v54, %v5745_v14  ;;  %v2879_v14 = vld [vmem:[#allocation3 + $0x18] sm:$0xff] }
 0x4d5   :  { %4209 = vtanh.f32 %v2867_v16  ;;  %v2883_v6 = vunpack.c.l.bf16 %v2879_v14  ;;  %v2884_v11 = vunpack.c.h.bf16 %v2879_v14 }
 0x4d6   :  { %v5860_v34 = vadd.f32 %v2874_v21, %v2872_v50 }
 0x4d8   :  { %v3000_v42 = vpack.c.bf16 %v5860_v34, %v5860_v34 }
 0x4da   :  { %v3012_v13 = vunpack.c.l.b16 %v3000_v42 }
 0x4db   :  { %v4210_v24 = vpop.eup %4209 }
 0x4dc   :  { %v2873_v47 = vmul.f32 %v4210_v24, %v2871_v60 }
 0x4de   :  { %v5863_v28 = vadd.f32 %v2875_v17, %v2873_v47 }
 0x4e0   :  { %v3001_v9 = vpack.c.bf16 %v5863_v28, %v5863_v28  ;;  %v3955_v46 = vpack.c.bf16 %v5863_v28, %v5860_v34 }
 0x4e2   :  { %3981 = vst [vmem:[%s5985_s7 + $0x28] sm:$0xff] %v3955_v46   ;;  %v3013_v53 = vunpack.c.l.b16 %v3001_v9 }
 0x4e4   :  { %v3014_v5 = vpack.c.b16 %v3013_v53, %v3012_v13 }
 0x4e6   :  { %3024 = vmatmul.bf16.vlgmr.msrb.gmra.mxu0 %v3014_v5  ;;  %3038 = vmatmul.bf16.vlgmr.msrb.gmra.mxu1 %v3014_v5 }
 0x4e7   :  { %3052 = vmatmul.bf16.vlgmr.msra.gmra.mxu2 %v3014_v5 }
 0x50d   :  { %v2738_v32 = vpop.f32.mrf.mxu1 }
 0x50e   :  { %v2889_v23 = vadd.f32 %v2883_v6, %v2738_v32 }
 0x510   :  { %v3814_v44 = vmul.f32 -1.442695, %v2889_v23 }
 0x512   :  { %4211 = vpow2.f32 %v3814_v44  ;;  %v2882_v44 = vld [vmem:[#allocation3 + $0x2c] sm:$0xf] }
 0x513   :  { %v2752_v39 = vpop.f32.mrf.mxu2 }
 0x514   :  { %v2929_v27 = vadd.f32 %v2884_v11, %v2752_v39  ;;  %v2766_v30 = vpop.f32.mrf.mxu3 }
 0x515   :  { %v2740_v58 = vpop.f32.mrf.mxu1  ;;  %v2969_v8 = vadd.f32 %v5794_v61, %v2766_v30 }
 0x516   :  { %v3816_v7 = vmul.f32 -1.442695, %v2929_v27  ;;  %v2890_v57 = vadd.f32 %v2886_v19, %v2740_v58 }
 0x518   :  { %v4212_v43 = vpop.eup %4211  ;;  %4213 = vpow2.f32 %v3816_v7  ;;  %v3815_v45 = vmul.f32 -1.442695, %v2890_v57  ;;  %v2888_v57 = vunpack.c.l.bf16 %v2882_v44 }
 0x519   :  { %v2897_v3 = vadd.f32 1.0, %v4212_v43 }
 0x51a   :  { %4215 = vpow2.f32 %v3815_v45 }
 0x51b   :  { %4217 = vrcp.f32 %v2897_v3  ;;  %v2754_v0 = vpop.f32.mrf.mxu2  ;;  %v2910_v20 = vand.u32 2147483648, %v2897_v3  ;;  %v2908_v59 = vand.u32 2147483647, %v2897_v3  ;;  %vm2904_vm2 = vweird.f32 %v2897_v3 }
 0x51c   :  { %v2930_v52 = vadd.f32 %v2887_v63, %v2754_v0  ;;  %v2768_v14 = vpop.f32.mrf.mxu3 }
 0x51d   :  { %v2911_v29 = vor.u32 1.1754944e-38, %v2910_v20  ;;  %vm2909_vm4 = vcmp.eq.f32.partialorder %v2908_v59, 8.507059e+37  ;;  %v2970_v27 = vadd.f32 %v5794_v61, %v2768_v14  ;;  %v2991_v20 = vpop.permute.xlu1 %2990 }
 0x51e   :  { %v4214_v41 = vpop.eup %4213  ;;  %v3817_v51 = vmul.f32 -1.442695, %v2930_v52 }
 0x51f   :  { %v2937_v35 = vadd.f32 1.0, %v4214_v41 }
 0x520   :  { %v4216_v48 = vpop.eup %4215  ;;  %4219 = vpow2.f32 %v3817_v51 }
 0x521   :  { %v4218_v2 = vpop.eup %4217  ;;  %4221 = vrcp.f32 %v2937_v35  ;;  %v2898_v49 = vadd.f32 1.0, %v4216_v48  ;;  %vm2944_vm6 = vweird.f32 %v2937_v35  ;;  %v2950_v54 = vand.u32 2147483648, %v2937_v35 }
 0x522   :  { %v2900_v33 = vmul.f32 %v4218_v2, %v2897_v3  ;;  %vm2905_vm1 = vweird.f32 %v4218_v2  ;;  %v2948_v24 = vand.u32 2147483647, %v2937_v35 }
 0x523   :  { %4223 = vrcp.f32 %v2898_v49  ;;  %vm2906_vm3 = vmor %vm2904_vm2, %vm2905_vm1  ;;  %v2925_v47 = vand.u32 2147483648, %v2898_v49  ;;  %v2923_v13 = vand.u32 2147483647, %v2898_v49  ;;  %v2951_v6 = vor.u32 1.1754944e-38, %v2950_v54  ;;  %v3109_v54 = vld [vmem:[#allocation2 + $0x9c] sm:$0xff] }
 0x524   :  { %v2901_v10 = vsub.f32 1.0, %v2900_v33  ;;  %vm2919_vm9 = vweird.f32 %v2898_v49  ;;  %vm2949_vm10 = vcmp.eq.f32.partialorder %v2948_v24, 8.507059e+37 }
 0x525   :  { %v2926_v22 = vor.u32 1.1754944e-38, %v2925_v47  ;;  %vm2924_vm12 = vcmp.eq.f32.partialorder %v2923_v13, 8.507059e+37 }
 0x526   :  { %v4220_v26 = vpop.eup %4219  ;;  %v2902_v36 = vmul.f32 %v4218_v2, %v2901_v10 }
 0x527   :  { %v4222_v18 = vpop.eup %4221  ;;  %v5874_v38 = vadd.f32 1.0, %v4220_v26 }
 0x528   :  { %v2940_v1 = vmul.f32 %v4222_v18, %v2937_v35  ;;  %v2903_v25 = vadd.f32 %v4218_v2, %v2902_v36  ;;  %vm2945_vm5 = vweird.f32 %v4222_v18 }
 0x529   :  { %4225 = vrcp.f32 %v5874_v38  ;;  %v4224_v15 = vpop.eup %4223  ;;  %vm5878_vm7 = vmor %vm2944_vm6, %vm2945_vm5  ;;  %v2965_v7 = vand.u32 2147483648, %v5874_v38  ;;  %vm2959_vm14 = vweird.f32 %v5874_v38  ;;  %v2963_v0 = vand.u32 2147483647, %v5874_v38 }
 0x52a   :  { %v2941_v55 = vsub.f32 1.0, %v2940_v1  ;;  %v2907_v62 = vsel %vm2906_vm3, %v4218_v2, %v2903_v25  ;;  %v2915_v40 = vmul.f32 %v4224_v15, %v2898_v49  ;;  %vm2920_vm8 = vweird.f32 %v4224_v15 }
 0x52b   :  { %v2912_v16 = vsel %vm2909_vm4, %v2911_v29, %v2907_v62  ;;  %vm2921_vm11 = vmor %vm2919_vm9, %vm2920_vm8  ;;  %v2966_v35 = vor.u32 1.1754944e-38, %v2965_v7  ;;  %vm2964_vm0 = vcmp.eq.f32.partialorder %v2963_v0, 8.507059e+37 }
 0x52c   :  { %v2942_v37 = vmul.f32 %v4222_v18, %v2941_v55  ;;  %v2971_v50 = vmul.f32 %v2969_v8, %v2912_v16  ;;  %v2916_v21 = vsub.f32 1.0, %v2915_v40 }
 0x52e   :  { %v2943_v60 = vadd.f32 %v4222_v18, %v2942_v37  ;;  %v2973_v17 = vadd.f32 %v2971_v50, %v2885_v4  ;;  %v2917_v46 = vmul.f32 %v4224_v15, %v2916_v21  ;;  %v3114_v21 = vunpack.c.l.bf16 %v3109_v54 }
 0x52f   :  { %v4226_v42 = vpop.eup %4225 }
 0x530   :  { %v2947_v53 = vsel %vm5878_vm7, %v4222_v18, %v2943_v60  ;;  %4227 = vtanh.f32 %v2973_v17  ;;  %v2955_v5 = vmul.f32 %v4226_v42, %v5874_v38  ;;  %v2918_v32 = vadd.f32 %v4224_v15, %v2917_v46  ;;  %v2996_v18 = vpop.permute.xlu2 %2995 }
 0x531   :  { %v2952_v11 = vsel %vm2949_vm10, %v2951_v6, %v2947_v53  ;;  %vm2960_vm13 = vweird.f32 %v4226_v42  ;;  %v3115_v60 = vunpack.c.h.bf16 %v3109_v54 }
 0x532   :  { %v2956_v23 = vsub.f32 1.0, %v2955_v5  ;;  %v2922_v39 = vsel %vm2921_vm11, %v4224_v15, %v2918_v32  ;;  %v2977_v3 = vsub.f32 1.0, %v2952_v11  ;;  %vm2961_vm15 = vmor %vm2959_vm14, %vm2960_vm13  ;;  %v2981_v48 = vmul.f32 %v2952_v11, %v5816_v31  ;;  %v3107_v15 = vld [vmem:[#allocation2 + $0x90] sm:$0xff] }
 0x533   :  { %v2927_v58 = vsel %vm2924_vm12, %v2926_v22, %v2922_v39  ;;  %v3111_v55 = vunpack.c.l.bf16 %v3107_v15  ;;  %v3112_v62 = vunpack.c.h.bf16 %v3107_v15 }
 0x534   :  { %v2957_v19 = vmul.f32 %v4226_v42, %v2956_v23  ;;  %v2972_v43 = vmul.f32 %v2970_v27, %v2927_v58 }
 0x536   :  { %v4228_v45 = vpop.eup %4227  ;;  %v2958_v63 = vadd.f32 %v4226_v42, %v2957_v19  ;;  %v2974_v52 = vadd.f32 %v2972_v43, %v2888_v57 }
 0x537   :  { %v2979_v41 = vmul.f32 %v4228_v45, %v2977_v3 }
 0x538   :  { %v2962_v51 = vsel %vm2961_vm15, %v4226_v42, %v2958_v63  ;;  %4229 = vtanh.f32 %v2974_v52 }
 0x539   :  { %v2967_v2 = vsel %vm2964_vm0, %v2966_v35, %v2962_v51  ;;  %v2983_v33 = vadd.f32 %v2981_v48, %v2979_v41  ;;  %v4275_v41 = vld [vmem:[%s5983_s6] ss:$0 sm:$0xff]  ;;  %v3108_v48 = vld [vmem:[#allocation2 + $0x98] sm:$0xf] }
 0x53a   :  { %v2978_v49 = vsub.f32 1.0, %v2967_v2  ;;  %v2982_v36 = vmul.f32 %v2967_v2, %v5818_v12 }
 0x53b   :  { %v5890_v26 = vmul.f32 %v2991_v20, %v2983_v33 }
 0x53d   :  { %v3005_v1 = vpack.c.bf16 %v5890_v26, %v5890_v26 }
 0x53e   :  { %v4230_v10 = vpop.eup %4229 }
 0x53f   :  { %v2980_v30 = vmul.f32 %v4230_v10, %v2978_v49  ;;  %v3060_v56 = vunpack.c.l.b16 %v3005_v1 }
 0x541   :  { %v2984_v59 = vadd.f32 %v2982_v36, %v2980_v30 }
 0x543   :  { %v5893_v38 = vmul.f32 %v2996_v18, %v2984_v59  ;;  %v3113_v59 = vunpack.c.l.bf16 %v3108_v48 }
 0x545   :  { %v3960_v31 = vpack.c.bf16 %v5893_v38, %v5890_v26  ;;  %v3006_v25 = vpack.c.bf16 %v5893_v38, %v5893_v38 }
 0x547   :  { %3982 = vst [vmem:[%s5986_s8 + $0x8] sm:$0xff] %v3960_v31   ;;  %v3061_v29 = vunpack.c.l.b16 %v3006_v25 }
 0x549   :  { %v3062_v12 = vpack.c.b16 %v3061_v29, %v3060_v56 }
 0x54b   :  { %3072 = vmatmul.bf16.vlgmr.msra.gmra.mxu3 %v3062_v12  ;;  %3086 = vmatmul.bf16.vlgmr.msra.gmra.mxu0 %v3062_v12 }
 0x54c   :  { %3100 = vmatmul.bf16.vlgmr.msra.gmra.mxu1 %v3062_v12 }
 0x563   :  { %v3025_v8 = vpop.f32.mrf.mxu0  ;;  %v3039_v16 = vpop.f32.mrf.mxu1 }
 0x564   :  { %v3117_v40 = vadd.f32 %v3111_v55, %v3025_v8  ;;  %v3157_v37 = vadd.f32 %v3112_v62, %v3039_v16  ;;  %v3110_v55 = vld [vmem:[#allocation2 + $0xa4] sm:$0xf] }
 0x566   :  { %v3824_v4 = vmul.f32 -1.442695, %v3117_v40  ;;  %v3826_v50 = vmul.f32 -1.442695, %v3157_v37 }
 0x568   :  { %4231 = vpow2.f32 %v3824_v4 }
 0x569   :  { %4233 = vpow2.f32 %v3826_v50 }
 0x56a   :  { %v3053_v58 = vpop.f32.mrf.mxu2 }
 0x56b   :  { %v3027_v24 = vpop.f32.mrf.mxu0  ;;  %v3041_v17 = vpop.f32.mrf.mxu1  ;;  %v3197_v51 = vadd.f32 %v4275_v41, %v3053_v58  ;;  %v3213_v58 = vld [vmem:[#allocation3] sm:$0xff] }
 0x56c   :  { %v3118_v47 = vadd.f32 %v3114_v21, %v3027_v24  ;;  %v3158_v42 = vadd.f32 %v3115_v60, %v3041_v17  ;;  %v3116_v21 = vunpack.c.l.bf16 %v3110_v55 }
 0x56e   :  { %v4232_v9 = vpop.eup %4231  ;;  %v3825_v46 = vmul.f32 -1.442695, %v3118_v47  ;;  %v3827_v5 = vmul.f32 -1.442695, %v3158_v42 }
 0x56f   :  { %v4234_v13 = vpop.eup %4233  ;;  %v3125_v53 = vadd.f32 1.0, %v4232_v9 }
 0x570   :  { %v5904_v14 = vadd.f32 1.0, %v4234_v13  ;;  %4235 = vpow2.f32 %v3825_v46 }
 0x571   :  { %4237 = vrcp.f32 %v3125_v53  ;;  %v3138_v7 = vand.u32 2147483648, %v3125_v53  ;;  %v3136_v43 = vand.u32 2147483647, %v3125_v53  ;;  %vm3132_vm2 = vweird.f32 %v3125_v53 }
 0x572   :  { %4239 = vrcp.f32 %v5904_v14  ;;  %v3055_v25 = vpop.f32.mrf.mxu2  ;;  %vm3172_vm6 = vweird.f32 %v5904_v14  ;;  %v3178_v8 = vand.u32 2147483648, %v5904_v14  ;;  %v3176_v37 = vand.u32 2147483647, %v5904_v14 }
 0x573   :  { %4241 = vpow2.f32 %v3827_v5  ;;  %v3139_v0 = vor.u32 1.1754944e-38, %v3138_v7  ;;  %vm3137_vm4 = vcmp.eq.f32.partialorder %v3136_v43, 8.507059e+37  ;;  %v3198_v40 = vadd.f32 %v4275_v41, %v3055_v25 }
 0x574   :  { %v3179_v47 = vor.u32 1.1754944e-38, %v3178_v8  ;;  %vm3177_vm15 = vcmp.eq.f32.partialorder %v3176_v37, 8.507059e+37  ;;  %v3218_v7 = vunpack.c.h.bf16 %v3213_v58 }
 0x576   :  { %v4236_v6 = vpop.eup %4235 }
 0x577   :  { %v4238_v32 = vpop.eup %4237  ;;  %v3126_v23 = vadd.f32 1.0, %v4236_v6 }
 0x578   :  { %v5907_v44 = vpop.eup %4239  ;;  %v3128_v22 = vmul.f32 %v4238_v32, %v3125_v53  ;;  %vm3133_vm1 = vweird.f32 %v4238_v32 }
 0x579   :  { %v4242_v11 = vpop.eup %4241  ;;  %4243 = vrcp.f32 %v3126_v23  ;;  %v3168_v19 = vmul.f32 %v5907_v44, %v5904_v14  ;;  %vm3134_vm3 = vmor %vm3132_vm2, %vm3133_vm1  ;;  %v3153_v36 = vand.u32 2147483648, %v3126_v23  ;;  %v3151_v1 = vand.u32 2147483647, %v3126_v23 }
 0x57a   :  { %v3129_v39 = vsub.f32 1.0, %v3128_v22  ;;  %v5909_v27 = vadd.f32 1.0, %v4242_v11  ;;  %vm3147_vm7 = vweird.f32 %v3126_v23  ;;  %vm3173_vm8 = vweird.f32 %v5907_v44 }
 0x57b   :  { %v3169_v63 = vsub.f32 1.0, %v3168_v19  ;;  %v3154_v62 = vor.u32 1.1754944e-38, %v3153_v36  ;;  %vm3152_vm10 = vcmp.eq.f32.partialorder %v3151_v1, 8.507059e+37  ;;  %vm3174_vm12 = vmor %vm3172_vm6, %vm3173_vm8 }
 0x57c   :  { %v3130_v57 = vmul.f32 %v4238_v32, %v3129_v39  ;;  %4245 = vrcp.f32 %v5909_v27  ;;  %v3193_v54 = vand.u32 2147483648, %v5909_v27  ;;  %vm3187_vm13 = vweird.f32 %v5909_v27 }
 0x57d   :  { %v3170_v20 = vmul.f32 %v5907_v44, %v3169_v63  ;;  %v3191_v17 = vand.u32 2147483647, %v5909_v27  ;;  %v3217_v63 = vunpack.c.l.bf16 %v3213_v58 }
 0x57e   :  { %v3131_v45 = vadd.f32 %v4238_v32, %v3130_v57  ;;  %v3194_v13 = vor.u32 1.1754944e-38, %v3193_v54 }
 0x57f   :  { %v4244_v3 = vpop.eup %4243  ;;  %v3171_v12 = vadd.f32 %v5907_v44, %v3170_v20  ;;  %vm3192_vm0 = vcmp.eq.f32.partialorder %v3191_v17, 8.507059e+37 }
 0x580   :  { %v3135_v52 = vsel %vm3134_vm3, %v4238_v32, %v3131_v45  ;;  %v3143_v35 = vmul.f32 %v4244_v3, %v3126_v23  ;;  %vm3148_vm5 = vweird.f32 %v4244_v3 }
 0x581   :  { %v3140_v2 = vsel %vm3137_vm4, %v3139_v0, %v3135_v52  ;;  %vm3149_vm9 = vmor %vm3147_vm7, %vm3148_vm5  ;;  %v3175_v24 = vsel %vm3174_vm12, %v5907_v44, %v3171_v12 }
 0x582   :  { %v4246_v33 = vpop.eup %4245  ;;  %v3199_v49 = vmul.f32 %v3197_v51, %v3140_v2  ;;  %v3144_v10 = vsub.f32 1.0, %v3143_v35  ;;  %v3180_v46 = vsel %vm3177_vm15, %v3179_v47, %v3175_v24 }
 0x583   :  { %v3183_v30 = vmul.f32 %v4246_v33, %v5909_v27  ;;  %vm3188_vm11 = vweird.f32 %v4246_v33  ;;  %v3205_v14 = vsub.f32 1.0, %v3180_v46  ;;  %v3209_v44 = vmul.f32 %v3180_v46, %v5860_v34 }
 0x584   :  { %v3145_v18 = vmul.f32 %v4244_v3, %v3144_v10  ;;  %v3201_v56 = vadd.f32 %v3199_v49, %v3113_v59  ;;  %vm3189_vm14 = vmor %vm3187_vm13, %vm3188_vm11 }
 0x585   :  { %v3184_v31 = vsub.f32 1.0, %v3183_v30 }
 0x586   :  { %v3146_v29 = vadd.f32 %v4244_v3, %v3145_v18  ;;  %4247 = vtanh.f32 %v3201_v56 }
 0x587   :  { %v3185_v15 = vmul.f32 %v4246_v33, %v3184_v31 }
 0x588   :  { %v3150_v16 = vsel %vm3149_vm9, %v4244_v3, %v3146_v29  ;;  %v3215_v3 = vld [vmem:[#allocation3 + $0xc] sm:$0xff] }
 0x589   :  { %v3186_v4 = vadd.f32 %v4246_v33, %v3185_v15  ;;  %v3155_v50 = vsel %vm3152_vm10, %v3154_v62, %v3150_v16  ;;  %v3221_v52 = vunpack.c.h.bf16 %v3215_v3  ;;  %v3220_v2 = vunpack.c.l.bf16 %v3215_v3 }
 0x58a   :  { %v3200_v60 = vmul.f32 %v3198_v40, %v3155_v50 }
 0x58b   :  { %v3190_v9 = vsel %vm3189_vm14, %v4246_v33, %v3186_v4 }
 0x58c   :  { %v3202_v42 = vadd.f32 %v3200_v60, %v3116_v21  ;;  %v4248_v53 = vpop.eup %4247  ;;  %v3195_v5 = vsel %vm3192_vm0, %v3194_v13, %v3190_v9  ;;  %v3214_v21 = vld [vmem:[#allocation3 + $0x8] sm:$0xf] }
 0x58d   :  { %v3207_v6 = vmul.f32 %v4248_v53, %v3205_v14  ;;  %v3206_v32 = vsub.f32 1.0, %v3195_v5  ;;  %v3210_v11 = vmul.f32 %v3195_v5, %v5863_v28  ;;  %v3219_v13 = vunpack.c.l.bf16 %v3214_v21 }
 0x58e   :  { %4249 = vtanh.f32 %v3202_v42 }
 0x58f   :  { %v3211_v39 = vadd.f32 %v3209_v44, %v3207_v6 }
 0x594   :  { %v4250_v23 = vpop.eup %4249 }
 0x595   :  { %v3208_v22 = vmul.f32 %v4250_v23, %v3206_v32 }
 0x597   :  { %v3212_v27 = vadd.f32 %v3210_v11, %v3208_v22 }
 0x599   :  { %v3965_v19 = vpack.c.bf16 %v3212_v27, %v3211_v39 }
 0x59b   :  { %3983 = vst [vmem:[%s5985_s7 + $0x30] sm:$0xff] %v3965_v19   ;;  %v3216_v19 = vld [vmem:[#allocation3 + $0x14] sm:$0xf] }
 0x5c8   :  { %v3087_v57 = vpop.f32.mrf.mxu0 }
 0x5c9   :  { %v3263_v43 = vadd.f32 %v3218_v7, %v3087_v57  ;;  %v3101_v62 = vpop.f32.mrf.mxu1  ;;  %v4276_v57 = vld [vmem:[%s5983_s6 + $0x1] ss:$0 sm:$0xff] }
 0x5ca   :  { %v3303_v24 = vadd.f32 %v5794_v61, %v3101_v62 }
 0x5cb   :  { %v3830_v45 = vmul.f32 -1.442695, %v3263_v43 }
 0x5cd   :  { %4251 = vpow2.f32 %v3830_v45 }
 0x5ce   :  { %v3073_v0 = vpop.f32.mrf.mxu3 }
 0x5cf   :  { %v3223_v34 = vadd.f32 %v3217_v63, %v3073_v0 }
 0x5d0   :  { %v3089_v41 = vpop.f32.mrf.mxu0 }
 0x5d1   :  { %v3828_v28 = vmul.f32 -1.442695, %v3223_v34  ;;  %v3264_v51 = vadd.f32 %v3221_v52, %v3089_v41  ;;  %v3103_v22 = vpop.f32.mrf.mxu1  ;;  %v3222_v41 = vunpack.c.l.bf16 %v3216_v19 }
 0x5d2   :  { %v3304_v43 = vadd.f32 %v4276_v57, %v3103_v22 }
 0x5d3   :  { %v4252_v35 = vpop.eup %4251  ;;  %4253 = vpow2.f32 %v3828_v28  ;;  %v3831_v48 = vmul.f32 -1.442695, %v3264_v51 }
 0x5d4   :  { %v5935_v33 = vadd.f32 1.0, %v4252_v35 }
 0x5d5   :  { %4255 = vpow2.f32 %v3831_v48 }
 0x5d6   :  { %v3075_v49 = vpop.f32.mrf.mxu3  ;;  %4257 = vrcp.f32 %v5935_v33  ;;  %v3284_v11 = vand.u32 2147483648, %v5935_v33  ;;  %vm3278_vm8 = vweird.f32 %v5935_v33  ;;  %v3282_v27 = vand.u32 2147483647, %v5935_v33 }
 0x5d7   :  { %v3224_v10 = vadd.f32 %v3220_v2, %v3075_v49 }
 0x5d8   :  { %v3285_v34 = vor.u32 1.1754944e-38, %v3284_v11  ;;  %vm3283_vm13 = vcmp.eq.f32.partialorder %v3282_v27, 8.507059e+37 }
 0x5d9   :  { %v4254_v20 = vpop.eup %4253  ;;  %v3829_v30 = vmul.f32 -1.442695, %v3224_v10 }
 0x5da   :  { %v3231_v36 = vadd.f32 1.0, %v4254_v20 }
 0x5db   :  { %v4256_v59 = vpop.eup %4255  ;;  %4259 = vpow2.f32 %v3829_v30 }
 0x5dc   :  { %4261 = vrcp.f32 %v3231_v36  ;;  %v5938_v18 = vadd.f32 1.0, %v4256_v59  ;;  %v5941_v1 = vpop.eup %4257  ;;  %v3244_v8 = vand.u32 2147483648, %v3231_v36  ;;  %v3242_v40 = vand.u32 2147483647, %v3231_v36 }
 0x5dd   :  { %v3274_v12 = vmul.f32 %v5941_v1, %v5935_v33  ;;  %vm3238_vm2 = vweird.f32 %v3231_v36  ;;  %vm3279_vm6 = vweird.f32 %v5941_v1 }
 0x5de   :  { %4263 = vrcp.f32 %v5938_v18  ;;  %v3245_v60 = vor.u32 1.1754944e-38, %v3244_v8  ;;  %vm3243_vm4 = vcmp.eq.f32.partialorder %v3242_v40, 8.507059e+37  ;;  %vm5957_vm10 = vmor %vm3278_vm8, %vm3279_vm6  ;;  %v3299_v52 = vand.u32 2147483648, %v5938_v18 }
 0x5df   :  { %v3275_v37 = vsub.f32 1.0, %v3274_v12  ;;  %vm3293_vm14 = vweird.f32 %v5938_v18  ;;  %v3297_v51 = vand.u32 2147483647, %v5938_v18  ;;  %v3329_v12 = vpop.permute.xlu1 %3328 }
 0x5e0   :  { %v3300_v49 = vor.u32 1.1754944e-38, %v3299_v52 }
 0x5e1   :  { %v4260_v31 = vpop.eup %4259  ;;  %v3276_v42 = vmul.f32 %v5941_v1, %v3275_v37  ;;  %vm3298_vm0 = vcmp.eq.f32.partialorder %v3297_v51, 8.507059e+37 }
 0x5e2   :  { %v4262_v25 = vpop.eup %4261  ;;  %v3232_v56 = vadd.f32 1.0, %v4260_v31 }
 0x5e3   :  { %v3234_v29 = vmul.f32 %v4262_v25, %v3231_v36  ;;  %vm3239_vm1 = vweird.f32 %v4262_v25  ;;  %v3277_v44 = vadd.f32 %v5941_v1, %v3276_v42 }
 0x5e4   :  { %4265 = vrcp.f32 %v3232_v56  ;;  %v5945_v15 = vpop.eup %4263  ;;  %vm3240_vm3 = vmor %vm3238_vm2, %vm3239_vm1  ;;  %v3259_v14 = vand.u32 2147483648, %v3232_v56  ;;  %v3257_v23 = vand.u32 2147483647, %v3232_v56  ;;  %vm3253_vm7 = vweird.f32 %v3232_v56 }
 0x5e5   :  { %v3235_v55 = vsub.f32 1.0, %v3234_v29  ;;  %v3289_v4 = vmul.f32 %v5945_v15, %v5938_v18  ;;  %v3281_v3 = vsel %vm5957_vm10, %v5941_v1, %v3277_v44  ;;  %vm3294_vm12 = vweird.f32 %v5945_v15  ;;  %v3324_v29 = vpop.permute.xlu0 %3323 }
 0x5e6   :  { %v3260_v58 = vor.u32 1.1754944e-38, %v3259_v14  ;;  %vm3258_vm11 = vcmp.eq.f32.partialorder %v3257_v23, 8.507059e+37  ;;  %v3286_v35 = vsel %vm3283_vm13, %v3285_v34, %v3281_v3  ;;  %vm3295_vm15 = vmor %vm3293_vm14, %vm3294_vm12 }
 0x5e7   :  { %v3236_v16 = vmul.f32 %v4262_v25, %v3235_v55  ;;  %v3290_v46 = vsub.f32 1.0, %v3289_v4  ;;  %v3311_v10 = vsub.f32 1.0, %v3286_v35  ;;  %v3315_v36 = vmul.f32 %v3286_v35, %v5890_v26 }
 0x5e9   :  { %v3237_v50 = vadd.f32 %v4262_v25, %v3236_v16  ;;  %v3291_v61 = vmul.f32 %v5945_v15, %v3290_v46 }
 0x5ea   :  { %v4266_v54 = vpop.eup %4265 }
 0x5eb   :  { %v3241_v17 = vsel %vm3240_vm3, %v4262_v25, %v3237_v50  ;;  %v3249_v47 = vmul.f32 %v4266_v54, %v3232_v56  ;;  %vm3254_vm5 = vweird.f32 %v4266_v54  ;;  %v3292_v63 = vadd.f32 %v5945_v15, %v3291_v61 }
 0x5ec   :  { %v3246_v9 = vsel %vm3243_vm4, %v3245_v60, %v3241_v17  ;;  %vm3255_vm9 = vmor %vm3253_vm7, %vm3254_vm5 }
 0x5ed   :  { %v3305_v53 = vmul.f32 %v3303_v24, %v3246_v9  ;;  %v3250_v5 = vsub.f32 1.0, %v3249_v47  ;;  %v3296_v2 = vsel %vm3295_vm15, %v5945_v15, %v3292_v63 }
 0x5ee   :  { %v3301_v20 = vsel %vm3298_vm0, %v3300_v49, %v3296_v2 }
 0x5ef   :  { %v3307_v6 = vadd.f32 %v3305_v53, %v3219_v13  ;;  %v3251_v32 = vmul.f32 %v4266_v54, %v3250_v5  ;;  %v3312_v59 = vsub.f32 1.0, %v3301_v20  ;;  %v3316_v25 = vmul.f32 %v3301_v20, %v5893_v38 }
 0x5f1   :  { %v3252_v39 = vadd.f32 %v4266_v54, %v3251_v32  ;;  %4267 = vtanh.f32 %v3307_v6 }
 0x5f3   :  { %v3256_v45 = vsel %vm3255_vm9, %v4266_v54, %v3252_v39 }
 0x5f4   :  { %v3261_v0 = vsel %vm3258_vm11, %v3260_v58, %v3256_v45 }
 0x5f5   :  { %v3306_v28 = vmul.f32 %v3304_v43, %v3261_v0 }
 0x5f7   :  { %v3308_v48 = vadd.f32 %v3306_v28, %v3222_v41  ;;  %v4268_v33 = vpop.eup %4267 }
 0x5f8   :  { %v3313_v30 = vmul.f32 %v4268_v33, %v3311_v10 }
 0x5f9   :  { %4269 = vtanh.f32 %v3308_v48 }
 0x5fa   :  { %v3317_v31 = vadd.f32 %v3315_v36, %v3313_v30 }
 0x5fc   :  { %v3331_v55 = vmul.f32 %v3324_v29, %v3317_v31 }
 0x5ff   :  { %v4270_v1 = vpop.eup %4269 }
 0x600   :  { %v3314_v18 = vmul.f32 %v4270_v1, %v3312_v59 }
 0x602   :  { %v3318_v56 = vadd.f32 %v3316_v25, %v3314_v18 }
 0x604   :  { %v3332_v15 = vmul.f32 %v3329_v12, %v3318_v56 }
 0x606   :  { %v3970_v62 = vpack.c.bf16 %v3332_v15, %v3331_v55 }
 0x608   :  { %3971 = vst [vmem:[%s5986_s8] sm:$0xff] %v3970_v62  }

</bundles_post_ra>
